<compile_context>
chip_gen: v7x
topology: tpu7x:2x2x1
jax: 0.10.0
libtpu: 0.0.40
codegen_flags: <defaults>
</compile_context>

<pallas_src>
import numpy as np
import jax
import jax.numpy as jnp
from jax import lax
from jax.experimental import pallas as pl
from jax.experimental.pallas import tpu as pltpu


def _round_up(n, m):
    return (n + m - 1) // m * m


def _pad_gate_matrix(w, in_pad, h, h_pad):
    """w: (in_dim, 4*h) right-multiply form -> (in_pad, 4*h_pad), padded per gate."""
    in_dim = w.shape[0]
    w4 = w.reshape(in_dim, 4, h)
    w4 = jnp.pad(w4, ((0, in_pad - in_dim), (0, 0), (0, h_pad - h)))
    return w4.reshape(in_pad, 4 * h_pad)


def _pad_gate_bias(b, h, h_pad):
    """b: (4*h,) -> (1, 4*h_pad), padded per gate."""
    b4 = b.reshape(4, h)
    b4 = jnp.pad(b4, ((0, 0), (0, h_pad - h)))
    return b4.reshape(1, 4 * h_pad)


def _pad2(a, rows, cols):
    return jnp.pad(a, ((0, rows - a.shape[0]), (0, cols - a.shape[1])))


def _pick_time_chunk(seq_len, desired):
    """Largest divisor of seq_len in [desired//2, desired] -> (chunk, False);
    otherwise (desired, True) with a masked ragged tail."""
    desired = max(1, min(desired, seq_len))
    for d in range(desired, max(1, desired // 2) - 1, -1):
        if seq_len % d == 0:
            return d, False
    return desired, True


def _make_kernel(*, seq_len, t_chunk, b_block, h_pad, mm_dtype, needs_mask):
    four_h = 4 * h_pad

    def cell(gates, c):
        # Gate slices are 128-lane aligned (h_pad % 128 == 0): no XLU shuffles.
        i = jax.nn.sigmoid(gates[:, 0 * h_pad:1 * h_pad])
        f = jax.nn.sigmoid(gates[:, 1 * h_pad:2 * h_pad])
        g = jnp.tanh(gates[:, 2 * h_pad:3 * h_pad])
        o = jax.nn.sigmoid(gates[:, 3 * h_pad:4 * h_pad])
        c_new = f * c + i * g
        h_new = o * jnp.tanh(c_new)          # tanh(c_new) computed exactly once
        return h_new, c_new

    def kernel(x_ref,                            # (Tt, Bb, D)      mm_dtype
               wih0_ref, whh0_ref, b0_ref,       # (D,4Hp) (Hp,4Hp) (1,4Hp)
               wih1_ref, whh1_ref, b1_ref,       # (Hp,4Hp) (Hp,4Hp) (1,4Hp)
               fc1w_ref, fc1b_ref,               # (Hp,F1p) (1,F1p)
               fc2w_ref, fc2b_ref,               # (F1p,Op) (1,Op)
               out_ref,                          # (Bb, Op)         f32
               g0_ref,                           # (Tt, Bb, 4Hp)    f32 scratch
               h0_ref, c0_ref, h1_ref, c1_ref):  # (Bb, Hp)         f32 scratch
        chunk = pl.program_id(1)                 # time-chunk axis (serial)

        @pl.when(chunk == 0)
        def _init():
            zeros = jnp.zeros((b_block, h_pad), jnp.float32)
            h0_ref[...] = zeros
            c0_ref[...] = zeros
            h1_ref[...] = zeros
            c1_ref[...] = zeros

        # ---- Phase 1: layer-0 input projection for the whole chunk (one big
        # MXU GEMM batched over all Tt timesteps of this batch block). ----
        d_in = x_ref.shape[-1]
        xf = x_ref[...].reshape(t_chunk * b_block, d_in)
        g0 = jnp.dot(xf, wih0_ref[...], preferred_element_type=jnp.float32)
        g0_ref[...] = (g0 + b0_ref[...]).reshape(t_chunk, b_block, four_h)

        # ---- Hoisted loop invariants. ----
        whh0 = whh0_ref[...]
        wih1 = wih1_ref[...]
        whh1 = whh1_ref[...]
        b1 = jnp.broadcast_to(b1_ref[...], (b_block, four_h))
        chunk_base = chunk * t_chunk

        # ---- Phase 2: serial recurrence; only hidden-state matmuls remain. ----
        def step(t, carry):
            h0, c0, h1, c1 = carry
            gates0 = g0_ref[t] + jnp.dot(h0.astype(mm_dtype), whh0,
                                         preferred_element_type=jnp.float32)
            h0n, c0n = cell(gates0, c0)
            # Layer 1: two dots sharing the f32 accumulator (no per-step concat).
            gates1 = (jnp.dot(h0n.astype(mm_dtype), wih1,
                              preferred_element_type=jnp.float32)
                      + jnp.dot(h1.astype(mm_dtype), whh1,
                                preferred_element_type=jnp.float32)
                      + b1)
            h1n, c1n = cell(gates1, c1)
            if needs_mask:
                valid = (chunk_base + t) < seq_len
                h0n = jnp.where(valid, h0n, h0)
                c0n = jnp.where(valid, c0n, c0)
                h1n = jnp.where(valid, h1n, h1)
                c1n = jnp.where(valid, c1n, c1)
            return h0n, c0n, h1n, c1n

        # Unroll vs vreg pressure: full unroll only for short chunks / small
        # state tiles (state tile = Bb*Hp f32 = Bb*Hp/1024 vregs).
        state_elems = b_block * h_pad
        if t_chunk <= 8:
            unroll = True
        elif state_elems <= 16 * 1024:
            unroll = 8
        else:
            unroll = 2
        h0, c0, h1, c1 = lax.fori_loop(
            0, t_chunk, step,
            (h0_ref[...], c0_ref[...], h1_ref[...], c1_ref[...]),
            unroll=unroll)
        h0_ref[...] = h0
        c0_ref[...] = c0
        h1_ref[...] = h1
        c1_ref[...] = c1

        # ---- Phase 3: FC head on the last timestep's top-layer hidden state.
        # (out[:, -1, :] of the LSTM; dropout is identity in eval mode.) ----
        @pl.when(chunk == pl.num_programs(1) - 1)
        def _head():
            z = jnp.dot(h1.astype(mm_dtype), fc1w_ref[...],
                        preferred_element_type=jnp.float32) + fc1b_ref[...]
            z = jnp.maximum(z, 0.0)                                   # ReLU
            out_ref[...] = (jnp.dot(z.astype(mm_dtype), fc2w_ref[...],
                                    preferred_element_type=jnp.float32)
                            + fc2b_ref[...])

    return kernel


def audio_lstm_forward(x, params, *, time_chunk=32, matmul_dtype=jnp.bfloat16):
    """Eval-mode AudioLSTM forward. x: (B, T, D) f32 -> (B, output_dim) f32."""
    B, T, D = x.shape
    H = params["w_hh_l0"].shape[1]
    F1 = params["fc1_w"].shape[0]          # hidden_dim // 2
    O = params["fc2_w"].shape[0]
    mm = matmul_dtype

    # Lane/sublane-aligned padded sizes.
    sub = 16 if mm == jnp.bfloat16 else 8  # bf16 packs (16,128) per vreg
    Bp0 = _round_up(max(B, sub), sub)
    Bb = Bp0 if Bp0 <= 64 else 64          # batch block (parallel grid axis)
    Bp = _round_up(Bp0, Bb)
    n_b = Bp // Bb
    Hp = _round_up(H, 128)                 # lane-dense per-gate slabs
    F1p = _round_up(F1, 128)
    Op = _round_up(O, 128)                 # lane-dense output store

    Tt, needs_mask = _pick_time_chunk(T, time_chunk)
    Tp = _round_up(T, Tt)
    n_chunks = Tp // Tt

    # Weights: right-multiply form, folded biases, per-gate lane padding.
    wih0 = _pad_gate_matrix(params["w_ih_l0"].T, D, H, Hp).astype(mm)
    whh0 = _pad_gate_matrix(params["w_hh_l0"].T, Hp, H, Hp).astype(mm)
    b0 = _pad_gate_bias(params["b_ih_l0"] + params["b_hh_l0"], H, Hp)
    wih1 = _pad_gate_matrix(params["w_ih_l1"].T, Hp, H, Hp).astype(mm)
    whh1 = _pad_gate_matrix(params["w_hh_l1"].T, Hp, H, Hp).astype(mm)
    b1 = _pad_gate_bias(params["b_ih_l1"] + params["b_hh_l1"], H, Hp)
    fc1w = _pad2(params["fc1_w"].T, Hp, F1p).astype(mm)
    fc1b = _pad2(params["fc1_b"].reshape(1, F1), 1, F1p)
    fc2w = _pad2(params["fc2_w"].T, F1p, Op).astype(mm)
    fc2b = _pad2(params["fc2_b"].reshape(1, O), 1, Op)

    # x: time-major, pad batch -> Bp and time -> Tp (padded steps are masked
    # only if the time chunk does not divide T).
    x_tbd = jnp.transpose(x, (1, 0, 2))
    x_tbd = jnp.pad(x_tbd, ((0, Tp - T), (0, Bp - B), (0, 0))).astype(mm)

    kernel = _make_kernel(seq_len=T, t_chunk=Tt, b_block=Bb, h_pad=Hp,
                          mm_dtype=mm, needs_mask=needs_mask)

    # Generation-aware VMEM limit (~3/4 of physical, <= 100 MiB).
    try:
        vmem_cap = int(pltpu.get_tpu_info().vmem_capacity_bytes)
    except Exception:
        vmem_cap = 64 * 1024 * 1024
    vmem_limit = int(min(max(vmem_cap * 3 // 4, 32 * 1024 * 1024),
                         100 * 1024 * 1024))

    weights = (wih0, whh0, b0, wih1, whh1, b1, fc1w, fc1b, fc2w, fc2b)

    def _run(weight_buffers):
        def wspec(a):
            idx = lambda b, t, _n=a.ndim: (0,) * _n
            if weight_buffers is None:
                return pl.BlockSpec(a.shape, idx)
            # Loop-invariant weights: don't double-buffer them.
            return pl.BlockSpec(a.shape, idx,
                                pipeline_mode=pl.Buffered(weight_buffers))

        grid_spec = pltpu.PrefetchScalarGridSpec(
            num_scalar_prefetch=0,
            grid=(n_b, n_chunks),
            in_specs=[pl.BlockSpec((Tt, Bb, D), lambda b, t: (t, b, 0))]
                     + [wspec(w) for w in weights],
            out_specs=pl.BlockSpec((Bb, Op), lambda b, t: (b, 0)),
            scratch_shapes=[
                pltpu.VMEM((Tt, Bb, 4 * Hp), jnp.float32),  # layer-0 gates
                pltpu.VMEM((Bb, Hp), jnp.float32),          # h0
                pltpu.VMEM((Bb, Hp), jnp.float32),          # c0
                pltpu.VMEM((Bb, Hp), jnp.float32),          # h1
                pltpu.VMEM((Bb, Hp), jnp.float32),          # c1
            ],
        )
        out = pl.pallas_call(
            kernel,
            out_shape=jax.ShapeDtypeStruct((Bp, Op), jnp.float32),
            grid_spec=grid_spec,
            compiler_params=pltpu.CompilerParams(
                dimension_semantics=("parallel", "arbitrary"),  # batch || , time serial
                vmem_limit_bytes=vmem_limit,
            ),
        )(x_tbd, *weights)
        return jax.block_until_ready(out)

    try:
        out = _run(1)           # single-buffered loop-invariant weights
    except Exception:
        out = _run(None)        # fall back to default double-buffering

    return out[:B, :O]


def init_params(key, input_dim, hidden_dim, output_dim):
    """PyTorch-style U(-1/sqrt(fan), 1/sqrt(fan)) init, PyTorch weight shapes."""
    H = hidden_dim
    ks = jax.random.split(key, 12)

    def u(k, shape, b):
        return jax.random.uniform(k, shape, jnp.float32, -b, b)

    bh = 1.0 / np.sqrt(H)
    return {
        "w_ih_l0": u(ks[0], (4 * H, input_dim), bh),
        "w_hh_l0": u(ks[1], (4 * H, H), bh),
        "b_ih_l0": u(ks[2], (4 * H,), bh),
        "b_hh_l0": u(ks[3], (4 * H,), bh),
        "w_ih_l1": u(ks[4], (4 * H, H), bh),
        "w_hh_l1": u(ks[5], (4 * H, H), bh),
        "b_ih_l1": u(ks[6], (4 * H,), bh),
        "b_hh_l1": u(ks[7], (4 * H,), bh),
        "fc1_w": u(ks[8], (H // 2, H), 1.0 / np.sqrt(H)),
        "fc1_b": u(ks[9], (H // 2,), 1.0 / np.sqrt(H)),
        "fc2_w": u(ks[10], (output_dim, H // 2), 1.0 / np.sqrt(H // 2)),
        "fc2_b": u(ks[11], (output_dim,), 1.0 / np.sqrt(H // 2)),
    }


def reference_forward(x, p):
    """Pure-JAX eval-mode reference (PyTorch gate order [i, f, g, o])."""
    H = p["w_hh_l0"].shape[1]
    B = x.shape[0]

    def cell(x_t, h, c, w_ih, w_hh, b_ih, b_hh):
        g = x_t @ w_ih.T + h @ w_hh.T + b_ih + b_hh
        i = jax.nn.sigmoid(g[:, 0:H])
        f = jax.nn.sigmoid(g[:, H:2 * H])
        gg = jnp.tanh(g[:, 2 * H:3 * H])
        o = jax.nn.sigmoid(g[:, 3 * H:4 * H])
        c = f * c + i * gg
        h = o * jnp.tanh(c)
        return h, c

    h0 = c0 = h1 = c1 = jnp.zeros((B, H), jnp.float32)
    for t in range(x.shape[1]):
        h0, c0 = cell(x[:, t, :], h0, c0,
                      p["w_ih_l0"], p["w_hh_l0"], p["b_ih_l0"], p["b_hh_l0"])
        h1, c1 = cell(h0, h1, c1,
                      p["w_ih_l1"], p["w_hh_l1"], p["b_ih_l1"], p["b_hh_l1"])
    z = jnp.maximum(h1 @ p["fc1_w"].T + p["fc1_b"], 0.0)
    return z @ p["fc2_w"].T + p["fc2_b"]


if __name__ == "__main__":
    B, T, D = 4, 10, 16          # batch, seq_len, input_dim
    H, O = 32, 10                # hidden_dim, output_dim

    key = jax.random.PRNGKey(0)
    k_x, k_p = jax.random.split(key)
    x = jax.random.normal(k_x, (B, T, D), jnp.float32)
    params = init_params(k_p, D, H, O)

    ref = reference_forward(x, params)

    # f32 matmul operands, multi-chunk streaming: time_chunk=5 divides T=10, so
    # the recurrence runs with no ragged-tail masking across 2 chunks.
    out = jax.block_until_ready(
        audio_lstm_forward(x, params, time_chunk=5, matmul_dtype=jnp.float32))
    np.testing.assert_allclose(np.asarray(out), np.asarray(ref),
                               rtol=2e-3, atol=2e-3)

    # f32, ragged tail: T=7 is prime, so Tt=4 with a masked last chunk.
    x7 = x[:, :7, :]
    ref7 = reference_forward(x7, params)
    out7 = jax.block_until_ready(
        audio_lstm_forward(x7, params, time_chunk=4, matmul_dtype=jnp.float32))
    np.testing.assert_allclose(np.asarray(out7), np.asarray(ref7),
                               rtol=2e-3, atol=2e-3)

    # bf16 matmul operands (default); gate math / cell state / accumulation f32.
    # TODO(synk): re-validate the bf16 recurrence at production sequence lengths.
    out_bf16 = jax.block_until_ready(
        audio_lstm_forward(x, params, time_chunk=5, matmul_dtype=jnp.bfloat16))
    np.testing.assert_allclose(np.asarray(out_bf16), np.asarray(ref),
                               rtol=1e-1, atol=1e-1)

    print("KERNEL_OK")
</pallas_src>

<mosaic_0001>
module attributes {stable_mosaic.version = 11 : i64} {
  func.func @kernel(%arg0: i32, %arg1: i32, %arg2: memref<5x8x16xf32, #tpu.memory_space<vmem>>, %arg3: memref<16x512xf32, #tpu.memory_space<vmem>>, %arg4: memref<128x512xf32, #tpu.memory_space<vmem>>, %arg5: memref<1x512xf32, #tpu.memory_space<vmem>>, %arg6: memref<128x512xf32, #tpu.memory_space<vmem>>, %arg7: memref<128x512xf32, #tpu.memory_space<vmem>>, %arg8: memref<1x512xf32, #tpu.memory_space<vmem>>, %arg9: memref<128x128xf32, #tpu.memory_space<vmem>>, %arg10: memref<1x128xf32, #tpu.memory_space<vmem>>, %arg11: memref<128x128xf32, #tpu.memory_space<vmem>>, %arg12: memref<1x128xf32, #tpu.memory_space<vmem>>, %arg13: memref<8x128xf32, #tpu.memory_space<vmem>>, %arg14: memref<5x8x512xf32, #tpu.memory_space<vmem>>, %arg15: memref<8x128xf32, #tpu.memory_space<vmem>>, %arg16: memref<8x128xf32, #tpu.memory_space<vmem>>, %arg17: memref<8x128xf32, #tpu.memory_space<vmem>>, %arg18: memref<8x128xf32, #tpu.memory_space<vmem>>) attributes {dimension_semantics = [#tpu.dimension_semantics<parallel>, #tpu.dimension_semantics<arbitrary>], iteration_bounds = array<i64: 1, 2>, scalar_prefetch = 0 : i64, scratch_operands = 5 : i64, tpu.core_type = #tpu.core_type<tc>, window_params = [{transform_indices = @transform_0, window_bounds = array<i64: 5, 8, 16>}, {pipeline_mode = #tpu.pipeline_mode<synchronous>, transform_indices = @transform_1, window_bounds = array<i64: 16, 512>}, {pipeline_mode = #tpu.pipeline_mode<synchronous>, transform_indices = @transform_2, window_bounds = array<i64: 128, 512>}, {pipeline_mode = #tpu.pipeline_mode<synchronous>, transform_indices = @transform_3, window_bounds = array<i64: 1, 512>}, {pipeline_mode = #tpu.pipeline_mode<synchronous>, transform_indices = @transform_4, window_bounds = array<i64: 128, 512>}, {pipeline_mode = #tpu.pipeline_mode<synchronous>, transform_indices = @transform_5, window_bounds = array<i64: 128, 512>}, {pipeline_mode = #tpu.pipeline_mode<synchronous>, transform_indices = @transform_6, window_bounds = array<i64: 1, 512>}, {pipeline_mode = #tpu.pipeline_mode<synchronous>, transform_indices = @transform_7, window_bounds = array<i64: 128, 128>}, {pipeline_mode = #tpu.pipeline_mode<synchronous>, transform_indices = @transform_8, window_bounds = array<i64: 1, 128>}, {pipeline_mode = #tpu.pipeline_mode<synchronous>, transform_indices = @transform_9, window_bounds = array<i64: 128, 128>}, {pipeline_mode = #tpu.pipeline_mode<synchronous>, transform_indices = @transform_10, window_bounds = array<i64: 1, 128>}, {transform_indices = @transform_11, window_bounds = array<i64: 8, 128>}]} {
    %c0_i32 = arith.constant 0 : i32
    %0 = arith.cmpi eq, %arg1, %c0_i32 : i32
    %1 = arith.extui %0 : i1 to i32
    %c0_i32_0 = arith.constant 0 : i32
    %2 = arith.cmpi ne, %1, %c0_i32_0 : i32
    scf.if %2 {
      %cst_92 = arith.constant 0.000000e+00 : f32
      %324 = vector.broadcast %cst_92 : f32 to vector<8x128xf32>
      %c0_93 = arith.constant 0 : index
      %c0_94 = arith.constant 0 : index
      %325 = vector.load %arg15[%c0_93, %c0_94] : memref<8x128xf32, #tpu.memory_space<vmem>>, vector<8x128xf32>
      tpu.vector_store %arg15[%c0_93, %c0_94], %324 {strides = array<i32>} : memref<8x128xf32, #tpu.memory_space<vmem>>, vector<8x128xf32>,
      %c0_95 = arith.constant 0 : index
      %c0_96 = arith.constant 0 : index
      %326 = vector.load %arg16[%c0_95, %c0_96] : memref<8x128xf32, #tpu.memory_space<vmem>>, vector<8x128xf32>
      tpu.vector_store %arg16[%c0_95, %c0_96], %324 {strides = array<i32>} : memref<8x128xf32, #tpu.memory_space<vmem>>, vector<8x128xf32>,
      %c0_97 = arith.constant 0 : index
      %c0_98 = arith.constant 0 : index
      %327 = vector.load %arg17[%c0_97, %c0_98] : memref<8x128xf32, #tpu.memory_space<vmem>>, vector<8x128xf32>
      tpu.vector_store %arg17[%c0_97, %c0_98], %324 {strides = array<i32>} : memref<8x128xf32, #tpu.memory_space<vmem>>, vector<8x128xf32>,
      %c0_99 = arith.constant 0 : index
      %c0_100 = arith.constant 0 : index
      %328 = vector.load %arg18[%c0_99, %c0_100] : memref<8x128xf32, #tpu.memory_space<vmem>>, vector<8x128xf32>
      tpu.vector_store %arg18[%c0_99, %c0_100], %324 {strides = array<i32>} : memref<8x128xf32, #tpu.memory_space<vmem>>, vector<8x128xf32>,
    } else {
    }
    %c0 = arith.constant 0 : index
    %c0_1 = arith.constant 0 : index
    %c0_2 = arith.constant 0 : index
    %3 = vector.load %arg2[%c0, %c0_1, %c0_2] : memref<5x8x16xf32, #tpu.memory_space<vmem>>, vector<5x8x16xf32>
    %4 = vector.shape_cast %3 : vector<5x8x16xf32> to vector<40x16xf32>
    %c0_3 = arith.constant 0 : index
    %c0_4 = arith.constant 0 : index
    %5 = vector.load %arg3[%c0_3, %c0_4] : memref<16x512xf32, #tpu.memory_space<vmem>>, vector<16x512xf32>
    %cst = arith.constant dense<0.000000e+00> : vector<40x512xf32>
    %6 = tpu.matmul %4, %5, %cst {dimension_numbers = #tpu.dot_dimension_numbers<[1], [0], [0], [1], [0, 0, 1, 1], [], []>} : vector<40x16xf32>, vector<16x512xf32>, vector<40x512xf32> -> vector<40x512xf32>
    %c0_5 = arith.constant 0 : index
    %c0_6 = arith.constant 0 : index
    %7 = vector.load %arg5[%c0_5, %c0_6] : memref<1x512xf32, #tpu.memory_space<vmem>>, vector<1x512xf32>
    %8 = vector.broadcast %7 : vector<1x512xf32> to vector<40x512xf32>
    %9 = arith.addf %6, %8 : vector<40x512xf32>
    %10 = vector.shape_cast %9 : vector<40x512xf32> to vector<5x8x512xf32>
    %c0_7 = arith.constant 0 : index
    %c0_8 = arith.constant 0 : index
    %c0_9 = arith.constant 0 : index
    %11 = vector.load %arg14[%c0_7, %c0_8, %c0_9] : memref<5x8x512xf32, #tpu.memory_space<vmem>>, vector<5x8x512xf32>
    tpu.vector_store %arg14[%c0_7, %c0_8, %c0_9], %10 {strides = array<i32>} : memref<5x8x512xf32, #tpu.memory_space<vmem>>, vector<5x8x512xf32>,
    %c0_10 = arith.constant 0 : index
    %c0_11 = arith.constant 0 : index
    %12 = vector.load %arg4[%c0_10, %c0_11] : memref<128x512xf32, #tpu.memory_space<vmem>>, vector<128x512xf32>
    %c0_12 = arith.constant 0 : index
    %c0_13 = arith.constant 0 : index
    %13 = vector.load %arg6[%c0_12, %c0_13] : memref<128x512xf32, #tpu.memory_space<vmem>>, vector<128x512xf32>
    %c0_14 = arith.constant 0 : index
    %c0_15 = arith.constant 0 : index
    %14 = vector.load %arg7[%c0_14, %c0_15] : memref<128x512xf32, #tpu.memory_space<vmem>>, vector<128x512xf32>
    %c0_16 = arith.constant 0 : index
    %c0_17 = arith.constant 0 : index
    %15 = vector.load %arg8[%c0_16, %c0_17] : memref<1x512xf32, #tpu.memory_space<vmem>>, vector<1x512xf32>
    %16 = vector.shape_cast %15 : vector<1x512xf32> to vector<1x512xf32>
    %17 = vector.broadcast %16 : vector<1x512xf32> to vector<8x512xf32>
    %c0_18 = arith.constant 0 : index
    %c0_19 = arith.constant 0 : index
    %18 = vector.load %arg15[%c0_18, %c0_19] : memref<8x128xf32, #tpu.memory_space<vmem>>, vector<8x128xf32>
    %c0_20 = arith.constant 0 : index
    %c0_21 = arith.constant 0 : index
    %19 = vector.load %arg16[%c0_20, %c0_21] : memref<8x128xf32, #tpu.memory_space<vmem>>, vector<8x128xf32>
    %c0_22 = arith.constant 0 : index
    %c0_23 = arith.constant 0 : index
    %20 = vector.load %arg17[%c0_22, %c0_23] : memref<8x128xf32, #tpu.memory_space<vmem>>, vector<8x128xf32>
    %c0_24 = arith.constant 0 : index
    %c0_25 = arith.constant 0 : index
    %21 = vector.load %arg18[%c0_24, %c0_25] : memref<8x128xf32, #tpu.memory_space<vmem>>, vector<8x128xf32>
    %c0_i32_26 = arith.constant 0 : i32
    %22 = arith.index_cast %c0_i32_26 : i32 to index
    %c0_27 = arith.constant 0 : index
    %c0_28 = arith.constant 0 : index
    %23 = vector.load %arg14[%22, %c0_27, %c0_28] : memref<5x8x512xf32, #tpu.memory_space<vmem>>, vector<1x8x512xf32>
    %24 = vector.shape_cast %23 : vector<1x8x512xf32> to vector<8x512xf32>
    %cst_29 = arith.constant dense<0.000000e+00> : vector<8x512xf32>
    %25 = tpu.matmul %18, %12, %cst_29 {dimension_numbers = #tpu.dot_dimension_numbers<[1], [0], [0], [1], [0, 0, 1, 1], [], []>} : vector<8x128xf32>, vector<128x512xf32>, vector<8x512xf32> -> vector<8x512xf32>
    %26 = arith.addf %24, %25 : vector<8x512xf32>
    %27 = vector.extract_strided_slice %26 {offsets = [0, 0], sizes = [8, 128], strides = [1, 1]} : vector<8x512xf32> to vector<8x128xf32>
    %28 = arith.negf %27 : vector<8x128xf32>
    %29 = math.exp %28 : vector<8x128xf32>
    %cst_30 = arith.constant 1.000000e+00 : f32
    %30 = vector.broadcast %cst_30 : f32 to vector<8x128xf32>
    %31 = arith.addf %30, %29 : vector<8x128xf32>
    %32 = arith.divf %30, %31 : vector<8x128xf32>
    %33 = vector.extract_strided_slice %26 {offsets = [0, 128], sizes = [8, 128], strides = [1, 1]} : vector<8x512xf32> to vector<8x128xf32>
    %34 = arith.negf %33 : vector<8x128xf32>
    %35 = math.exp %34 : vector<8x128xf32>
    %cst_31 = arith.constant 1.000000e+00 : f32
    %36 = vector.broadcast %cst_31 : f32 to vector<8x128xf32>
    %37 = arith.addf %36, %35 : vector<8x128xf32>
    %38 = arith.divf %36, %37 : vector<8x128xf32>
    %39 = vector.extract_strided_slice %26 {offsets = [0, 256], sizes = [8, 128], strides = [1, 1]} : vector<8x512xf32> to vector<8x128xf32>
    %40 = math.tanh %39 : vector<8x128xf32>
    %41 = vector.extract_strided_slice %26 {offsets = [0, 384], sizes = [8, 128], strides = [1, 1]} : vector<8x512xf32> to vector<8x128xf32>
    %42 = arith.negf %41 : vector<8x128xf32>
    %43 = math.exp %42 : vector<8x128xf32>
    %cst_32 = arith.constant 1.000000e+00 : f32
    %44 = vector.broadcast %cst_32 : f32 to vector<8x128xf32>
    %45 = arith.addf %44, %43 : vector<8x128xf32>
    %46 = arith.divf %44, %45 : vector<8x128xf32>
    %47 = arith.mulf %38, %19 : vector<8x128xf32>
    %48 = arith.mulf %32, %40 : vector<8x128xf32>
    %49 = arith.addf %47, %48 : vector<8x128xf32>
    %50 = math.tanh %49 : vector<8x128xf32>
    %51 = arith.mulf %46, %50 : vector<8x128xf32>
    %cst_33 = arith.constant dense<0.000000e+00> : vector<8x512xf32>
    %52 = tpu.matmul %51, %13, %cst_33 {dimension_numbers = #tpu.dot_dimension_numbers<[1], [0], [0], [1], [0, 0, 1, 1], [], []>} : vector<8x128xf32>, vector<128x512xf32>, vector<8x512xf32> -> vector<8x512xf32>
    %cst_34 = arith.constant dense<0.000000e+00> : vector<8x512xf32>
    %53 = tpu.matmul %20, %14, %cst_34 {dimension_numbers = #tpu.dot_dimension_numbers<[1], [0], [0], [1], [0, 0, 1, 1], [], []>} : vector<8x128xf32>, vector<128x512xf32>, vector<8x512xf32> -> vector<8x512xf32>
    %54 = arith.addf %52, %53 : vector<8x512xf32>
    %55 = arith.addf %54, %17 : vector<8x512xf32>
    %56 = vector.extract_strided_slice %55 {offsets = [0, 0], sizes = [8, 128], strides = [1, 1]} : vector<8x512xf32> to vector<8x128xf32>
    %57 = arith.negf %56 : vector<8x128xf32>
    %58 = math.exp %57 : vector<8x128xf32>
    %cst_35 = arith.constant 1.000000e+00 : f32
    %59 = vector.broadcast %cst_35 : f32 to vector<8x128xf32>
    %60 = arith.addf %59, %58 : vector<8x128xf32>
    %61 = arith.divf %59, %60 : vector<8x128xf32>
    %62 = vector.extract_strided_slice %55 {offsets = [0, 128], sizes = [8, 128], strides = [1, 1]} : vector<8x512xf32> to vector<8x128xf32>
    %63 = arith.negf %62 : vector<8x128xf32>
    %64 = math.exp %63 : vector<8x128xf32>
    %cst_36 = arith.constant 1.000000e+00 : f32
    %65 = vector.broadcast %cst_36 : f32 to vector<8x128xf32>
    %66 = arith.addf %65, %64 : vector<8x128xf32>
    %67 = arith.divf %65, %66 : vector<8x128xf32>
    %68 = vector.extract_strided_slice %55 {offsets = [0, 256], sizes = [8, 128], strides = [1, 1]} : vector<8x512xf32> to vector<8x128xf32>
    %69 = math.tanh %68 : vector<8x128xf32>
    %70 = vector.extract_strided_slice %55 {offsets = [0, 384], sizes = [8, 128], strides = [1, 1]} : vector<8x512xf32> to vector<8x128xf32>
    %71 = arith.negf %70 : vector<8x128xf32>
    %72 = math.exp %71 : vector<8x128xf32>
    %cst_37 = arith.constant 1.000000e+00 : f32
    %73 = vector.broadcast %cst_37 : f32 to vector<8x128xf32>
    %74 = arith.addf %73, %72 : vector<8x128xf32>
    %75 = arith.divf %73, %74 : vector<8x128xf32>
    %76 = arith.mulf %67, %21 : vector<8x128xf32>
    %77 = arith.mulf %61, %69 : vector<8x128xf32>
    %78 = arith.addf %76, %77 : vector<8x128xf32>
    %79 = math.tanh %78 : vector<8x128xf32>
    %80 = arith.mulf %75, %79 : vector<8x128xf32>
    %c1_i32 = arith.constant 1 : i32
    %81 = arith.index_cast %c1_i32 : i32 to index
    %c0_38 = arith.constant 0 : index
    %c0_39 = arith.constant 0 : index
    %82 = vector.load %arg14[%81, %c0_38, %c0_39] : memref<5x8x512xf32, #tpu.memory_space<vmem>>, vector<1x8x512xf32>
    %83 = vector.shape_cast %82 : vector<1x8x512xf32> to vector<8x512xf32>
    %cst_40 = arith.constant dense<0.000000e+00> : vector<8x512xf32>
    %84 = tpu.matmul %51, %12, %cst_40 {dimension_numbers = #tpu.dot_dimension_numbers<[1], [0], [0], [1], [0, 0, 1, 1], [], []>} : vector<8x128xf32>, vector<128x512xf32>, vector<8x512xf32> -> vector<8x512xf32>
    %85 = arith.addf %83, %84 : vector<8x512xf32>
    %86 = vector.extract_strided_slice %85 {offsets = [0, 0], sizes = [8, 128], strides = [1, 1]} : vector<8x512xf32> to vector<8x128xf32>
    %87 = arith.negf %86 : vector<8x128xf32>
    %88 = math.exp %87 : vector<8x128xf32>
    %cst_41 = arith.constant 1.000000e+00 : f32
    %89 = vector.broadcast %cst_41 : f32 to vector<8x128xf32>
    %90 = arith.addf %89, %88 : vector<8x128xf32>
    %91 = arith.divf %89, %90 : vector<8x128xf32>
    %92 = vector.extract_strided_slice %85 {offsets = [0, 128], sizes = [8, 128], strides = [1, 1]} : vector<8x512xf32> to vector<8x128xf32>
    %93 = arith.negf %92 : vector<8x128xf32>
    %94 = math.exp %93 : vector<8x128xf32>
    %cst_42 = arith.constant 1.000000e+00 : f32
    %95 = vector.broadcast %cst_42 : f32 to vector<8x128xf32>
    %96 = arith.addf %95, %94 : vector<8x128xf32>
    %97 = arith.divf %95, %96 : vector<8x128xf32>
    %98 = vector.extract_strided_slice %85 {offsets = [0, 256], sizes = [8, 128], strides = [1, 1]} : vector<8x512xf32> to vector<8x128xf32>
    %99 = math.tanh %98 : vector<8x128xf32>
    %100 = vector.extract_strided_slice %85 {offsets = [0, 384], sizes = [8, 128], strides = [1, 1]} : vector<8x512xf32> to vector<8x128xf32>
    %101 = arith.negf %100 : vector<8x128xf32>
    %102 = math.exp %101 : vector<8x128xf32>
    %cst_43 = arith.constant 1.000000e+00 : f32
    %103 = vector.broadcast %cst_43 : f32 to vector<8x128xf32>
    %104 = arith.addf %103, %102 : vector<8x128xf32>
    %105 = arith.divf %103, %104 : vector<8x128xf32>
    %106 = arith.mulf %97, %49 : vector<8x128xf32>
    %107 = arith.mulf %91, %99 : vector<8x128xf32>
    %108 = arith.addf %106, %107 : vector<8x128xf32>
    %109 = math.tanh %108 : vector<8x128xf32>
    %110 = arith.mulf %105, %109 : vector<8x128xf32>
    %cst_44 = arith.constant dense<0.000000e+00> : vector<8x512xf32>
    %111 = tpu.matmul %110, %13, %cst_44 {dimension_numbers = #tpu.dot_dimension_numbers<[1], [0], [0], [1], [0, 0, 1, 1], [], []>} : vector<8x128xf32>, vector<128x512xf32>, vector<8x512xf32> -> vector<8x512xf32>
    %cst_45 = arith.constant dense<0.000000e+00> : vector<8x512xf32>
    %112 = tpu.matmul %80, %14, %cst_45 {dimension_numbers = #tpu.dot_dimension_numbers<[1], [0], [0], [1], [0, 0, 1, 1], [], []>} : vector<8x128xf32>, vector<128x512xf32>, vector<8x512xf32> -> vector<8x512xf32>
    %113 = arith.addf %111, %112 : vector<8x512xf32>
    %114 = arith.addf %113, %17 : vector<8x512xf32>
    %115 = vector.extract_strided_slice %114 {offsets = [0, 0], sizes = [8, 128], strides = [1, 1]} : vector<8x512xf32> to vector<8x128xf32>
    %116 = arith.negf %115 : vector<8x128xf32>
    %117 = math.exp %116 : vector<8x128xf32>
    %cst_46 = arith.constant 1.000000e+00 : f32
    %118 = vector.broadcast %cst_46 : f32 to vector<8x128xf32>
    %119 = arith.addf %118, %117 : vector<8x128xf32>
    %120 = arith.divf %118, %119 : vector<8x128xf32>
    %121 = vector.extract_strided_slice %114 {offsets = [0, 128], sizes = [8, 128], strides = [1, 1]} : vector<8x512xf32> to vector<8x128xf32>
    %122 = arith.negf %121 : vector<8x128xf32>
    %123 = math.exp %122 : vector<8x128xf32>
    %cst_47 = arith.constant 1.000000e+00 : f32
    %124 = vector.broadcast %cst_47 : f32 to vector<8x128xf32>
    %125 = arith.addf %124, %123 : vector<8x128xf32>
    %126 = arith.divf %124, %125 : vector<8x128xf32>
    %127 = vector.extract_strided_slice %114 {offsets = [0, 256], sizes = [8, 128], strides = [1, 1]} : vector<8x512xf32> to vector<8x128xf32>
    %128 = math.tanh %127 : vector<8x128xf32>
    %129 = vector.extract_strided_slice %114 {offsets = [0, 384], sizes = [8, 128], strides = [1, 1]} : vector<8x512xf32> to vector<8x128xf32>
    %130 = arith.negf %129 : vector<8x128xf32>
    %131 = math.exp %130 : vector<8x128xf32>
    %cst_48 = arith.constant 1.000000e+00 : f32
    %132 = vector.broadcast %cst_48 : f32 to vector<8x128xf32>
    %133 = arith.addf %132, %131 : vector<8x128xf32>
    %134 = arith.divf %132, %133 : vector<8x128xf32>
    %135 = arith.mulf %126, %78 : vector<8x128xf32>
    %136 = arith.mulf %120, %128 : vector<8x128xf32>
    %137 = arith.addf %135, %136 : vector<8x128xf32>
    %138 = math.tanh %137 : vector<8x128xf32>
    %139 = arith.mulf %134, %138 : vector<8x128xf32>
    %c2_i32 = arith.constant 2 : i32
    %140 = arith.index_cast %c2_i32 : i32 to index
    %c0_49 = arith.constant 0 : index
    %c0_50 = arith.constant 0 : index
    %141 = vector.load %arg14[%140, %c0_49, %c0_50] : memref<5x8x512xf32, #tpu.memory_space<vmem>>, vector<1x8x512xf32>
    %142 = vector.shape_cast %141 : vector<1x8x512xf32> to vector<8x512xf32>
    %cst_51 = arith.constant dense<0.000000e+00> : vector<8x512xf32>
    %143 = tpu.matmul %110, %12, %cst_51 {dimension_numbers = #tpu.dot_dimension_numbers<[1], [0], [0], [1], [0, 0, 1, 1], [], []>} : vector<8x128xf32>, vector<128x512xf32>, vector<8x512xf32> -> vector<8x512xf32>
    %144 = arith.addf %142, %143 : vector<8x512xf32>
    %145 = vector.extract_strided_slice %144 {offsets = [0, 0], sizes = [8, 128], strides = [1, 1]} : vector<8x512xf32> to vector<8x128xf32>
    %146 = arith.negf %145 : vector<8x128xf32>
    %147 = math.exp %146 : vector<8x128xf32>
    %cst_52 = arith.constant 1.000000e+00 : f32
    %148 = vector.broadcast %cst_52 : f32 to vector<8x128xf32>
    %149 = arith.addf %148, %147 : vector<8x128xf32>
    %150 = arith.divf %148, %149 : vector<8x128xf32>
    %151 = vector.extract_strided_slice %144 {offsets = [0, 128], sizes = [8, 128], strides = [1, 1]} : vector<8x512xf32> to vector<8x128xf32>
    %152 = arith.negf %151 : vector<8x128xf32>
    %153 = math.exp %152 : vector<8x128xf32>
    %cst_53 = arith.constant 1.000000e+00 : f32
    %154 = vector.broadcast %cst_53 : f32 to vector<8x128xf32>
    %155 = arith.addf %154, %153 : vector<8x128xf32>
    %156 = arith.divf %154, %155 : vector<8x128xf32>
    %157 = vector.extract_strided_slice %144 {offsets = [0, 256], sizes = [8, 128], strides = [1, 1]} : vector<8x512xf32> to vector<8x128xf32>
    %158 = math.tanh %157 : vector<8x128xf32>
    %159 = vector.extract_strided_slice %144 {offsets = [0, 384], sizes = [8, 128], strides = [1, 1]} : vector<8x512xf32> to vector<8x128xf32>
    %160 = arith.negf %159 : vector<8x128xf32>
    %161 = math.exp %160 : vector<8x128xf32>
    %cst_54 = arith.constant 1.000000e+00 : f32
    %162 = vector.broadcast %cst_54 : f32 to vector<8x128xf32>
    %163 = arith.addf %162, %161 : vector<8x128xf32>
    %164 = arith.divf %162, %163 : vector<8x128xf32>
    %165 = arith.mulf %156, %108 : vector<8x128xf32>
    %166 = arith.mulf %150, %158 : vector<8x128xf32>
    %167 = arith.addf %165, %166 : vector<8x128xf32>
    %168 = math.tanh %167 : vector<8x128xf32>
    %169 = arith.mulf %164, %168 : vector<8x128xf32>
    %cst_55 = arith.constant dense<0.000000e+00> : vector<8x512xf32>
    %170 = tpu.matmul %169, %13, %cst_55 {dimension_numbers = #tpu.dot_dimension_numbers<[1], [0], [0], [1], [0, 0, 1, 1], [], []>} : vector<8x128xf32>, vector<128x512xf32>, vector<8x512xf32> -> vector<8x512xf32>
    %cst_56 = arith.constant dense<0.000000e+00> : vector<8x512xf32>
    %171 = tpu.matmul %139, %14, %cst_56 {dimension_numbers = #tpu.dot_dimension_numbers<[1], [0], [0], [1], [0, 0, 1, 1], [], []>} : vector<8x128xf32>, vector<128x512xf32>, vector<8x512xf32> -> vector<8x512xf32>
    %172 = arith.addf %170, %171 : vector<8x512xf32>
    %173 = arith.addf %172, %17 : vector<8x512xf32>
    %174 = vector.extract_strided_slice %173 {offsets = [0, 0], sizes = [8, 128], strides = [1, 1]} : vector<8x512xf32> to vector<8x128xf32>
    %175 = arith.negf %174 : vector<8x128xf32>
    %176 = math.exp %175 : vector<8x128xf32>
    %cst_57 = arith.constant 1.000000e+00 : f32
    %177 = vector.broadcast %cst_57 : f32 to vector<8x128xf32>
    %178 = arith.addf %177, %176 : vector<8x128xf32>
    %179 = arith.divf %177, %178 : vector<8x128xf32>
    %180 = vector.extract_strided_slice %173 {offsets = [0, 128], sizes = [8, 128], strides = [1, 1]} : vector<8x512xf32> to vector<8x128xf32>
    %181 = arith.negf %180 : vector<8x128xf32>
    %182 = math.exp %181 : vector<8x128xf32>
    %cst_58 = arith.constant 1.000000e+00 : f32
    %183 = vector.broadcast %cst_58 : f32 to vector<8x128xf32>
    %184 = arith.addf %183, %182 : vector<8x128xf32>
    %185 = arith.divf %183, %184 : vector<8x128xf32>
    %186 = vector.extract_strided_slice %173 {offsets = [0, 256], sizes = [8, 128], strides = [1, 1]} : vector<8x512xf32> to vector<8x128xf32>
    %187 = math.tanh %186 : vector<8x128xf32>
    %188 = vector.extract_strided_slice %173 {offsets = [0, 384], sizes = [8, 128], strides = [1, 1]} : vector<8x512xf32> to vector<8x128xf32>
    %189 = arith.negf %188 : vector<8x128xf32>
    %190 = math.exp %189 : vector<8x128xf32>
    %cst_59 = arith.constant 1.000000e+00 : f32
    %191 = vector.broadcast %cst_59 : f32 to vector<8x128xf32>
    %192 = arith.addf %191, %190 : vector<8x128xf32>
    %193 = arith.divf %191, %192 : vector<8x128xf32>
    %194 = arith.mulf %185, %137 : vector<8x128xf32>
    %195 = arith.mulf %179, %187 : vector<8x128xf32>
    %196 = arith.addf %194, %195 : vector<8x128xf32>
    %197 = math.tanh %196 : vector<8x128xf32>
    %198 = arith.mulf %193, %197 : vector<8x128xf32>
    %c3_i32 = arith.constant 3 : i32
    %199 = arith.index_cast %c3_i32 : i32 to index
    %c0_60 = arith.constant 0 : index
    %c0_61 = arith.constant 0 : index
    %200 = vector.load %arg14[%199, %c0_60, %c0_61] : memref<5x8x512xf32, #tpu.memory_space<vmem>>, vector<1x8x512xf32>
    %201 = vector.shape_cast %200 : vector<1x8x512xf32> to vector<8x512xf32>
    %cst_62 = arith.constant dense<0.000000e+00> : vector<8x512xf32>
    %202 = tpu.matmul %169, %12, %cst_62 {dimension_numbers = #tpu.dot_dimension_numbers<[1], [0], [0], [1], [0, 0, 1, 1], [], []>} : vector<8x128xf32>, vector<128x512xf32>, vector<8x512xf32> -> vector<8x512xf32>
    %203 = arith.addf %201, %202 : vector<8x512xf32>
    %204 = vector.extract_strided_slice %203 {offsets = [0, 0], sizes = [8, 128], strides = [1, 1]} : vector<8x512xf32> to vector<8x128xf32>
    %205 = arith.negf %204 : vector<8x128xf32>
    %206 = math.exp %205 : vector<8x128xf32>
    %cst_63 = arith.constant 1.000000e+00 : f32
    %207 = vector.broadcast %cst_63 : f32 to vector<8x128xf32>
    %208 = arith.addf %207, %206 : vector<8x128xf32>
    %209 = arith.divf %207, %208 : vector<8x128xf32>
    %210 = vector.extract_strided_slice %203 {offsets = [0, 128], sizes = [8, 128], strides = [1, 1]} : vector<8x512xf32> to vector<8x128xf32>
    %211 = arith.negf %210 : vector<8x128xf32>
    %212 = math.exp %211 : vector<8x128xf32>
    %cst_64 = arith.constant 1.000000e+00 : f32
    %213 = vector.broadcast %cst_64 : f32 to vector<8x128xf32>
    %214 = arith.addf %213, %212 : vector<8x128xf32>
    %215 = arith.divf %213, %214 : vector<8x128xf32>
    %216 = vector.extract_strided_slice %203 {offsets = [0, 256], sizes = [8, 128], strides = [1, 1]} : vector<8x512xf32> to vector<8x128xf32>
    %217 = math.tanh %216 : vector<8x128xf32>
    %218 = vector.extract_strided_slice %203 {offsets = [0, 384], sizes = [8, 128], strides = [1, 1]} : vector<8x512xf32> to vector<8x128xf32>
    %219 = arith.negf %218 : vector<8x128xf32>
    %220 = math.exp %219 : vector<8x128xf32>
    %cst_65 = arith.constant 1.000000e+00 : f32
    %221 = vector.broadcast %cst_65 : f32 to vector<8x128xf32>
    %222 = arith.addf %221, %220 : vector<8x128xf32>
    %223 = arith.divf %221, %222 : vector<8x128xf32>
    %224 = arith.mulf %215, %167 : vector<8x128xf32>
    %225 = arith.mulf %209, %217 : vector<8x128xf32>
    %226 = arith.addf %224, %225 : vector<8x128xf32>
    %227 = math.tanh %226 : vector<8x128xf32>
    %228 = arith.mulf %223, %227 : vector<8x128xf32>
    %cst_66 = arith.constant dense<0.000000e+00> : vector<8x512xf32>
    %229 = tpu.matmul %228, %13, %cst_66 {dimension_numbers = #tpu.dot_dimension_numbers<[1], [0], [0], [1], [0, 0, 1, 1], [], []>} : vector<8x128xf32>, vector<128x512xf32>, vector<8x512xf32> -> vector<8x512xf32>
    %cst_67 = arith.constant dense<0.000000e+00> : vector<8x512xf32>
    %230 = tpu.matmul %198, %14, %cst_67 {dimension_numbers = #tpu.dot_dimension_numbers<[1], [0], [0], [1], [0, 0, 1, 1], [], []>} : vector<8x128xf32>, vector<128x512xf32>, vector<8x512xf32> -> vector<8x512xf32>
    %231 = arith.addf %229, %230 : vector<8x512xf32>
    %232 = arith.addf %231, %17 : vector<8x512xf32>
    %233 = vector.extract_strided_slice %232 {offsets = [0, 0], sizes = [8, 128], strides = [1, 1]} : vector<8x512xf32> to vector<8x128xf32>
    %234 = arith.negf %233 : vector<8x128xf32>
    %235 = math.exp %234 : vector<8x128xf32>
    %cst_68 = arith.constant 1.000000e+00 : f32
    %236 = vector.broadcast %cst_68 : f32 to vector<8x128xf32>
    %237 = arith.addf %236, %235 : vector<8x128xf32>
    %238 = arith.divf %236, %237 : vector<8x128xf32>
    %239 = vector.extract_strided_slice %232 {offsets = [0, 128], sizes = [8, 128], strides = [1, 1]} : vector<8x512xf32> to vector<8x128xf32>
    %240 = arith.negf %239 : vector<8x128xf32>
    %241 = math.exp %240 : vector<8x128xf32>
    %cst_69 = arith.constant 1.000000e+00 : f32
    %242 = vector.broadcast %cst_69 : f32 to vector<8x128xf32>
    %243 = arith.addf %242, %241 : vector<8x128xf32>
    %244 = arith.divf %242, %243 : vector<8x128xf32>
    %245 = vector.extract_strided_slice %232 {offsets = [0, 256], sizes = [8, 128], strides = [1, 1]} : vector<8x512xf32> to vector<8x128xf32>
    %246 = math.tanh %245 : vector<8x128xf32>
    %247 = vector.extract_strided_slice %232 {offsets = [0, 384], sizes = [8, 128], strides = [1, 1]} : vector<8x512xf32> to vector<8x128xf32>
    %248 = arith.negf %247 : vector<8x128xf32>
    %249 = math.exp %248 : vector<8x128xf32>
    %cst_70 = arith.constant 1.000000e+00 : f32
    %250 = vector.broadcast %cst_70 : f32 to vector<8x128xf32>
    %251 = arith.addf %250, %249 : vector<8x128xf32>
    %252 = arith.divf %250, %251 : vector<8x128xf32>
    %253 = arith.mulf %244, %196 : vector<8x128xf32>
    %254 = arith.mulf %238, %246 : vector<8x128xf32>
    %255 = arith.addf %253, %254 : vector<8x128xf32>
    %256 = math.tanh %255 : vector<8x128xf32>
    %257 = arith.mulf %252, %256 : vector<8x128xf32>
    %c4_i32 = arith.constant 4 : i32
    %258 = arith.index_cast %c4_i32 : i32 to index
    %c0_71 = arith.constant 0 : index
    %c0_72 = arith.constant 0 : index
    %259 = vector.load %arg14[%258, %c0_71, %c0_72] : memref<5x8x512xf32, #tpu.memory_space<vmem>>, vector<1x8x512xf32>
    %260 = vector.shape_cast %259 : vector<1x8x512xf32> to vector<8x512xf32>
    %cst_73 = arith.constant dense<0.000000e+00> : vector<8x512xf32>
    %261 = tpu.matmul %228, %12, %cst_73 {dimension_numbers = #tpu.dot_dimension_numbers<[1], [0], [0], [1], [0, 0, 1, 1], [], []>} : vector<8x128xf32>, vector<128x512xf32>, vector<8x512xf32> -> vector<8x512xf32>
    %262 = arith.addf %260, %261 : vector<8x512xf32>
    %263 = vector.extract_strided_slice %262 {offsets = [0, 0], sizes = [8, 128], strides = [1, 1]} : vector<8x512xf32> to vector<8x128xf32>
    %264 = arith.negf %263 : vector<8x128xf32>
    %265 = math.exp %264 : vector<8x128xf32>
    %cst_74 = arith.constant 1.000000e+00 : f32
    %266 = vector.broadcast %cst_74 : f32 to vector<8x128xf32>
    %267 = arith.addf %266, %265 : vector<8x128xf32>
    %268 = arith.divf %266, %267 : vector<8x128xf32>
    %269 = vector.extract_strided_slice %262 {offsets = [0, 128], sizes = [8, 128], strides = [1, 1]} : vector<8x512xf32> to vector<8x128xf32>
    %270 = arith.negf %269 : vector<8x128xf32>
    %271 = math.exp %270 : vector<8x128xf32>
    %cst_75 = arith.constant 1.000000e+00 : f32
    %272 = vector.broadcast %cst_75 : f32 to vector<8x128xf32>
    %273 = arith.addf %272, %271 : vector<8x128xf32>
    %274 = arith.divf %272, %273 : vector<8x128xf32>
    %275 = vector.extract_strided_slice %262 {offsets = [0, 256], sizes = [8, 128], strides = [1, 1]} : vector<8x512xf32> to vector<8x128xf32>
    %276 = math.tanh %275 : vector<8x128xf32>
    %277 = vector.extract_strided_slice %262 {offsets = [0, 384], sizes = [8, 128], strides = [1, 1]} : vector<8x512xf32> to vector<8x128xf32>
    %278 = arith.negf %277 : vector<8x128xf32>
    %279 = math.exp %278 : vector<8x128xf32>
    %cst_76 = arith.constant 1.000000e+00 : f32
    %280 = vector.broadcast %cst_76 : f32 to vector<8x128xf32>
    %281 = arith.addf %280, %279 : vector<8x128xf32>
    %282 = arith.divf %280, %281 : vector<8x128xf32>
    %283 = arith.mulf %274, %226 : vector<8x128xf32>
    %284 = arith.mulf %268, %276 : vector<8x128xf32>
    %285 = arith.addf %283, %284 : vector<8x128xf32>
    %286 = math.tanh %285 : vector<8x128xf32>
    %287 = arith.mulf %282, %286 : vector<8x128xf32>
    %cst_77 = arith.constant dense<0.000000e+00> : vector<8x512xf32>
    %288 = tpu.matmul %287, %13, %cst_77 {dimension_numbers = #tpu.dot_dimension_numbers<[1], [0], [0], [1], [0, 0, 1, 1], [], []>} : vector<8x128xf32>, vector<128x512xf32>, vector<8x512xf32> -> vector<8x512xf32>
    %cst_78 = arith.constant dense<0.000000e+00> : vector<8x512xf32>
    %289 = tpu.matmul %257, %14, %cst_78 {dimension_numbers = #tpu.dot_dimension_numbers<[1], [0], [0], [1], [0, 0, 1, 1], [], []>} : vector<8x128xf32>, vector<128x512xf32>, vector<8x512xf32> -> vector<8x512xf32>
    %290 = arith.addf %288, %289 : vector<8x512xf32>
    %291 = arith.addf %290, %17 : vector<8x512xf32>
    %292 = vector.extract_strided_slice %291 {offsets = [0, 0], sizes = [8, 128], strides = [1, 1]} : vector<8x512xf32> to vector<8x128xf32>
    %293 = arith.negf %292 : vector<8x128xf32>
    %294 = math.exp %293 : vector<8x128xf32>
    %cst_79 = arith.constant 1.000000e+00 : f32
    %295 = vector.broadcast %cst_79 : f32 to vector<8x128xf32>
    %296 = arith.addf %295, %294 : vector<8x128xf32>
    %297 = arith.divf %295, %296 : vector<8x128xf32>
    %298 = vector.extract_strided_slice %291 {offsets = [0, 128], sizes = [8, 128], strides = [1, 1]} : vector<8x512xf32> to vector<8x128xf32>
    %299 = arith.negf %298 : vector<8x128xf32>
    %300 = math.exp %299 : vector<8x128xf32>
    %cst_80 = arith.constant 1.000000e+00 : f32
    %301 = vector.broadcast %cst_80 : f32 to vector<8x128xf32>
    %302 = arith.addf %301, %300 : vector<8x128xf32>
    %303 = arith.divf %301, %302 : vector<8x128xf32>
    %304 = vector.extract_strided_slice %291 {offsets = [0, 256], sizes = [8, 128], strides = [1, 1]} : vector<8x512xf32> to vector<8x128xf32>
    %305 = math.tanh %304 : vector<8x128xf32>
    %306 = vector.extract_strided_slice %291 {offsets = [0, 384], sizes = [8, 128], strides = [1, 1]} : vector<8x512xf32> to vector<8x128xf32>
    %307 = arith.negf %306 : vector<8x128xf32>
    %308 = math.exp %307 : vector<8x128xf32>
    %cst_81 = arith.constant 1.000000e+00 : f32
    %309 = vector.broadcast %cst_81 : f32 to vector<8x128xf32>
    %310 = arith.addf %309, %308 : vector<8x128xf32>
    %311 = arith.divf %309, %310 : vector<8x128xf32>
    %312 = arith.mulf %303, %255 : vector<8x128xf32>
    %313 = arith.mulf %297, %305 : vector<8x128xf32>
    %314 = arith.addf %312, %313 : vector<8x128xf32>
    %315 = math.tanh %314 : vector<8x128xf32>
    %316 = arith.mulf %311, %315 : vector<8x128xf32>
    %c5_i32 = arith.constant 5 : i32
    %c0_82 = arith.constant 0 : index
    %c0_83 = arith.constant 0 : index
    %317 = vector.load %arg15[%c0_82, %c0_83] : memref<8x128xf32, #tpu.memory_space<vmem>>, vector<8x128xf32>
    tpu.vector_store %arg15[%c0_82, %c0_83], %287 {strides = array<i32>} : memref<8x128xf32, #tpu.memory_space<vmem>>, vector<8x128xf32>,
    %c0_84 = arith.constant 0 : index
    %c0_85 = arith.constant 0 : index
    %318 = vector.load %arg16[%c0_84, %c0_85] : memref<8x128xf32, #tpu.memory_space<vmem>>, vector<8x128xf32>
    tpu.vector_store %arg16[%c0_84, %c0_85], %285 {strides = array<i32>} : memref<8x128xf32, #tpu.memory_space<vmem>>, vector<8x128xf32>,
    %c0_86 = arith.constant 0 : index
    %c0_87 = arith.constant 0 : index
    %319 = vector.load %arg17[%c0_86, %c0_87] : memref<8x128xf32, #tpu.memory_space<vmem>>, vector<8x128xf32>
    tpu.vector_store %arg17[%c0_86, %c0_87], %316 {strides = array<i32>} : memref<8x128xf32, #tpu.memory_space<vmem>>, vector<8x128xf32>,
    %c0_88 = arith.constant 0 : index
    %c0_89 = arith.constant 0 : index
    %320 = vector.load %arg18[%c0_88, %c0_89] : memref<8x128xf32, #tpu.memory_space<vmem>>, vector<8x128xf32>
    tpu.vector_store %arg18[%c0_88, %c0_89], %314 {strides = array<i32>} : memref<8x128xf32, #tpu.memory_space<vmem>>, vector<8x128xf32>,
    %c1_i32_90 = arith.constant 1 : i32
    %321 = arith.cmpi eq, %arg1, %c1_i32_90 : i32
    %322 = arith.extui %321 : i1 to i32
    %c0_i32_91 = arith.constant 0 : i32
    %323 = arith.cmpi ne, %322, %c0_i32_91 : i32
    scf.if %323 {
      %c0_92 = arith.constant 0 : index
      %c0_93 = arith.constant 0 : index
      %324 = vector.load %arg9[%c0_92, %c0_93] : memref<128x128xf32, #tpu.memory_space<vmem>>, vector<128x128xf32>
      %cst_94 = arith.constant dense<0.000000e+00> : vector<8x128xf32>
      %325 = tpu.matmul %316, %324, %cst_94 {dimension_numbers = #tpu.dot_dimension_numbers<[1], [0], [0], [1], [0, 0, 1, 1], [], []>} : vector<8x128xf32>, vector<128x128xf32>, vector<8x128xf32> -> vector<8x128xf32>
      %c0_95 = arith.constant 0 : index
      %c0_96 = arith.constant 0 : index
      %326 = vector.load %arg10[%c0_95, %c0_96] : memref<1x128xf32, #tpu.memory_space<vmem>>, vector<1x128xf32>
      %327 = vector.broadcast %326 : vector<1x128xf32> to vector<8x128xf32>
      %328 = arith.addf %325, %327 : vector<8x128xf32>
      %cst_97 = arith.constant 0.000000e+00 : f32
      %329 = vector.broadcast %cst_97 : f32 to vector<8x128xf32>
      %330 = arith.maximumf %328, %329 : vector<8x128xf32>
      %c0_98 = arith.constant 0 : index
      %c0_99 = arith.constant 0 : index
      %331 = vector.load %arg11[%c0_98, %c0_99] : memref<128x128xf32, #tpu.memory_space<vmem>>, vector<128x128xf32>
      %cst_100 = arith.constant dense<0.000000e+00> : vector<8x128xf32>
      %332 = tpu.matmul %330, %331, %cst_100 {dimension_numbers = #tpu.dot_dimension_numbers<[1], [0], [0], [1], [0, 0, 1, 1], [], []>} : vector<8x128xf32>, vector<128x128xf32>, vector<8x128xf32> -> vector<8x128xf32>
      %c0_101 = arith.constant 0 : index
      %c0_102 = arith.constant 0 : index
      %333 = vector.load %arg12[%c0_101, %c0_102] : memref<1x128xf32, #tpu.memory_space<vmem>>, vector<1x128xf32>
      %334 = vector.broadcast %333 : vector<1x128xf32> to vector<8x128xf32>
      %335 = arith.addf %332, %334 : vector<8x128xf32>
      %c0_103 = arith.constant 0 : index
      %c0_104 = arith.constant 0 : index
      %336 = vector.load %arg13[%c0_103, %c0_104] : memref<8x128xf32, #tpu.memory_space<vmem>>, vector<8x128xf32>
      tpu.vector_store %arg13[%c0_103, %c0_104], %335 {strides = array<i32>} : memref<8x128xf32, #tpu.memory_space<vmem>>, vector<8x128xf32>,
    } else {
    }
    return
  }
  func.func @transform_0(%arg0: i32, %arg1: i32) -> (i32, i32, i32) {
    %c0_i32 = arith.constant 0 : i32
    %c0_i32_0 = arith.constant 0 : i32
    return %arg1, %arg0, %c0_i32 : i32, i32, i32
  }
  func.func @transform_1(%arg0: i32, %arg1: i32) -> (i32, i32) {
    %c0_i32 = arith.constant 0 : i32
    %c0_i32_0 = arith.constant 0 : i32
    %c0_i32_1 = arith.constant 0 : i32
    return %c0_i32, %c0_i32_0 : i32, i32
  }
  func.func @transform_2(%arg0: i32, %arg1: i32) -> (i32, i32) {
    %c0_i32 = arith.constant 0 : i32
    %c0_i32_0 = arith.constant 0 : i32
    %c0_i32_1 = arith.constant 0 : i32
    return %c0_i32, %c0_i32_0 : i32, i32
  }
  func.func @transform_3(%arg0: i32, %arg1: i32) -> (i32, i32) {
    %c0_i32 = arith.constant 0 : i32
    %c0_i32_0 = arith.constant 0 : i32
    %c0_i32_1 = arith.constant 0 : i32
    return %c0_i32, %c0_i32_0 : i32, i32
  }
  func.func @transform_4(%arg0: i32, %arg1: i32) -> (i32, i32) {
    %c0_i32 = arith.constant 0 : i32
    %c0_i32_0 = arith.constant 0 : i32
    %c0_i32_1 = arith.constant 0 : i32
    return %c0_i32, %c0_i32_0 : i32, i32
  }
  func.func @transform_5(%arg0: i32, %arg1: i32) -> (i32, i32) {
    %c0_i32 = arith.constant 0 : i32
    %c0_i32_0 = arith.constant 0 : i32
    %c0_i32_1 = arith.constant 0 : i32
    return %c0_i32, %c0_i32_0 : i32, i32
  }
  func.func @transform_6(%arg0: i32, %arg1: i32) -> (i32, i32) {
    %c0_i32 = arith.constant 0 : i32
    %c0_i32_0 = arith.constant 0 : i32
    %c0_i32_1 = arith.constant 0 : i32
    return %c0_i32, %c0_i32_0 : i32, i32
  }
  func.func @transform_7(%arg0: i32, %arg1: i32) -> (i32, i32) {
    %c0_i32 = arith.constant 0 : i32
    %c0_i32_0 = arith.constant 0 : i32
    %c0_i32_1 = arith.constant 0 : i32
    return %c0_i32, %c0_i32_0 : i32, i32
  }
  func.func @transform_8(%arg0: i32, %arg1: i32) -> (i32, i32) {
    %c0_i32 = arith.constant 0 : i32
    %c0_i32_0 = arith.constant 0 : i32
    %c0_i32_1 = arith.constant 0 : i32
    return %c0_i32, %c0_i32_0 : i32, i32
  }
  func.func @transform_9(%arg0: i32, %arg1: i32) -> (i32, i32) {
    %c0_i32 = arith.constant 0 : i32
    %c0_i32_0 = arith.constant 0 : i32
    %c0_i32_1 = arith.constant 0 : i32
    return %c0_i32, %c0_i32_0 : i32, i32
  }
  func.func @transform_10(%arg0: i32, %arg1: i32) -> (i32, i32) {
    %c0_i32 = arith.constant 0 : i32
    %c0_i32_0 = arith.constant 0 : i32
    %c0_i32_1 = arith.constant 0 : i32
    return %c0_i32, %c0_i32_0 : i32, i32
  }
  func.func @transform_11(%arg0: i32, %arg1: i32) -> (i32, i32) {
    %c0_i32 = arith.constant 0 : i32
    %c0_i32_0 = arith.constant 0 : i32
    return %arg0, %c0_i32 : i32, i32
  }
}

module attributes {stable_mosaic.version = 11 : i64} {
  func.func @kernel(%arg0: i32, %arg1: i32, %arg2: memref<5x8x16xf32, #tpu.memory_space<vmem>>, %arg3: memref<16x512xf32, #tpu.memory_space<vmem>>, %arg4: memref<128x512xf32, #tpu.memory_space<vmem>>, %arg5: memref<1x512xf32, #tpu.memory_space<vmem>>, %arg6: memref<128x512xf32, #tpu.memory_space<vmem>>, %arg7: memref<128x512xf32, #tpu.memory_space<vmem>>, %arg8: memref<1x512xf32, #tpu.memory_space<vmem>>, %arg9: memref<128x128xf32, #tpu.memory_space<vmem>>, %arg10: memref<1x128xf32, #tpu.memory_space<vmem>>, %arg11: memref<128x128xf32, #tpu.memory_space<vmem>>, %arg12: memref<1x128xf32, #tpu.memory_space<vmem>>, %arg13: memref<8x128xf32, #tpu.memory_space<vmem>>, %arg14: memref<5x8x512xf32, #tpu.memory_space<vmem>>, %arg15: memref<8x128xf32, #tpu.memory_space<vmem>>, %arg16: memref<8x128xf32, #tpu.memory_space<vmem>>, %arg17: memref<8x128xf32, #tpu.memory_space<vmem>>, %arg18: memref<8x128xf32, #tpu.memory_space<vmem>>) attributes {dimension_semantics = [#tpu.dimension_semantics<parallel>, #tpu.dimension_semantics<arbitrary>], iteration_bounds = array<i64: 1, 2>, scalar_prefetch = 0 : i64, scratch_operands = 5 : i64, tpu.core_type = #tpu.core_type<tc>, window_params = [{transform_indices = @transform_0, window_bounds = array<i64: 5, 8, 16>}, {pipeline_mode = #tpu.pipeline_mode<synchronous>, transform_indices = @transform_1, window_bounds = array<i64: 16, 512>}, {pipeline_mode = #tpu.pipeline_mode<synchronous>, transform_indices = @transform_2, window_bounds = array<i64: 128, 512>}, {pipeline_mode = #tpu.pipeline_mode<synchronous>, transform_indices = @transform_3, window_bounds = array<i64: 1, 512>}, {pipeline_mode = #tpu.pipeline_mode<synchronous>, transform_indices = @transform_4, window_bounds = array<i64: 128, 512>}, {pipeline_mode = #tpu.pipeline_mode<synchronous>, transform_indices = @transform_5, window_bounds = array<i64: 128, 512>}, {pipeline_mode = #tpu.pipeline_mode<synchronous>, transform_indices = @transform_6, window_bounds = array<i64: 1, 512>}, {pipeline_mode = #tpu.pipeline_mode<synchronous>, transform_indices = @transform_7, window_bounds = array<i64: 128, 128>}, {pipeline_mode = #tpu.pipeline_mode<synchronous>, transform_indices = @transform_8, window_bounds = array<i64: 1, 128>}, {pipeline_mode = #tpu.pipeline_mode<synchronous>, transform_indices = @transform_9, window_bounds = array<i64: 128, 128>}, {pipeline_mode = #tpu.pipeline_mode<synchronous>, transform_indices = @transform_10, window_bounds = array<i64: 1, 128>}, {transform_indices = @transform_11, window_bounds = array<i64: 8, 128>}]} {
    %c0_i32 = arith.constant 0 : i32
    %0 = arith.cmpi eq, %arg1, %c0_i32 : i32
    %1 = arith.extui %0 : i1 to i32
    %c0_i32_0 = arith.constant 0 : i32
    %2 = arith.cmpi ne, %1, %c0_i32_0 : i32
    scf.if %2 {
      %cst_92 = arith.constant 0.000000e+00 : f32
      %324 = vector.broadcast %cst_92 : f32 to vector<8x128xf32>
      %c0_93 = arith.constant 0 : index
      %c0_94 = arith.constant 0 : index
      %325 = vector.load %arg15[%c0_93, %c0_94] : memref<8x128xf32, #tpu.memory_space<vmem>>, vector<8x128xf32>
      tpu.vector_store %arg15[%c0_93, %c0_94], %324 {strides = array<i32>} : memref<8x128xf32, #tpu.memory_space<vmem>>, vector<8x128xf32>,
      %c0_95 = arith.constant 0 : index
      %c0_96 = arith.constant 0 : index
      %326 = vector.load %arg16[%c0_95, %c0_96] : memref<8x128xf32, #tpu.memory_space<vmem>>, vector<8x128xf32>
      tpu.vector_store %arg16[%c0_95, %c0_96], %324 {strides = array<i32>} : memref<8x128xf32, #tpu.memory_space<vmem>>, vector<8x128xf32>,
      %c0_97 = arith.constant 0 : index
      %c0_98 = arith.constant 0 : index
      %327 = vector.load %arg17[%c0_97, %c0_98] : memref<8x128xf32, #tpu.memory_space<vmem>>, vector<8x128xf32>
      tpu.vector_store %arg17[%c0_97, %c0_98], %324 {strides = array<i32>} : memref<8x128xf32, #tpu.memory_space<vmem>>, vector<8x128xf32>,
      %c0_99 = arith.constant 0 : index
      %c0_100 = arith.constant 0 : index
      %328 = vector.load %arg18[%c0_99, %c0_100] : memref<8x128xf32, #tpu.memory_space<vmem>>, vector<8x128xf32>
      tpu.vector_store %arg18[%c0_99, %c0_100], %324 {strides = array<i32>} : memref<8x128xf32, #tpu.memory_space<vmem>>, vector<8x128xf32>,
    } else {
    }
    %c0 = arith.constant 0 : index
    %c0_1 = arith.constant 0 : index
    %c0_2 = arith.constant 0 : index
    %3 = vector.load %arg2[%c0, %c0_1, %c0_2] : memref<5x8x16xf32, #tpu.memory_space<vmem>>, vector<5x8x16xf32>
    %4 = vector.shape_cast %3 : vector<5x8x16xf32> to vector<40x16xf32>
    %c0_3 = arith.constant 0 : index
    %c0_4 = arith.constant 0 : index
    %5 = vector.load %arg3[%c0_3, %c0_4] : memref<16x512xf32, #tpu.memory_space<vmem>>, vector<16x512xf32>
    %cst = arith.constant dense<0.000000e+00> : vector<40x512xf32>
    %6 = tpu.matmul %4, %5, %cst {dimension_numbers = #tpu.dot_dimension_numbers<[1], [0], [0], [1], [0, 0, 1, 1], [], []>} : vector<40x16xf32>, vector<16x512xf32>, vector<40x512xf32> -> vector<40x512xf32>
    %c0_5 = arith.constant 0 : index
    %c0_6 = arith.constant 0 : index
    %7 = vector.load %arg5[%c0_5, %c0_6] : memref<1x512xf32, #tpu.memory_space<vmem>>, vector<1x512xf32>
    %8 = vector.broadcast %7 : vector<1x512xf32> to vector<40x512xf32>
    %9 = arith.addf %6, %8 : vector<40x512xf32>
    %10 = vector.shape_cast %9 : vector<40x512xf32> to vector<5x8x512xf32>
    %c0_7 = arith.constant 0 : index
    %c0_8 = arith.constant 0 : index
    %c0_9 = arith.constant 0 : index
    %11 = vector.load %arg14[%c0_7, %c0_8, %c0_9] : memref<5x8x512xf32, #tpu.memory_space<vmem>>, vector<5x8x512xf32>
    tpu.vector_store %arg14[%c0_7, %c0_8, %c0_9], %10 {strides = array<i32>} : memref<5x8x512xf32, #tpu.memory_space<vmem>>, vector<5x8x512xf32>,
    %c0_10 = arith.constant 0 : index
    %c0_11 = arith.constant 0 : index
    %12 = vector.load %arg4[%c0_10, %c0_11] : memref<128x512xf32, #tpu.memory_space<vmem>>, vector<128x512xf32>
    %c0_12 = arith.constant 0 : index
    %c0_13 = arith.constant 0 : index
    %13 = vector.load %arg6[%c0_12, %c0_13] : memref<128x512xf32, #tpu.memory_space<vmem>>, vector<128x512xf32>
    %c0_14 = arith.constant 0 : index
    %c0_15 = arith.constant 0 : index
    %14 = vector.load %arg7[%c0_14, %c0_15] : memref<128x512xf32, #tpu.memory_space<vmem>>, vector<128x512xf32>
    %c0_16 = arith.constant 0 : index
    %c0_17 = arith.constant 0 : index
    %15 = vector.load %arg8[%c0_16, %c0_17] : memref<1x512xf32, #tpu.memory_space<vmem>>, vector<1x512xf32>
    %16 = vector.shape_cast %15 : vector<1x512xf32> to vector<1x512xf32>
    %17 = vector.broadcast %16 : vector<1x512xf32> to vector<8x512xf32>
    %c0_18 = arith.constant 0 : index
    %c0_19 = arith.constant 0 : index
    %18 = vector.load %arg15[%c0_18, %c0_19] : memref<8x128xf32, #tpu.memory_space<vmem>>, vector<8x128xf32>
    %c0_20 = arith.constant 0 : index
    %c0_21 = arith.constant 0 : index
    %19 = vector.load %arg16[%c0_20, %c0_21] : memref<8x128xf32, #tpu.memory_space<vmem>>, vector<8x128xf32>
    %c0_22 = arith.constant 0 : index
    %c0_23 = arith.constant 0 : index
    %20 = vector.load %arg17[%c0_22, %c0_23] : memref<8x128xf32, #tpu.memory_space<vmem>>, vector<8x128xf32>
    %c0_24 = arith.constant 0 : index
    %c0_25 = arith.constant 0 : index
    %21 = vector.load %arg18[%c0_24, %c0_25] : memref<8x128xf32, #tpu.memory_space<vmem>>, vector<8x128xf32>
    %c0_i32_26 = arith.constant 0 : i32
    %22 = arith.index_cast %c0_i32_26 : i32 to index
    %c0_27 = arith.constant 0 : index
    %c0_28 = arith.constant 0 : index
    %23 = vector.load %arg14[%22, %c0_27, %c0_28] : memref<5x8x512xf32, #tpu.memory_space<vmem>>, vector<1x8x512xf32>
    %24 = vector.shape_cast %23 : vector<1x8x512xf32> to vector<8x512xf32>
    %cst_29 = arith.constant dense<0.000000e+00> : vector<8x512xf32>
    %25 = tpu.matmul %18, %12, %cst_29 {dimension_numbers = #tpu.dot_dimension_numbers<[1], [0], [0], [1], [0, 0, 1, 1], [], []>} : vector<8x128xf32>, vector<128x512xf32>, vector<8x512xf32> -> vector<8x512xf32>
    %26 = arith.addf %24, %25 : vector<8x512xf32>
    %27 = vector.extract_strided_slice %26 {offsets = [0, 0], sizes = [8, 128], strides = [1, 1]} : vector<8x512xf32> to vector<8x128xf32>
    %28 = arith.negf %27 : vector<8x128xf32>
    %29 = math.exp %28 : vector<8x128xf32>
    %cst_30 = arith.constant 1.000000e+00 : f32
    %30 = vector.broadcast %cst_30 : f32 to vector<8x128xf32>
    %31 = arith.addf %30, %29 : vector<8x128xf32>
    %32 = arith.divf %30, %31 : vector<8x128xf32>
    %33 = vector.extract_strided_slice %26 {offsets = [0, 128], sizes = [8, 128], strides = [1, 1]} : vector<8x512xf32> to vector<8x128xf32>
    %34 = arith.negf %33 : vector<8x128xf32>
    %35 = math.exp %34 : vector<8x128xf32>
    %cst_31 = arith.constant 1.000000e+00 : f32
    %36 = vector.broadcast %cst_31 : f32 to vector<8x128xf32>
    %37 = arith.addf %36, %35 : vector<8x128xf32>
    %38 = arith.divf %36, %37 : vector<8x128xf32>
    %39 = vector.extract_strided_slice %26 {offsets = [0, 256], sizes = [8, 128], strides = [1, 1]} : vector<8x512xf32> to vector<8x128xf32>
    %40 = math.tanh %39 : vector<8x128xf32>
    %41 = vector.extract_strided_slice %26 {offsets = [0, 384], sizes = [8, 128], strides = [1, 1]} : vector<8x512xf32> to vector<8x128xf32>
    %42 = arith.negf %41 : vector<8x128xf32>
    %43 = math.exp %42 : vector<8x128xf32>
    %cst_32 = arith.constant 1.000000e+00 : f32
    %44 = vector.broadcast %cst_32 : f32 to vector<8x128xf32>
    %45 = arith.addf %44, %43 : vector<8x128xf32>
    %46 = arith.divf %44, %45 : vector<8x128xf32>
    %47 = arith.mulf %38, %19 : vector<8x128xf32>
    %48 = arith.mulf %32, %40 : vector<8x128xf32>
    %49 = arith.addf %47, %48 : vector<8x128xf32>
    %50 = math.tanh %49 : vector<8x128xf32>
    %51 = arith.mulf %46, %50 : vector<8x128xf32>
    %cst_33 = arith.constant dense<0.000000e+00> : vector<8x512xf32>
    %52 = tpu.matmul %51, %13, %cst_33 {dimension_numbers = #tpu.dot_dimension_numbers<[1], [0], [0], [1], [0, 0, 1, 1], [], []>} : vector<8x128xf32>, vector<128x512xf32>, vector<8x512xf32> -> vector<8x512xf32>
    %cst_34 = arith.constant dense<0.000000e+00> : vector<8x512xf32>
    %53 = tpu.matmul %20, %14, %cst_34 {dimension_numbers = #tpu.dot_dimension_numbers<[1], [0], [0], [1], [0, 0, 1, 1], [], []>} : vector<8x128xf32>, vector<128x512xf32>, vector<8x512xf32> -> vector<8x512xf32>
    %54 = arith.addf %52, %53 : vector<8x512xf32>
    %55 = arith.addf %54, %17 : vector<8x512xf32>
    %56 = vector.extract_strided_slice %55 {offsets = [0, 0], sizes = [8, 128], strides = [1, 1]} : vector<8x512xf32> to vector<8x128xf32>
    %57 = arith.negf %56 : vector<8x128xf32>
    %58 = math.exp %57 : vector<8x128xf32>
    %cst_35 = arith.constant 1.000000e+00 : f32
    %59 = vector.broadcast %cst_35 : f32 to vector<8x128xf32>
    %60 = arith.addf %59, %58 : vector<8x128xf32>
    %61 = arith.divf %59, %60 : vector<8x128xf32>
    %62 = vector.extract_strided_slice %55 {offsets = [0, 128], sizes = [8, 128], strides = [1, 1]} : vector<8x512xf32> to vector<8x128xf32>
    %63 = arith.negf %62 : vector<8x128xf32>
    %64 = math.exp %63 : vector<8x128xf32>
    %cst_36 = arith.constant 1.000000e+00 : f32
    %65 = vector.broadcast %cst_36 : f32 to vector<8x128xf32>
    %66 = arith.addf %65, %64 : vector<8x128xf32>
    %67 = arith.divf %65, %66 : vector<8x128xf32>
    %68 = vector.extract_strided_slice %55 {offsets = [0, 256], sizes = [8, 128], strides = [1, 1]} : vector<8x512xf32> to vector<8x128xf32>
    %69 = math.tanh %68 : vector<8x128xf32>
    %70 = vector.extract_strided_slice %55 {offsets = [0, 384], sizes = [8, 128], strides = [1, 1]} : vector<8x512xf32> to vector<8x128xf32>
    %71 = arith.negf %70 : vector<8x128xf32>
    %72 = math.exp %71 : vector<8x128xf32>
    %cst_37 = arith.constant 1.000000e+00 : f32
    %73 = vector.broadcast %cst_37 : f32 to vector<8x128xf32>
    %74 = arith.addf %73, %72 : vector<8x128xf32>
    %75 = arith.divf %73, %74 : vector<8x128xf32>
    %76 = arith.mulf %67, %21 : vector<8x128xf32>
    %77 = arith.mulf %61, %69 : vector<8x128xf32>
    %78 = arith.addf %76, %77 : vector<8x128xf32>
    %79 = math.tanh %78 : vector<8x128xf32>
    %80 = arith.mulf %75, %79 : vector<8x128xf32>
    %c1_i32 = arith.constant 1 : i32
    %81 = arith.index_cast %c1_i32 : i32 to index
    %c0_38 = arith.constant 0 : index
    %c0_39 = arith.constant 0 : index
    %82 = vector.load %arg14[%81, %c0_38, %c0_39] : memref<5x8x512xf32, #tpu.memory_space<vmem>>, vector<1x8x512xf32>
    %83 = vector.shape_cast %82 : vector<1x8x512xf32> to vector<8x512xf32>
    %cst_40 = arith.constant dense<0.000000e+00> : vector<8x512xf32>
    %84 = tpu.matmul %51, %12, %cst_40 {dimension_numbers = #tpu.dot_dimension_numbers<[1], [0], [0], [1], [0, 0, 1, 1], [], []>} : vector<8x128xf32>, vector<128x512xf32>, vector<8x512xf32> -> vector<8x512xf32>
    %85 = arith.addf %83, %84 : vector<8x512xf32>
    %86 = vector.extract_strided_slice %85 {offsets = [0, 0], sizes = [8, 128], strides = [1, 1]} : vector<8x512xf32> to vector<8x128xf32>
    %87 = arith.negf %86 : vector<8x128xf32>
    %88 = math.exp %87 : vector<8x128xf32>
    %cst_41 = arith.constant 1.000000e+00 : f32
    %89 = vector.broadcast %cst_41 : f32 to vector<8x128xf32>
    %90 = arith.addf %89, %88 : vector<8x128xf32>
    %91 = arith.divf %89, %90 : vector<8x128xf32>
    %92 = vector.extract_strided_slice %85 {offsets = [0, 128], sizes = [8, 128], strides = [1, 1]} : vector<8x512xf32> to vector<8x128xf32>
    %93 = arith.negf %92 : vector<8x128xf32>
    %94 = math.exp %93 : vector<8x128xf32>
    %cst_42 = arith.constant 1.000000e+00 : f32
    %95 = vector.broadcast %cst_42 : f32 to vector<8x128xf32>
    %96 = arith.addf %95, %94 : vector<8x128xf32>
    %97 = arith.divf %95, %96 : vector<8x128xf32>
    %98 = vector.extract_strided_slice %85 {offsets = [0, 256], sizes = [8, 128], strides = [1, 1]} : vector<8x512xf32> to vector<8x128xf32>
    %99 = math.tanh %98 : vector<8x128xf32>
    %100 = vector.extract_strided_slice %85 {offsets = [0, 384], sizes = [8, 128], strides = [1, 1]} : vector<8x512xf32> to vector<8x128xf32>
    %101 = arith.negf %100 : vector<8x128xf32>
    %102 = math.exp %101 : vector<8x128xf32>
    %cst_43 = arith.constant 1.000000e+00 : f32
    %103 = vector.broadcast %cst_43 : f32 to vector<8x128xf32>
    %104 = arith.addf %103, %102 : vector<8x128xf32>
    %105 = arith.divf %103, %104 : vector<8x128xf32>
    %106 = arith.mulf %97, %49 : vector<8x128xf32>
    %107 = arith.mulf %91, %99 : vector<8x128xf32>
    %108 = arith.addf %106, %107 : vector<8x128xf32>
    %109 = math.tanh %108 : vector<8x128xf32>
    %110 = arith.mulf %105, %109 : vector<8x128xf32>
    %cst_44 = arith.constant dense<0.000000e+00> : vector<8x512xf32>
    %111 = tpu.matmul %110, %13, %cst_44 {dimension_numbers = #tpu.dot_dimension_numbers<[1], [0], [0], [1], [0, 0, 1, 1], [], []>} : vector<8x128xf32>, vector<128x512xf32>, vector<8x512xf32> -> vector<8x512xf32>
    %cst_45 = arith.constant dense<0.000000e+00> : vector<8x512xf32>
    %112 = tpu.matmul %80, %14, %cst_45 {dimension_numbers = #tpu.dot_dimension_numbers<[1], [0], [0], [1], [0, 0, 1, 1], [], []>} : vector<8x128xf32>, vector<128x512xf32>, vector<8x512xf32> -> vector<8x512xf32>
    %113 = arith.addf %111, %112 : vector<8x512xf32>
    %114 = arith.addf %113, %17 : vector<8x512xf32>
    %115 = vector.extract_strided_slice %114 {offsets = [0, 0], sizes = [8, 128], strides = [1, 1]} : vector<8x512xf32> to vector<8x128xf32>
    %116 = arith.negf %115 : vector<8x128xf32>
    %117 = math.exp %116 : vector<8x128xf32>
    %cst_46 = arith.constant 1.000000e+00 : f32
    %118 = vector.broadcast %cst_46 : f32 to vector<8x128xf32>
    %119 = arith.addf %118, %117 : vector<8x128xf32>
    %120 = arith.divf %118, %119 : vector<8x128xf32>
    %121 = vector.extract_strided_slice %114 {offsets = [0, 128], sizes = [8, 128], strides = [1, 1]} : vector<8x512xf32> to vector<8x128xf32>
    %122 = arith.negf %121 : vector<8x128xf32>
    %123 = math.exp %122 : vector<8x128xf32>
    %cst_47 = arith.constant 1.000000e+00 : f32
    %124 = vector.broadcast %cst_47 : f32 to vector<8x128xf32>
    %125 = arith.addf %124, %123 : vector<8x128xf32>
    %126 = arith.divf %124, %125 : vector<8x128xf32>
    %127 = vector.extract_strided_slice %114 {offsets = [0, 256], sizes = [8, 128], strides = [1, 1]} : vector<8x512xf32> to vector<8x128xf32>
    %128 = math.tanh %127 : vector<8x128xf32>
    %129 = vector.extract_strided_slice %114 {offsets = [0, 384], sizes = [8, 128], strides = [1, 1]} : vector<8x512xf32> to vector<8x128xf32>
    %130 = arith.negf %129 : vector<8x128xf32>
    %131 = math.exp %130 : vector<8x128xf32>
    %cst_48 = arith.constant 1.000000e+00 : f32
    %132 = vector.broadcast %cst_48 : f32 to vector<8x128xf32>
    %133 = arith.addf %132, %131 : vector<8x128xf32>
    %134 = arith.divf %132, %133 : vector<8x128xf32>
    %135 = arith.mulf %126, %78 : vector<8x128xf32>
    %136 = arith.mulf %120, %128 : vector<8x128xf32>
    %137 = arith.addf %135, %136 : vector<8x128xf32>
    %138 = math.tanh %137 : vector<8x128xf32>
    %139 = arith.mulf %134, %138 : vector<8x128xf32>
    %c2_i32 = arith.constant 2 : i32
    %140 = arith.index_cast %c2_i32 : i32 to index
    %c0_49 = arith.constant 0 : index
    %c0_50 = arith.constant 0 : index
    %141 = vector.load %arg14[%140, %c0_49, %c0_50] : memref<5x8x512xf32, #tpu.memory_space<vmem>>, vector<1x8x512xf32>
    %142 = vector.shape_cast %141 : vector<1x8x512xf32> to vector<8x512xf32>
    %cst_51 = arith.constant dense<0.000000e+00> : vector<8x512xf32>
    %143 = tpu.matmul %110, %12, %cst_51 {dimension_numbers = #tpu.dot_dimension_numbers<[1], [0], [0], [1], [0, 0, 1, 1], [], []>} : vector<8x128xf32>, vector<128x512xf32>, vector<8x512xf32> -> vector<8x512xf32>
    %144 = arith.addf %142, %143 : vector<8x512xf32>
    %145 = vector.extract_strided_slice %144 {offsets = [0, 0], sizes = [8, 128], strides = [1, 1]} : vector<8x512xf32> to vector<8x128xf32>
    %146 = arith.negf %145 : vector<8x128xf32>
    %147 = math.exp %146 : vector<8x128xf32>
    %cst_52 = arith.constant 1.000000e+00 : f32
    %148 = vector.broadcast %cst_52 : f32 to vector<8x128xf32>
    %149 = arith.addf %148, %147 : vector<8x128xf32>
    %150 = arith.divf %148, %149 : vector<8x128xf32>
    %151 = vector.extract_strided_slice %144 {offsets = [0, 128], sizes = [8, 128], strides = [1, 1]} : vector<8x512xf32> to vector<8x128xf32>
    %152 = arith.negf %151 : vector<8x128xf32>
    %153 = math.exp %152 : vector<8x128xf32>
    %cst_53 = arith.constant 1.000000e+00 : f32
    %154 = vector.broadcast %cst_53 : f32 to vector<8x128xf32>
    %155 = arith.addf %154, %153 : vector<8x128xf32>
    %156 = arith.divf %154, %155 : vector<8x128xf32>
    %157 = vector.extract_strided_slice %144 {offsets = [0, 256], sizes = [8, 128], strides = [1, 1]} : vector<8x512xf32> to vector<8x128xf32>
    %158 = math.tanh %157 : vector<8x128xf32>
    %159 = vector.extract_strided_slice %144 {offsets = [0, 384], sizes = [8, 128], strides = [1, 1]} : vector<8x512xf32> to vector<8x128xf32>
    %160 = arith.negf %159 : vector<8x128xf32>
    %161 = math.exp %160 : vector<8x128xf32>
    %cst_54 = arith.constant 1.000000e+00 : f32
    %162 = vector.broadcast %cst_54 : f32 to vector<8x128xf32>
    %163 = arith.addf %162, %161 : vector<8x128xf32>
    %164 = arith.divf %162, %163 : vector<8x128xf32>
    %165 = arith.mulf %156, %108 : vector<8x128xf32>
    %166 = arith.mulf %150, %158 : vector<8x128xf32>
    %167 = arith.addf %165, %166 : vector<8x128xf32>
    %168 = math.tanh %167 : vector<8x128xf32>
    %169 = arith.mulf %164, %168 : vector<8x128xf32>
    %cst_55 = arith.constant dense<0.000000e+00> : vector<8x512xf32>
    %170 = tpu.matmul %169, %13, %cst_55 {dimension_numbers = #tpu.dot_dimension_numbers<[1], [0], [0], [1], [0, 0, 1, 1], [], []>} : vector<8x128xf32>, vector<128x512xf32>, vector<8x512xf32> -> vector<8x512xf32>
    %cst_56 = arith.constant dense<0.000000e+00> : vector<8x512xf32>
    %171 = tpu.matmul %139, %14, %cst_56 {dimension_numbers = #tpu.dot_dimension_numbers<[1], [0], [0], [1], [0, 0, 1, 1], [], []>} : vector<8x128xf32>, vector<128x512xf32>, vector<8x512xf32> -> vector<8x512xf32>
    %172 = arith.addf %170, %171 : vector<8x512xf32>
    %173 = arith.addf %172, %17 : vector<8x512xf32>
    %174 = vector.extract_strided_slice %173 {offsets = [0, 0], sizes = [8, 128], strides = [1, 1]} : vector<8x512xf32> to vector<8x128xf32>
    %175 = arith.negf %174 : vector<8x128xf32>
    %176 = math.exp %175 : vector<8x128xf32>
    %cst_57 = arith.constant 1.000000e+00 : f32
    %177 = vector.broadcast %cst_57 : f32 to vector<8x128xf32>
    %178 = arith.addf %177, %176 : vector<8x128xf32>
    %179 = arith.divf %177, %178 : vector<8x128xf32>
    %180 = vector.extract_strided_slice %173 {offsets = [0, 128], sizes = [8, 128], strides = [1, 1]} : vector<8x512xf32> to vector<8x128xf32>
    %181 = arith.negf %180 : vector<8x128xf32>
    %182 = math.exp %181 : vector<8x128xf32>
    %cst_58 = arith.constant 1.000000e+00 : f32
    %183 = vector.broadcast %cst_58 : f32 to vector<8x128xf32>
    %184 = arith.addf %183, %182 : vector<8x128xf32>
    %185 = arith.divf %183, %184 : vector<8x128xf32>
    %186 = vector.extract_strided_slice %173 {offsets = [0, 256], sizes = [8, 128], strides = [1, 1]} : vector<8x512xf32> to vector<8x128xf32>
    %187 = math.tanh %186 : vector<8x128xf32>
    %188 = vector.extract_strided_slice %173 {offsets = [0, 384], sizes = [8, 128], strides = [1, 1]} : vector<8x512xf32> to vector<8x128xf32>
    %189 = arith.negf %188 : vector<8x128xf32>
    %190 = math.exp %189 : vector<8x128xf32>
    %cst_59 = arith.constant 1.000000e+00 : f32
    %191 = vector.broadcast %cst_59 : f32 to vector<8x128xf32>
    %192 = arith.addf %191, %190 : vector<8x128xf32>
    %193 = arith.divf %191, %192 : vector<8x128xf32>
    %194 = arith.mulf %185, %137 : vector<8x128xf32>
    %195 = arith.mulf %179, %187 : vector<8x128xf32>
    %196 = arith.addf %194, %195 : vector<8x128xf32>
    %197 = math.tanh %196 : vector<8x128xf32>
    %198 = arith.mulf %193, %197 : vector<8x128xf32>
    %c3_i32 = arith.constant 3 : i32
    %199 = arith.index_cast %c3_i32 : i32 to index
    %c0_60 = arith.constant 0 : index
    %c0_61 = arith.constant 0 : index
    %200 = vector.load %arg14[%199, %c0_60, %c0_61] : memref<5x8x512xf32, #tpu.memory_space<vmem>>, vector<1x8x512xf32>
    %201 = vector.shape_cast %200 : vector<1x8x512xf32> to vector<8x512xf32>
    %cst_62 = arith.constant dense<0.000000e+00> : vector<8x512xf32>
    %202 = tpu.matmul %169, %12, %cst_62 {dimension_numbers = #tpu.dot_dimension_numbers<[1], [0], [0], [1], [0, 0, 1, 1], [], []>} : vector<8x128xf32>, vector<128x512xf32>, vector<8x512xf32> -> vector<8x512xf32>
    %203 = arith.addf %201, %202 : vector<8x512xf32>
    %204 = vector.extract_strided_slice %203 {offsets = [0, 0], sizes = [8, 128], strides = [1, 1]} : vector<8x512xf32> to vector<8x128xf32>
    %205 = arith.negf %204 : vector<8x128xf32>
    %206 = math.exp %205 : vector<8x128xf32>
    %cst_63 = arith.constant 1.000000e+00 : f32
    %207 = vector.broadcast %cst_63 : f32 to vector<8x128xf32>
    %208 = arith.addf %207, %206 : vector<8x128xf32>
    %209 = arith.divf %207, %208 : vector<8x128xf32>
    %210 = vector.extract_strided_slice %203 {offsets = [0, 128], sizes = [8, 128], strides = [1, 1]} : vector<8x512xf32> to vector<8x128xf32>
    %211 = arith.negf %210 : vector<8x128xf32>
    %212 = math.exp %211 : vector<8x128xf32>
    %cst_64 = arith.constant 1.000000e+00 : f32
    %213 = vector.broadcast %cst_64 : f32 to vector<8x128xf32>
    %214 = arith.addf %213, %212 : vector<8x128xf32>
    %215 = arith.divf %213, %214 : vector<8x128xf32>
    %216 = vector.extract_strided_slice %203 {offsets = [0, 256], sizes = [8, 128], strides = [1, 1]} : vector<8x512xf32> to vector<8x128xf32>
    %217 = math.tanh %216 : vector<8x128xf32>
    %218 = vector.extract_strided_slice %203 {offsets = [0, 384], sizes = [8, 128], strides = [1, 1]} : vector<8x512xf32> to vector<8x128xf32>
    %219 = arith.negf %218 : vector<8x128xf32>
    %220 = math.exp %219 : vector<8x128xf32>
    %cst_65 = arith.constant 1.000000e+00 : f32
    %221 = vector.broadcast %cst_65 : f32 to vector<8x128xf32>
    %222 = arith.addf %221, %220 : vector<8x128xf32>
    %223 = arith.divf %221, %222 : vector<8x128xf32>
    %224 = arith.mulf %215, %167 : vector<8x128xf32>
    %225 = arith.mulf %209, %217 : vector<8x128xf32>
    %226 = arith.addf %224, %225 : vector<8x128xf32>
    %227 = math.tanh %226 : vector<8x128xf32>
    %228 = arith.mulf %223, %227 : vector<8x128xf32>
    %cst_66 = arith.constant dense<0.000000e+00> : vector<8x512xf32>
    %229 = tpu.matmul %228, %13, %cst_66 {dimension_numbers = #tpu.dot_dimension_numbers<[1], [0], [0], [1], [0, 0, 1, 1], [], []>} : vector<8x128xf32>, vector<128x512xf32>, vector<8x512xf32> -> vector<8x512xf32>
    %cst_67 = arith.constant dense<0.000000e+00> : vector<8x512xf32>
    %230 = tpu.matmul %198, %14, %cst_67 {dimension_numbers = #tpu.dot_dimension_numbers<[1], [0], [0], [1], [0, 0, 1, 1], [], []>} : vector<8x128xf32>, vector<128x512xf32>, vector<8x512xf32> -> vector<8x512xf32>
    %231 = arith.addf %229, %230 : vector<8x512xf32>
    %232 = arith.addf %231, %17 : vector<8x512xf32>
    %233 = vector.extract_strided_slice %232 {offsets = [0, 0], sizes = [8, 128], strides = [1, 1]} : vector<8x512xf32> to vector<8x128xf32>
    %234 = arith.negf %233 : vector<8x128xf32>
    %235 = math.exp %234 : vector<8x128xf32>
    %cst_68 = arith.constant 1.000000e+00 : f32
    %236 = vector.broadcast %cst_68 : f32 to vector<8x128xf32>
    %237 = arith.addf %236, %235 : vector<8x128xf32>
    %238 = arith.divf %236, %237 : vector<8x128xf32>
    %239 = vector.extract_strided_slice %232 {offsets = [0, 128], sizes = [8, 128], strides = [1, 1]} : vector<8x512xf32> to vector<8x128xf32>
    %240 = arith.negf %239 : vector<8x128xf32>
    %241 = math.exp %240 : vector<8x128xf32>
    %cst_69 = arith.constant 1.000000e+00 : f32
    %242 = vector.broadcast %cst_69 : f32 to vector<8x128xf32>
    %243 = arith.addf %242, %241 : vector<8x128xf32>
    %244 = arith.divf %242, %243 : vector<8x128xf32>
    %245 = vector.extract_strided_slice %232 {offsets = [0, 256], sizes = [8, 128], strides = [1, 1]} : vector<8x512xf32> to vector<8x128xf32>
    %246 = math.tanh %245 : vector<8x128xf32>
    %247 = vector.extract_strided_slice %232 {offsets = [0, 384], sizes = [8, 128], strides = [1, 1]} : vector<8x512xf32> to vector<8x128xf32>
    %248 = arith.negf %247 : vector<8x128xf32>
    %249 = math.exp %248 : vector<8x128xf32>
    %cst_70 = arith.constant 1.000000e+00 : f32
    %250 = vector.broadcast %cst_70 : f32 to vector<8x128xf32>
    %251 = arith.addf %250, %249 : vector<8x128xf32>
    %252 = arith.divf %250, %251 : vector<8x128xf32>
    %253 = arith.mulf %244, %196 : vector<8x128xf32>
    %254 = arith.mulf %238, %246 : vector<8x128xf32>
    %255 = arith.addf %253, %254 : vector<8x128xf32>
    %256 = math.tanh %255 : vector<8x128xf32>
    %257 = arith.mulf %252, %256 : vector<8x128xf32>
    %c4_i32 = arith.constant 4 : i32
    %258 = arith.index_cast %c4_i32 : i32 to index
    %c0_71 = arith.constant 0 : index
    %c0_72 = arith.constant 0 : index
    %259 = vector.load %arg14[%258, %c0_71, %c0_72] : memref<5x8x512xf32, #tpu.memory_space<vmem>>, vector<1x8x512xf32>
    %260 = vector.shape_cast %259 : vector<1x8x512xf32> to vector<8x512xf32>
    %cst_73 = arith.constant dense<0.000000e+00> : vector<8x512xf32>
    %261 = tpu.matmul %228, %12, %cst_73 {dimension_numbers = #tpu.dot_dimension_numbers<[1], [0], [0], [1], [0, 0, 1, 1], [], []>} : vector<8x128xf32>, vector<128x512xf32>, vector<8x512xf32> -> vector<8x512xf32>
    %262 = arith.addf %260, %261 : vector<8x512xf32>
    %263 = vector.extract_strided_slice %262 {offsets = [0, 0], sizes = [8, 128], strides = [1, 1]} : vector<8x512xf32> to vector<8x128xf32>
    %264 = arith.negf %263 : vector<8x128xf32>
    %265 = math.exp %264 : vector<8x128xf32>
    %cst_74 = arith.constant 1.000000e+00 : f32
    %266 = vector.broadcast %cst_74 : f32 to vector<8x128xf32>
    %267 = arith.addf %266, %265 : vector<8x128xf32>
    %268 = arith.divf %266, %267 : vector<8x128xf32>
    %269 = vector.extract_strided_slice %262 {offsets = [0, 128], sizes = [8, 128], strides = [1, 1]} : vector<8x512xf32> to vector<8x128xf32>
    %270 = arith.negf %269 : vector<8x128xf32>
    %271 = math.exp %270 : vector<8x128xf32>
    %cst_75 = arith.constant 1.000000e+00 : f32
    %272 = vector.broadcast %cst_75 : f32 to vector<8x128xf32>
    %273 = arith.addf %272, %271 : vector<8x128xf32>
    %274 = arith.divf %272, %273 : vector<8x128xf32>
    %275 = vector.extract_strided_slice %262 {offsets = [0, 256], sizes = [8, 128], strides = [1, 1]} : vector<8x512xf32> to vector<8x128xf32>
    %276 = math.tanh %275 : vector<8x128xf32>
    %277 = vector.extract_strided_slice %262 {offsets = [0, 384], sizes = [8, 128], strides = [1, 1]} : vector<8x512xf32> to vector<8x128xf32>
    %278 = arith.negf %277 : vector<8x128xf32>
    %279 = math.exp %278 : vector<8x128xf32>
    %cst_76 = arith.constant 1.000000e+00 : f32
    %280 = vector.broadcast %cst_76 : f32 to vector<8x128xf32>
    %281 = arith.addf %280, %279 : vector<8x128xf32>
    %282 = arith.divf %280, %281 : vector<8x128xf32>
    %283 = arith.mulf %274, %226 : vector<8x128xf32>
    %284 = arith.mulf %268, %276 : vector<8x128xf32>
    %285 = arith.addf %283, %284 : vector<8x128xf32>
    %286 = math.tanh %285 : vector<8x128xf32>
    %287 = arith.mulf %282, %286 : vector<8x128xf32>
    %cst_77 = arith.constant dense<0.000000e+00> : vector<8x512xf32>
    %288 = tpu.matmul %287, %13, %cst_77 {dimension_numbers = #tpu.dot_dimension_numbers<[1], [0], [0], [1], [0, 0, 1, 1], [], []>} : vector<8x128xf32>, vector<128x512xf32>, vector<8x512xf32> -> vector<8x512xf32>
    %cst_78 = arith.constant dense<0.000000e+00> : vector<8x512xf32>
    %289 = tpu.matmul %257, %14, %cst_78 {dimension_numbers = #tpu.dot_dimension_numbers<[1], [0], [0], [1], [0, 0, 1, 1], [], []>} : vector<8x128xf32>, vector<128x512xf32>, vector<8x512xf32> -> vector<8x512xf32>
    %290 = arith.addf %288, %289 : vector<8x512xf32>
    %291 = arith.addf %290, %17 : vector<8x512xf32>
    %292 = vector.extract_strided_slice %291 {offsets = [0, 0], sizes = [8, 128], strides = [1, 1]} : vector<8x512xf32> to vector<8x128xf32>
    %293 = arith.negf %292 : vector<8x128xf32>
    %294 = math.exp %293 : vector<8x128xf32>
    %cst_79 = arith.constant 1.000000e+00 : f32
    %295 = vector.broadcast %cst_79 : f32 to vector<8x128xf32>
    %296 = arith.addf %295, %294 : vector<8x128xf32>
    %297 = arith.divf %295, %296 : vector<8x128xf32>
    %298 = vector.extract_strided_slice %291 {offsets = [0, 128], sizes = [8, 128], strides = [1, 1]} : vector<8x512xf32> to vector<8x128xf32>
    %299 = arith.negf %298 : vector<8x128xf32>
    %300 = math.exp %299 : vector<8x128xf32>
    %cst_80 = arith.constant 1.000000e+00 : f32
    %301 = vector.broadcast %cst_80 : f32 to vector<8x128xf32>
    %302 = arith.addf %301, %300 : vector<8x128xf32>
    %303 = arith.divf %301, %302 : vector<8x128xf32>
    %304 = vector.extract_strided_slice %291 {offsets = [0, 256], sizes = [8, 128], strides = [1, 1]} : vector<8x512xf32> to vector<8x128xf32>
    %305 = math.tanh %304 : vector<8x128xf32>
    %306 = vector.extract_strided_slice %291 {offsets = [0, 384], sizes = [8, 128], strides = [1, 1]} : vector<8x512xf32> to vector<8x128xf32>
    %307 = arith.negf %306 : vector<8x128xf32>
    %308 = math.exp %307 : vector<8x128xf32>
    %cst_81 = arith.constant 1.000000e+00 : f32
    %309 = vector.broadcast %cst_81 : f32 to vector<8x128xf32>
    %310 = arith.addf %309, %308 : vector<8x128xf32>
    %311 = arith.divf %309, %310 : vector<8x128xf32>
    %312 = arith.mulf %303, %255 : vector<8x128xf32>
    %313 = arith.mulf %297, %305 : vector<8x128xf32>
    %314 = arith.addf %312, %313 : vector<8x128xf32>
    %315 = math.tanh %314 : vector<8x128xf32>
    %316 = arith.mulf %311, %315 : vector<8x128xf32>
    %c5_i32 = arith.constant 5 : i32
    %c0_82 = arith.constant 0 : index
    %c0_83 = arith.constant 0 : index
    %317 = vector.load %arg15[%c0_82, %c0_83] : memref<8x128xf32, #tpu.memory_space<vmem>>, vector<8x128xf32>
    tpu.vector_store %arg15[%c0_82, %c0_83], %287 {strides = array<i32>} : memref<8x128xf32, #tpu.memory_space<vmem>>, vector<8x128xf32>,
    %c0_84 = arith.constant 0 : index
    %c0_85 = arith.constant 0 : index
    %318 = vector.load %arg16[%c0_84, %c0_85] : memref<8x128xf32, #tpu.memory_space<vmem>>, vector<8x128xf32>
    tpu.vector_store %arg16[%c0_84, %c0_85], %285 {strides = array<i32>} : memref<8x128xf32, #tpu.memory_space<vmem>>, vector<8x128xf32>,
    %c0_86 = arith.constant 0 : index
    %c0_87 = arith.constant 0 : index
    %319 = vector.load %arg17[%c0_86, %c0_87] : memref<8x128xf32, #tpu.memory_space<vmem>>, vector<8x128xf32>
    tpu.vector_store %arg17[%c0_86, %c0_87], %316 {strides = array<i32>} : memref<8x128xf32, #tpu.memory_space<vmem>>, vector<8x128xf32>,
    %c0_88 = arith.constant 0 : index
    %c0_89 = arith.constant 0 : index
    %320 = vector.load %arg18[%c0_88, %c0_89] : memref<8x128xf32, #tpu.memory_space<vmem>>, vector<8x128xf32>
    tpu.vector_store %arg18[%c0_88, %c0_89], %314 {strides = array<i32>} : memref<8x128xf32, #tpu.memory_space<vmem>>, vector<8x128xf32>,
    %c1_i32_90 = arith.constant 1 : i32
    %321 = arith.cmpi eq, %arg1, %c1_i32_90 : i32
    %322 = arith.extui %321 : i1 to i32
    %c0_i32_91 = arith.constant 0 : i32
    %323 = arith.cmpi ne, %322, %c0_i32_91 : i32
    scf.if %323 {
      %c0_92 = arith.constant 0 : index
      %c0_93 = arith.constant 0 : index
      %324 = vector.load %arg9[%c0_92, %c0_93] : memref<128x128xf32, #tpu.memory_space<vmem>>, vector<128x128xf32>
      %cst_94 = arith.constant dense<0.000000e+00> : vector<8x128xf32>
      %325 = tpu.matmul %316, %324, %cst_94 {dimension_numbers = #tpu.dot_dimension_numbers<[1], [0], [0], [1], [0, 0, 1, 1], [], []>} : vector<8x128xf32>, vector<128x128xf32>, vector<8x128xf32> -> vector<8x128xf32>
      %c0_95 = arith.constant 0 : index
      %c0_96 = arith.constant 0 : index
      %326 = vector.load %arg10[%c0_95, %c0_96] : memref<1x128xf32, #tpu.memory_space<vmem>>, vector<1x128xf32>
      %327 = vector.broadcast %326 : vector<1x128xf32> to vector<8x128xf32>
      %328 = arith.addf %325, %327 : vector<8x128xf32>
      %cst_97 = arith.constant 0.000000e+00 : f32
      %329 = vector.broadcast %cst_97 : f32 to vector<8x128xf32>
      %330 = arith.maximumf %328, %329 : vector<8x128xf32>
      %c0_98 = arith.constant 0 : index
      %c0_99 = arith.constant 0 : index
      %331 = vector.load %arg11[%c0_98, %c0_99] : memref<128x128xf32, #tpu.memory_space<vmem>>, vector<128x128xf32>
      %cst_100 = arith.constant dense<0.000000e+00> : vector<8x128xf32>
      %332 = tpu.matmul %330, %331, %cst_100 {dimension_numbers = #tpu.dot_dimension_numbers<[1], [0], [0], [1], [0, 0, 1, 1], [], []>} : vector<8x128xf32>, vector<128x128xf32>, vector<8x128xf32> -> vector<8x128xf32>
      %c0_101 = arith.constant 0 : index
      %c0_102 = arith.constant 0 : index
      %333 = vector.load %arg12[%c0_101, %c0_102] : memref<1x128xf32, #tpu.memory_space<vmem>>, vector<1x128xf32>
      %334 = vector.broadcast %333 : vector<1x128xf32> to vector<8x128xf32>
      %335 = arith.addf %332, %334 : vector<8x128xf32>
      %c0_103 = arith.constant 0 : index
      %c0_104 = arith.constant 0 : index
      %336 = vector.load %arg13[%c0_103, %c0_104] : memref<8x128xf32, #tpu.memory_space<vmem>>, vector<8x128xf32>
      tpu.vector_store %arg13[%c0_103, %c0_104], %335 {strides = array<i32>} : memref<8x128xf32, #tpu.memory_space<vmem>>, vector<8x128xf32>,
    } else {
    }
    return
  }
  func.func @transform_0(%arg0: i32, %arg1: i32) -> (i32, i32, i32) {
    %c0_i32 = arith.constant 0 : i32
    %c0_i32_0 = arith.constant 0 : i32
    return %arg1, %arg0, %c0_i32 : i32, i32, i32
  }
  func.func @transform_1(%arg0: i32, %arg1: i32) -> (i32, i32) {
    %c0_i32 = arith.constant 0 : i32
    %c0_i32_0 = arith.constant 0 : i32
    %c0_i32_1 = arith.constant 0 : i32
    return %c0_i32, %c0_i32_0 : i32, i32
  }
  func.func @transform_2(%arg0: i32, %arg1: i32) -> (i32, i32) {
    %c0_i32 = arith.constant 0 : i32
    %c0_i32_0 = arith.constant 0 : i32
    %c0_i32_1 = arith.constant 0 : i32
    return %c0_i32, %c0_i32_0 : i32, i32
  }
  func.func @transform_3(%arg0: i32, %arg1: i32) -> (i32, i32) {
    %c0_i32 = arith.constant 0 : i32
    %c0_i32_0 = arith.constant 0 : i32
    %c0_i32_1 = arith.constant 0 : i32
    return %c0_i32, %c0_i32_0 : i32, i32
  }
  func.func @transform_4(%arg0: i32, %arg1: i32) -> (i32, i32) {
    %c0_i32 = arith.constant 0 : i32
    %c0_i32_0 = arith.constant 0 : i32
    %c0_i32_1 = arith.constant 0 : i32
    return %c0_i32, %c0_i32_0 : i32, i32
  }
  func.func @transform_5(%arg0: i32, %arg1: i32) -> (i32, i32) {
    %c0_i32 = arith.constant 0 : i32
    %c0_i32_0 = arith.constant 0 : i32
    %c0_i32_1 = arith.constant 0 : i32
    return %c0_i32, %c0_i32_0 : i32, i32
  }
  func.func @transform_6(%arg0: i32, %arg1: i32) -> (i32, i32) {
    %c0_i32 = arith.constant 0 : i32
    %c0_i32_0 = arith.constant 0 : i32
    %c0_i32_1 = arith.constant 0 : i32
    return %c0_i32, %c0_i32_0 : i32, i32
  }
  func.func @transform_7(%arg0: i32, %arg1: i32) -> (i32, i32) {
    %c0_i32 = arith.constant 0 : i32
    %c0_i32_0 = arith.constant 0 : i32
    %c0_i32_1 = arith.constant 0 : i32
    return %c0_i32, %c0_i32_0 : i32, i32
  }
  func.func @transform_8(%arg0: i32, %arg1: i32) -> (i32, i32) {
    %c0_i32 = arith.constant 0 : i32
    %c0_i32_0 = arith.constant 0 : i32
    %c0_i32_1 = arith.constant 0 : i32
    return %c0_i32, %c0_i32_0 : i32, i32
  }
  func.func @transform_9(%arg0: i32, %arg1: i32) -> (i32, i32) {
    %c0_i32 = arith.constant 0 : i32
    %c0_i32_0 = arith.constant 0 : i32
    %c0_i32_1 = arith.constant 0 : i32
    return %c0_i32, %c0_i32_0 : i32, i32
  }
  func.func @transform_10(%arg0: i32, %arg1: i32) -> (i32, i32) {
    %c0_i32 = arith.constant 0 : i32
    %c0_i32_0 = arith.constant 0 : i32
    %c0_i32_1 = arith.constant 0 : i32
    return %c0_i32, %c0_i32_0 : i32, i32
  }
  func.func @transform_11(%arg0: i32, %arg1: i32) -> (i32, i32) {
    %c0_i32 = arith.constant 0 : i32
    %c0_i32_0 = arith.constant 0 : i32
    return %arg0, %c0_i32 : i32, i32
  }
}

</mosaic_0001>

<bundles_post_ra>
// kernel: tpu_custom_call.1
= control target key start
LH: loop header
LB: loop body
LE: loop exit
PB: predicated region body
PF: predicated region fallthrough
CT: control target
= control target key end

     0   :  { %s6859_s0 = inlined_call_operand.hbm [shape: f32[10,8,16], index: 0, kind: input, shape index: {}]   ;;  %s6860_s1 = inlined_call_operand.hbm [shape: f32[16,512], index: 1, kind: input, shape index: {}]   ;;  %s6861_s2 = inlined_call_operand.hbm [shape: f32[128,512], index: 2, kind: input, shape index: {}]   ;;  %s6862_s3 = inlined_call_operand.vmem [shape: f32[1,512], index: 3, kind: input, shape index: {}]   ;;  %s6863_s4 = inlined_call_operand.hbm [shape: f32[128,512], index: 4, kind: input, shape index: {}]   ;;  %s6864_s5 = inlined_call_operand.hbm [shape: f32[128,512], index: 5, kind: input, shape index: {}]   ;;  %s6865_s6 = inlined_call_operand.vmem [shape: f32[1,512], index: 6, kind: input, shape index: {}]   ;;  %s6866_s7 = inlined_call_operand.hbm [shape: f32[128,128], index: 7, kind: input, shape index: {}]   ;;  %s6867_s8 = inlined_call_operand.vmem [shape: f32[1,128], index: 8, kind: input, shape index: {}]   ;;  %s6868_s9 = inlined_call_operand.hbm [shape: f32[128,128], index: 9, kind: input, shape index: {}]   ;;  %s6869_s10 = inlined_call_operand.vmem [shape: f32[1,128], index: 10, kind: input, shape index: {}]   ;;  %s6870_s11 = inlined_call_operand.hbm [shape: f32[8,128], index: 11, kind: output, shape index: {}]  }
   0x1   :  { %7050 = sst [smem:[#allocation113_spill]] %s6860_s1 }
   0x2   :  { %7051 = sst [smem:[#allocation114_spill]] %s6862_s3 }
   0x3   :  { %7052 = sst [smem:[#allocation115_spill]] %s6863_s4 }
   0x4   :  { %7053 = sst [smem:[#allocation116_spill]] %s6865_s6 }
   0x5   :  { %7054 = sst [smem:[#allocation117_spill]] %s6867_s8 }
   0x6   :  { %7055 = sst [smem:[#allocation118_spill]] %s6869_s10 }
   0x7   :  { %7056 = sst [smem:[#allocation119_spill]] %s6870_s11 }
   0x8   :  { %16 = vsyncpa [#allocation8], 0 }
   0x9   :  { %18 = vsyncpa [#allocation8 + $0x1], 0 }
   0xa   :  { %19 = vsyncpa [#allocation11], 0 }
   0xb   :  { %20 = vsyncpa [#allocation14], 0 }
   0xc   :  { %21 = vsyncpa [#allocation17], 0 }
   0xd   :  { %22 = vsyncpa [#allocation9], 0  ;;  %s5656_s17 = smov 0   ;;  %s5658_s18 = smov 0  }
   0xe   :  { %s5660_s19 = smov 0   ;;  %s5662_s20 = smov 0  }
   0xf   :  { %s5664_s21 = smov 0   ;;  %s5666_s22 = smov 0  }
  0x10 LB: > { %s6871_s23 = sadd.s32 4294967295, %s5577_s22   ;;  %p3748_p0 = scmp.ge.s32.totalorder %s5577_s22, 1  ;;  %s5577_s22 = sphi %s5666_s22, %s28_s22   ;;  %s5573_s21 = sphi %s5664_s21, %s7374_s21   ;;  %s5569_s20 = sphi %s5662_s20, %s7373_s20   ;;  %s5565_s19 = sphi %s5660_s19, %s7372_s19   ;;  %s5561_s18 = sphi %s5658_s18, %s7371_s18   ;;  %s5557_s17 = sphi %s5656_s17, %s7370_s17  }
  0x11   : > { %p5690_p1 = scmp.eq.s32.totalorder %s6871_s23, 0  ;;  %p309_p2 = scmp.lt.s32.totalorder %s5577_s22, 3 }
  0x12   : > { %s5579_s26 = smov [#allocation10]   ;;  %s5580_s29 = smov [#allocation13]  }
  0x13   : > { %s7057_s24 = scalar_select %p5690_p1, 1, 0 }
  0x14   : > { %p5695_p3 = pnand %p3748_p0, %p309_p2  ;;  %s321_s27 = sshll.u32 %s5579_s26, 4  ;;  %s5699_s27 = int_to_ptr.vmem [resolvable:$true] %s321_s27 }
  0x15   : > { %s350_s30 = sshll.u32 %s5580_s29, 4  ;;  %s5581_s12 = smov [#allocation16]   ;;  %s5709_s30 = int_to_ptr.vmem [resolvable:$true] %s350_s30 }
  0x16   : > { %s7058_s25 = scalar_select %p5695_p3, 1, 0 }
  0x17   : > { %p5025_p4 = pneg %p5695_p3  ;;  %s5711_s13 = sshll.u32 %s5581_s12, 4  ;;  %s380_s13 = int_to_ptr.vmem [resolvable:$true] %s5711_s13 }
  0x18   : > { %s7060_s1 = sld [smem:[#allocation113_spill]] }
  0x19   : > { %p5705_p5 = pnand %p5025_p4, %p5690_p1 }
  0x1b   : > { %p5721_p7 = pneg %p5705_p5 }
  0x1e   : > { %s5287_s16 = scalar_lea.hbm %s7060_s1, 1024 }
  0x1f   : > { %p5288_p6 = scmp.ne.s32.totalorder %s7060_s1, %s5287_s16  ;;  %p5294_p10 = scmp.lt.u32.totalorder %s5287_s16, %s7060_s1 }
  0x21   : > { %p5290_p8 = pnand %p5721_p7, %p5288_p6 }
  0x23   : > { %p5291_p9 = pneg %p5290_p8 }
  0x25   : > { %p5296_p11 = pnand %p5294_p10, %p5291_p9 }
  0x27   : > { %5299 = shalt.err (!%p5296_p11)
}
  0x28   : > { %s5300_s23 = scalar_lea.vmem %s5699_s27, 1024  ;;  %p5308_p2 = scmp.lt.s32.totalorder %s5699_s27, %s5699_s27 }
  0x29   : > { %p5301_p12 = scmp.ne.s32.totalorder %s5699_s27, %s5300_s23  ;;  %p5309_p4 = scmp.lt.s32.totalorder %s5300_s23, %s5300_s23 }
  0x2b   : > { %p5303_p13 = pnand %p5301_p12, %p5721_p7  ;;  %p5310_p6 = por %p5309_p4, %p5308_p2 }
  0x2d   : > { %p5304_p0 = pneg %p5303_p13 }
  0x2f   : > { %p5311_p8 = pnand %p5310_p6, %p5304_p0 }
  0x31   : > { %5314 = shalt.err (!%p5311_p8)
}
  0x32   : > { %s6876_s14 = smov 512   ;;  %s6878_s15 = smov 32  }
  0x33   : > { %5028 = dma.hbm_to_vmem [thread:$0]  (!%p5705_p5), %s7060_s1, 1024, %s5699_s27, [#allocation11], %s6876_s14, %s6876_s14, %s6878_s15  }
  0x34   : > { %s7062_s4 = sld [smem:[#allocation115_spill]] }
  0x3a   : > { %s5315_s23 = scalar_lea.hbm %s7062_s4, 8192 }
  0x3b   : > { %p5316_p9 = scmp.ne.s32.totalorder %s7062_s4, %s5315_s23  ;;  %p5322_p12 = scmp.lt.u32.totalorder %s5315_s23, %s7062_s4 }
  0x3d   : > { %p5318_p10 = pnand %p5316_p9, %p5721_p7 }
  0x3f   : > { %p5319_p11 = pneg %p5318_p10 }
  0x41   : > { %p5324_p13 = pnand %p5322_p12, %p5319_p11 }
  0x43   : > { %5327 = shalt.err (!%p5324_p13)
}
  0x44   : > { %s5328_s27 = scalar_lea.vmem %s5709_s30, 8192  ;;  %p5336_p6 = scmp.lt.s32.totalorder %s5709_s30, %s5709_s30 }
  0x45   : > { %p5329_p0 = scmp.ne.s32.totalorder %s5709_s30, %s5328_s27  ;;  %p5337_p8 = scmp.lt.s32.totalorder %s5328_s27, %s5328_s27 }
  0x47   : > { %p5331_p2 = pnand %p5329_p0, %p5721_p7  ;;  %p5338_p9 = por %p5337_p8, %p5336_p6 }
  0x49   : > { %p5332_p4 = pneg %p5331_p2 }
  0x4b   : > { %p5339_p10 = pnand %p5338_p9, %p5332_p4 }
  0x4d   : > { %5342 = shalt.err (!%p5339_p10)
}
  0x4e   : > { %5034 = dma.hbm_to_vmem [thread:$0]  (!%p5705_p5), %s7062_s4, 8192, %s5709_s30, [#allocation14], %s6876_s14, %s6876_s14, %s6878_s15  }
  0x4f   : > { %s5343_s16 = scalar_lea.hbm %s6866_s7, 2048 }
  0x50   : > { %p5344_p11 = scmp.ne.s32.totalorder %s6866_s7, %s5343_s16  ;;  %p5350_p0 = scmp.lt.u32.totalorder %s5343_s16, %s6866_s7 }
  0x52   : > { %p5346_p12 = pnand %p5344_p11, %p5721_p7 }
  0x54   : > { %p5347_p13 = pneg %p5346_p12 }
  0x56   : > { %p5352_p2 = pnand %p5350_p0, %p5347_p13 }
  0x58   : > { %5355 = shalt.err (!%p5352_p2)
}
  0x59   : > { %s5356_s27 = scalar_lea.vmem %s380_s13, 2048  ;;  %p5364_p9 = scmp.lt.s32.totalorder %s380_s13, %s380_s13 }
  0x5a   : > { %p5357_p4 = scmp.ne.s32.totalorder %s380_s13, %s5356_s27  ;;  %p5365_p10 = scmp.lt.s32.totalorder %s5356_s27, %s5356_s27 }
  0x5c   : > { %p5359_p6 = pnand %p5357_p4, %p5721_p7  ;;  %p5366_p3 = por %p5365_p10, %p5364_p9 }
  0x5e   : > { %p5360_p8 = pneg %p5359_p6 }
  0x60   : > { %p5367_p1 = pnand %p5366_p3, %p5360_p8 }
  0x62   : > { %5370 = shalt.err (!%p5367_p1)
}
  0x63   : > { %s5584_s30 = smov 128   ;;  %s5585_s3 = smov 8  }
  0x64   : > { %5040 = dma.hbm_to_vmem [thread:$0]  (!%p5705_p5), %s6866_s7, 2048, %s380_s13, [#allocation17], %s5584_s30, %s5584_s30, %s5585_s3  }
  0x65   : > { %s5586_s10 = smov [#allocation12]   ;;  %s5587_s26 = smov [#allocation15]  }
  0x66   : > { %s334_s16 = sshll.u32 %s5586_s10, 4  ;;  %s363_s29 = sshll.u32 %s5587_s26, 4  ;;  %s335_s16 = int_to_ptr.vmem [resolvable:$true] %s334_s16  ;;  %s364_s29 = int_to_ptr.vmem [resolvable:$true] %s363_s29 }
  0x67   : > { %s5371_s27 = scalar_lea.hbm %s6861_s2, 8192 }
  0x68   : > { %p5372_p1 = scmp.ne.s32.totalorder %s6861_s2, %s5371_s27  ;;  %p5378_p12 = scmp.lt.u32.totalorder %s5371_s27, %s6861_s2 }
  0x6a   : > { %p5374_p3 = pnand %p5372_p1, %p5721_p7 }
  0x6c   : > { %p5375_p11 = pneg %p5374_p3 }
  0x6e   : > { %p5380_p13 = pnand %p5378_p12, %p5375_p11 }
  0x70   : > { %5383 = shalt.err (!%p5380_p13)
}
  0x71   : > { %s5384_s13 = scalar_lea.vmem %s335_s16, 8192  ;;  %p5392_p6 = scmp.lt.s32.totalorder %s335_s16, %s335_s16 }
  0x72   : > { %p5385_p0 = scmp.ne.s32.totalorder %s335_s16, %s5384_s13  ;;  %p5393_p8 = scmp.lt.s32.totalorder %s5384_s13, %s5384_s13 }
  0x74   : > { %p5387_p2 = pnand %p5385_p0, %p5721_p7  ;;  %p5394_p9 = por %p5393_p8, %p5392_p6 }
  0x76   : > { %p5388_p4 = pneg %p5387_p2 }
  0x78   : > { %p5395_p10 = pnand %p5394_p9, %p5388_p4 }
  0x7a   : > { %5398 = shalt.err (!%p5395_p10)
}
  0x7b   : > { %s7063_s14 = smov 32   ;;  %s7064_s15 = smov 512  }
  0x7c   : > { %5031 = dma.hbm_to_vmem [thread:$0]  (!%p5705_p5), %s6861_s2, 8192, %s335_s16, [#allocation11], %s7064_s15, %s7064_s15, %s7063_s14  }
  0x7d   : > { %s5399_s10 = scalar_lea.hbm %s6864_s5, 8192 }
  0x7e   : > { %p5400_p1 = scmp.ne.s32.totalorder %s6864_s5, %s5399_s10  ;;  %p5406_p12 = scmp.lt.u32.totalorder %s5399_s10, %s6864_s5 }
  0x80   : > { %p5402_p3 = pnand %p5400_p1, %p5721_p7 }
  0x82   : > { %p5403_p11 = pneg %p5402_p3 }
  0x84   : > { %p5408_p13 = pnand %p5406_p12, %p5403_p11 }
  0x86   : > { %5411 = shalt.err (!%p5408_p13)
}
  0x87   : > { %s5412_s13 = scalar_lea.vmem %s364_s29, 8192  ;;  %p5420_p6 = scmp.lt.s32.totalorder %s364_s29, %s364_s29 }
  0x88   : > { %p5413_p0 = scmp.ne.s32.totalorder %s364_s29, %s5412_s13  ;;  %p5421_p8 = scmp.lt.s32.totalorder %s5412_s13, %s5412_s13 }
  0x8a   : > { %p5415_p2 = pnand %p5413_p0, %p5721_p7  ;;  %p5422_p9 = por %p5421_p8, %p5420_p6 }
  0x8c   : > { %p5416_p4 = pneg %p5415_p2 }
  0x8e   : > { %p5423_p10 = pnand %p5422_p9, %p5416_p4 }
  0x90   : > { %5426 = shalt.err (!%p5423_p10)
}
  0x91   : > { %5037 = dma.hbm_to_vmem [thread:$0]  (!%p5705_p5), %s6864_s5, 8192, %s364_s29, [#allocation14], %s7064_s15, %s7064_s15, %s7063_s14  }
  0x92   : > { %s5588_s4 = smov [#allocation18]   ;;  %s5427_s26 = scalar_lea.hbm %s6868_s9, 2048 }
  0x93   : > { %s395_s6 = sshll.u32 %s5588_s4, 4  ;;  %p5428_p1 = scmp.ne.s32.totalorder %s6868_s9, %s5427_s26  ;;  %s396_s6 = int_to_ptr.vmem [resolvable:$true] %s395_s6 }
  0x94   : > { %p5434_p12 = scmp.lt.u32.totalorder %s5427_s26, %s6868_s9 }
  0x95   : > { %p5430_p3 = pnand %p5428_p1, %p5721_p7 }
  0x97   : > { %p5431_p11 = pneg %p5430_p3 }
  0x99   : > { %p5436_p13 = pnand %p5434_p12, %p5431_p11 }
  0x9b   : > { %5439 = shalt.err (!%p5436_p13)
}
  0x9c   : > { %s5440_s29 = scalar_lea.vmem %s396_s6, 2048  ;;  %p5448_p6 = scmp.lt.s32.totalorder %s396_s6, %s396_s6 }
  0x9d   : > { %p5441_p0 = scmp.ne.s32.totalorder %s396_s6, %s5440_s29  ;;  %p5449_p8 = scmp.lt.s32.totalorder %s5440_s29, %s5440_s29 }
  0x9f   : > { %p5443_p2 = pnand %p5441_p0, %p5721_p7  ;;  %p5450_p9 = por %p5449_p8, %p5448_p6 }
  0xa1   : > { %p5444_p4 = pneg %p5443_p2 }
  0xa3   : > { %p5451_p10 = pnand %p5450_p9, %p5444_p4 }
  0xa5   : > { %5454 = shalt.err (!%p5451_p10)
}
  0xa6   : > { %5043 = dma.hbm_to_vmem [thread:$0]  (!%p5705_p5), %s6868_s9, 2048, %s396_s6, [#allocation17], %s5584_s30, %s5584_s30, %s5585_s3  }
  0xa7   : > { %s37_s11 = sadd.s32 1, %s5573_s21  ;;  %s49_s28 = sadd.s32 1, %s5565_s19 }
  0xa8   : > { %p38_p7 = scmp.ge.s32.totalorder %s37_s11, 2  ;;  %p56_p1 = scmp.ne.s32.totalorder %s5565_s19, %s5561_s18 }
  0xa9   : > { %p57_p3 = scmp.eq.s32.totalorder %s5577_s22, 0  ;;  %p62_p11 = scmp.ne.s32.totalorder %s5561_s18, %s5557_s17 }
  0xaa   : > { %s7376_s11 = smov (%p38_p7, %s37_s11), 0  ;;  %p7065_p13 = scmp.ne.s32.totalorder %s7057_s24, 0 }
  0xab   : > { %p58_p12 = por %p57_p3, %p56_p1  ;;  %s44_s1 = ssub.s32 %s5573_s21, %s7376_s11 }
  0xac   : > { %p5867_p0 = por %p7065_p13, %p62_p11  ;;  %p5054_p2 = scmp.lt.s32.totalorder %s5577_s22, 2 }
  0xad   : > { %p47_p4 = scmp.eq.s32.totalorder %s44_s1, 0  ;;  %s412_s4 = sand.u32 1, %s5565_s19  }
  0xae   : > { %s4993_s6 = smul.u32 40, %s412_s4  ;;  %p5879_p5 = pnand %p5054_p2, %p58_p12 }
  0xaf   : > { %s5876_s8 = scalar_select %p47_p4, %s5565_s19, %s49_s28  }
  0xb0   : > { %s3812_s10 = smul.u32 640, %s5573_s21  ;;  %s416_s26 = scalar_lea.vmem [#allocation7], %s4993_s6 }
  0xb1   : > { %s424_s12 = sshll.u32 %s416_s26, 4  ;;  %s5890_s29 = scalar_lea.sflag [#allocation8], %s412_s4  ;;  %s5888_s12 = int_to_ptr.vmem [resolvable:$true] %s424_s12 }
  0xb2   : > { %s5886_s13 = scalar_lea.hbm %s6859_s0, %s3812_s10  ;;  %p5457_p8 = pneg %p5879_p5 }
  0xb3   : > { %s5455_s14 = scalar_lea.hbm %s5886_s13, 640  ;;  %s5460_s1 = scalar_lea.hbm %s6859_s0, 1280 }
  0xb4   : > { %p5456_p6 = scmp.ne.s32.totalorder %s5886_s13, %s5455_s14  ;;  %p5461_p7 = scmp.lt.u32.totalorder %s5886_s13, %s6859_s0 }
  0xb5   : > { %p5462_p1 = scmp.lt.u32.totalorder %s5460_s1, %s5455_s14  ;;  %p5464_p11 = scmp.lt.u32.totalorder %s5455_s14, %s5886_s13 }
  0xb6   : > { %p5458_p9 = pnand %p5457_p8, %p5456_p6 }
  0xb7   : > { %p5463_p3 = por %p5462_p1, %p5461_p7 }
  0xb8   : > { %p5459_p10 = pneg %p5458_p9 }
  0xb9   : > { %p5465_p12 = por %p5464_p11, %p5463_p3 }
  0xbb   : > { %p5466_p13 = pnand %p5465_p12, %p5459_p10 }
  0xbd   : > { %5469 = shalt.err (!%p5466_p13)
}
  0xbe   : > { %s5470_s4 = scalar_lea.vmem %s5888_s12, 640  ;;  %s5589_s26 = smov [#allocation7]  }
  0xbf   : > { %p5471_p2 = scmp.ne.s32.totalorder %s5888_s12, %s5470_s4  ;;  %s5475_s23 = sshll.u32 %s5589_s26, 4  ;;  %s5476_s23 = int_to_ptr.vmem [resolvable:$false] %s5475_s23 }
  0xc0   : > { %s5477_s27 = scalar_lea.vmem %s5476_s23, 1280  ;;  %p5478_p9 = scmp.lt.s32.totalorder %s5888_s12, %s5476_s23 }
  0xc1   : > { %p5473_p4 = pnand %p5471_p2, %p5457_p8  ;;  %p5479_p7 = scmp.lt.s32.totalorder %s5477_s27, %s5470_s4 }
  0xc3   : > { %p5474_p6 = pneg %p5473_p4  ;;  %p5480_p1 = por %p5479_p7, %p5478_p9 }
  0xc5   : > { %p5481_p3 = pnand %p5480_p1, %p5474_p6 }
  0xc7   : > { %5484 = shalt.err (!%p5481_p3)
}
  0xc8   : > { %5047 = dma.hbm_to_vmem [thread:$0]  (!%p5879_p5), %s5886_s13, 640, %s5888_s12, %s5890_s29, %s5584_s30, %s5584_s30, %s5585_s3  }
  0xc9   : > { %p7068_p8 = scmp.ne.s32.totalorder %s7058_s25, 0 }
  0xcb   : > { %436 = sbr.rel (%p7068_p8) target bundleno = 2418 (0x972), region = 64 }
  0xd2   : > { %s438_s14 = sand.u32 1, %s5561_s18  }
  0xd3   : > { %s4994_s15 = smul.u32 40, %s438_s14  ;;  %s439_s28 = scalar_lea.sflag [#allocation8], %s438_s14 }
  0xd5   : > { %s5924_s1 = scalar_lea.vmem [#allocation7], %s4994_s15 }
  0xd6   : > { %5536 = dma.done.wait (%p5867_p0), %s439_s28, 640  }
  0xd7   : > { %5538 = vsyncadd (%p5867_p0), %s439_s28, 4294966656  ;;  %p7069_p10 = scmp.ne.s32.totalorder %s7057_s24, 0 }
  0xd9   : > { %5540 = dma.done.wait (%p7069_p10), [#allocation11], 9216  }
  0xda   : > { %5542 = vsyncadd (%p7069_p10), [#allocation11], 4294958080 }
  0xdb   : > { %5544 = dma.done.wait (%p7069_p10), [#allocation14], 16384  }
  0xdc   : > { %5546 = vsyncadd (%p7069_p10), [#allocation14], 4294950912 }
  0xdd   : > { %5548 = dma.done.wait (%p7069_p10), [#allocation17], 4096  }
  0xde   : > { %5550 = vsyncadd (%p7069_p10), [#allocation17], 4294963200  ;;  %p3764_p0 = scmp.ne.s32.totalorder %s5569_s20, 0 }
  0xdf   : > { %v5590_v0 = vmov (!%p3764_p0), 0.0  }
  0xe0   : > { %504 = sbr.rel (%p3764_p0) target bundleno = 231 (0xe7), region = 96  ;;  %505 = vst [vmem:[#allocation3] sm:$0xff] (!%p3764_p0), %v5590_v0  ;;  %506 = vst [vmem:[#allocation4] sm:$0xff] (!%p3764_p0), %v5590_v0 }
  0xe1   : > { %507 = vst [vmem:[#allocation5] sm:$0xff] (!%p3764_p0), %v5590_v0  ;;  %508 = vst [vmem:[#allocation6] sm:$0xff] (!%p3764_p0), %v5590_v0 }
  0xe7 PF: > { %v515_v1 = vld [vmem:[#allocation10 + $0x8] sm:$0xff]  ;;  %v517_v3 = vld [vmem:[#allocation10 + $0x18] sm:$0xff]  ;;  %v514_v6 = vld [vmem:[#allocation10] sm:$0xff]  ;;  %v6880_v8 = vmov 0.0   ;;  %vm544_vm0 = vcmask 130048   ;;  %s7153_s30 = sld [smem:[#allocation114_spill]] }
  0xe8   : > { %v519_v2 = vld [vmem:[#allocation10 + $0x28] sm:$0xff]  ;;  %v521_v5 = vld [vmem:[#allocation10 + $0x38] sm:$0xff]  ;;  %v518_v7 = vld [vmem:[#allocation10 + $0x20] sm:$0xff]  ;;  %624 = vmatprep.mubr.f32.mxu0 %v6880_v8  ;;  %719 = vmatprep.mubr.f32.mxu1 %v6880_v8  ;;  %s7178_s12 = sld [smem:[#allocation116_spill]]  ;;  %p3805_p5 = scmp.ne.s32.totalorder %s5569_s20, 1 }
  0xe9   : > { %v3917_v4 = vpack.c.bf16 %v519_v2, %v515_v1  ;;  %v3921_v9 = vpack.c.bf16 %v521_v5, %v517_v3  ;;  %v3919_v10 = vpack.c.bf16 %v518_v7, %v514_v6  ;;  %v516_v11 = vld [vmem:[#allocation10 + $0x10] sm:$0xff]  ;;  %v771_v13 = vld [vmem:[#allocation12 + $0x8] sm:$0xff]  ;;  %v773_v16 = vld [vmem:[#allocation12 + $0x18] sm:$0xff]  ;;  %vm5593_vm1 = vmmov (!%p3805_p5), 0   ;;  %s7365_s13 = sld [smem:[#allocation117_spill]] (!%p3805_p5)  ;;  %s7366_s10 = sld [smem:[#allocation118_spill]] (!%p3805_p5) }
  0xea   : > { %v520_v12 = vld [vmem:[#allocation10 + $0x30] sm:$0xff]  ;;  %v775_v15 = vld [vmem:[#allocation12 + $0x28] sm:$0xff]  ;;  %v777_v17 = vld [vmem:[#allocation12 + $0x38] sm:$0xff] }
  0xeb   : > { %3918 = vmatprep.subr.bf16.mxu0 %v3917_v4  ;;  %v3923_v14 = vpack.c.bf16 %v520_v12, %v516_v11  ;;  %3922 = vmatprep.subr.bf16.mxu1 %v3921_v9  ;;  %v5945_v18 = vpack.c.bf16 %v775_v15, %v771_v13  ;;  %v5947_v19 = vpack.c.bf16 %v777_v17, %v773_v16  ;;  %v509_v20 = vld [vmem:[%s5924_s1] sm:$0xff]  ;;  %v770_v21 = vld [vmem:[#allocation12] sm:$0xff]  ;;  %v779_v26 = vld [vmem:[#allocation12 + $0x48] sm:$0xff] }
  0xec   : > { %3920 = vmatpush1.bf16.msra.mxu0 %v3919_v10  ;;  %v774_v22 = vld [vmem:[#allocation12 + $0x20] sm:$0xff]  ;;  %v772_v24 = vld [vmem:[#allocation12 + $0x10] sm:$0xff]  ;;  %v783_v28 = vld [vmem:[#allocation12 + $0x68] sm:$0xff] }
  0xed   : > { %7070 = vst [vmem:[#allocation25_spill] sm:$0xff] %v5945_v18  ;;  %7071 = vst [vmem:[#allocation26_spill] sm:$0xff] %v5947_v19  ;;  %3924 = vmatpush1.bf16.msra.mxu1 %v3923_v14  ;;  %v5950_v23 = vpack.c.bf16 %v774_v22, %v770_v21  ;;  %v776_v25 = vld [vmem:[#allocation12 + $0x30] sm:$0xff]  ;;  %3926 = vmatprep.subr.bf16.mxu0 %v5945_v18  ;;  %v781_v29 = vld [vmem:[#allocation12 + $0x58] sm:$0xff]  ;;  %v5957_v31 = vpack.c.bf16 %v783_v28, %v779_v26 }
  0xee   : > { %3958 = vmatprep.subr.bf16.mxu1 %v5947_v19  ;;  %v5954_v27 = vpack.c.bf16 %v776_v25, %v772_v24  ;;  %v785_v30 = vld [vmem:[#allocation12 + $0x78] sm:$0xff]  ;;  %v778_v33 = vld [vmem:[#allocation12 + $0x40] sm:$0xff]  ;;  %v780_v35 = vld [vmem:[#allocation12 + $0x50] sm:$0xff] }
  0xef   : > { %3765 = vmatmul.mubr.msk.f32.vlgmr.msra.gmra.mrb[0].mxu0 %vm544_vm0, %v509_v20  ;;  %v5959_v32 = vpack.c.bf16 %v785_v30, %v781_v29  ;;  %v782_v34 = vld [vmem:[#allocation12 + $0x60] sm:$0xff]  ;;  %v784_v37 = vld [vmem:[#allocation12 + $0x70] sm:$0xff]  ;;  %v787_v38 = vld [vmem:[#allocation12 + $0x88] sm:$0xff] }
  0xf0   : > { %3770 = vmatmul.mubr.msk.f32.vlgmr.msra.gmra.mrb[0].mxu1 %vm544_vm0, %v509_v20  ;;  %3928 = vmatpush1.bf16.msra.mxu0 %v5950_v23  ;;  %v5963_v36 = vpack.c.bf16 %v782_v34, %v778_v33  ;;  %v791_v39 = vld [vmem:[#allocation12 + $0xa8] sm:$0xff]  ;;  %v5967_v40 = vpack.c.bf16 %v784_v37, %v780_v35  ;;  %v789_v42 = vld [vmem:[#allocation12 + $0x98] sm:$0xff]  ;;  %v786_v44 = vld [vmem:[#allocation12 + $0x80] sm:$0xff] }
  0xf1   : > { %3960 = vmatpush1.bf16.msra.mxu1 %v5954_v27  ;;  %3930 = vmatprep.subr.bf16.mxu0 %v5957_v31  ;;  %v5969_v41 = vpack.c.bf16 %v791_v39, %v787_v38  ;;  %v793_v43 = vld [vmem:[#allocation12 + $0xb8] sm:$0xff]  ;;  %v790_v46 = vld [vmem:[#allocation12 + $0xa0] sm:$0xff]  ;;  %v788_v47 = vld [vmem:[#allocation12 + $0x90] sm:$0xff] }
  0xf2   : > { %3962 = vmatprep.subr.bf16.mxu1 %v5959_v32  ;;  %v5972_v45 = vpack.c.bf16 %v793_v43, %v789_v42  ;;  %v792_v48 = vld [vmem:[#allocation12 + $0xb0] sm:$0xff]  ;;  %630 = vmatprep.mubr.f32.mxu0 %v6880_v8  ;;  %v795_v49 = vld [vmem:[#allocation12 + $0xc8] sm:$0xff]  ;;  %v797_v51 = vld [vmem:[#allocation12 + $0xd8] sm:$0xff]  ;;  %v5977_v52 = vpack.c.bf16 %v790_v46, %v786_v44 }
  0xf3   : > { %v799_v50 = vld [vmem:[#allocation12 + $0xe8] sm:$0xff]  ;;  %725 = vmatprep.mubr.f32.mxu1 %v6880_v8  ;;  %v801_v53 = vld [vmem:[#allocation12 + $0xf8] sm:$0xff]  ;;  %v794_v54 = vld [vmem:[#allocation12 + $0xc0] sm:$0xff]  ;;  %v5981_v55 = vpack.c.bf16 %v792_v48, %v788_v47 }
  0xf4   : > { %3932 = vmatpush1.bf16.msra.mxu0 %v5963_v36  ;;  %v5983_v56 = vpack.c.bf16 %v799_v50, %v795_v49  ;;  %v798_v57 = vld [vmem:[#allocation12 + $0xe0] sm:$0xff]  ;;  %v796_v58 = vld [vmem:[#allocation12 + $0xd0] sm:$0xff]  ;;  %v5987_v60 = vpack.c.bf16 %v801_v53, %v797_v51  ;;  %v803_v62 = vld [vmem:[#allocation12 + $0x108] sm:$0xff] }
  0xf5   : > { %3964 = vmatpush1.bf16.msra.mxu1 %v5967_v40  ;;  %3934 = vmatprep.subr.bf16.mxu0 %v5969_v41  ;;  %v510_v59 = vld [vmem:[%s5924_s1 + $0x8] sm:$0xff]  ;;  %v800_v61 = vld [vmem:[#allocation12 + $0xf0] sm:$0xff]  ;;  %v807_v63 = vld [vmem:[#allocation12 + $0x128] sm:$0xff]  ;;  %v5993_v2 = vpack.c.bf16 %v798_v57, %v794_v54 }
  0xf6   : > { %3966 = vmatprep.subr.bf16.mxu1 %v5972_v45  ;;  %3766 = vmatmul.mubr.msk.f32.gmra.mrb[2].mxu0 %vm544_vm0, %v510_v59  ;;  %v805_v0 = vld [vmem:[#allocation12 + $0x118] sm:$0xff]  ;;  %v511_v3 = vld [vmem:[%s5924_s1 + $0x10] sm:$0xff]  ;;  %v5999_v4 = vpack.c.bf16 %v800_v61, %v796_v58  ;;  %v6001_v5 = vpack.c.bf16 %v807_v63, %v803_v62  ;;  %v804_v9 = vld [vmem:[#allocation12 + $0x110] sm:$0xff] }
  0xf7   : > { %3771 = vmatmul.mubr.msk.f32.gmra.mrb[2].mxu1 %vm544_vm0, %v510_v59  ;;  %v809_v1 = vld [vmem:[#allocation12 + $0x138] sm:$0xff]  ;;  %636 = vmatprep.mubr.f32.mxu0 %v6880_v8  ;;  %v802_v6 = vld [vmem:[#allocation12 + $0x100] sm:$0xff]  ;;  %v808_v11 = vld [vmem:[#allocation12 + $0x130] sm:$0xff] }
  0xf8   : > { %3936 = vmatpush1.bf16.msra.mxu0 %v5977_v52  ;;  %731 = vmatprep.mubr.f32.mxu1 %v6880_v8  ;;  %7072 = vst [vmem:[#allocation27_spill] sm:$0xff] %v6001_v5  ;;  %v806_v7 = vld [vmem:[#allocation12 + $0x120] sm:$0xff]  ;;  %v6004_v10 = vpack.c.bf16 %v809_v1, %v805_v0  ;;  %v811_v12 = vld [vmem:[#allocation12 + $0x148] sm:$0xff]  ;;  %v813_v14 = vld [vmem:[#allocation12 + $0x158] sm:$0xff]  ;;  %v6016_v20 = vpack.c.bf16 %v808_v11, %v804_v9 }
  0xf9   : > { %3968 = vmatpush1.bf16.msra.mxu1 %v5981_v55  ;;  %3938 = vmatprep.subr.bf16.mxu0 %v5983_v56  ;;  %v815_v13 = vld [vmem:[#allocation12 + $0x168] sm:$0xff]  ;;  %v817_v15 = vld [vmem:[#allocation12 + $0x178] sm:$0xff]  ;;  %v6011_v17 = vpack.c.bf16 %v806_v7, %v802_v6  ;;  %v810_v22 = vld [vmem:[#allocation12 + $0x140] sm:$0xff] }
  0xfa   : > { %3970 = vmatprep.subr.bf16.mxu1 %v5987_v60  ;;  %7073 = vst [vmem:[#allocation28_spill] sm:$0xff] %v6004_v10  ;;  %3767 = vmatmul.mubr.msk.f32.gmra.mrb[4].mxu0 %vm544_vm0, %v511_v3  ;;  %v512_v16 = vld [vmem:[%s5924_s1 + $0x18] sm:$0xff]  ;;  %7075 = vst [vmem:[#allocation30_spill] sm:$0xff] %v6016_v20  ;;  %v6018_v21 = vpack.c.bf16 %v815_v13, %v811_v12  ;;  %v814_v24 = vld [vmem:[#allocation12 + $0x160] sm:$0xff]  ;;  %v6021_v26 = vpack.c.bf16 %v817_v15, %v813_v14 }
  0xfb   : > { %3772 = vmatmul.mubr.msk.f32.gmra.mrb[4].mxu1 %vm544_vm0, %v511_v3  ;;  %642 = vmatprep.mubr.f32.mxu0 %v6880_v8  ;;  %7074 = vst [vmem:[#allocation29_spill] sm:$0xff] %v6011_v17  ;;  %v812_v25 = vld [vmem:[#allocation12 + $0x150] sm:$0xff]  ;;  %v819_v29 = vld [vmem:[#allocation12 + $0x188] sm:$0xff]  ;;  %v821_v33 = vld [vmem:[#allocation12 + $0x198] sm:$0xff]  ;;  %v6028_v37 = vpack.c.bf16 %v814_v24, %v810_v22 }
  0xfc   : > { %3940 = vmatpush1.bf16.msra.mxu0 %v5993_v2  ;;  %737 = vmatprep.mubr.f32.mxu1 %v6880_v8  ;;  %7076 = vst [vmem:[#allocation31_spill] sm:$0xff] %v6018_v21  ;;  %7077 = vst [vmem:[#allocation32_spill] sm:$0xff] %v6021_v26  ;;  %v816_v28 = vld [vmem:[#allocation12 + $0x170] sm:$0xff]  ;;  %v823_v30 = vld [vmem:[#allocation12 + $0x1a8] sm:$0xff] }
  0xfd   : > { %3972 = vmatpush1.bf16.msra.mxu1 %v5999_v4  ;;  %3942 = vmatprep.subr.bf16.mxu0 %v6001_v5  ;;  %v825_v34 = vld [vmem:[#allocation12 + $0x1b8] sm:$0xff]  ;;  %7078 = vst [vmem:[#allocation33_spill] sm:$0xff] %v6028_v37  ;;  %v6033_v38 = vpack.c.bf16 %v816_v28, %v812_v25  ;;  %v6035_v39 = vpack.c.bf16 %v823_v30, %v819_v29  ;;  %v818_v42 = vld [vmem:[#allocation12 + $0x180] sm:$0xff]  ;;  %v820_v44 = vld [vmem:[#allocation12 + $0x190] sm:$0xff] }
  0xfe   : > { %3974 = vmatprep.subr.bf16.mxu1 %v6004_v10  ;;  %3768 = vmatmul.mubr.msk.f32.gmra.mrb[6].mxu0 %vm544_vm0, %v512_v16  ;;  %v513_v35 = vld [vmem:[%s5924_s1 + $0x20] sm:$0xff]  ;;  %v822_v43 = vld [vmem:[#allocation12 + $0x1a0] sm:$0xff]  ;;  %v6038_v46 = vpack.c.bf16 %v825_v34, %v821_v33  ;;  %v827_v48 = vld [vmem:[#allocation12 + $0x1c8] sm:$0xff] }
  0xff   : > { %3773 = vmatmul.mubr.msk.f32.gmra.mrb[6].mxu1 %vm544_vm0, %v512_v16  ;;  %648 = vmatprep.mubr.f32.mxu0 %v6880_v8  ;;  %7079 = vst [vmem:[#allocation34_spill] sm:$0xff] %v6033_v38  ;;  %7080 = vst [vmem:[#allocation35_spill] sm:$0xff] %v6035_v39  ;;  %v824_v47 = vld [vmem:[#allocation12 + $0x1b0] sm:$0xff]  ;;  %v831_v49 = vld [vmem:[#allocation12 + $0x1e8] sm:$0xff]  ;;  %v6044_v53 = vpack.c.bf16 %v822_v43, %v818_v42 }
 0x100   : > { %3944 = vmatpush1.bf16.msra.mxu0 %v6011_v17  ;;  %743 = vmatprep.mubr.f32.mxu1 %v6880_v8  ;;  %7081 = vst [vmem:[#allocation36_spill] sm:$0xff] %v6038_v46  ;;  %v829_v50 = vld [vmem:[#allocation12 + $0x1d8] sm:$0xff]  ;;  %v6049_v54 = vpack.c.bf16 %v824_v47, %v820_v44  ;;  %v6051_v57 = vpack.c.bf16 %v831_v49, %v827_v48  ;;  %v826_v58 = vld [vmem:[#allocation12 + $0x1c0] sm:$0xff]  ;;  %v828_v61 = vld [vmem:[#allocation12 + $0x1d0] sm:$0xff] }
 0x101   : > { %3976 = vmatpush1.bf16.msra.mxu1 %v6016_v20  ;;  %3946 = vmatprep.subr.bf16.mxu0 %v6018_v21  ;;  %v833_v51 = vld [vmem:[#allocation12 + $0x1f8] sm:$0xff]  ;;  %7082 = vst [vmem:[#allocation37_spill] sm:$0xff] %v6044_v53  ;;  %v830_v59 = vld [vmem:[#allocation12 + $0x1e0] sm:$0xff]  ;;  %v832_v63 = vld [vmem:[#allocation12 + $0x1f0] sm:$0xff] }
 0x102   : > { %3978 = vmatprep.subr.bf16.mxu1 %v6021_v26  ;;  %3769 = vmatmul.mubr.msk.f32.gmra.mrb[8].mxu0 %vm544_vm0, %v513_v35  ;;  %7083 = vst [vmem:[#allocation38_spill] sm:$0xff] %v6049_v54  ;;  %7084 = vst [vmem:[#allocation39_spill] sm:$0xff] %v6051_v57  ;;  %v6054_v62 = vpack.c.bf16 %v833_v51, %v829_v50  ;;  %v899_v0 = vld [vmem:[#allocation15 + $0x8] sm:$0xff]  ;;  %v901_v3 = vld [vmem:[#allocation15 + $0x18] sm:$0xff]  ;;  %v6057_v7 = vpack.c.bf16 %v830_v59, %v826_v58 }
 0x103   : > { %3774 = vmatmul.mubr.msk.f32.gmra.mrb[8].mxu1 %vm544_vm0, %v513_v35  ;;  %1056 = vmatprep.mubr.f32.mxu0 %v6880_v8  ;;  %v903_v1 = vld [vmem:[#allocation15 + $0x28] sm:$0xff]  ;;  %v905_v6 = vld [vmem:[#allocation15 + $0x38] sm:$0xff]  ;;  %v6061_v9 = vpack.c.bf16 %v832_v63, %v828_v61  ;;  %v898_v12 = vld [vmem:[#allocation15] sm:$0xff] }
 0x104   : > { %3948 = vmatpush1.bf16.msra.mxu0 %v6028_v37  ;;  %1127 = vmatprep.mubr.f32.mxu1 %v6880_v8  ;;  %7085 = vst [vmem:[#allocation40_spill] sm:$0xff] %v6054_v62  ;;  %7086 = vst [vmem:[#allocation41_spill] sm:$0xff] %v6057_v7  ;;  %v6063_v11 = vpack.c.bf16 %v903_v1, %v899_v0  ;;  %v902_v13 = vld [vmem:[#allocation15 + $0x20] sm:$0xff]  ;;  %v900_v14 = vld [vmem:[#allocation15 + $0x10] sm:$0xff]  ;;  %v6066_v15 = vpack.c.bf16 %v905_v6, %v901_v3 }
 0x105   : > { %3980 = vmatpush1.bf16.msra.mxu1 %v6033_v38  ;;  %3950 = vmatprep.subr.bf16.mxu0 %v6035_v39  ;;  %7087 = vst [vmem:[#allocation42_spill] sm:$0xff] %v6061_v9  ;;  %v904_v16 = vld [vmem:[#allocation15 + $0x30] sm:$0xff]  ;;  %v907_v22 = vld [vmem:[#allocation15 + $0x48] sm:$0xff]  ;;  %v909_v25 = vld [vmem:[#allocation15 + $0x58] sm:$0xff]  ;;  %v6069_v30 = vpack.c.bf16 %v902_v13, %v898_v12 }
 0x106   : > { %3982 = vmatprep.subr.bf16.mxu1 %v6038_v46  ;;  %7088 = vst [vmem:[#allocation43_spill] sm:$0xff] %v6063_v11  ;;  %7089 = vst [vmem:[#allocation44_spill] sm:$0xff] %v6066_v15  ;;  %v911_v24 = vld [vmem:[#allocation15 + $0x68] sm:$0xff]  ;;  %v913_v28 = vld [vmem:[#allocation15 + $0x78] sm:$0xff]  ;;  %v6073_v33 = vpack.c.bf16 %v904_v16, %v900_v14 }
 0x107   : > { %v984_v29 = vld [vmem:[#allocation3] sm:$0xff]  ;;  %7090 = vst [vmem:[#allocation45_spill] sm:$0xff] %v6069_v30  ;;  %v6075_v34 = vpack.c.bf16 %v911_v24, %v907_v22  ;;  %v906_v35 = vld [vmem:[#allocation15 + $0x40] sm:$0xff]  ;;  %v6078_v44 = vpack.c.bf16 %v913_v28, %v909_v25  ;;  %v915_v48 = vld [vmem:[#allocation15 + $0x88] sm:$0xff] }
 0x108   : > { %3952 = vmatpush1.bf16.msra.mxu0 %v6044_v53  ;;  %7091 = vst [vmem:[#allocation46_spill] sm:$0xff] %v6073_v33  ;;  %v910_v42 = vld [vmem:[#allocation15 + $0x60] sm:$0xff]  ;;  %v908_v43 = vld [vmem:[#allocation15 + $0x50] sm:$0xff]  ;;  %v919_v49 = vld [vmem:[#allocation15 + $0xa8] sm:$0xff] }
 0x109   : > { %3984 = vmatpush1.bf16.msra.mxu1 %v6049_v54  ;;  %3954 = vmatprep.subr.bf16.mxu0 %v6051_v57  ;;  %7092 = vst [vmem:[#allocation47_spill] sm:$0xff] %v6075_v34  ;;  %7093 = vst [vmem:[#allocation48_spill] sm:$0xff] %v6078_v44  ;;  %v912_v47 = vld [vmem:[#allocation15 + $0x70] sm:$0xff]  ;;  %v917_v50 = vld [vmem:[#allocation15 + $0x98] sm:$0xff]  ;;  %v6081_v58 = vpack.c.bf16 %v910_v42, %v906_v35  ;;  %v6087_v61 = vpack.c.bf16 %v919_v49, %v915_v48 }
 0x10a   : > { %3986 = vmatprep.subr.bf16.mxu1 %v6054_v62  ;;  %v921_v51 = vld [vmem:[#allocation15 + $0xb8] sm:$0xff]  ;;  %v6085_v59 = vpack.c.bf16 %v912_v47, %v908_v43  ;;  %v914_v63 = vld [vmem:[#allocation15 + $0x80] sm:$0xff]  ;;  %v916_v1 = vld [vmem:[#allocation15 + $0x90] sm:$0xff] }
 0x10b   : > { %7094 = vst [vmem:[#allocation49_spill] sm:$0xff] %v6081_v58  ;;  %7096 = vst [vmem:[#allocation51_spill] sm:$0xff] %v6087_v61  ;;  %v918_v0 = vld [vmem:[#allocation15 + $0xa0] sm:$0xff]  ;;  %v6090_v3 = vpack.c.bf16 %v921_v51, %v917_v50  ;;  %v920_v6 = vld [vmem:[#allocation15 + $0xb0] sm:$0xff] }
 0x10c   : > { %3956 = vmatpush1.bf16.msra.mxu0 %v6057_v7  ;;  %7095 = vst [vmem:[#allocation50_spill] sm:$0xff] %v6085_v59  ;;  %v923_v12 = vld [vmem:[#allocation15 + $0xc8] sm:$0xff]  ;;  %v925_v14 = vld [vmem:[#allocation15 + $0xd8] sm:$0xff]  ;;  %v6095_v22 = vpack.c.bf16 %v918_v0, %v914_v63  ;;  %v6099_v24 = vpack.c.bf16 %v920_v6, %v916_v1  ;;  %v922_v28 = vld [vmem:[#allocation15 + $0xc0] sm:$0xff] }
 0x10d   : > { %3988 = vmatpush1.bf16.msra.mxu1 %v6061_v9  ;;  %3990 = vmatprep.subr.bf16.mxu0 %v6063_v11  ;;  %7097 = vst [vmem:[#allocation52_spill] sm:$0xff] %v6090_v3  ;;  %v927_v13 = vld [vmem:[#allocation15 + $0xe8] sm:$0xff]  ;;  %v929_v16 = vld [vmem:[#allocation15 + $0xf8] sm:$0xff]  ;;  %v924_v35 = vld [vmem:[#allocation15 + $0xd0] sm:$0xff] }
 0x10e   : > { %4022 = vmatprep.subr.bf16.mxu1 %v6066_v15  ;;  %7098 = vst [vmem:[#allocation53_spill] sm:$0xff] %v6095_v22  ;;  %7099 = vst [vmem:[#allocation54_spill] sm:$0xff] %v6099_v24  ;;  %v6101_v25 = vpack.c.bf16 %v927_v13, %v923_v12  ;;  %v6104_v42 = vpack.c.bf16 %v929_v16, %v925_v14  ;;  %v928_v43 = vld [vmem:[#allocation15 + $0xf0] sm:$0xff]  ;;  %v931_v47 = vld [vmem:[#allocation15 + $0x108] sm:$0xff] }
 0x10f   : > { %1057 = vmatmul.mubr.f32.vlgmr.msra.gmra.mrb[0].mxu0 %v984_v29  ;;  %v935_v48 = vld [vmem:[#allocation15 + $0x128] sm:$0xff]  ;;  %v933_v49 = vld [vmem:[#allocation15 + $0x118] sm:$0xff]  ;;  %v6111_v63 = vpack.c.bf16 %v928_v43, %v924_v35  ;;  %v930_v1 = vld [vmem:[#allocation15 + $0x100] sm:$0xff] }
 0x110   : > { %1128 = vmatmul.mubr.f32.vlgmr.msra.gmra.mrb[0].mxu1 %v984_v29  ;;  %3992 = vmatpush1.bf16.msra.mxu0 %v6069_v30  ;;  %7100 = vst [vmem:[#allocation55_spill] sm:$0xff] %v6101_v25  ;;  %v926_v29 = vld [vmem:[#allocation15 + $0xe0] sm:$0xff]  ;;  %7101 = vst [vmem:[#allocation56_spill] sm:$0xff] %v6104_v42  ;;  %v937_v50 = vld [vmem:[#allocation15 + $0x138] sm:$0xff]  ;;  %v6113_v0 = vpack.c.bf16 %v935_v48, %v931_v47 }
 0x111   : > { %4024 = vmatpush1.bf16.msra.mxu1 %v6073_v33  ;;  %3994 = vmatprep.subr.bf16.mxu0 %v6075_v34  ;;  %v6107_v51 = vpack.c.bf16 %v926_v29, %v922_v28  ;;  %7103 = vst [vmem:[#allocation58_spill] sm:$0xff] %v6111_v63  ;;  %v934_v6 = vld [vmem:[#allocation15 + $0x120] sm:$0xff]  ;;  %v6116_v12 = vpack.c.bf16 %v937_v50, %v933_v49  ;;  %v932_v13 = vld [vmem:[#allocation15 + $0x110] sm:$0xff]  ;;  %v939_v29 = vld [vmem:[#allocation15 + $0x148] sm:$0xff] }
 0x112   : > { %4026 = vmatprep.subr.bf16.mxu1 %v6078_v44  ;;  %1226 = vmatprep.mubr.f32.mxu0 %v6880_v8  ;;  %7104 = vst [vmem:[#allocation59_spill] sm:$0xff] %v6113_v0  ;;  %v936_v14 = vld [vmem:[#allocation15 + $0x130] sm:$0xff]  ;;  %v6119_v16 = vpack.c.bf16 %v934_v6, %v930_v1  ;;  %v943_v35 = vld [vmem:[#allocation15 + $0x168] sm:$0xff]  ;;  %v941_v43 = vld [vmem:[#allocation15 + $0x158] sm:$0xff] }
 0x113   : > { %1297 = vmatprep.mubr.f32.mxu1 %v6880_v8  ;;  %7102 = vst [vmem:[#allocation57_spill] sm:$0xff] %v6107_v51  ;;  %7105 = vst [vmem:[#allocation60_spill] sm:$0xff] %v6116_v12  ;;  %v6123_v28 = vpack.c.bf16 %v936_v14, %v932_v13  ;;  %v6128_v47 = vpack.c.bf16 %v943_v35, %v939_v29  ;;  %v945_v48 = vld [vmem:[#allocation15 + $0x178] sm:$0xff]  ;;  %v938_v49 = vld [vmem:[#allocation15 + $0x140] sm:$0xff] }
 0x114   : > { %3996 = vmatpush1.bf16.msra.mxu0 %v6081_v58  ;;  %7106 = vst [vmem:[#allocation61_spill] sm:$0xff] %v6119_v16  ;;  %v942_v50 = vld [vmem:[#allocation15 + $0x160] sm:$0xff]  ;;  %v6130_v1 = vpack.c.bf16 %v945_v48, %v941_v43  ;;  %v940_v13 = vld [vmem:[#allocation15 + $0x150] sm:$0xff]  ;;  %v951_v29 = vld [vmem:[#allocation15 + $0x1a8] sm:$0xff] }
 0x115   : > { %4028 = vmatpush1.bf16.msra.mxu1 %v6085_v59  ;;  %3998 = vmatprep.subr.bf16.mxu0 %v6087_v61  ;;  %7107 = vst [vmem:[#allocation62_spill] sm:$0xff] %v6123_v28  ;;  %7108 = vst [vmem:[#allocation63_spill] sm:$0xff] %v6128_v47  ;;  %v6132_v6 = vpack.c.bf16 %v942_v50, %v938_v49  ;;  %v944_v14 = vld [vmem:[#allocation15 + $0x170] sm:$0xff]  ;;  %v949_v35 = vld [vmem:[#allocation15 + $0x198] sm:$0xff] }
 0x116   : > { %4030 = vmatprep.subr.bf16.mxu1 %v6090_v3  ;;  %7109 = vst [vmem:[#allocation64_spill] sm:$0xff] %v6130_v1  ;;  %v6135_v8 = vpack.c.bf16 %v944_v14, %v940_v13  ;;  %v953_v43 = vld [vmem:[#allocation15 + $0x1b8] sm:$0xff]  ;;  %v946_v48 = vld [vmem:[#allocation15 + $0x180] sm:$0xff]  ;;  %v948_v13 = vld [vmem:[#allocation15 + $0x190] sm:$0xff] }
 0x117   : > { %7110 = vst [vmem:[#allocation65_spill] sm:$0xff] %v6132_v6  ;;  %v950_v49 = vld [vmem:[#allocation15 + $0x1a0] sm:$0xff]  ;;  %v6142_v50 = vpack.c.bf16 %v953_v43, %v949_v35  ;;  %v952_v14 = vld [vmem:[#allocation15 + $0x1b0] sm:$0xff]  ;;  %v961_v35 = vld [vmem:[#allocation15 + $0x1f8] sm:$0xff] }
 0x118   : > { %4000 = vmatpush1.bf16.msra.mxu0 %v6095_v22  ;;  %7111 = vst [vmem:[#allocation66_spill] sm:$0xff] %v6135_v8  ;;  %v954_v43 = vld [vmem:[#allocation15 + $0x1c0] sm:$0xff] }
 0x119   : > { %4032 = vmatpush1.bf16.msra.mxu1 %v6099_v24  ;;  %4002 = vmatprep.subr.bf16.mxu0 %v6101_v25  ;;  %7113 = vst [vmem:[#allocation68_spill] sm:$0xff] %v6142_v50 }
 0x11a   : > { %4034 = vmatprep.subr.bf16.mxu1 %v6104_v42 }
 0x11c   : > { %4004 = vmatpush1.bf16.msra.mxu0 %v6107_v51 }
 0x11d   : > { %4036 = vmatpush1.bf16.msra.mxu1 %v6111_v63  ;;  %4006 = vmatprep.subr.bf16.mxu0 %v6113_v0 }
 0x11e   : > { %4038 = vmatprep.subr.bf16.mxu1 %v6116_v12  ;;  %v6144_v12 = vpack.c.bf16 %v950_v49, %v946_v48  ;;  %v958_v48 = vld [vmem:[#allocation15 + $0x1e0] sm:$0xff] }
 0x120   : > { %4008 = vmatpush1.bf16.msra.mxu0 %v6119_v16  ;;  %7114 = vst [vmem:[#allocation69_spill] sm:$0xff] %v6144_v12 }
 0x121   : > { %4040 = vmatpush1.bf16.msra.mxu1 %v6123_v28  ;;  %4010 = vmatprep.subr.bf16.mxu0 %v6128_v47  ;;  %v947_v28 = vld [vmem:[#allocation15 + $0x188] sm:$0xff]  ;;  %v6156_v47 = vpack.c.bf16 %v958_v48, %v954_v43  ;;  %v838_v43 = vld [vmem:[#allocation13 + $0x20] sm:$0xff] }
 0x122   : > { %4042 = vmatprep.subr.bf16.mxu1 %v6130_v1  ;;  %v6140_v16 = vpack.c.bf16 %v951_v29, %v947_v28  ;;  %v6147_v1 = vpack.c.bf16 %v952_v14, %v948_v13  ;;  %v959_v28 = vld [vmem:[#allocation15 + $0x1e8] sm:$0xff]  ;;  %v957_v29 = vld [vmem:[#allocation15 + $0x1d8] sm:$0xff]  ;;  %v956_v13 = vld [vmem:[#allocation15 + $0x1d0] sm:$0xff] }
 0x123   : > { %v6154_v49 = vpack.c.bf16 %v961_v35, %v957_v29  ;;  %7118 = vst [vmem:[#allocation73_spill] sm:$0xff] %v6156_v47  ;;  %v960_v14 = vld [vmem:[#allocation15 + $0x1f0] sm:$0xff]  ;;  %v841_v29 = vld [vmem:[#allocation13 + $0x38] sm:$0xff]  ;;  %v834_v35 = vld [vmem:[#allocation13] sm:$0xff] }
 0x124   : > { %4012 = vmatpush1.bf16.msra.mxu0 %v6132_v6  ;;  %7112 = vst [vmem:[#allocation67_spill] sm:$0xff] %v6140_v16  ;;  %7115 = vst [vmem:[#allocation70_spill] sm:$0xff] %v6147_v1 }
 0x125   : > { %4044 = vmatpush1.bf16.msra.mxu1 %v6135_v8  ;;  %4014 = vmatprep.subr.bf16.mxu0 %v6140_v16  ;;  %v955_v8 = vld [vmem:[#allocation15 + $0x1c8] sm:$0xff]  ;;  %7117 = vst [vmem:[#allocation72_spill] sm:$0xff] %v6154_v49  ;;  %v6168_v16 = vpack.c.bf16 %v838_v43, %v834_v35  ;;  %v842_v35 = vld [vmem:[#allocation13 + $0x40] sm:$0xff] }
 0x126   : > { %4046 = vmatprep.subr.bf16.mxu1 %v6142_v50  ;;  %v6152_v6 = vpack.c.bf16 %v959_v28, %v955_v8  ;;  %v6159_v50 = vpack.c.bf16 %v960_v14, %v956_v13  ;;  %v839_v8 = vld [vmem:[#allocation13 + $0x28] sm:$0xff]  ;;  %v837_v28 = vld [vmem:[#allocation13 + $0x18] sm:$0xff]  ;;  %v836_v13 = vld [vmem:[#allocation13 + $0x10] sm:$0xff] }
 0x127   : > { %v6166_v48 = vpack.c.bf16 %v841_v29, %v837_v28  ;;  %7122 = vst [vmem:[#allocation77_spill] sm:$0xff] %v6168_v16  ;;  %v840_v14 = vld [vmem:[#allocation13 + $0x30] sm:$0xff]  ;;  %v849_v29 = vld [vmem:[#allocation13 + $0x78] sm:$0xff]  ;;  %v846_v43 = vld [vmem:[#allocation13 + $0x60] sm:$0xff] }
 0x128   : > { %4016 = vmatpush1.bf16.msra.mxu0 %v6144_v12  ;;  %7116 = vst [vmem:[#allocation71_spill] sm:$0xff] %v6152_v6  ;;  %7119 = vst [vmem:[#allocation74_spill] sm:$0xff] %v6159_v50 }
 0x129   : > { %4048 = vmatpush1.bf16.msra.mxu1 %v6147_v1  ;;  %4018 = vmatprep.subr.bf16.mxu0 %v6152_v6  ;;  %v835_v1 = vld [vmem:[#allocation13 + $0x8] sm:$0xff]  ;;  %7121 = vst [vmem:[#allocation76_spill] sm:$0xff] %v6166_v48  ;;  %v7127_v6 = vmov 0.0  }
 0x12a   : > { %4050 = vmatprep.subr.bf16.mxu1 %v6154_v49  ;;  %v6164_v12 = vpack.c.bf16 %v839_v8, %v835_v1  ;;  %v986_v49 = vld [vmem:[#allocation5] sm:$0xff]  ;;  %v847_v1 = vld [vmem:[#allocation13 + $0x68] sm:$0xff]  ;;  %v845_v8 = vld [vmem:[#allocation13 + $0x58] sm:$0xff] }
 0x12c   : > { %4020 = vmatpush1.bf16.msra.mxu0 %v6156_v47  ;;  %7120 = vst [vmem:[#allocation75_spill] sm:$0xff] %v6164_v12  ;;  %v6171_v47 = vpack.c.bf16 %v840_v14, %v836_v13  ;;  %v6180_v13 = vpack.c.bf16 %v846_v43, %v842_v35  ;;  %v844_v14 = vld [vmem:[#allocation13 + $0x50] sm:$0xff]  ;;  %v850_v35 = vld [vmem:[#allocation13 + $0x80] sm:$0xff] }
 0x12d   : > { %4052 = vmatpush1.bf16.msra.mxu1 %v6159_v50  ;;  %4054 = vmatprep.subr.bf16.mxu0 %v6164_v12  ;;  %v843_v50 = vld [vmem:[#allocation13 + $0x48] sm:$0xff]  ;;  %v6178_v12 = vpack.c.bf16 %v849_v29, %v845_v8  ;;  %v857_v29 = vld [vmem:[#allocation13 + $0xb8] sm:$0xff]  ;;  %v854_v43 = vld [vmem:[#allocation13 + $0xa0] sm:$0xff] }
 0x12e   : > { %7123 = vst [vmem:[#allocation78_spill] sm:$0xff] %v6171_v47  ;;  %4086 = vmatprep.subr.bf16.mxu1 %v6166_v48  ;;  %v6175_v28 = vpack.c.bf16 %v847_v1, %v843_v50  ;;  %7126 = vst [vmem:[#allocation81_spill] sm:$0xff] %v6180_v13  ;;  %v848_v48 = vld [vmem:[#allocation13 + $0x70] sm:$0xff]  ;;  %v851_v50 = vld [vmem:[#allocation13 + $0x88] sm:$0xff] }
 0x12f   : > { %1227 = vmatmul.mubr.f32.vlgmr.msra.gmra.mrb[10].mxu0 %v986_v49  ;;  %7125 = vst [vmem:[#allocation80_spill] sm:$0xff] %v6178_v12  ;;  %v855_v1 = vld [vmem:[#allocation13 + $0xa8] sm:$0xff] }
 0x130   : > { %1298 = vmatmul.mubr.f32.vlgmr.msra.gmra.mrb[10].mxu1 %v986_v49  ;;  %4056 = vmatpush1.bf16.msra.mxu0 %v6168_v16  ;;  %7124 = vst [vmem:[#allocation79_spill] sm:$0xff] %v6175_v28  ;;  %v6184_v49 = vpack.c.bf16 %v848_v48, %v844_v14  ;;  %v853_v16 = vld [vmem:[#allocation13 + $0x98] sm:$0xff]  ;;  %v6189_v8 = vpack.c.bf16 %v855_v1, %v851_v50  ;;  %v852_v14 = vld [vmem:[#allocation13 + $0x90] sm:$0xff]  ;;  %v863_v50 = vld [vmem:[#allocation13 + $0xe8] sm:$0xff] }
 0x131   : > { %4088 = vmatpush1.bf16.msra.mxu1 %v6171_v47  ;;  %1368 = vmatprep.mubr.f32.mxu0 %v7127_v6  ;;  %v6192_v47 = vpack.c.bf16 %v857_v29, %v853_v16  ;;  %v6194_v48 = vpack.c.bf16 %v854_v43, %v850_v35  ;;  %v861_v1 = vld [vmem:[#allocation13 + $0xd8] sm:$0xff]  ;;  %v858_v16 = vld [vmem:[#allocation13 + $0xc0] sm:$0xff] }
 0x132   : > { %4058 = vmatprep.subr.bf16.mxu0 %v6175_v28  ;;  %7128 = vst [vmem:[#allocation82_spill] sm:$0xff] %v6184_v49  ;;  %1439 = vmatprep.mubr.f32.mxu1 %v7127_v6  ;;  %7129 = vst [vmem:[#allocation83_spill] sm:$0xff] %v6189_v8  ;;  %v856_v28 = vld [vmem:[#allocation13 + $0xb0] sm:$0xff]  ;;  %v862_v29 = vld [vmem:[#allocation13 + $0xe0] sm:$0xff] }
 0x133   : > { %4090 = vmatprep.subr.bf16.mxu1 %v6178_v12  ;;  %7130 = vst [vmem:[#allocation84_spill] sm:$0xff] %v6192_v47  ;;  %7131 = vst [vmem:[#allocation85_spill] sm:$0xff] %v6194_v48  ;;  %v6197_v12 = vpack.c.bf16 %v856_v28, %v852_v14  ;;  %v6206_v43 = vpack.c.bf16 %v862_v29, %v858_v16  ;;  %v860_v28 = vld [vmem:[#allocation13 + $0xd0] sm:$0xff]  ;;  %v870_v16 = vld [vmem:[#allocation13 + $0x120] sm:$0xff] }
 0x134   : > { %4060 = vmatpush1.bf16.msra.mxu0 %v6180_v13  ;;  %v859_v13 = vld [vmem:[#allocation13 + $0xc8] sm:$0xff]  ;;  %v864_v14 = vld [vmem:[#allocation13 + $0xf0] sm:$0xff] }
 0x135   : > { %4092 = vmatpush1.bf16.msra.mxu1 %v6184_v49  ;;  %4062 = vmatprep.subr.bf16.mxu0 %v6189_v8  ;;  %7132 = vst [vmem:[#allocation86_spill] sm:$0xff] %v6197_v12  ;;  %v6201_v0 = vpack.c.bf16 %v863_v50, %v859_v13  ;;  %v865_v49 = vld [vmem:[#allocation13 + $0xf8] sm:$0xff]  ;;  %7135 = vst [vmem:[#allocation89_spill] sm:$0xff] %v6206_v43  ;;  %v871_v13 = vld [vmem:[#allocation13 + $0x128] sm:$0xff] }
 0x136   : > { %4094 = vmatprep.subr.bf16.mxu1 %v6192_v47  ;;  %v6204_v35 = vpack.c.bf16 %v865_v49, %v861_v1  ;;  %v6209_v47 = vpack.c.bf16 %v864_v14, %v860_v28  ;;  %v869_v50 = vld [vmem:[#allocation13 + $0x118] sm:$0xff]  ;;  %v866_v49 = vld [vmem:[#allocation13 + $0x100] sm:$0xff]  ;;  %v868_v29 = vld [vmem:[#allocation13 + $0x110] sm:$0xff] }
 0x137   : > { %7133 = vst [vmem:[#allocation87_spill] sm:$0xff] %v6201_v0  ;;  %v6219_v28 = vpack.c.bf16 %v870_v16, %v866_v49  ;;  %v880_v16 = vld [vmem:[#allocation13 + $0x170] sm:$0xff] }
 0x138   : > { %4064 = vmatpush1.bf16.msra.mxu0 %v6194_v48  ;;  %7134 = vst [vmem:[#allocation88_spill] sm:$0xff] %v6204_v35  ;;  %7136 = vst [vmem:[#allocation90_spill] sm:$0xff] %v6209_v47  ;;  %v867_v48 = vld [vmem:[#allocation13 + $0x108] sm:$0xff] }
 0x139   : > { %4096 = vmatpush1.bf16.msra.mxu1 %v6197_v12  ;;  %4066 = vmatprep.subr.bf16.mxu0 %v6201_v0  ;;  %v6213_v8 = vpack.c.bf16 %v871_v13, %v867_v48  ;;  %v873_v12 = vld [vmem:[#allocation13 + $0x138] sm:$0xff]  ;;  %v872_v0 = vld [vmem:[#allocation13 + $0x130] sm:$0xff]  ;;  %7139 = vst [vmem:[#allocation93_spill] sm:$0xff] %v6219_v28  ;;  %v879_v48 = vld [vmem:[#allocation13 + $0x168] sm:$0xff] }
 0x13a   : > { %4098 = vmatprep.subr.bf16.mxu1 %v6204_v35  ;;  %v6216_v1 = vpack.c.bf16 %v873_v12, %v869_v50  ;;  %v6221_v14 = vpack.c.bf16 %v872_v0, %v868_v29  ;;  %v877_v13 = vld [vmem:[#allocation13 + $0x158] sm:$0xff]  ;;  %v874_v50 = vld [vmem:[#allocation13 + $0x140] sm:$0xff]  ;;  %v876_v0 = vld [vmem:[#allocation13 + $0x150] sm:$0xff] }
 0x13b   : > { %7137 = vst [vmem:[#allocation91_spill] sm:$0xff] %v6213_v8  ;;  %v881_v12 = vld [vmem:[#allocation13 + $0x178] sm:$0xff]  ;;  %v883_v29 = vld [vmem:[#allocation13 + $0x188] sm:$0xff] }
 0x13c   : > { %4068 = vmatpush1.bf16.msra.mxu0 %v6206_v43  ;;  %7138 = vst [vmem:[#allocation92_spill] sm:$0xff] %v6216_v1  ;;  %7140 = vst [vmem:[#allocation94_spill] sm:$0xff] %v6221_v14  ;;  %v875_v43 = vld [vmem:[#allocation13 + $0x148] sm:$0xff]  ;;  %v6228_v63 = vpack.c.bf16 %v881_v12, %v877_v13  ;;  %v882_v13 = vld [vmem:[#allocation13 + $0x180] sm:$0xff] }
 0x13d   : > { %4100 = vmatpush1.bf16.msra.mxu1 %v6209_v47  ;;  %4070 = vmatprep.subr.bf16.mxu0 %v6213_v8  ;;  %v6225_v35 = vpack.c.bf16 %v879_v48, %v875_v43  ;;  %v878_v47 = vld [vmem:[#allocation13 + $0x160] sm:$0xff]  ;;  %v887_v8 = vld [vmem:[#allocation13 + $0x1a8] sm:$0xff]  ;;  %v889_v43 = vld [vmem:[#allocation13 + $0x1b8] sm:$0xff] }
 0x13e   : > { %4102 = vmatprep.subr.bf16.mxu1 %v6216_v1  ;;  %7142 = vst [vmem:[#allocation96_spill] sm:$0xff] %v6228_v63  ;;  %v6230_v49 = vpack.c.bf16 %v878_v47, %v874_v50  ;;  %v6233_v1 = vpack.c.bf16 %v880_v16, %v876_v0  ;;  %v6236_v48 = vpack.c.bf16 %v887_v8, %v883_v29  ;;  %v886_v12 = vld [vmem:[#allocation13 + $0x1a0] sm:$0xff]  ;;  %v884_v47 = vld [vmem:[#allocation13 + $0x190] sm:$0xff]  ;;  %v895_v0 = vld [vmem:[#allocation13 + $0x1e8] sm:$0xff] }
 0x13f   : > { %7141 = vst [vmem:[#allocation95_spill] sm:$0xff] %v6225_v35  ;;  %v6241_v50 = vpack.c.bf16 %v886_v12, %v882_v13  ;;  %v897_v29 = vld [vmem:[#allocation13 + $0x1f8] sm:$0xff]  ;;  %v894_v13 = vld [vmem:[#allocation13 + $0x1e0] sm:$0xff]  ;;  %v892_v12 = vld [vmem:[#allocation13 + $0x1d0] sm:$0xff] }
 0x140   : > { %4072 = vmatpush1.bf16.msra.mxu0 %v6219_v28  ;;  %7143 = vst [vmem:[#allocation97_spill] sm:$0xff] %v6230_v49  ;;  %7144 = vst [vmem:[#allocation98_spill] sm:$0xff] %v6233_v1  ;;  %v885_v28 = vld [vmem:[#allocation13 + $0x198] sm:$0xff] }
 0x141   : > { %4104 = vmatpush1.bf16.msra.mxu1 %v6221_v14  ;;  %4074 = vmatprep.subr.bf16.mxu0 %v6225_v35  ;;  %7145 = vst [vmem:[#allocation99_spill] sm:$0xff] %v6236_v48  ;;  %v6238_v51 = vpack.c.bf16 %v889_v43, %v885_v28  ;;  %7147 = vst [vmem:[#allocation101_spill] sm:$0xff] %v6241_v50  ;;  %v888_v14 = vld [vmem:[#allocation13 + $0x1b0] sm:$0xff]  ;;  %v891_v35 = vld [vmem:[#allocation13 + $0x1c8] sm:$0xff] }
 0x142   : > { %4106 = vmatprep.subr.bf16.mxu1 %v6228_v63  ;;  %v6245_v16 = vpack.c.bf16 %v888_v14, %v884_v47  ;;  %v6247_v8 = vpack.c.bf16 %v895_v0, %v891_v35  ;;  %v893_v28 = vld [vmem:[#allocation13 + $0x1d8] sm:$0xff]  ;;  %v890_v43 = vld [vmem:[#allocation13 + $0x1c0] sm:$0xff]  ;;  %v524_v14 = vlaneseq }
 0x143   : > { %7146 = vst [vmem:[#allocation100_spill] sm:$0xff] %v6238_v51  ;;  %v6250_v63 = vpack.c.bf16 %v897_v29, %v893_v28  ;;  %v6253_v42 = vpack.c.bf16 %v894_v13, %v890_v43 }
 0x144   : > { %4076 = vmatpush1.bf16.msra.mxu0 %v6230_v49  ;;  %7148 = vst [vmem:[#allocation102_spill] sm:$0xff] %v6245_v16  ;;  %7149 = vst [vmem:[#allocation103_spill] sm:$0xff] %v6247_v8  ;;  %v896_v49 = vld [vmem:[#allocation13 + $0x1f0] sm:$0xff]  ;;  %v6264_v47 = vshrl.u32 %v524_v14, 7 }
 0x145   : > { %4108 = vmatpush1.bf16.msra.mxu1 %v6233_v1  ;;  %4078 = vmatprep.subr.bf16.mxu0 %v6236_v48  ;;  %7150 = vst [vmem:[#allocation104_spill] sm:$0xff] %v6250_v63  ;;  %7151 = vst [vmem:[#allocation105_spill] sm:$0xff] %v6253_v42  ;;  %v6257_v35 = vpack.c.bf16 %v896_v49, %v892_v12  ;;  %v522_v49 = vld [vmem:[%s7153_s30] sm:$0xf] }
 0x146   : > { %4110 = vmatprep.subr.bf16.mxu1 %v6238_v51  ;;  %v6978_v0 = vsub.s32 0, %v6264_v47  ;;  %v6979_v28 = vsub.s32 1, %v6264_v47  ;;  %v6986_v12 = vsub.s32 3, %v6264_v47 }
 0x147   : > { %7152 = vst [vmem:[#allocation106_spill] sm:$0xff] %v6257_v35 }
 0x148   : > { %4080 = vmatpush1.bf16.msra.mxu0 %v6241_v50  ;;  %v6273_v29 = vrot.slane %v522_v49, %v6978_v0  ;;  %v6277_v43 = vrot.slane %v522_v49, %v6979_v28  ;;  %v6284_v0 = vrot.slane %v522_v49, %v6986_v12  ;;  %v6995_v28 = vsub.s32 2, %v6264_v47 }
 0x149   : > { %4112 = vmatpush1.bf16.msra.mxu1 %v6245_v16  ;;  %4082 = vmatprep.subr.bf16.mxu0 %v6247_v8 }
 0x14a   : > { %4114 = vmatprep.subr.bf16.mxu1 %v6250_v63  ;;  %7154 = vst [vmem:[#allocation107_spill] sm:$0xff] %v6273_v29  ;;  %7155 = vst [vmem:[#allocation108_spill] sm:$0xff] %v6277_v43 }
 0x14b   : > { %7156 = vst [vmem:[#allocation109_spill] sm:$0xff] %v6284_v0 }
 0x14c   : > { %4084 = vmatpush1.bf16.msra.mxu0 %v6253_v42 }
 0x14d   : > { %4116 = vmatpush1.bf16.msra.mxu1 %v6257_v35  ;;  %4118 = vmatprep.subr.bf16.mxu0 %v5945_v18 }
 0x14e   : > { %4150 = vmatprep.subr.bf16.mxu1 %v5947_v19 }
 0x1e2   : > { %v1058_v13 = vpop.f32.mrb[0].mxu0 }
 0x1e3   : > { %v4933_v14 = vadd.f32 %v1058_v13, %v6273_v29  ;;  %v1129_v19 = vpop.f32.mrb[0].mxu1  ;;  %v1060_v18 = vpop.f32.mrb[1].mxu0  ;;  %v6290_v13 = vrot.slane %v522_v49, %v6995_v28 }
 0x1e4   : > { %v4934_v35 = vadd.f32 %v1060_v18, %v6277_v43  ;;  %v1131_v42 = vpop.f32.mrb[1].mxu1 }
 0x1e5   : > { %v3775_v63 = vmul.f32 -1.442695, %v4933_v14  ;;  %v4944_v16 = vadd.f32 %v1131_v42, %v6284_v0  ;;  %v4943_v18 = vadd.f32 %v1129_v19, %v6290_v13 }
 0x1e6   : > { %v3776_v8 = vmul.f32 -1.442695, %v4934_v35 }
 0x1e7   : > { %5127 = vpow2.f32 %v3775_v63  ;;  %v3777_v50 = vmul.f32 -1.442695, %v4944_v16  ;;  %v7159_v16 = vld [vmem:[#allocation58_spill] sm:$0xff] }
 0x1e8   : > { %5129 = vpow2.f32 %v3776_v8  ;;  %v985_v8 = vld [vmem:[#allocation4] sm:$0xff] }
 0x1e9   : > { %5131 = vpow2.f32 %v3777_v50 }
 0x1ea   : > { %5133 = vtanh.f32 %v4943_v18  ;;  %v7163_v18 = vld [vmem:[#allocation62_spill] sm:$0xff] }
 0x1f1   : > { %v5128_v51 = vpop.eup %5127 }
 0x1f2   : > { %v5130_v14 = vpop.eup %5129  ;;  %v1141_v35 = vadd.f32 1.0, %v5128_v51 }
 0x1f3   : > { %v1147_v12 = vadd.f32 1.0, %v5130_v14  ;;  %v5132_v63 = vpop.eup %5131  ;;  %v7164_v14 = vld [vmem:[#allocation63_spill] sm:$0xff] }
 0x1f4   : > { %5135 = vrcp.f32 %v1141_v35  ;;  %v5134_v48 = vpop.eup %5133  ;;  %v1154_v43 = vadd.f32 1.0, %v5132_v63  ;;  %v7165_v35 = vld [vmem:[#allocation64_spill] sm:$0xff]  ;;  %v7166_v63 = vld [vmem:[#allocation65_spill] sm:$0xff] }
 0x1f5   : > { %5137 = vrcp.f32 %v1147_v12  ;;  %v7162_v12 = vld [vmem:[#allocation61_spill] sm:$0xff] }
 0x1f6   : > { %5139 = vrcp.f32 %v1154_v43  ;;  %v7161_v43 = vld [vmem:[#allocation60_spill] sm:$0xff] }
 0x1fe   : > { %v5136_v1 = vpop.eup %5135 }
 0x1ff   : > { %v5138_v42 = vpop.eup %5137  ;;  %v1158_v0 = vmul.f32 %v5136_v1, %v5134_v48  ;;  %v7157_v1 = vld [vmem:[#allocation56_spill] sm:$0xff]  ;;  %v7158_v48 = vld [vmem:[#allocation57_spill] sm:$0xff] }
 0x200   : > { %v1157_v49 = vmul.f32 %v5138_v42, %v985_v8  ;;  %v5140_v19 = vpop.eup %5139  ;;  %v7167_v8 = vld [vmem:[#allocation66_spill] sm:$0xff]  ;;  %v7168_v42 = vld [vmem:[#allocation67_spill] sm:$0xff] }
 0x202   : > { %v6293_v28 = vadd.f32 %v1158_v0, %v1157_v49  ;;  %v7160_v0 = vld [vmem:[#allocation59_spill] sm:$0xff]  ;;  %v7169_v49 = vld [vmem:[#allocation68_spill] sm:$0xff] }
 0x204   : > { %5141 = vtanh.f32 %v6293_v28 }
 0x20e   : > { %v5142_v51 = vpop.eup %5141 }
 0x20f   : > { %v1161_v50 = vmul.f32 %v5142_v51, %v5140_v19  ;;  %v7170_v19 = vld [vmem:[#allocation69_spill] sm:$0xff]  ;;  %v7171_v51 = vld [vmem:[#allocation70_spill] sm:$0xff] }
 0x211   : > { %1369 = vmatmul.mubr.f32.vlgmr.msra.gmra.mrb[10].mxu0 %v1161_v50  ;;  %1440 = vmatmul.mubr.f32.vlgmr.msra.gmra.mrb[10].mxu1 %v1161_v50 }
 0x212   : > { %4120 = vmatpush1.bf16.msra.mxu0 %v5950_v23  ;;  %4152 = vmatpush1.bf16.msra.mxu1 %v5954_v27 }
 0x213   : > { %4122 = vmatprep.subr.bf16.mxu0 %v5957_v31  ;;  %4154 = vmatprep.subr.bf16.mxu1 %v5959_v32 }
 0x214   : > { %1543 = vmatprep.mubr.f32.mxu0 %v7127_v6  ;;  %1614 = vmatprep.mubr.f32.mxu1 %v7127_v6 }
 0x216   : > { %4124 = vmatpush1.bf16.msra.mxu0 %v5963_v36  ;;  %4156 = vmatpush1.bf16.msra.mxu1 %v5967_v40 }
 0x217   : > { %4126 = vmatprep.subr.bf16.mxu0 %v5969_v41  ;;  %4158 = vmatprep.subr.bf16.mxu1 %v5972_v45 }
 0x21a   : > { %4128 = vmatpush1.bf16.msra.mxu0 %v5977_v52  ;;  %4160 = vmatpush1.bf16.msra.mxu1 %v5981_v55 }
 0x21b   : > { %4130 = vmatprep.subr.bf16.mxu0 %v5983_v56  ;;  %4162 = vmatprep.subr.bf16.mxu1 %v5987_v60 }
 0x21e   : > { %4132 = vmatpush1.bf16.msra.mxu0 %v5993_v2  ;;  %4164 = vmatpush1.bf16.msra.mxu1 %v5999_v4 }
 0x21f   : > { %4134 = vmatprep.subr.bf16.mxu0 %v6001_v5  ;;  %4166 = vmatprep.subr.bf16.mxu1 %v6004_v10 }
 0x222   : > { %4136 = vmatpush1.bf16.msra.mxu0 %v6011_v17  ;;  %4168 = vmatpush1.bf16.msra.mxu1 %v6016_v20 }
 0x223   : > { %4138 = vmatprep.subr.bf16.mxu0 %v6018_v21  ;;  %4170 = vmatprep.subr.bf16.mxu1 %v6021_v26 }
 0x226   : > { %4140 = vmatpush1.bf16.msra.mxu0 %v6028_v37  ;;  %4172 = vmatpush1.bf16.msra.mxu1 %v6033_v38 }
 0x227   : > { %4142 = vmatprep.subr.bf16.mxu0 %v6035_v39  ;;  %4174 = vmatprep.subr.bf16.mxu1 %v6038_v46 }
 0x22a   : > { %4144 = vmatpush1.bf16.msra.mxu0 %v6044_v53  ;;  %4176 = vmatpush1.bf16.msra.mxu1 %v6049_v54 }
 0x22b   : > { %4146 = vmatprep.subr.bf16.mxu0 %v6051_v57  ;;  %4178 = vmatprep.subr.bf16.mxu1 %v6054_v62 }
 0x22e   : > { %4148 = vmatpush1.bf16.msra.mxu0 %v6057_v7  ;;  %4180 = vmatpush1.bf16.msra.mxu1 %v6061_v9 }
 0x22f   : > { %4182 = vmatprep.subr.bf16.mxu0 %v6063_v11  ;;  %4214 = vmatprep.subr.bf16.mxu1 %v6066_v15 }
 0x231   : > { %1544 = vmatmul.mubr.f32.vlgmr.msra.gmra.mrb[2].mxu0 %v1161_v50  ;;  %1615 = vmatmul.mubr.f32.vlgmr.msra.gmra.mrb[2].mxu1 %v1161_v50  ;;  %v7172_v50 = vld [vmem:[#allocation71_spill] sm:$0xff] }
 0x232   : > { %4184 = vmatpush1.bf16.msra.mxu0 %v6069_v30  ;;  %4216 = vmatpush1.bf16.msra.mxu1 %v6073_v33 }
 0x233   : > { %4186 = vmatprep.subr.bf16.mxu0 %v6075_v34  ;;  %4218 = vmatprep.subr.bf16.mxu1 %v6078_v44 }
 0x234   : > { %1713 = vmatprep.mubr.f32.mxu0 %v7127_v6  ;;  %1784 = vmatprep.mubr.f32.mxu1 %v7127_v6 }
 0x236   : > { %4188 = vmatpush1.bf16.msra.mxu0 %v6081_v58  ;;  %4220 = vmatpush1.bf16.msra.mxu1 %v6085_v59 }
 0x237   : > { %4190 = vmatprep.subr.bf16.mxu0 %v6087_v61  ;;  %4222 = vmatprep.subr.bf16.mxu1 %v6090_v3 }
 0x23a   : > { %4192 = vmatpush1.bf16.msra.mxu0 %v6095_v22  ;;  %4224 = vmatpush1.bf16.msra.mxu1 %v6099_v24 }
 0x23b   : > { %4194 = vmatprep.subr.bf16.mxu0 %v6101_v25  ;;  %4226 = vmatprep.subr.bf16.mxu1 %v7157_v1 }
 0x23e   : > { %4196 = vmatpush1.bf16.msra.mxu0 %v7158_v48  ;;  %4228 = vmatpush1.bf16.msra.mxu1 %v7159_v16  ;;  %v7182_v16 = vsub.s32 3, %v6264_v47 }
 0x23f   : > { %4198 = vmatprep.subr.bf16.mxu0 %v7160_v0  ;;  %4230 = vmatprep.subr.bf16.mxu1 %v7161_v43 }
 0x242   : > { %4200 = vmatpush1.bf16.msra.mxu0 %v7162_v12  ;;  %4232 = vmatpush1.bf16.msra.mxu1 %v7163_v18  ;;  %v7173_v12 = vld [vmem:[#allocation72_spill] sm:$0xff]  ;;  %v7174_v18 = vld [vmem:[#allocation73_spill] sm:$0xff] }
 0x243   : > { %4202 = vmatprep.subr.bf16.mxu0 %v7164_v14  ;;  %4234 = vmatprep.subr.bf16.mxu1 %v7165_v35  ;;  %v7175_v14 = vld [vmem:[#allocation74_spill] sm:$0xff]  ;;  %v7176_v35 = vld [vmem:[#allocation75_spill] sm:$0xff] }
 0x246   : > { %4204 = vmatpush1.bf16.msra.mxu0 %v7166_v63  ;;  %4236 = vmatpush1.bf16.msra.mxu1 %v7167_v8  ;;  %v7177_v63 = vld [vmem:[#allocation76_spill] sm:$0xff] }
 0x247   : > { %4206 = vmatprep.subr.bf16.mxu0 %v7168_v42  ;;  %4238 = vmatprep.subr.bf16.mxu1 %v7169_v49  ;;  %v962_v49 = vld [vmem:[%s7178_s12] sm:$0xf] }
 0x248   : > { %v6379_v48 = vrot.slane %v962_v49, %v7182_v16 }
 0x24a   : > { %4208 = vmatpush1.bf16.msra.mxu0 %v7170_v19  ;;  %4240 = vmatpush1.bf16.msra.mxu1 %v7171_v51  ;;  %v7179_v19 = vsub.s32 0, %v6264_v47  ;;  %7183 = vst [vmem:[#allocation111_spill] sm:$0xff] %v6379_v48 }
 0x24b   : > { %4210 = vmatprep.subr.bf16.mxu0 %v7172_v50  ;;  %4242 = vmatprep.subr.bf16.mxu1 %v7173_v12  ;;  %v7181_v50 = vsub.s32 1, %v6264_v47 }
 0x24c   : > { %v6369_v42 = vrot.slane %v962_v49, %v7179_v19 }
 0x24d   : > { %v6373_v51 = vrot.slane %v962_v49, %v7181_v50  ;;  %v7184_v50 = vsub.s32 2, %v6264_v47 }
 0x24e   : > { %4212 = vmatpush1.bf16.msra.mxu0 %v7174_v18  ;;  %4244 = vmatpush1.bf16.msra.mxu1 %v7175_v14  ;;  %7180 = vst [vmem:[#allocation110_spill] sm:$0xff] %v6369_v42 }
 0x24f   : > { %4246 = vmatprep.subr.bf16.mxu0 %v7176_v35  ;;  %4278 = vmatprep.subr.bf16.mxu1 %v7177_v63  ;;  %v6384_v1 = vrot.slane %v962_v49, %v7184_v50 }
 0x251   : > { %7185 = vst [vmem:[#allocation112_spill] sm:$0xff] %v6384_v1 }
 0x2e4   : > { %v1370_v12 = vpop.f32.mrb[10].mxu0  ;;  %v1441_v18 = vpop.f32.mrb[10].mxu1 }
 0x2e5   : > { %v1446_v14 = vadd.f32 %v1370_v12, %v6369_v42  ;;  %v1372_v8 = vpop.f32.mrb[11].mxu0  ;;  %v1443_v35 = vpop.f32.mrb[11].mxu1  ;;  %v1448_v12 = vadd.f32 %v1441_v18, %v6384_v1 }
 0x2e6   : > { %v1447_v63 = vadd.f32 %v1372_v8, %v6373_v51  ;;  %v1449_v19 = vadd.f32 %v1443_v35, %v6379_v48 }
 0x2e7   : > { %v3778_v43 = vmul.f32 -1.442695, %v1446_v14 }
 0x2e8   : > { %v3779_v0 = vmul.f32 -1.442695, %v1447_v63  ;;  %v3780_v25 = vmul.f32 -1.442695, %v1449_v19 }
 0x2e9   : > { %5143 = vpow2.f32 %v3778_v43 }
 0x2ea   : > { %5145 = vpow2.f32 %v3779_v0  ;;  %v987_v0 = vld [vmem:[#allocation6] sm:$0xff] }
 0x2eb   : > { %5147 = vpow2.f32 %v3780_v25 }
 0x2ec   : > { %5149 = vtanh.f32 %v1448_v12 }
 0x2f3   : > { %v5144_v42 = vpop.eup %5143 }
 0x2f4   : > { %v5146_v24 = vpop.eup %5145  ;;  %v1453_v8 = vadd.f32 1.0, %v5144_v42 }
 0x2f5   : > { %v1459_v14 = vadd.f32 1.0, %v5146_v24  ;;  %v5148_v16 = vpop.eup %5147  ;;  %v7186_v24 = vld [vmem:[#allocation108_spill] sm:$0xff] }
 0x2f6   : > { %5151 = vrcp.f32 %v1453_v8  ;;  %v5150_v43 = vpop.eup %5149  ;;  %v1466_v47 = vadd.f32 1.0, %v5148_v16 }
 0x2f7   : > { %5153 = vrcp.f32 %v1459_v14 }
 0x2f8   : > { %5155 = vrcp.f32 %v1466_v47 }
 0x300   : > { %v5152_v63 = vpop.eup %5151 }
 0x301   : > { %v5154_v35 = vpop.eup %5153  ;;  %v1470_v48 = vmul.f32 %v5152_v63, %v5150_v43  ;;  %v7187_v43 = vld [vmem:[#allocation109_spill] sm:$0xff] }
 0x302   : > { %v1469_v49 = vmul.f32 %v5154_v35, %v987_v0  ;;  %v5156_v0 = vpop.eup %5155 }
 0x304   : > { %v6387_v50 = vadd.f32 %v1470_v48, %v1469_v49  ;;  %v1545_v19 = vpop.f32.mrb[2].mxu0  ;;  %v1616_v18 = vpop.f32.mrb[2].mxu1 }
 0x305   : > { %v4935_v42 = vadd.f32 %v1545_v19, %v6273_v29  ;;  %v1547_v25 = vpop.f32.mrb[3].mxu0  ;;  %v1618_v12 = vpop.f32.mrb[3].mxu1  ;;  %v4945_v35 = vadd.f32 %v1616_v18, %v6290_v13  ;;  %v7192_v18 = vld [vmem:[#allocation81_spill] sm:$0xff] }
 0x306   : > { %v4936_v8 = vadd.f32 %v1547_v25, %v7186_v24  ;;  %5157 = vtanh.f32 %v6387_v50  ;;  %v4946_v16 = vadd.f32 %v1618_v12, %v7187_v43  ;;  %v7188_v25 = vld [vmem:[#allocation77_spill] sm:$0xff]  ;;  %v7191_v12 = vld [vmem:[#allocation80_spill] sm:$0xff] }
 0x307   : > { %v3781_v14 = vmul.f32 -1.442695, %v4935_v42  ;;  %v7189_v42 = vld [vmem:[#allocation78_spill] sm:$0xff] }
 0x308   : > { %v3782_v1 = vmul.f32 -1.442695, %v4936_v8  ;;  %v3783_v63 = vmul.f32 -1.442695, %v4946_v16  ;;  %v7190_v8 = vld [vmem:[#allocation79_spill] sm:$0xff] }
 0x309   : > { %5159 = vpow2.f32 %v3781_v14  ;;  %v7193_v14 = vld [vmem:[#allocation82_spill] sm:$0xff]  ;;  %v7194_v16 = vld [vmem:[#allocation83_spill] sm:$0xff] }
 0x30a   : > { %5161 = vpow2.f32 %v3782_v1 }
 0x30b   : > { %5163 = vpow2.f32 %v3783_v63  ;;  %v7197_v63 = vld [vmem:[#allocation86_spill] sm:$0xff] }
 0x30c   : > { %5165 = vtanh.f32 %v4945_v35  ;;  %v7198_v35 = vld [vmem:[#allocation87_spill] sm:$0xff] }
 0x310   : > { %v5158_v48 = vpop.eup %5157 }
 0x311   : > { %v1473_v47 = vmul.f32 %v5158_v48, %v5156_v0  ;;  %v7195_v0 = vld [vmem:[#allocation84_spill] sm:$0xff]  ;;  %v7196_v48 = vld [vmem:[#allocation85_spill] sm:$0xff] }
 0x313   : > { %v5160_v49 = vpop.eup %5159  ;;  %1714 = vmatmul.mubr.f32.vlgmr.msra.gmra.mrb[12].mxu0 %v1473_v47  ;;  %1785 = vmatmul.mubr.f32.vlgmr.msra.gmra.mrb[12].mxu1 %v1473_v47 }
 0x314   : > { %v5162_v19 = vpop.eup %5161  ;;  %v1628_v29 = vadd.f32 1.0, %v5160_v49  ;;  %4248 = vmatpush1.bf16.msra.mxu0 %v7188_v25  ;;  %4280 = vmatpush1.bf16.msra.mxu1 %v7189_v42  ;;  %v7206_v42 = vld [vmem:[#allocation95_spill] sm:$0xff] }
 0x315   : > { %v1634_v1 = vadd.f32 1.0, %v5162_v19  ;;  %4250 = vmatprep.subr.bf16.mxu0 %v7190_v8  ;;  %4282 = vmatprep.subr.bf16.mxu1 %v7191_v12  ;;  %v5164_v47 = vpop.eup %5163  ;;  %v7202_v8 = vld [vmem:[#allocation91_spill] sm:$0xff] }
 0x316   : > { %5167 = vrcp.f32 %v1628_v29  ;;  %1855 = vmatprep.mubr.f32.mxu0 %v7127_v6  ;;  %1926 = vmatprep.mubr.f32.mxu1 %v7127_v6  ;;  %v7199_v29 = vld [vmem:[#allocation88_spill] sm:$0xff]  ;;  %v5166_v49 = vpop.eup %5165 }
 0x317   : > { %5169 = vrcp.f32 %v1634_v1  ;;  %v7200_v1 = vld [vmem:[#allocation89_spill] sm:$0xff] }
 0x318   : > { %4252 = vmatpush1.bf16.msra.mxu0 %v7192_v18  ;;  %4284 = vmatpush1.bf16.msra.mxu1 %v7193_v14  ;;  %v7201_v18 = vld [vmem:[#allocation90_spill] sm:$0xff] }
 0x319   : > { %4254 = vmatprep.subr.bf16.mxu0 %v7194_v16  ;;  %4286 = vmatprep.subr.bf16.mxu1 %v7195_v0  ;;  %v1641_v16 = vadd.f32 1.0, %v5164_v47  ;;  %v7203_v0 = vld [vmem:[#allocation92_spill] sm:$0xff]  ;;  %v7208_v47 = vld [vmem:[#allocation97_spill] sm:$0xff] }
 0x31b   : > { %5171 = vrcp.f32 %v1641_v16  ;;  %v7215_v16 = vld [vmem:[#allocation104_spill] sm:$0xff] }
 0x31c   : > { %4256 = vmatpush1.bf16.msra.mxu0 %v7196_v48  ;;  %4288 = vmatpush1.bf16.msra.mxu1 %v7197_v63 }
 0x31d   : > { %4258 = vmatprep.subr.bf16.mxu0 %v7198_v35  ;;  %4290 = vmatprep.subr.bf16.mxu1 %v7199_v29  ;;  %v7204_v35 = vld [vmem:[#allocation93_spill] sm:$0xff]  ;;  %v7205_v29 = vld [vmem:[#allocation94_spill] sm:$0xff] }
 0x320   : > { %v5168_v19 = vpop.eup %5167  ;;  %4260 = vmatpush1.bf16.msra.mxu0 %v7200_v1  ;;  %4292 = vmatpush1.bf16.msra.mxu1 %v7201_v18  ;;  %v7207_v1 = vld [vmem:[#allocation96_spill] sm:$0xff] }
 0x321   : > { %v5170_v14 = vpop.eup %5169  ;;  %v1645_v12 = vmul.f32 %v5168_v19, %v5166_v49  ;;  %4262 = vmatprep.subr.bf16.mxu0 %v7202_v8  ;;  %4294 = vmatprep.subr.bf16.mxu1 %v7203_v0  ;;  %v7209_v49 = vld [vmem:[#allocation98_spill] sm:$0xff]  ;;  %v7210_v19 = vld [vmem:[#allocation99_spill] sm:$0xff] }
 0x322   : > { %v1644_v63 = vmul.f32 %v5170_v14, %v6293_v28  ;;  %v7211_v28 = vld [vmem:[#allocation100_spill] sm:$0xff]  ;;  %v7213_v14 = vld [vmem:[#allocation102_spill] sm:$0xff] }
 0x324   : > { %v6413_v48 = vadd.f32 %v1645_v12, %v1644_v63  ;;  %4264 = vmatpush1.bf16.msra.mxu0 %v7204_v35  ;;  %4296 = vmatpush1.bf16.msra.mxu1 %v7205_v29  ;;  %v7212_v12 = vld [vmem:[#allocation101_spill] sm:$0xff]  ;;  %v7214_v63 = vld [vmem:[#allocation103_spill] sm:$0xff]  ;;  %v7217_v35 = vld [vmem:[#allocation106_spill] sm:$0xff] }
 0x325   : > { %4266 = vmatprep.subr.bf16.mxu0 %v7206_v42  ;;  %4298 = vmatprep.subr.bf16.mxu1 %v7207_v1  ;;  %v5172_v42 = vpop.eup %5171  ;;  %v7216_v29 = vld [vmem:[#allocation105_spill] sm:$0xff] }
 0x326   : > { %5173 = vtanh.f32 %v6413_v48 }
 0x328   : > { %4268 = vmatpush1.bf16.msra.mxu0 %v7208_v47  ;;  %4300 = vmatpush1.bf16.msra.mxu1 %v7209_v49  ;;  %v7218_v49 = vld [vmem:[#allocation25_spill] sm:$0xff] }
 0x329   : > { %4270 = vmatprep.subr.bf16.mxu0 %v7210_v19  ;;  %4302 = vmatprep.subr.bf16.mxu1 %v7211_v28  ;;  %v7219_v19 = vld [vmem:[#allocation26_spill] sm:$0xff] }
 0x32c   : > { %4272 = vmatpush1.bf16.msra.mxu0 %v7212_v12  ;;  %4304 = vmatpush1.bf16.msra.mxu1 %v7213_v14 }
 0x32d   : > { %4274 = vmatprep.subr.bf16.mxu0 %v7214_v63  ;;  %4306 = vmatprep.subr.bf16.mxu1 %v7215_v16 }
 0x330   : > { %v5174_v1 = vpop.eup %5173  ;;  %4276 = vmatpush1.bf16.msra.mxu0 %v7216_v29  ;;  %4308 = vmatpush1.bf16.msra.mxu1 %v7217_v35 }
 0x331   : > { %v1648_v47 = vmul.f32 %v5174_v1, %v5172_v42  ;;  %4310 = vmatprep.subr.bf16.mxu0 %v7218_v49  ;;  %4342 = vmatprep.subr.bf16.mxu1 %v7219_v19  ;;  %v7220_v42 = vld [vmem:[#allocation54_spill] sm:$0xff]  ;;  %v7221_v1 = vld [vmem:[#allocation55_spill] sm:$0xff] }
 0x333   : > { %1856 = vmatmul.mubr.f32.vlgmr.msra.gmra.mrb[12].mxu0 %v1648_v47  ;;  %1927 = vmatmul.mubr.f32.vlgmr.msra.gmra.mrb[12].mxu1 %v1648_v47 }
 0x334   : > { %4312 = vmatpush1.bf16.msra.mxu0 %v5950_v23  ;;  %4344 = vmatpush1.bf16.msra.mxu1 %v5954_v27 }
 0x335   : > { %4314 = vmatprep.subr.bf16.mxu0 %v5957_v31  ;;  %4346 = vmatprep.subr.bf16.mxu1 %v5959_v32 }
 0x336   : > { %2030 = vmatprep.mubr.f32.mxu0 %v7127_v6  ;;  %2101 = vmatprep.mubr.f32.mxu1 %v7127_v6 }
 0x338   : > { %4316 = vmatpush1.bf16.msra.mxu0 %v5963_v36  ;;  %4348 = vmatpush1.bf16.msra.mxu1 %v5967_v40 }
 0x339   : > { %4318 = vmatprep.subr.bf16.mxu0 %v5969_v41  ;;  %4350 = vmatprep.subr.bf16.mxu1 %v5972_v45 }
 0x33c   : > { %4320 = vmatpush1.bf16.msra.mxu0 %v5977_v52  ;;  %4352 = vmatpush1.bf16.msra.mxu1 %v5981_v55 }
 0x33d   : > { %4322 = vmatprep.subr.bf16.mxu0 %v5983_v56  ;;  %4354 = vmatprep.subr.bf16.mxu1 %v5987_v60 }
 0x340   : > { %4324 = vmatpush1.bf16.msra.mxu0 %v5993_v2  ;;  %4356 = vmatpush1.bf16.msra.mxu1 %v5999_v4 }
 0x341   : > { %4326 = vmatprep.subr.bf16.mxu0 %v6001_v5  ;;  %4358 = vmatprep.subr.bf16.mxu1 %v6004_v10 }
 0x344   : > { %4328 = vmatpush1.bf16.msra.mxu0 %v6011_v17  ;;  %4360 = vmatpush1.bf16.msra.mxu1 %v6016_v20 }
 0x345   : > { %4330 = vmatprep.subr.bf16.mxu0 %v6018_v21  ;;  %4362 = vmatprep.subr.bf16.mxu1 %v6021_v26 }
 0x348   : > { %4332 = vmatpush1.bf16.msra.mxu0 %v6028_v37  ;;  %4364 = vmatpush1.bf16.msra.mxu1 %v6033_v38 }
 0x349   : > { %4334 = vmatprep.subr.bf16.mxu0 %v6035_v39  ;;  %4366 = vmatprep.subr.bf16.mxu1 %v6038_v46 }
 0x34c   : > { %4336 = vmatpush1.bf16.msra.mxu0 %v6044_v53  ;;  %4368 = vmatpush1.bf16.msra.mxu1 %v6049_v54 }
 0x34d   : > { %4338 = vmatprep.subr.bf16.mxu0 %v6051_v57  ;;  %4370 = vmatprep.subr.bf16.mxu1 %v6054_v62 }
 0x350   : > { %4340 = vmatpush1.bf16.msra.mxu0 %v6057_v7  ;;  %4372 = vmatpush1.bf16.msra.mxu1 %v6061_v9 }
 0x351   : > { %4374 = vmatprep.subr.bf16.mxu0 %v6063_v11  ;;  %4406 = vmatprep.subr.bf16.mxu1 %v6066_v15 }
 0x353   : > { %2031 = vmatmul.mubr.f32.vlgmr.msra.gmra.mrb[4].mxu0 %v1648_v47  ;;  %2102 = vmatmul.mubr.f32.vlgmr.msra.gmra.mrb[4].mxu1 %v1648_v47  ;;  %v7222_v47 = vld [vmem:[#allocation56_spill] sm:$0xff] }
 0x354   : > { %4376 = vmatpush1.bf16.msra.mxu0 %v6069_v30  ;;  %4408 = vmatpush1.bf16.msra.mxu1 %v6073_v33  ;;  %v7225_v33 = vld [vmem:[#allocation59_spill] sm:$0xff]  ;;  %v7243_v30 = vld [vmem:[#allocation110_spill] sm:$0xff] }
 0x355   : > { %4378 = vmatprep.subr.bf16.mxu0 %v6075_v34  ;;  %4410 = vmatprep.subr.bf16.mxu1 %v6078_v44  ;;  %v7223_v44 = vld [vmem:[#allocation57_spill] sm:$0xff]  ;;  %v7224_v34 = vld [vmem:[#allocation58_spill] sm:$0xff] }
 0x356   : > { %2200 = vmatprep.mubr.f32.mxu0 %v7127_v6  ;;  %2271 = vmatprep.mubr.f32.mxu1 %v7127_v6 }
 0x358   : > { %4380 = vmatpush1.bf16.msra.mxu0 %v6081_v58  ;;  %4412 = vmatpush1.bf16.msra.mxu1 %v6085_v59  ;;  %v7226_v58 = vld [vmem:[#allocation60_spill] sm:$0xff]  ;;  %v7227_v59 = vld [vmem:[#allocation61_spill] sm:$0xff] }
 0x359   : > { %4382 = vmatprep.subr.bf16.mxu0 %v6087_v61  ;;  %4414 = vmatprep.subr.bf16.mxu1 %v6090_v3  ;;  %v7228_v61 = vld [vmem:[#allocation62_spill] sm:$0xff]  ;;  %v7229_v3 = vld [vmem:[#allocation63_spill] sm:$0xff] }
 0x35c   : > { %4384 = vmatpush1.bf16.msra.mxu0 %v6095_v22  ;;  %4416 = vmatpush1.bf16.msra.mxu1 %v7220_v42  ;;  %v7230_v22 = vld [vmem:[#allocation64_spill] sm:$0xff]  ;;  %v7231_v42 = vld [vmem:[#allocation65_spill] sm:$0xff] }
 0x35d   : > { %4386 = vmatprep.subr.bf16.mxu0 %v7221_v1  ;;  %4418 = vmatprep.subr.bf16.mxu1 %v7222_v47  ;;  %v7232_v1 = vld [vmem:[#allocation66_spill] sm:$0xff]  ;;  %v7233_v47 = vld [vmem:[#allocation67_spill] sm:$0xff] }
 0x360   : > { %4388 = vmatpush1.bf16.msra.mxu0 %v7223_v44  ;;  %4420 = vmatpush1.bf16.msra.mxu1 %v7224_v34  ;;  %v7234_v44 = vld [vmem:[#allocation68_spill] sm:$0xff]  ;;  %v7235_v34 = vld [vmem:[#allocation69_spill] sm:$0xff] }
 0x361   : > { %4390 = vmatprep.subr.bf16.mxu0 %v7225_v33  ;;  %4422 = vmatprep.subr.bf16.mxu1 %v7226_v58  ;;  %v7236_v33 = vld [vmem:[#allocation70_spill] sm:$0xff]  ;;  %v7237_v58 = vld [vmem:[#allocation71_spill] sm:$0xff] }
 0x364   : > { %4392 = vmatpush1.bf16.msra.mxu0 %v7227_v59  ;;  %4424 = vmatpush1.bf16.msra.mxu1 %v7228_v61  ;;  %v7238_v59 = vld [vmem:[#allocation72_spill] sm:$0xff]  ;;  %v7239_v61 = vld [vmem:[#allocation73_spill] sm:$0xff] }
 0x365   : > { %4394 = vmatprep.subr.bf16.mxu0 %v7229_v3  ;;  %4426 = vmatprep.subr.bf16.mxu1 %v7230_v22  ;;  %v7240_v3 = vld [vmem:[#allocation74_spill] sm:$0xff]  ;;  %v7241_v22 = vld [vmem:[#allocation75_spill] sm:$0xff] }
 0x368   : > { %4396 = vmatpush1.bf16.msra.mxu0 %v7231_v42  ;;  %4428 = vmatpush1.bf16.msra.mxu1 %v7232_v1  ;;  %v7242_v42 = vld [vmem:[#allocation76_spill] sm:$0xff] }
 0x369   : > { %4398 = vmatprep.subr.bf16.mxu0 %v7233_v47  ;;  %4430 = vmatprep.subr.bf16.mxu1 %v7234_v44 }
 0x36c   : > { %4400 = vmatpush1.bf16.msra.mxu0 %v7235_v34  ;;  %4432 = vmatpush1.bf16.msra.mxu1 %v7236_v33 }
 0x36d   : > { %4402 = vmatprep.subr.bf16.mxu0 %v7237_v58  ;;  %4434 = vmatprep.subr.bf16.mxu1 %v7238_v59  ;;  %v7244_v59 = vld [vmem:[#allocation111_spill] sm:$0xff] }
 0x370   : > { %4404 = vmatpush1.bf16.msra.mxu0 %v7239_v61  ;;  %4436 = vmatpush1.bf16.msra.mxu1 %v7240_v3  ;;  %v7245_v3 = vld [vmem:[#allocation112_spill] sm:$0xff] }
 0x371   : > { %4438 = vmatprep.subr.bf16.mxu0 %v7241_v22  ;;  %4470 = vmatprep.subr.bf16.mxu1 %v7242_v42 }
 0x406   : > { %v1857_v1 = vpop.f32.mrb[12].mxu0  ;;  %v1928_v47 = vpop.f32.mrb[12].mxu1 }
 0x407   : > { %v1933_v44 = vadd.f32 %v1857_v1, %v7243_v30  ;;  %v1859_v15 = vpop.f32.mrb[13].mxu0  ;;  %v1930_v34 = vpop.f32.mrb[13].mxu1  ;;  %v1935_v7 = vadd.f32 %v1928_v47, %v7245_v3  ;;  %v7246_v3 = vld [vmem:[#allocation107_spill] sm:$0xff] }
 0x408   : > { %v1934_v33 = vadd.f32 %v1859_v15, %v6373_v51  ;;  %v1936_v61 = vadd.f32 %v1930_v34, %v7244_v59 }
 0x409   : > { %v3784_v11 = vmul.f32 -1.442695, %v1933_v44 }
 0x40a   : > { %v3785_v58 = vmul.f32 -1.442695, %v1934_v33  ;;  %v3786_v9 = vmul.f32 -1.442695, %v1936_v61 }
 0x40b   : > { %5175 = vpow2.f32 %v3784_v11 }
 0x40c   : > { %5177 = vpow2.f32 %v3785_v58 }
 0x40d   : > { %5179 = vpow2.f32 %v3786_v9 }
 0x40e   : > { %5181 = vtanh.f32 %v1935_v7 }
 0x415   : > { %v5176_v22 = vpop.eup %5175 }
 0x416   : > { %v5178_v62 = vpop.eup %5177  ;;  %v1940_v42 = vadd.f32 1.0, %v5176_v22 }
 0x417   : > { %v1946_v57 = vadd.f32 1.0, %v5178_v62  ;;  %v5180_v1 = vpop.eup %5179 }
 0x418   : > { %5183 = vrcp.f32 %v1940_v42  ;;  %v5182_v30 = vpop.eup %5181  ;;  %v1953_v11 = vadd.f32 1.0, %v5180_v1 }
 0x419   : > { %5185 = vrcp.f32 %v1946_v57 }
 0x41a   : > { %5187 = vrcp.f32 %v1953_v11 }
 0x422   : > { %v5184_v15 = vpop.eup %5183 }
 0x423   : > { %v5186_v44 = vpop.eup %5185  ;;  %v1957_v33 = vmul.f32 %v5184_v15, %v5182_v30 }
 0x424   : > { %v1956_v58 = vmul.f32 %v5186_v44, %v6387_v50  ;;  %v5188_v50 = vpop.eup %5187 }
 0x426   : > { %v6505_v34 = vadd.f32 %v1957_v33, %v1956_v58  ;;  %v2032_v61 = vpop.f32.mrb[4].mxu0  ;;  %v2103_v47 = vpop.f32.mrb[4].mxu1 }
 0x427   : > { %v4937_v22 = vadd.f32 %v2032_v61, %v7246_v3  ;;  %v2034_v9 = vpop.f32.mrb[5].mxu0  ;;  %v2105_v7 = vpop.f32.mrb[5].mxu1  ;;  %v4947_v44 = vadd.f32 %v2103_v47, %v6290_v13  ;;  %v7250_v47 = vld [vmem:[#allocation81_spill] sm:$0xff] }
 0x428   : > { %v4938_v62 = vadd.f32 %v2034_v9, %v7186_v24  ;;  %5189 = vtanh.f32 %v6505_v34  ;;  %v4948_v30 = vadd.f32 %v2105_v7, %v7187_v43  ;;  %v7249_v7 = vld [vmem:[#allocation80_spill] sm:$0xff] }
 0x429   : > { %v3787_v57 = vmul.f32 -1.442695, %v4937_v22  ;;  %v7247_v22 = vld [vmem:[#allocation78_spill] sm:$0xff] }
 0x42a   : > { %v3788_v42 = vmul.f32 -1.442695, %v4938_v62  ;;  %v3789_v15 = vmul.f32 -1.442695, %v4948_v30  ;;  %v7248_v62 = vld [vmem:[#allocation79_spill] sm:$0xff]  ;;  %v7253_v30 = vld [vmem:[#allocation84_spill] sm:$0xff] }
 0x42b   : > { %5191 = vpow2.f32 %v3787_v57  ;;  %v7251_v57 = vld [vmem:[#allocation82_spill] sm:$0xff] }
 0x42c   : > { %5193 = vpow2.f32 %v3788_v42  ;;  %v7252_v42 = vld [vmem:[#allocation83_spill] sm:$0xff] }
 0x42d   : > { %5195 = vpow2.f32 %v3789_v15  ;;  %v7256_v15 = vld [vmem:[#allocation87_spill] sm:$0xff] }
 0x42e   : > { %5197 = vtanh.f32 %v4947_v44  ;;  %v7257_v44 = vld [vmem:[#allocation88_spill] sm:$0xff] }
 0x432   : > { %v5190_v1 = vpop.eup %5189 }
 0x433   : > { %v1960_v33 = vmul.f32 %v5190_v1, %v5188_v50  ;;  %v7254_v50 = vld [vmem:[#allocation85_spill] sm:$0xff]  ;;  %v7255_v1 = vld [vmem:[#allocation86_spill] sm:$0xff] }
 0x435   : > { %v5192_v11 = vpop.eup %5191  ;;  %2201 = vmatmul.mubr.f32.vlgmr.msra.gmra.mrb[14].mxu0 %v1960_v33  ;;  %2272 = vmatmul.mubr.f32.vlgmr.msra.gmra.mrb[14].mxu1 %v1960_v33 }
 0x436   : > { %v5194_v58 = vpop.eup %5193  ;;  %v2115_v61 = vadd.f32 1.0, %v5192_v11  ;;  %4440 = vmatpush1.bf16.msra.mxu0 %v7188_v25  ;;  %4472 = vmatpush1.bf16.msra.mxu1 %v7247_v22 }
 0x437   : > { %v2121_v9 = vadd.f32 1.0, %v5194_v58  ;;  %4442 = vmatprep.subr.bf16.mxu0 %v7248_v62  ;;  %4474 = vmatprep.subr.bf16.mxu1 %v7249_v7  ;;  %v5196_v33 = vpop.eup %5195 }
 0x438   : > { %5199 = vrcp.f32 %v2115_v61  ;;  %2342 = vmatprep.mubr.f32.mxu0 %v7127_v6  ;;  %2413 = vmatprep.mubr.f32.mxu1 %v7127_v6  ;;  %v5198_v11 = vpop.eup %5197  ;;  %v7258_v61 = vld [vmem:[#allocation89_spill] sm:$0xff] }
 0x439   : > { %5201 = vrcp.f32 %v2121_v9 }
 0x43a   : > { %4444 = vmatpush1.bf16.msra.mxu0 %v7250_v47  ;;  %4476 = vmatpush1.bf16.msra.mxu1 %v7251_v57 }
 0x43b   : > { %4446 = vmatprep.subr.bf16.mxu0 %v7252_v42  ;;  %4478 = vmatprep.subr.bf16.mxu1 %v7253_v30  ;;  %v2128_v42 = vadd.f32 1.0, %v5196_v33  ;;  %v7261_v30 = vld [vmem:[#allocation95_spill] sm:$0xff]  ;;  %v7263_v33 = vld [vmem:[#allocation97_spill] sm:$0xff] }
 0x43d   : > { %5203 = vrcp.f32 %v2128_v42 }
 0x43e   : > { %4448 = vmatpush1.bf16.msra.mxu0 %v7254_v50  ;;  %4480 = vmatpush1.bf16.msra.mxu1 %v7255_v1 }
 0x43f   : > { %4450 = vmatprep.subr.bf16.mxu0 %v7256_v15  ;;  %4482 = vmatprep.subr.bf16.mxu1 %v7257_v44  ;;  %v7259_v15 = vld [vmem:[#allocation93_spill] sm:$0xff]  ;;  %v7260_v44 = vld [vmem:[#allocation94_spill] sm:$0xff] }
 0x442   : > { %v5200_v58 = vpop.eup %5199  ;;  %4452 = vmatpush1.bf16.msra.mxu0 %v7258_v61  ;;  %4484 = vmatpush1.bf16.msra.mxu1 %v7201_v18  ;;  %v7262_v61 = vld [vmem:[#allocation96_spill] sm:$0xff] }
 0x443   : > { %v5202_v9 = vpop.eup %5201  ;;  %v2132_v57 = vmul.f32 %v5200_v58, %v5198_v11  ;;  %4454 = vmatprep.subr.bf16.mxu0 %v7202_v8  ;;  %4486 = vmatprep.subr.bf16.mxu1 %v7203_v0  ;;  %v7264_v11 = vld [vmem:[#allocation98_spill] sm:$0xff]  ;;  %v7265_v58 = vld [vmem:[#allocation99_spill] sm:$0xff] }
 0x444   : > { %v2131_v1 = vmul.f32 %v5202_v9, %v6413_v48  ;;  %v7267_v9 = vld [vmem:[#allocation40_spill] sm:$0xff] }
 0x446   : > { %v6531_v50 = vadd.f32 %v2132_v57, %v2131_v1  ;;  %4456 = vmatpush1.bf16.msra.mxu0 %v7259_v15  ;;  %4488 = vmatpush1.bf16.msra.mxu1 %v7260_v44  ;;  %v7266_v1 = vld [vmem:[#allocation39_spill] sm:$0xff] }
 0x447   : > { %4458 = vmatprep.subr.bf16.mxu0 %v7261_v30  ;;  %4490 = vmatprep.subr.bf16.mxu1 %v7262_v61  ;;  %v5204_v48 = vpop.eup %5203 }
 0x448   : > { %5205 = vtanh.f32 %v6531_v50 }
 0x44a   : > { %4460 = vmatpush1.bf16.msra.mxu0 %v7263_v33  ;;  %4492 = vmatpush1.bf16.msra.mxu1 %v7264_v11 }
 0x44b   : > { %4462 = vmatprep.subr.bf16.mxu0 %v7265_v58  ;;  %4494 = vmatprep.subr.bf16.mxu1 %v7211_v28 }
 0x44e   : > { %4464 = vmatpush1.bf16.msra.mxu0 %v7212_v12  ;;  %4496 = vmatpush1.bf16.msra.mxu1 %v7213_v14 }
 0x44f   : > { %4466 = vmatprep.subr.bf16.mxu0 %v7214_v63  ;;  %4498 = vmatprep.subr.bf16.mxu1 %v7215_v16 }
 0x452   : > { %v5206_v57 = vpop.eup %5205  ;;  %4468 = vmatpush1.bf16.msra.mxu0 %v7216_v29  ;;  %4500 = vmatpush1.bf16.msra.mxu1 %v7217_v35 }
 0x453   : > { %4502 = vmatprep.subr.bf16.mxu0 %v7218_v49  ;;  %4534 = vmatprep.subr.bf16.mxu1 %v7219_v19  ;;  %v2135_v42 = vmul.f32 %v5206_v57, %v5204_v48  ;;  %v7268_v48 = vld [vmem:[#allocation41_spill] sm:$0xff]  ;;  %v7269_v57 = vld [vmem:[#allocation42_spill] sm:$0xff] }
 0x455   : > { %2343 = vmatmul.mubr.f32.vlgmr.msra.gmra.mrb[14].mxu0 %v2135_v42  ;;  %2414 = vmatmul.mubr.f32.vlgmr.msra.gmra.mrb[14].mxu1 %v2135_v42 }
 0x456   : > { %4504 = vmatpush1.bf16.msra.mxu0 %v5950_v23  ;;  %4536 = vmatpush1.bf16.msra.mxu1 %v5954_v27 }
 0x457   : > { %4506 = vmatprep.subr.bf16.mxu0 %v5957_v31  ;;  %4538 = vmatprep.subr.bf16.mxu1 %v5959_v32 }
 0x458   : > { %2517 = vmatprep.mubr.f32.mxu0 %v7127_v6  ;;  %2588 = vmatprep.mubr.f32.mxu1 %v7127_v6 }
 0x45a   : > { %4508 = vmatpush1.bf16.msra.mxu0 %v5963_v36  ;;  %4540 = vmatpush1.bf16.msra.mxu1 %v5967_v40 }
 0x45b   : > { %4510 = vmatprep.subr.bf16.mxu0 %v5969_v41  ;;  %4542 = vmatprep.subr.bf16.mxu1 %v5972_v45 }
 0x45e   : > { %4512 = vmatpush1.bf16.msra.mxu0 %v5977_v52  ;;  %4544 = vmatpush1.bf16.msra.mxu1 %v5981_v55 }
 0x45f   : > { %4514 = vmatprep.subr.bf16.mxu0 %v5983_v56  ;;  %4546 = vmatprep.subr.bf16.mxu1 %v5987_v60 }
 0x462   : > { %4516 = vmatpush1.bf16.msra.mxu0 %v5993_v2  ;;  %4548 = vmatpush1.bf16.msra.mxu1 %v5999_v4 }
 0x463   : > { %4518 = vmatprep.subr.bf16.mxu0 %v6001_v5  ;;  %4550 = vmatprep.subr.bf16.mxu1 %v6004_v10 }
 0x466   : > { %4520 = vmatpush1.bf16.msra.mxu0 %v6011_v17  ;;  %4552 = vmatpush1.bf16.msra.mxu1 %v6016_v20 }
 0x467   : > { %4522 = vmatprep.subr.bf16.mxu0 %v6018_v21  ;;  %4554 = vmatprep.subr.bf16.mxu1 %v6021_v26  ;;  %v7270_v26 = vld [vmem:[#allocation43_spill] sm:$0xff] }
 0x46a   : > { %4524 = vmatpush1.bf16.msra.mxu0 %v6028_v37  ;;  %4556 = vmatpush1.bf16.msra.mxu1 %v6033_v38  ;;  %v7271_v37 = vld [vmem:[#allocation44_spill] sm:$0xff]  ;;  %v7304_v38 = vld [vmem:[#allocation110_spill] sm:$0xff] }
 0x46b   : > { %4526 = vmatprep.subr.bf16.mxu0 %v6035_v39  ;;  %4558 = vmatprep.subr.bf16.mxu1 %v6038_v46  ;;  %v7272_v39 = vld [vmem:[#allocation45_spill] sm:$0xff]  ;;  %v7273_v46 = vld [vmem:[#allocation46_spill] sm:$0xff] }
 0x46e   : > { %4528 = vmatpush1.bf16.msra.mxu0 %v6044_v53  ;;  %4560 = vmatpush1.bf16.msra.mxu1 %v6049_v54  ;;  %v7274_v53 = vld [vmem:[#allocation47_spill] sm:$0xff]  ;;  %v7275_v54 = vld [vmem:[#allocation48_spill] sm:$0xff] }
 0x46f   : > { %4530 = vmatprep.subr.bf16.mxu0 %v7266_v1  ;;  %4562 = vmatprep.subr.bf16.mxu1 %v7267_v9  ;;  %v7285_v9 = vld [vmem:[#allocation58_spill] sm:$0xff]  ;;  %v7286_v1 = vld [vmem:[#allocation59_spill] sm:$0xff] }
 0x472   : > { %4532 = vmatpush1.bf16.msra.mxu0 %v7268_v48  ;;  %4564 = vmatpush1.bf16.msra.mxu1 %v7269_v57  ;;  %v7276_v48 = vld [vmem:[#allocation49_spill] sm:$0xff]  ;;  %v7277_v57 = vld [vmem:[#allocation50_spill] sm:$0xff] }
 0x473   : > { %4566 = vmatprep.subr.bf16.mxu0 %v7270_v26  ;;  %4598 = vmatprep.subr.bf16.mxu1 %v7271_v37  ;;  %v7278_v26 = vld [vmem:[#allocation51_spill] sm:$0xff]  ;;  %v7279_v37 = vld [vmem:[#allocation52_spill] sm:$0xff] }
 0x475   : > { %2518 = vmatmul.mubr.f32.vlgmr.msra.gmra.mrb[6].mxu0 %v2135_v42  ;;  %2589 = vmatmul.mubr.f32.vlgmr.msra.gmra.mrb[6].mxu1 %v2135_v42  ;;  %v7280_v42 = vld [vmem:[#allocation53_spill] sm:$0xff] }
 0x476   : > { %4568 = vmatpush1.bf16.msra.mxu0 %v7272_v39  ;;  %4600 = vmatpush1.bf16.msra.mxu1 %v7273_v46  ;;  %v7281_v39 = vld [vmem:[#allocation54_spill] sm:$0xff]  ;;  %v7282_v46 = vld [vmem:[#allocation55_spill] sm:$0xff] }
 0x477   : > { %4570 = vmatprep.subr.bf16.mxu0 %v7274_v53  ;;  %4602 = vmatprep.subr.bf16.mxu1 %v7275_v54  ;;  %v7283_v53 = vld [vmem:[#allocation56_spill] sm:$0xff]  ;;  %v7284_v54 = vld [vmem:[#allocation57_spill] sm:$0xff] }
 0x478   : > { %2687 = vmatprep.mubr.f32.mxu0 %v7127_v6  ;;  %2758 = vmatprep.mubr.f32.mxu1 %v7127_v6 }
 0x47a   : > { %4572 = vmatpush1.bf16.msra.mxu0 %v7276_v48  ;;  %4604 = vmatpush1.bf16.msra.mxu1 %v7277_v57  ;;  %v7287_v48 = vld [vmem:[#allocation60_spill] sm:$0xff]  ;;  %v7288_v57 = vld [vmem:[#allocation61_spill] sm:$0xff] }
 0x47b   : > { %4574 = vmatprep.subr.bf16.mxu0 %v7278_v26  ;;  %4606 = vmatprep.subr.bf16.mxu1 %v7279_v37  ;;  %v7289_v26 = vld [vmem:[#allocation62_spill] sm:$0xff]  ;;  %v7290_v37 = vld [vmem:[#allocation63_spill] sm:$0xff] }
 0x47e   : > { %4576 = vmatpush1.bf16.msra.mxu0 %v7280_v42  ;;  %4608 = vmatpush1.bf16.msra.mxu1 %v7281_v39  ;;  %v7291_v42 = vld [vmem:[#allocation64_spill] sm:$0xff]  ;;  %v7292_v39 = vld [vmem:[#allocation65_spill] sm:$0xff] }
 0x47f   : > { %4578 = vmatprep.subr.bf16.mxu0 %v7282_v46  ;;  %4610 = vmatprep.subr.bf16.mxu1 %v7283_v53  ;;  %v7293_v46 = vld [vmem:[#allocation66_spill] sm:$0xff]  ;;  %v7294_v53 = vld [vmem:[#allocation67_spill] sm:$0xff] }
 0x482   : > { %4580 = vmatpush1.bf16.msra.mxu0 %v7284_v54  ;;  %4612 = vmatpush1.bf16.msra.mxu1 %v7285_v9  ;;  %v7295_v54 = vld [vmem:[#allocation68_spill] sm:$0xff]  ;;  %v7296_v9 = vld [vmem:[#allocation69_spill] sm:$0xff] }
 0x483   : > { %4582 = vmatprep.subr.bf16.mxu0 %v7286_v1  ;;  %4614 = vmatprep.subr.bf16.mxu1 %v7287_v48  ;;  %v7297_v1 = vld [vmem:[#allocation70_spill] sm:$0xff]  ;;  %v7298_v48 = vld [vmem:[#allocation71_spill] sm:$0xff] }
 0x486   : > { %4584 = vmatpush1.bf16.msra.mxu0 %v7288_v57  ;;  %4616 = vmatpush1.bf16.msra.mxu1 %v7289_v26  ;;  %v7299_v57 = vld [vmem:[#allocation72_spill] sm:$0xff]  ;;  %v7300_v26 = vld [vmem:[#allocation73_spill] sm:$0xff] }
 0x487   : > { %4586 = vmatprep.subr.bf16.mxu0 %v7290_v37  ;;  %4618 = vmatprep.subr.bf16.mxu1 %v7291_v42  ;;  %v7301_v37 = vld [vmem:[#allocation74_spill] sm:$0xff]  ;;  %v7302_v42 = vld [vmem:[#allocation75_spill] sm:$0xff] }
 0x48a   : > { %4588 = vmatpush1.bf16.msra.mxu0 %v7292_v39  ;;  %4620 = vmatpush1.bf16.msra.mxu1 %v7293_v46  ;;  %v7303_v39 = vld [vmem:[#allocation76_spill] sm:$0xff] }
 0x48b   : > { %4590 = vmatprep.subr.bf16.mxu0 %v7294_v53  ;;  %4622 = vmatprep.subr.bf16.mxu1 %v7295_v54 }
 0x48e   : > { %4592 = vmatpush1.bf16.msra.mxu0 %v7296_v9  ;;  %4624 = vmatpush1.bf16.msra.mxu1 %v7297_v1 }
 0x48f   : > { %4594 = vmatprep.subr.bf16.mxu0 %v7298_v48  ;;  %4626 = vmatprep.subr.bf16.mxu1 %v7299_v57 }
 0x492   : > { %4596 = vmatpush1.bf16.msra.mxu0 %v7300_v26  ;;  %4628 = vmatpush1.bf16.msra.mxu1 %v7301_v37  ;;  %v7305_v37 = vld [vmem:[#allocation112_spill] sm:$0xff] }
 0x493   : > { %4630 = vmatprep.subr.bf16.mxu0 %v7302_v42  ;;  %4662 = vmatprep.subr.bf16.mxu1 %v7303_v39 }
 0x528   : > { %v2344_v46 = vpop.f32.mrb[14].mxu0  ;;  %v2415_v53 = vpop.f32.mrb[14].mxu1 }
 0x529   : > { %v2420_v54 = vadd.f32 %v2344_v46, %v7304_v38  ;;  %v2346_v21 = vpop.f32.mrb[15].mxu0  ;;  %v2417_v9 = vpop.f32.mrb[15].mxu1  ;;  %v2422_v17 = vadd.f32 %v2415_v53, %v7305_v37 }
 0x52a   : > { %v2421_v1 = vadd.f32 %v2346_v21, %v6373_v51  ;;  %v2423_v26 = vadd.f32 %v2417_v9, %v7244_v59 }
 0x52b   : > { %v3790_v20 = vmul.f32 -1.442695, %v2420_v54 }
 0x52c   : > { %v3791_v48 = vmul.f32 -1.442695, %v2421_v1  ;;  %v3792_v57 = vmul.f32 -1.442695, %v2423_v26 }
 0x52d   : > { %5207 = vpow2.f32 %v3790_v20 }
 0x52e   : > { %5209 = vpow2.f32 %v3791_v48 }
 0x52f   : > { %5211 = vpow2.f32 %v3792_v57 }
 0x530   : > { %5213 = vtanh.f32 %v2422_v17 }
 0x537   : > { %v5208_v42 = vpop.eup %5207 }
 0x538   : > { %v5210_v10 = vpop.eup %5209  ;;  %v2427_v39 = vadd.f32 1.0, %v5208_v42 }
 0x539   : > { %v2433_v5 = vadd.f32 1.0, %v5210_v10  ;;  %v5212_v46 = vpop.eup %5211 }
 0x53a   : > { %5215 = vrcp.f32 %v2427_v39  ;;  %v5214_v38 = vpop.eup %5213  ;;  %v2440_v20 = vadd.f32 1.0, %v5212_v46 }
 0x53b   : > { %5217 = vrcp.f32 %v2433_v5 }
 0x53c   : > { %5219 = vrcp.f32 %v2440_v20 }
 0x544   : > { %v5216_v21 = vpop.eup %5215 }
 0x545   : > { %v5218_v54 = vpop.eup %5217  ;;  %v2444_v1 = vmul.f32 %v5216_v21, %v5214_v38 }
 0x546   : > { %v2443_v48 = vmul.f32 %v5218_v54, %v6505_v34  ;;  %v5220_v34 = vpop.eup %5219 }
 0x548   : > { %v6623_v9 = vadd.f32 %v2444_v1, %v2443_v48  ;;  %v2519_v26 = vpop.f32.mrb[6].mxu0  ;;  %v2590_v53 = vpop.f32.mrb[6].mxu1 }
 0x549   : > { %v4939_v42 = vadd.f32 %v2519_v26, %v7246_v3  ;;  %v2521_v57 = vpop.f32.mrb[7].mxu0  ;;  %v2592_v17 = vpop.f32.mrb[7].mxu1  ;;  %v4949_v54 = vadd.f32 %v2590_v53, %v6290_v13  ;;  %v7306_v53 = vld [vmem:[#allocation82_spill] sm:$0xff] }
 0x54a   : > { %v4940_v10 = vadd.f32 %v2521_v57, %v7186_v24  ;;  %5221 = vtanh.f32 %v6623_v9  ;;  %v4950_v38 = vadd.f32 %v2592_v17, %v7187_v43  ;;  %v7307_v57 = vld [vmem:[#allocation83_spill] sm:$0xff]  ;;  %v7308_v17 = vld [vmem:[#allocation84_spill] sm:$0xff] }
 0x54b   : > { %v3793_v5 = vmul.f32 -1.442695, %v4939_v42 }
 0x54c   : > { %v3794_v39 = vmul.f32 -1.442695, %v4940_v10  ;;  %v3795_v21 = vmul.f32 -1.442695, %v4950_v38  ;;  %v7309_v10 = vld [vmem:[#allocation85_spill] sm:$0xff]  ;;  %v7312_v38 = vld [vmem:[#allocation88_spill] sm:$0xff] }
 0x54d   : > { %5223 = vpow2.f32 %v3793_v5  ;;  %v7310_v5 = vld [vmem:[#allocation86_spill] sm:$0xff] }
 0x54e   : > { %5225 = vpow2.f32 %v3794_v39  ;;  %v7311_v39 = vld [vmem:[#allocation87_spill] sm:$0xff] }
 0x54f   : > { %5227 = vpow2.f32 %v3795_v21 }
 0x550   : > { %5229 = vtanh.f32 %v4949_v54  ;;  %v7313_v54 = vld [vmem:[#allocation89_spill] sm:$0xff] }
 0x554   : > { %v5222_v46 = vpop.eup %5221 }
 0x555   : > { %v2447_v1 = vmul.f32 %v5222_v46, %v5220_v34 }
 0x557   : > { %v5224_v20 = vpop.eup %5223  ;;  %2688 = vmatmul.mubr.f32.vlgmr.msra.gmra.mrb[16].mxu0 %v2447_v1  ;;  %2759 = vmatmul.mubr.f32.vlgmr.msra.gmra.mrb[16].mxu1 %v2447_v1 }
 0x558   : > { %v5226_v48 = vpop.eup %5225  ;;  %v2602_v26 = vadd.f32 1.0, %v5224_v20  ;;  %4632 = vmatpush1.bf16.msra.mxu0 %v7188_v25  ;;  %4664 = vmatpush1.bf16.msra.mxu1 %v7247_v22 }
 0x559   : > { %v2608_v42 = vadd.f32 1.0, %v5226_v48  ;;  %4634 = vmatprep.subr.bf16.mxu0 %v7248_v62  ;;  %4666 = vmatprep.subr.bf16.mxu1 %v7249_v7  ;;  %v5228_v34 = vpop.eup %5227 }
 0x55a   : > { %5231 = vrcp.f32 %v2602_v26  ;;  %2829 = vmatprep.mubr.f32.mxu0 %v7127_v6  ;;  %2900 = vmatprep.mubr.f32.mxu1 %v7127_v6  ;;  %v5230_v46 = vpop.eup %5229  ;;  %v2615_v48 = vadd.f32 1.0, %v5228_v34 }
 0x55b   : > { %5233 = vrcp.f32 %v2608_v42 }
 0x55c   : > { %4636 = vmatpush1.bf16.msra.mxu0 %v7250_v47  ;;  %4668 = vmatpush1.bf16.msra.mxu1 %v7306_v53  ;;  %5235 = vrcp.f32 %v2615_v48  ;;  %v7333_v48 = vld [vmem:[#allocation46_spill] sm:$0xff] }
 0x55d   : > { %4638 = vmatprep.subr.bf16.mxu0 %v7307_v57  ;;  %4670 = vmatprep.subr.bf16.mxu1 %v7308_v17 }
 0x560   : > { %4640 = vmatpush1.bf16.msra.mxu0 %v7309_v10  ;;  %4672 = vmatpush1.bf16.msra.mxu1 %v7310_v5 }
 0x561   : > { %4642 = vmatprep.subr.bf16.mxu0 %v7311_v39  ;;  %4674 = vmatprep.subr.bf16.mxu1 %v7312_v38 }
 0x564   : > { %v5232_v21 = vpop.eup %5231  ;;  %4644 = vmatpush1.bf16.msra.mxu0 %v7313_v54  ;;  %4676 = vmatpush1.bf16.msra.mxu1 %v7201_v18 }
 0x565   : > { %v5234_v1 = vpop.eup %5233  ;;  %v2619_v20 = vmul.f32 %v5232_v21, %v5230_v46  ;;  %4646 = vmatprep.subr.bf16.mxu0 %v7202_v8  ;;  %4678 = vmatprep.subr.bf16.mxu1 %v7203_v0  ;;  %v7330_v21 = vld [vmem:[#allocation43_spill] sm:$0xff] }
 0x566   : > { %v2618_v26 = vmul.f32 %v5234_v1, %v6531_v50  ;;  %v5236_v50 = vpop.eup %5235  ;;  %v7331_v1 = vld [vmem:[#allocation44_spill] sm:$0xff] }
 0x568   : > { %v6649_v42 = vadd.f32 %v2619_v20, %v2618_v26  ;;  %4648 = vmatpush1.bf16.msra.mxu0 %v7259_v15  ;;  %4680 = vmatpush1.bf16.msra.mxu1 %v7260_v44  ;;  %v7332_v20 = vld [vmem:[#allocation45_spill] sm:$0xff]  ;;  %v7334_v26 = vld [vmem:[#allocation47_spill] sm:$0xff] }
 0x569   : > { %4650 = vmatprep.subr.bf16.mxu0 %v7261_v30  ;;  %4682 = vmatprep.subr.bf16.mxu1 %v7262_v61 }
 0x56a   : > { %5237 = vtanh.f32 %v6649_v42 }
 0x56c   : > { %4652 = vmatpush1.bf16.msra.mxu0 %v7263_v33  ;;  %4684 = vmatpush1.bf16.msra.mxu1 %v7264_v11 }
 0x56d   : > { %4654 = vmatprep.subr.bf16.mxu0 %v7265_v58  ;;  %4686 = vmatprep.subr.bf16.mxu1 %v7211_v28 }
 0x570   : > { %4656 = vmatpush1.bf16.msra.mxu0 %v7212_v12  ;;  %4688 = vmatpush1.bf16.msra.mxu1 %v7213_v14 }
 0x571   : > { %4658 = vmatprep.subr.bf16.mxu0 %v7214_v63  ;;  %4690 = vmatprep.subr.bf16.mxu1 %v7215_v16 }
 0x574   : > { %v5238_v34 = vpop.eup %5237  ;;  %4660 = vmatpush1.bf16.msra.mxu0 %v7216_v29  ;;  %4692 = vmatpush1.bf16.msra.mxu1 %v7217_v35 }
 0x575   : > { %v2622_v46 = vmul.f32 %v5238_v34, %v5236_v50  ;;  %4694 = vmatprep.subr.bf16.mxu0 %v7218_v49  ;;  %4726 = vmatprep.subr.bf16.mxu1 %v7219_v19  ;;  %v7328_v49 = vld [vmem:[#allocation41_spill] sm:$0xff]  ;;  %v7329_v19 = vld [vmem:[#allocation42_spill] sm:$0xff]  ;;  %v7335_v50 = vld [vmem:[#allocation48_spill] sm:$0xff] }
 0x576   : > { %v7336_v34 = vld [vmem:[#allocation49_spill] sm:$0xff] }
 0x577   : > { %2830 = vmatmul.mubr.f32.vlgmr.msra.gmra.mrb[16].mxu0 %v2622_v46  ;;  %2901 = vmatmul.mubr.f32.vlgmr.msra.gmra.mrb[16].mxu1 %v2622_v46 }
 0x578   : > { %4696 = vmatpush1.bf16.msra.mxu0 %v5950_v23  ;;  %4728 = vmatpush1.bf16.msra.mxu1 %v5954_v27  ;;  %v7314_v23 = vld [vmem:[#allocation27_spill] sm:$0xff]  ;;  %v7315_v27 = vld [vmem:[#allocation28_spill] sm:$0xff] }
 0x579   : > { %4698 = vmatprep.subr.bf16.mxu0 %v5957_v31  ;;  %4730 = vmatprep.subr.bf16.mxu1 %v5959_v32  ;;  %v7316_v31 = vld [vmem:[#allocation29_spill] sm:$0xff]  ;;  %v7317_v32 = vld [vmem:[#allocation30_spill] sm:$0xff] }
 0x57a   : > { %3004 = vmatprep.mubr.f32.mxu0 %v7127_v6  ;;  %3075 = vmatprep.mubr.f32.mxu1 %v7127_v6 }
 0x57c   : > { %4700 = vmatpush1.bf16.msra.mxu0 %v5963_v36  ;;  %4732 = vmatpush1.bf16.msra.mxu1 %v5967_v40  ;;  %v7318_v36 = vld [vmem:[#allocation31_spill] sm:$0xff]  ;;  %v7319_v40 = vld [vmem:[#allocation32_spill] sm:$0xff] }
 0x57d   : > { %4702 = vmatprep.subr.bf16.mxu0 %v5969_v41  ;;  %4734 = vmatprep.subr.bf16.mxu1 %v5972_v45  ;;  %v7320_v41 = vld [vmem:[#allocation33_spill] sm:$0xff]  ;;  %v7321_v45 = vld [vmem:[#allocation34_spill] sm:$0xff] }
 0x580   : > { %4704 = vmatpush1.bf16.msra.mxu0 %v5977_v52  ;;  %4736 = vmatpush1.bf16.msra.mxu1 %v5981_v55  ;;  %v7322_v52 = vld [vmem:[#allocation35_spill] sm:$0xff]  ;;  %v7323_v55 = vld [vmem:[#allocation36_spill] sm:$0xff] }
 0x581   : > { %4706 = vmatprep.subr.bf16.mxu0 %v5983_v56  ;;  %4738 = vmatprep.subr.bf16.mxu1 %v5987_v60  ;;  %v7324_v56 = vld [vmem:[#allocation37_spill] sm:$0xff]  ;;  %v7325_v60 = vld [vmem:[#allocation38_spill] sm:$0xff] }
 0x584   : > { %4708 = vmatpush1.bf16.msra.mxu0 %v5993_v2  ;;  %4740 = vmatpush1.bf16.msra.mxu1 %v5999_v4  ;;  %v7326_v2 = vld [vmem:[#allocation39_spill] sm:$0xff]  ;;  %v7327_v4 = vld [vmem:[#allocation40_spill] sm:$0xff] }
 0x585   : > { %4710 = vmatprep.subr.bf16.mxu0 %v7314_v23  ;;  %4742 = vmatprep.subr.bf16.mxu1 %v7315_v27  ;;  %v7337_v23 = vld [vmem:[#allocation50_spill] sm:$0xff]  ;;  %v7338_v27 = vld [vmem:[#allocation51_spill] sm:$0xff] }
 0x588   : > { %4712 = vmatpush1.bf16.msra.mxu0 %v7316_v31  ;;  %4744 = vmatpush1.bf16.msra.mxu1 %v7317_v32  ;;  %v7339_v31 = vld [vmem:[#allocation52_spill] sm:$0xff]  ;;  %v7341_v32 = vld [vmem:[#allocation54_spill] sm:$0xff] }
 0x589   : > { %4714 = vmatprep.subr.bf16.mxu0 %v7318_v36  ;;  %4746 = vmatprep.subr.bf16.mxu1 %v7319_v40  ;;  %v7342_v36 = vld [vmem:[#allocation55_spill] sm:$0xff]  ;;  %v7343_v40 = vld [vmem:[#allocation56_spill] sm:$0xff] }
 0x58c   : > { %4716 = vmatpush1.bf16.msra.mxu0 %v7320_v41  ;;  %4748 = vmatpush1.bf16.msra.mxu1 %v7321_v45  ;;  %v7344_v41 = vld [vmem:[#allocation57_spill] sm:$0xff]  ;;  %v7345_v45 = vld [vmem:[#allocation58_spill] sm:$0xff] }
 0x58d   : > { %4718 = vmatprep.subr.bf16.mxu0 %v7322_v52  ;;  %4750 = vmatprep.subr.bf16.mxu1 %v7323_v55  ;;  %v7346_v52 = vld [vmem:[#allocation59_spill] sm:$0xff]  ;;  %v7347_v55 = vld [vmem:[#allocation60_spill] sm:$0xff] }
 0x590   : > { %4720 = vmatpush1.bf16.msra.mxu0 %v7324_v56  ;;  %4752 = vmatpush1.bf16.msra.mxu1 %v7325_v60  ;;  %v7348_v56 = vld [vmem:[#allocation61_spill] sm:$0xff]  ;;  %v7349_v60 = vld [vmem:[#allocation62_spill] sm:$0xff] }
 0x591   : > { %4722 = vmatprep.subr.bf16.mxu0 %v7326_v2  ;;  %4754 = vmatprep.subr.bf16.mxu1 %v7327_v4  ;;  %v7350_v2 = vld [vmem:[#allocation63_spill] sm:$0xff]  ;;  %v7351_v4 = vld [vmem:[#allocation64_spill] sm:$0xff] }
 0x594   : > { %4724 = vmatpush1.bf16.msra.mxu0 %v7328_v49  ;;  %4756 = vmatpush1.bf16.msra.mxu1 %v7329_v19  ;;  %v7352_v49 = vld [vmem:[#allocation65_spill] sm:$0xff]  ;;  %v7353_v19 = vld [vmem:[#allocation66_spill] sm:$0xff] }
 0x595   : > { %4758 = vmatprep.subr.bf16.mxu0 %v7330_v21  ;;  %4790 = vmatprep.subr.bf16.mxu1 %v7331_v1  ;;  %v7354_v21 = vld [vmem:[#allocation67_spill] sm:$0xff]  ;;  %v7355_v1 = vld [vmem:[#allocation68_spill] sm:$0xff] }
 0x597   : > { %3005 = vmatmul.mubr.f32.vlgmr.msra.gmra.mrb[8].mxu0 %v2622_v46  ;;  %3076 = vmatmul.mubr.f32.vlgmr.msra.gmra.mrb[8].mxu1 %v2622_v46  ;;  %v7340_v46 = vld [vmem:[#allocation53_spill] sm:$0xff] }
 0x598   : > { %4760 = vmatpush1.bf16.msra.mxu0 %v7332_v20  ;;  %4792 = vmatpush1.bf16.msra.mxu1 %v7333_v48  ;;  %v7356_v20 = vld [vmem:[#allocation69_spill] sm:$0xff]  ;;  %v7357_v48 = vld [vmem:[#allocation70_spill] sm:$0xff] }
 0x599   : > { %4762 = vmatprep.subr.bf16.mxu0 %v7334_v26  ;;  %4794 = vmatprep.subr.bf16.mxu1 %v7335_v50  ;;  %v7358_v26 = vld [vmem:[#allocation71_spill] sm:$0xff]  ;;  %v7359_v50 = vld [vmem:[#allocation72_spill] sm:$0xff] }
 0x59a   : > { %3174 = vmatprep.mubr.f32.mxu0 %v7127_v6  ;;  %3245 = vmatprep.mubr.f32.mxu1 %v7127_v6 }
 0x59c   : > { %4764 = vmatpush1.bf16.msra.mxu0 %v7336_v34  ;;  %4796 = vmatpush1.bf16.msra.mxu1 %v7337_v23  ;;  %v7360_v34 = vld [vmem:[#allocation73_spill] sm:$0xff]  ;;  %v7361_v23 = vld [vmem:[#allocation74_spill] sm:$0xff] }
 0x59d   : > { %4766 = vmatprep.subr.bf16.mxu0 %v7338_v27  ;;  %4798 = vmatprep.subr.bf16.mxu1 %v7339_v31  ;;  %v7362_v27 = vld [vmem:[#allocation75_spill] sm:$0xff]  ;;  %v7363_v31 = vld [vmem:[#allocation76_spill] sm:$0xff] }
 0x5a0   : > { %4768 = vmatpush1.bf16.msra.mxu0 %v7340_v46  ;;  %4800 = vmatpush1.bf16.msra.mxu1 %v7341_v32 }
 0x5a1   : > { %4770 = vmatprep.subr.bf16.mxu0 %v7342_v36  ;;  %4802 = vmatprep.subr.bf16.mxu1 %v7343_v40  ;;  %v7364_v36 = vld [vmem:[#allocation110_spill] sm:$0xff] }
 0x5a4   : > { %4772 = vmatpush1.bf16.msra.mxu0 %v7344_v41  ;;  %4804 = vmatpush1.bf16.msra.mxu1 %v7345_v45 }
 0x5a5   : > { %4774 = vmatprep.subr.bf16.mxu0 %v7346_v52  ;;  %4806 = vmatprep.subr.bf16.mxu1 %v7347_v55 }
 0x5a8   : > { %4776 = vmatpush1.bf16.msra.mxu0 %v7348_v56  ;;  %4808 = vmatpush1.bf16.msra.mxu1 %v7349_v60 }
 0x5a9   : > { %4778 = vmatprep.subr.bf16.mxu0 %v7350_v2  ;;  %4810 = vmatprep.subr.bf16.mxu1 %v7351_v4 }
 0x5ac   : > { %4780 = vmatpush1.bf16.msra.mxu0 %v7352_v49  ;;  %4812 = vmatpush1.bf16.msra.mxu1 %v7353_v19 }
 0x5ad   : > { %4782 = vmatprep.subr.bf16.mxu0 %v7354_v21  ;;  %4814 = vmatprep.subr.bf16.mxu1 %v7355_v1 }
 0x5b0   : > { %4784 = vmatpush1.bf16.msra.mxu0 %v7356_v20  ;;  %4816 = vmatpush1.bf16.msra.mxu1 %v7357_v48 }
 0x5b1   : > { %4786 = vmatprep.subr.bf16.mxu0 %v7358_v26  ;;  %4818 = vmatprep.subr.bf16.mxu1 %v7359_v50 }
 0x5b4   : > { %4788 = vmatpush1.bf16.msra.mxu0 %v7360_v34  ;;  %4820 = vmatpush1.bf16.msra.mxu1 %v7361_v23 }
 0x5b5   : > { %4822 = vmatprep.subr.bf16.mxu0 %v7362_v27  ;;  %4854 = vmatprep.subr.bf16.mxu1 %v7363_v31 }
 0x64a   : > { %v2831_v46 = vpop.f32.mrb[16].mxu0  ;;  %v2902_v32 = vpop.f32.mrb[16].mxu1 }
 0x64b   : > { %v2907_v40 = vadd.f32 %v2831_v46, %v7364_v36  ;;  %v2833_v41 = vpop.f32.mrb[17].mxu0  ;;  %v2904_v45 = vpop.f32.mrb[17].mxu1  ;;  %v2909_v4 = vadd.f32 %v2902_v32, %v7305_v37 }
 0x64c   : > { %v2908_v52 = vadd.f32 %v2833_v41, %v6373_v51  ;;  %v2910_v60 = vadd.f32 %v2904_v45, %v7244_v59 }
 0x64d   : > { %v3796_v55 = vmul.f32 -1.442695, %v2907_v40 }
 0x64e   : > { %v3797_v56 = vmul.f32 -1.442695, %v2908_v52  ;;  %v3798_v2 = vmul.f32 -1.442695, %v2910_v60 }
 0x64f   : > { %5239 = vpow2.f32 %v3796_v55 }
 0x650   : > { %5241 = vpow2.f32 %v3797_v56 }
 0x651   : > { %5243 = vpow2.f32 %v3798_v2 }
 0x652   : > { %5245 = vtanh.f32 %v2909_v4 }
 0x659   : > { %v5240_v49 = vpop.eup %5239 }
 0x65a   : > { %v5242_v19 = vpop.eup %5241  ;;  %v2914_v21 = vadd.f32 1.0, %v5240_v49 }
 0x65b   : > { %v2920_v1 = vadd.f32 1.0, %v5242_v19  ;;  %v5244_v20 = vpop.eup %5243 }
 0x65c   : > { %5247 = vrcp.f32 %v2914_v21  ;;  %v5246_v48 = vpop.eup %5245  ;;  %v2927_v23 = vadd.f32 1.0, %v5244_v20  ;;  %v3431_v20 = vld [vmem:[#allocation16 + $0x8] sm:$0xff] (!%p3805_p5) }
 0x65d   : > { %5249 = vrcp.f32 %v2920_v1 }
 0x65e   : > { %5251 = vrcp.f32 %v2927_v23  ;;  %v5594_v23 = vmov (!%p3805_p5), 0.0  }
 0x666   : > { %v5248_v26 = vpop.eup %5247 }
 0x667   : > { %v5250_v50 = vpop.eup %5249  ;;  %v2931_v34 = vmul.f32 %v5248_v26, %v5246_v48  ;;  %v3432_v48 = vld [vmem:[#allocation16 + $0x10] sm:$0xff] (!%p3805_p5)  ;;  %v5592_v26 = vmov (!%p3805_p5), 0.0|0.0  }
 0x668   : > { %v2930_v27 = vmul.f32 %v5250_v50, %v6623_v9  ;;  %v5252_v9 = vpop.eup %5251 }
 0x66a   : > { %v6741_v31 = vadd.f32 %v2931_v34, %v2930_v27  ;;  %v3006_v46 = vpop.f32.mrb[8].mxu0  ;;  %v3077_v32 = vpop.f32.mrb[8].mxu1  ;;  %v3433_v34 = vld [vmem:[#allocation16 + $0x18] sm:$0xff] (!%p3805_p5) }
 0x66b   : > { %v4941_v40 = vadd.f32 %v3006_v46, %v7246_v3  ;;  %v3008_v41 = vpop.f32.mrb[9].mxu0  ;;  %v3079_v45 = vpop.f32.mrb[9].mxu1  ;;  %v4951_v49 = vadd.f32 %v3077_v32, %v6290_v13  ;;  %v4889_v27 = vpack.c.bf16 (!%p3805_p5), %v3433_v34, %v3432_v48  ;;  %v3435_v46 = vld [vmem:[#allocation16 + $0x28] sm:$0xff] (!%p3805_p5)  ;;  %v3524_v32 = vld [vmem:[#allocation18] sm:$0xff] (!%p3805_p5) }
 0x66c   : > { %v4942_v52 = vadd.f32 %v3008_v41, %v7186_v24  ;;  %5253 = vtanh.f32 %v6741_v31  ;;  %v4952_v60 = vadd.f32 %v3079_v45, %v7187_v43  ;;  %v3526_v45 = vld [vmem:[#allocation18 + $0x10] sm:$0xff] (!%p3805_p5) }
 0x66d   : > { %v3799_v55 = vmul.f32 -1.442695, %v4941_v40  ;;  %v3525_v40 = vld [vmem:[#allocation18 + $0x8] sm:$0xff] (!%p3805_p5) }
 0x66e   : > { %v3800_v56 = vmul.f32 -1.442695, %v4942_v52  ;;  %v3801_v4 = vmul.f32 -1.442695, %v4952_v60  ;;  %v4910_v41 = vpack.c.bf16 (!%p3805_p5), %v3525_v40, %v3524_v32  ;;  %v3527_v52 = vld [vmem:[#allocation18 + $0x18] sm:$0xff] (!%p3805_p5) }
 0x66f   : > { %5255 = vpow2.f32 %v3799_v55  ;;  %v3437_v60 = vld [vmem:[#allocation16 + $0x38] sm:$0xff] (!%p3805_p5) }
 0x670   : > { %5257 = vpow2.f32 %v3800_v56  ;;  %v3436_v56 = vld [vmem:[#allocation16 + $0x30] sm:$0xff] (!%p3805_p5) }
 0x671   : > { %5259 = vpow2.f32 %v3801_v4  ;;  %v3529_v4 = vld [vmem:[#allocation18 + $0x28] sm:$0xff] (!%p3805_p5) }
 0x672   : > { %5261 = vtanh.f32 %v4951_v49  ;;  %v4895_v49 = vpack.c.bf16 (!%p3805_p5), %v3437_v60, %v3436_v56 }
 0x676   : > { %v5254_v2 = vpop.eup %5253 }
 0x677   : > { %v2934_v19 = vmul.f32 %v5254_v2, %v5252_v9  ;;  %v4913_v9 = vpack.c.bf16 (!%p3805_p5), %v3527_v52, %v3526_v45  ;;  %v3528_v2 = vld [vmem:[#allocation18 + $0x20] sm:$0xff] (!%p3805_p5) }
 0x679   : > { %v5256_v21 = vpop.eup %5255  ;;  %3175 = vmatmul.mubr.f32.vlgmr.msra.gmra.mrb[18].mxu0 %v2934_v19  ;;  %3246 = vmatmul.mubr.f32.vlgmr.msra.gmra.mrb[18].mxu1 %v2934_v19  ;;  %v3438_v19 = vld [vmem:[#allocation16 + $0x40] sm:$0xff] (!%p3805_p5) }
 0x67a   : > { %v5258_v3 = vpop.eup %5257  ;;  %v3089_v1 = vadd.f32 1.0, %v5256_v21  ;;  %4824 = vmatpush1.bf16.msra.mxu0 %v7188_v25  ;;  %4856 = vmatpush1.bf16.msra.mxu1 %v7247_v22  ;;  %v3439_v21 = vld [vmem:[#allocation16 + $0x48] sm:$0xff] (!%p3805_p5) }
 0x67b   : > { %v3095_v24 = vadd.f32 1.0, %v5258_v3  ;;  %4826 = vmatprep.subr.bf16.mxu0 %v7248_v62  ;;  %4858 = vmatprep.subr.bf16.mxu1 %v7249_v7  ;;  %v5260_v13 = vpop.eup %5259  ;;  %v4916_v3 = vpack.c.bf16 (!%p3805_p5), %v3529_v4, %v3528_v2 }
 0x67c   : > { %5263 = vrcp.f32 %v3089_v1  ;;  %3316 = vmatprep.mubr.f32.mxu0 %v7127_v6  ;;  %3387 = vmatprep.mubr.f32.mxu1 %v7127_v6  ;;  %v5262_v43 = vpop.eup %5261  ;;  %v3102_v62 = vadd.f32 1.0, %v5260_v13  ;;  %v3530_v1 = vld [vmem:[#allocation18 + $0x30] sm:$0xff] (!%p3805_p5)  ;;  %v4898_v13 = vpack.c.bf16 (!%p3805_p5), %v3439_v21, %v3438_v19 }
 0x67d   : > { %5265 = vrcp.f32 %v3095_v24  ;;  %v3531_v24 = vld [vmem:[#allocation18 + $0x38] sm:$0xff] (!%p3805_p5) }
 0x67e   : > { %4828 = vmatpush1.bf16.msra.mxu0 %v7250_v47  ;;  %4860 = vmatpush1.bf16.msra.mxu1 %v7306_v53  ;;  %5267 = vrcp.f32 %v3102_v62  ;;  %v3533_v62 = vld [vmem:[#allocation18 + $0x48] sm:$0xff] (!%p3805_p5) }
 0x67f   : > { %4830 = vmatprep.subr.bf16.mxu0 %v7307_v57  ;;  %4862 = vmatprep.subr.bf16.mxu1 %v7308_v17 }
 0x682   : > { %4832 = vmatpush1.bf16.msra.mxu0 %v7309_v10  ;;  %4864 = vmatpush1.bf16.msra.mxu1 %v7310_v5 }
 0x683   : > { %4834 = vmatprep.subr.bf16.mxu0 %v7311_v39  ;;  %4866 = vmatprep.subr.bf16.mxu1 %v7312_v38 }
 0x686   : > { %v5264_v6 = vpop.eup %5263  ;;  %4836 = vmatpush1.bf16.msra.mxu0 %v7313_v54  ;;  %4868 = vmatpush1.bf16.msra.mxu1 %v7201_v18 }
 0x687   : > { %v5266_v25 = vpop.eup %5265  ;;  %v3106_v22 = vmul.f32 %v5264_v6, %v5262_v43  ;;  %4838 = vmatprep.subr.bf16.mxu0 %v7202_v8  ;;  %4870 = vmatprep.subr.bf16.mxu1 %v7203_v0  ;;  %v3440_v43 = vld [vmem:[#allocation16 + $0x50] sm:$0xff] (!%p3805_p5)  ;;  %v3441_v6 = vld [vmem:[#allocation16 + $0x58] sm:$0xff] (!%p3805_p5) }
 0x688   : > { %v3105_v7 = vmul.f32 %v5266_v25, %v6649_v42  ;;  %v5268_v8 = vpop.eup %5267  ;;  %v4919_v25 = vpack.c.bf16 (!%p3805_p5), %v3531_v24, %v3530_v1 }
 0x68a   : > { %v3107_v47 = vadd.f32 %v3106_v22, %v3105_v7  ;;  %4840 = vmatpush1.bf16.msra.mxu0 %v7259_v15  ;;  %4872 = vmatpush1.bf16.msra.mxu1 %v7260_v44  ;;  %v3532_v22 = vld [vmem:[#allocation18 + $0x40] sm:$0xff] (!%p3805_p5)  ;;  %v4901_v7 = vpack.c.bf16 (!%p3805_p5), %v3441_v6, %v3440_v43 }
 0x68b   : > { %4842 = vmatprep.subr.bf16.mxu0 %v7261_v30  ;;  %4874 = vmatprep.subr.bf16.mxu1 %v7262_v61 }
 0x68c   : > { %3423 = vst [vmem:[#allocation4] sm:$0xff] %v3107_v47  ;;  %5269 = vtanh.f32 %v3107_v47  ;;  %v3442_v47 = vld [vmem:[#allocation16 + $0x60] sm:$0xff] (!%p3805_p5) }
 0x68e   : > { %4844 = vmatpush1.bf16.msra.mxu0 %v7263_v33  ;;  %4876 = vmatpush1.bf16.msra.mxu1 %v7264_v11 }
 0x68f   : > { %4846 = vmatprep.subr.bf16.mxu0 %v7265_v58  ;;  %4878 = vmatprep.subr.bf16.mxu1 %v7211_v28 }
 0x692   : > { %4848 = vmatpush1.bf16.msra.mxu0 %v7212_v12  ;;  %4880 = vmatpush1.bf16.msra.mxu1 %v7213_v14 }
 0x693   : > { %4850 = vmatprep.subr.bf16.mxu0 %v7214_v63  ;;  %4882 = vmatprep.subr.bf16.mxu1 %v7215_v16 }
 0x696   : > { %v5270_v18 = vpop.eup %5269  ;;  %4852 = vmatpush1.bf16.msra.mxu0 %v7216_v29  ;;  %4884 = vmatpush1.bf16.msra.mxu1 %v7217_v35 }
 0x697   : > { %v3109_v0 = vmul.f32 %v5270_v18, %v5268_v8  ;;  %4885 = vmatprep.subr.bf16.mxu0 (!%p3805_p5), %v5592_v26  ;;  %4909 = vmatprep.subr.bf16.mxu1 (!%p3805_p5), %v5592_v26  ;;  %v3443_v8 = vld [vmem:[#allocation16 + $0x68] sm:$0xff] (!%p3805_p5)  ;;  %v4922_v18 = vpack.c.bf16 (!%p3805_p5), %v3533_v62, %v3532_v22 }
 0x699   : > { %3317 = vmatmul.mubr.f32.vlgmr.msra.gmra.mrb[18].mxu0 %v3109_v0  ;;  %3422 = vst [vmem:[#allocation3] sm:$0xff] %v3109_v0  ;;  %3388 = vmatmul.mubr.f32.vlgmr.msra.gmra.mrb[18].mxu1 %v3109_v0  ;;  %v3534_v0 = vld [vmem:[#allocation18 + $0x50] sm:$0xff] (!%p3805_p5) }
 0x69a   : > { %3879 = vmatprep.mubr.msk.f32.mxu0 (!%p3805_p5), %vm5593_vm1, %v5594_v23  ;;  %3914 = vmatprep.mubr.msk.f32.mxu1 (!%p3805_p5), %vm5593_vm1, %v5594_v23 }
 0x69b   : > { %4911 = vmatpush3.bf16.msra.mxu1 (!%p3805_p5), %v4910_v41 }
 0x69c   : > { %4912 = vmatprep.subr.bf16.mxu1 (!%p3805_p5), %v5592_v26 }
 0x69f   : > { %4914 = vmatpush3.bf16.msra.mxu1 (!%p3805_p5), %v4913_v9 }
 0x6a0   : > { %4915 = vmatprep.subr.bf16.mxu1 (!%p3805_p5), %v5592_v26 }
 0x6a3   : > { %4917 = vmatpush3.bf16.msra.mxu1 (!%p3805_p5), %v4916_v3 }
 0x6a4   : > { %4918 = vmatprep.subr.bf16.mxu1 (!%p3805_p5), %v5592_v26 }
 0x6a7   : > { %4920 = vmatpush3.bf16.msra.mxu1 (!%p3805_p5), %v4919_v25 }
 0x6a8   : > { %4921 = vmatprep.subr.bf16.mxu1 (!%p3805_p5), %v5592_v26 }
 0x6ab   : > { %4923 = vmatpush3.bf16.msra.mxu1 (!%p3805_p5), %v4922_v18 }
 0x6ac   : > { %4924 = vmatprep.subr.bf16.mxu1 (!%p3805_p5), %v5592_v26 }
 0x76c   : > { %v3318_v30 = vpop.f32.mrb[18].mxu0  ;;  %v3389_v28 = vpop.f32.mrb[18].mxu1 }
 0x76d   : > { %v3394_v12 = vadd.f32 %v3318_v30, %v7364_v36  ;;  %v3320_v15 = vpop.f32.mrb[19].mxu0  ;;  %v3391_v14 = vpop.f32.mrb[19].mxu1  ;;  %v3396_v35 = vadd.f32 %v3389_v28, %v7305_v37  ;;  %v3430_v36 = vld [vmem:[#allocation16] sm:$0xff] (!%p3805_p5)  ;;  %v3535_v30 = vld [vmem:[#allocation18 + $0x58] sm:$0xff] (!%p3805_p5)  ;;  %v4904_v28 = vpack.c.bf16 (!%p3805_p5), %v3443_v8, %v3442_v47 }
 0x76e   : > { %v3395_v63 = vadd.f32 %v3320_v15, %v6373_v51  ;;  %v3397_v29 = vadd.f32 %v3391_v14, %v7244_v59  ;;  %v4886_v50 = vpack.c.bf16 (!%p3805_p5), %v3431_v20, %v3430_v36  ;;  %v3445_v15 = vld [vmem:[#allocation16 + $0x78] sm:$0xff] (!%p3805_p5)  ;;  %v4925_v14 = vpack.c.bf16 (!%p3805_p5), %v3535_v30, %v3534_v0 }
 0x76f   : > { %v3802_v44 = vmul.f32 -1.442695, %v3394_v12  ;;  %v3444_v12 = vld [vmem:[#allocation16 + $0x70] sm:$0xff] (!%p3805_p5) }
 0x770   : > { %v3803_v16 = vmul.f32 -1.442695, %v3395_v63  ;;  %v3804_v61 = vmul.f32 -1.442695, %v3397_v29  ;;  %4887 = vmatpush3.bf16.msra.mxu0 (!%p3805_p5), %v4886_v50  ;;  %v3536_v63 = vld [vmem:[#allocation18 + $0x60] sm:$0xff] (!%p3805_p5)  ;;  %4926 = vmatpush3.bf16.msra.mxu1 (!%p3805_p5), %v4925_v14 }
 0x771   : > { %5271 = vpow2.f32 %v3802_v44  ;;  %4888 = vmatprep.subr.bf16.mxu0 (!%p3805_p5), %v5592_v26  ;;  %v3537_v44 = vld [vmem:[#allocation18 + $0x68] sm:$0xff] (!%p3805_p5)  ;;  %4927 = vmatprep.subr.bf16.mxu1 (!%p3805_p5), %v5592_v26 }
 0x772   : > { %5273 = vpow2.f32 %v3803_v16  ;;  %v4907_v16 = vpack.c.bf16 (!%p3805_p5), %v3445_v15, %v3444_v12  ;;  %v4928_v29 = vpack.c.bf16 (!%p3805_p5), %v3537_v44, %v3536_v63 }
 0x773   : > { %5275 = vpow2.f32 %v3804_v61  ;;  %v3538_v61 = vld [vmem:[#allocation18 + $0x70] sm:$0xff] (!%p3805_p5) }
 0x774   : > { %5277 = vtanh.f32 %v3396_v35  ;;  %4890 = vmatpush3.bf16.msra.mxu0 (!%p3805_p5), %v4889_v27  ;;  %4929 = vmatpush3.bf16.msra.mxu1 (!%p3805_p5), %v4928_v29  ;;  %v3539_v35 = vld [vmem:[#allocation18 + $0x78] sm:$0xff] (!%p3805_p5) }
 0x775   : > { %4891 = vmatprep.subr.bf16.mxu0 (!%p3805_p5), %v5592_v26  ;;  %4930 = vmatprep.subr.bf16.mxu1 (!%p3805_p5), %v5592_v26 }
 0x77b   : > { %v5272_v33 = vpop.eup %5271 }
 0x77c   : > { %v5274_v11 = vpop.eup %5273  ;;  %v3401_v58 = vadd.f32 1.0, %v5272_v33  ;;  %v4931_v33 = vpack.c.bf16 (!%p3805_p5), %v3539_v35, %v3538_v61 }
 0x77d   : > { %v3407_v53 = vadd.f32 1.0, %v5274_v11  ;;  %v5276_v57 = vpop.eup %5275  ;;  %v3806_v11 = vld [vmem:[%s7365_s13] ss:$0 sm:$0xff] (!%p3805_p5) }
 0x77e   : > { %5279 = vrcp.f32 %v3401_v58  ;;  %v5278_v17 = vpop.eup %5277  ;;  %v3414_v39 = vadd.f32 1.0, %v5276_v57  ;;  %4932 = vmatpush3.bf16.msra.mxu1 (!%p3805_p5), %v4931_v33 }
 0x77f   : > { %5281 = vrcp.f32 %v3407_v53 }
 0x780   : > { %5283 = vrcp.f32 %v3414_v39 }
 0x788   : > { %v5280_v51 = vpop.eup %5279 }
 0x789   : > { %v5282_v10 = vpop.eup %5281  ;;  %v3418_v5 = vmul.f32 %v5280_v51, %v5278_v17  ;;  %v3807_v51 = vld [vmem:[%s7366_s10] ss:$0 sm:$0xff] (!%p3805_p5) }
 0x78a   : > { %v3417_v38 = vmul.f32 %v5282_v10, %v6741_v31  ;;  %v5284_v37 = vpop.eup %5283  ;;  %v3434_v31 = vld [vmem:[#allocation16 + $0x20] sm:$0xff] (!%p3805_p5) }
 0x78b   : > { %v4892_v55 = vpack.c.bf16 (!%p3805_p5), %v3435_v46, %v3434_v31 }
 0x78c   : > { %v3419_v59 = vadd.f32 %v3418_v5, %v3417_v38 }
 0x78d   : > { %4893 = vmatpush3.bf16.msra.mxu0 (!%p3805_p5), %v4892_v55 }
 0x78e   : > { %5285 = vtanh.f32 %v3419_v59  ;;  %3425 = vst [vmem:[#allocation6] sm:$0xff] %v3419_v59  ;;  %4894 = vmatprep.subr.bf16.mxu0 (!%p3805_p5), %v5592_v26 }
 0x791   : > { %4896 = vmatpush3.bf16.msra.mxu0 (!%p3805_p5), %v4895_v49 }
 0x792   : > { %4897 = vmatprep.subr.bf16.mxu0 (!%p3805_p5), %v5592_v26 }
 0x795   : > { %3429 = sbr.rel (%p3805_p5) target bundleno = 2387 (0x953), region = 100  ;;  %4899 = vmatpush3.bf16.msra.mxu0 (!%p3805_p5), %v4898_v13 }
 0x796   : > { %4900 = vmatprep.subr.bf16.mxu0 (!%p3805_p5), %v5592_v26 }
 0x798   : > { %v5286_v54 = vpop.eup %5285 }
 0x799   : > { %v6786_v42 = vmul.f32 %v5286_v54, %v5284_v37  ;;  %4902 = vmatpush3.bf16.msra.mxu0 (!%p3805_p5), %v4901_v7 }
 0x79a   : > { %4903 = vmatprep.subr.bf16.mxu0 (!%p3805_p5), %v5592_v26 }
 0x79b   : > { %3424 = vst [vmem:[#allocation5] sm:$0xff] %v6786_v42 }
 0x79d   : > { %4905 = vmatpush3.bf16.msra.mxu0 %v4904_v28 }
 0x79e   : > { %4906 = vmatprep.subr.bf16.mxu0 %v5592_v26 }
 0x7a1   : > { %4908 = vmatpush3.bf16.msra.mxu0 %v4907_v16 }
 0x7a4   : > { %3880 = vmatmul.mubr.f32.vlgmr.msra.gmra.mrb[0].mxu0 %v6786_v42 }
 0x877   : > { %v3519_v58 = vpop.f32.mrb[0].mxu0 }
 0x878   : > { %v3520_v53 = vadd.f32 %v3806_v11, %v3519_v58  ;;  %v3881_v57 = vpop.f32.mrb[1].mxu0 }
 0x87a   : > { %v3523_v17 = vmax.f32 %v3520_v53, 0.0 }
 0x87c   : > { %3915 = vmatmul.mubr.f32.vlgmr.msra.gmra.mrb[0].mxu1 %v3523_v17 }
 0x94f   : > { %v3613_v10 = vpop.f32.mrb[0].mxu1 }
 0x950   : > { %v3614_v5 = vadd.f32 %v3807_v51, %v3613_v10  ;;  %v3916_v39 = vpop.f32.mrb[1].mxu1 }
 0x952   : > { %3617 = vst [vmem:[#allocation19] sm:$0xff] %v3614_v5 }
 0x953 PF: > { %s7367_s4 = sadd.s32 4294967295, %s5577_s22   ;;  %s5595_s23 = smov [#allocation19]  }
 0x954   : > { %p6815_p11 = scmp.eq.s32.totalorder %s7367_s4, 1  ;;  %s3627_s27 = sshll.u32 %s5595_s23, 4  ;;  %s3628_s27 = int_to_ptr.vmem [resolvable:$true] %s3627_s27 }
 0x955   : > { %s5485_s14 = scalar_lea.vmem %s3628_s27, 128  ;;  %p5492_p4 = scmp.lt.s32.totalorder %s3628_s27, %s3628_s27 }
 0x956   : > { %p5486_p12 = scmp.ne.s32.totalorder %s3628_s27, %s5485_s14  ;;  %p5493_p6 = scmp.lt.s32.totalorder %s5485_s14, %s5485_s14 }
 0x958   : > { %p5487_p13 = pnand %p5486_p12, %p6815_p11  ;;  %p5494_p9 = por %p5493_p6, %p5492_p4 }
 0x95a   : > { %p5488_p2 = pneg %p5487_p13 }
 0x95c   : > { %p5495_p7 = pnand %p5494_p9, %p5488_p2 }
 0x95e   : > { %5498 = shalt.err (!%p5495_p7)
}
 0x95f   : > { %s7369_s1 = sld [smem:[#allocation119_spill]] }
 0x965   : > { %s5499_s24 = scalar_lea.hbm %s7369_s1, 128 }
 0x966   : > { %p5500_p1 = scmp.ne.s32.totalorder %s7369_s1, %s5499_s24  ;;  %p5505_p10 = scmp.lt.u32.totalorder %s5499_s24, %s7369_s1 }
 0x968   : > { %p5501_p3 = pnand %p5500_p1, %p6815_p11 }
 0x96a   : > { %p5502_p8 = pneg %p5501_p3 }
 0x96c   : > { %p5507_p0 = pnand %p5505_p10, %p5502_p8 }
 0x96e   : > { %5510 = shalt.err (!%p5507_p0)
}
 0x96f   : > { %5022 = dma.vmem_to_hbm [thread:$0]  (%p6815_p11), %s3628_s27, 128, %s7369_s1, [#allocation9]  }
 0x970   : > { %5552 = dma.done.wait (%p6815_p11), [#allocation9], 128  }
 0x971   : > { %5554 = vsyncadd (%p6815_p11), [#allocation9], 4294967168 }
 0x972 PF: > { %s28_s22 = sadd.s32 1, %s5577_s22   ;;  %s7370_s17 = smov %s5561_s18 }
 0x973   : > { %p25_p5 = scmp.ge.s32.totalorder %s28_s22, 4   ;;  %s7371_s18 = smov %s5565_s19 }
 0x974   : > { %s7372_s19 = smov %s5876_s8  ;;  %s7373_s20 = smov %s5573_s21 }
 0x975   : > { %s7374_s21 = smov %s7376_s11  ;;  %27 = sbr.rel (!%p25_p5) target bundleno = 16 (0x10), region = 138 }
 0x97c   :  { %3640 = vsyncpa [#allocation8], 1 }
 0x97d   :  { %3642 = vsyncpa [#allocation8 + $0x1], 1 }
 0x97e   :  { %3643 = vsyncpa [#allocation11], 1 }
 0x97f   :  { %3644 = vsyncpa [#allocation14], 1 }
 0x980   :  { %3645 = vsyncpa [#allocation17], 1 }
 0x981   :  { %3646 = vsyncpa [#allocation9], 1 }
 0x982   :  { %3648 = vsyncpa [#allocation9 + $0x1], 1 }

// kernel: tpu_custom_call.1
= control target key start
LH: loop header
LB: loop body
LE: loop exit
PB: predicated region body
PF: predicated region fallthrough
CT: control target
= control target key end

     0   :  { %s6859_s0 = inlined_call_operand.hbm [shape: f32[10,8,16], index: 0, kind: input, shape index: {}]   ;;  %s6860_s1 = inlined_call_operand.hbm [shape: f32[16,512], index: 1, kind: input, shape index: {}]   ;;  %s6861_s2 = inlined_call_operand.hbm [shape: f32[128,512], index: 2, kind: input, shape index: {}]   ;;  %s6862_s3 = inlined_call_operand.vmem [shape: f32[1,512], index: 3, kind: input, shape index: {}]   ;;  %s6863_s4 = inlined_call_operand.hbm [shape: f32[128,512], index: 4, kind: input, shape index: {}]   ;;  %s6864_s5 = inlined_call_operand.hbm [shape: f32[128,512], index: 5, kind: input, shape index: {}]   ;;  %s6865_s6 = inlined_call_operand.vmem [shape: f32[1,512], index: 6, kind: input, shape index: {}]   ;;  %s6866_s7 = inlined_call_operand.hbm [shape: f32[128,128], index: 7, kind: input, shape index: {}]   ;;  %s6867_s8 = inlined_call_operand.vmem [shape: f32[1,128], index: 8, kind: input, shape index: {}]   ;;  %s6868_s9 = inlined_call_operand.hbm [shape: f32[128,128], index: 9, kind: input, shape index: {}]   ;;  %s6869_s10 = inlined_call_operand.vmem [shape: f32[1,128], index: 10, kind: input, shape index: {}]   ;;  %s6870_s11 = inlined_call_operand.hbm [shape: f32[8,128], index: 11, kind: output, shape index: {}]  }
   0x1   :  { %7050 = sst [smem:[#allocation113_spill]] %s6860_s1 }
   0x2   :  { %7051 = sst [smem:[#allocation114_spill]] %s6862_s3 }
   0x3   :  { %7052 = sst [smem:[#allocation115_spill]] %s6863_s4 }
   0x4   :  { %7053 = sst [smem:[#allocation116_spill]] %s6865_s6 }
   0x5   :  { %7054 = sst [smem:[#allocation117_spill]] %s6867_s8 }
   0x6   :  { %7055 = sst [smem:[#allocation118_spill]] %s6869_s10 }
   0x7   :  { %7056 = sst [smem:[#allocation119_spill]] %s6870_s11 }
   0x8   :  { %16 = vsyncpa [#allocation8], 0 }
   0x9   :  { %18 = vsyncpa [#allocation8 + $0x1], 0 }
   0xa   :  { %19 = vsyncpa [#allocation11], 0 }
   0xb   :  { %20 = vsyncpa [#allocation14], 0 }
   0xc   :  { %21 = vsyncpa [#allocation17], 0 }
   0xd   :  { %22 = vsyncpa [#allocation9], 0  ;;  %s5656_s17 = smov 0   ;;  %s5658_s18 = smov 0  }
   0xe   :  { %s5660_s19 = smov 0   ;;  %s5662_s20 = smov 0  }
   0xf   :  { %s5664_s21 = smov 0   ;;  %s5666_s22 = smov 0  }
  0x10 LB: > { %s6871_s23 = sadd.s32 4294967295, %s5577_s22   ;;  %p3748_p0 = scmp.ge.s32.totalorder %s5577_s22, 1  ;;  %s5577_s22 = sphi %s5666_s22, %s28_s22   ;;  %s5573_s21 = sphi %s5664_s21, %s7374_s21   ;;  %s5569_s20 = sphi %s5662_s20, %s7373_s20   ;;  %s5565_s19 = sphi %s5660_s19, %s7372_s19   ;;  %s5561_s18 = sphi %s5658_s18, %s7371_s18   ;;  %s5557_s17 = sphi %s5656_s17, %s7370_s17  }
  0x11   : > { %p5690_p1 = scmp.eq.s32.totalorder %s6871_s23, 0  ;;  %p309_p2 = scmp.lt.s32.totalorder %s5577_s22, 3 }
  0x12   : > { %s5579_s26 = smov [#allocation10]   ;;  %s5580_s29 = smov [#allocation13]  }
  0x13   : > { %s7057_s24 = scalar_select %p5690_p1, 1, 0 }
  0x14   : > { %p5695_p3 = pnand %p3748_p0, %p309_p2  ;;  %s321_s27 = sshll.u32 %s5579_s26, 4  ;;  %s5699_s27 = int_to_ptr.vmem [resolvable:$true] %s321_s27 }
  0x15   : > { %s350_s30 = sshll.u32 %s5580_s29, 4  ;;  %s5581_s12 = smov [#allocation16]   ;;  %s5709_s30 = int_to_ptr.vmem [resolvable:$true] %s350_s30 }
  0x16   : > { %s7058_s25 = scalar_select %p5695_p3, 1, 0 }
  0x17   : > { %p5025_p4 = pneg %p5695_p3  ;;  %s5711_s13 = sshll.u32 %s5581_s12, 4  ;;  %s380_s13 = int_to_ptr.vmem [resolvable:$true] %s5711_s13 }
  0x18   : > { %s7060_s1 = sld [smem:[#allocation113_spill]] }
  0x19   : > { %p5705_p5 = pnand %p5025_p4, %p5690_p1 }
  0x1b   : > { %p5721_p7 = pneg %p5705_p5 }
  0x1e   : > { %s5287_s16 = scalar_lea.hbm %s7060_s1, 1024 }
  0x1f   : > { %p5288_p6 = scmp.ne.s32.totalorder %s7060_s1, %s5287_s16  ;;  %p5294_p10 = scmp.lt.u32.totalorder %s5287_s16, %s7060_s1 }
  0x21   : > { %p5290_p8 = pnand %p5721_p7, %p5288_p6 }
  0x23   : > { %p5291_p9 = pneg %p5290_p8 }
  0x25   : > { %p5296_p11 = pnand %p5294_p10, %p5291_p9 }
  0x27   : > { %5299 = shalt.err (!%p5296_p11)
}
  0x28   : > { %s5300_s23 = scalar_lea.vmem %s5699_s27, 1024  ;;  %p5308_p2 = scmp.lt.s32.totalorder %s5699_s27, %s5699_s27 }
  0x29   : > { %p5301_p12 = scmp.ne.s32.totalorder %s5699_s27, %s5300_s23  ;;  %p5309_p4 = scmp.lt.s32.totalorder %s5300_s23, %s5300_s23 }
  0x2b   : > { %p5303_p13 = pnand %p5301_p12, %p5721_p7  ;;  %p5310_p6 = por %p5309_p4, %p5308_p2 }
  0x2d   : > { %p5304_p0 = pneg %p5303_p13 }
  0x2f   : > { %p5311_p8 = pnand %p5310_p6, %p5304_p0 }
  0x31   : > { %5314 = shalt.err (!%p5311_p8)
}
  0x32   : > { %s6876_s14 = smov 512   ;;  %s6878_s15 = smov 32  }
  0x33   : > { %5028 = dma.hbm_to_vmem [thread:$0]  (!%p5705_p5), %s7060_s1, 1024, %s5699_s27, [#allocation11], %s6876_s14, %s6876_s14, %s6878_s15  }
  0x34   : > { %s7062_s4 = sld [smem:[#allocation115_spill]] }
  0x3a   : > { %s5315_s23 = scalar_lea.hbm %s7062_s4, 8192 }
  0x3b   : > { %p5316_p9 = scmp.ne.s32.totalorder %s7062_s4, %s5315_s23  ;;  %p5322_p12 = scmp.lt.u32.totalorder %s5315_s23, %s7062_s4 }
  0x3d   : > { %p5318_p10 = pnand %p5316_p9, %p5721_p7 }
  0x3f   : > { %p5319_p11 = pneg %p5318_p10 }
  0x41   : > { %p5324_p13 = pnand %p5322_p12, %p5319_p11 }
  0x43   : > { %5327 = shalt.err (!%p5324_p13)
}
  0x44   : > { %s5328_s27 = scalar_lea.vmem %s5709_s30, 8192  ;;  %p5336_p6 = scmp.lt.s32.totalorder %s5709_s30, %s5709_s30 }
  0x45   : > { %p5329_p0 = scmp.ne.s32.totalorder %s5709_s30, %s5328_s27  ;;  %p5337_p8 = scmp.lt.s32.totalorder %s5328_s27, %s5328_s27 }
  0x47   : > { %p5331_p2 = pnand %p5329_p0, %p5721_p7  ;;  %p5338_p9 = por %p5337_p8, %p5336_p6 }
  0x49   : > { %p5332_p4 = pneg %p5331_p2 }
  0x4b   : > { %p5339_p10 = pnand %p5338_p9, %p5332_p4 }
  0x4d   : > { %5342 = shalt.err (!%p5339_p10)
}
  0x4e   : > { %5034 = dma.hbm_to_vmem [thread:$0]  (!%p5705_p5), %s7062_s4, 8192, %s5709_s30, [#allocation14], %s6876_s14, %s6876_s14, %s6878_s15  }
  0x4f   : > { %s5343_s16 = scalar_lea.hbm %s6866_s7, 2048 }
  0x50   : > { %p5344_p11 = scmp.ne.s32.totalorder %s6866_s7, %s5343_s16  ;;  %p5350_p0 = scmp.lt.u32.totalorder %s5343_s16, %s6866_s7 }
  0x52   : > { %p5346_p12 = pnand %p5344_p11, %p5721_p7 }
  0x54   : > { %p5347_p13 = pneg %p5346_p12 }
  0x56   : > { %p5352_p2 = pnand %p5350_p0, %p5347_p13 }
  0x58   : > { %5355 = shalt.err (!%p5352_p2)
}
  0x59   : > { %s5356_s27 = scalar_lea.vmem %s380_s13, 2048  ;;  %p5364_p9 = scmp.lt.s32.totalorder %s380_s13, %s380_s13 }
  0x5a   : > { %p5357_p4 = scmp.ne.s32.totalorder %s380_s13, %s5356_s27  ;;  %p5365_p10 = scmp.lt.s32.totalorder %s5356_s27, %s5356_s27 }
  0x5c   : > { %p5359_p6 = pnand %p5357_p4, %p5721_p7  ;;  %p5366_p3 = por %p5365_p10, %p5364_p9 }
  0x5e   : > { %p5360_p8 = pneg %p5359_p6 }
  0x60   : > { %p5367_p1 = pnand %p5366_p3, %p5360_p8 }
  0x62   : > { %5370 = shalt.err (!%p5367_p1)
}
  0x63   : > { %s5584_s30 = smov 128   ;;  %s5585_s3 = smov 8  }
  0x64   : > { %5040 = dma.hbm_to_vmem [thread:$0]  (!%p5705_p5), %s6866_s7, 2048, %s380_s13, [#allocation17], %s5584_s30, %s5584_s30, %s5585_s3  }
  0x65   : > { %s5586_s10 = smov [#allocation12]   ;;  %s5587_s26 = smov [#allocation15]  }
  0x66   : > { %s334_s16 = sshll.u32 %s5586_s10, 4  ;;  %s363_s29 = sshll.u32 %s5587_s26, 4  ;;  %s335_s16 = int_to_ptr.vmem [resolvable:$true] %s334_s16  ;;  %s364_s29 = int_to_ptr.vmem [resolvable:$true] %s363_s29 }
  0x67   : > { %s5371_s27 = scalar_lea.hbm %s6861_s2, 8192 }
  0x68   : > { %p5372_p1 = scmp.ne.s32.totalorder %s6861_s2, %s5371_s27  ;;  %p5378_p12 = scmp.lt.u32.totalorder %s5371_s27, %s6861_s2 }
  0x6a   : > { %p5374_p3 = pnand %p5372_p1, %p5721_p7 }
  0x6c   : > { %p5375_p11 = pneg %p5374_p3 }
  0x6e   : > { %p5380_p13 = pnand %p5378_p12, %p5375_p11 }
  0x70   : > { %5383 = shalt.err (!%p5380_p13)
}
  0x71   : > { %s5384_s13 = scalar_lea.vmem %s335_s16, 8192  ;;  %p5392_p6 = scmp.lt.s32.totalorder %s335_s16, %s335_s16 }
  0x72   : > { %p5385_p0 = scmp.ne.s32.totalorder %s335_s16, %s5384_s13  ;;  %p5393_p8 = scmp.lt.s32.totalorder %s5384_s13, %s5384_s13 }
  0x74   : > { %p5387_p2 = pnand %p5385_p0, %p5721_p7  ;;  %p5394_p9 = por %p5393_p8, %p5392_p6 }
  0x76   : > { %p5388_p4 = pneg %p5387_p2 }
  0x78   : > { %p5395_p10 = pnand %p5394_p9, %p5388_p4 }
  0x7a   : > { %5398 = shalt.err (!%p5395_p10)
}
  0x7b   : > { %s7063_s14 = smov 32   ;;  %s7064_s15 = smov 512  }
  0x7c   : > { %5031 = dma.hbm_to_vmem [thread:$0]  (!%p5705_p5), %s6861_s2, 8192, %s335_s16, [#allocation11], %s7064_s15, %s7064_s15, %s7063_s14  }
  0x7d   : > { %s5399_s10 = scalar_lea.hbm %s6864_s5, 8192 }
  0x7e   : > { %p5400_p1 = scmp.ne.s32.totalorder %s6864_s5, %s5399_s10  ;;  %p5406_p12 = scmp.lt.u32.totalorder %s5399_s10, %s6864_s5 }
  0x80   : > { %p5402_p3 = pnand %p5400_p1, %p5721_p7 }
  0x82   : > { %p5403_p11 = pneg %p5402_p3 }
  0x84   : > { %p5408_p13 = pnand %p5406_p12, %p5403_p11 }
  0x86   : > { %5411 = shalt.err (!%p5408_p13)
}
  0x87   : > { %s5412_s13 = scalar_lea.vmem %s364_s29, 8192  ;;  %p5420_p6 = scmp.lt.s32.totalorder %s364_s29, %s364_s29 }
  0x88   : > { %p5413_p0 = scmp.ne.s32.totalorder %s364_s29, %s5412_s13  ;;  %p5421_p8 = scmp.lt.s32.totalorder %s5412_s13, %s5412_s13 }
  0x8a   : > { %p5415_p2 = pnand %p5413_p0, %p5721_p7  ;;  %p5422_p9 = por %p5421_p8, %p5420_p6 }
  0x8c   : > { %p5416_p4 = pneg %p5415_p2 }
  0x8e   : > { %p5423_p10 = pnand %p5422_p9, %p5416_p4 }
  0x90   : > { %5426 = shalt.err (!%p5423_p10)
}
  0x91   : > { %5037 = dma.hbm_to_vmem [thread:$0]  (!%p5705_p5), %s6864_s5, 8192, %s364_s29, [#allocation14], %s7064_s15, %s7064_s15, %s7063_s14  }
  0x92   : > { %s5588_s4 = smov [#allocation18]   ;;  %s5427_s26 = scalar_lea.hbm %s6868_s9, 2048 }
  0x93   : > { %s395_s6 = sshll.u32 %s5588_s4, 4  ;;  %p5428_p1 = scmp.ne.s32.totalorder %s6868_s9, %s5427_s26  ;;  %s396_s6 = int_to_ptr.vmem [resolvable:$true] %s395_s6 }
  0x94   : > { %p5434_p12 = scmp.lt.u32.totalorder %s5427_s26, %s6868_s9 }
  0x95   : > { %p5430_p3 = pnand %p5428_p1, %p5721_p7 }
  0x97   : > { %p5431_p11 = pneg %p5430_p3 }
  0x99   : > { %p5436_p13 = pnand %p5434_p12, %p5431_p11 }
  0x9b   : > { %5439 = shalt.err (!%p5436_p13)
}
  0x9c   : > { %s5440_s29 = scalar_lea.vmem %s396_s6, 2048  ;;  %p5448_p6 = scmp.lt.s32.totalorder %s396_s6, %s396_s6 }
  0x9d   : > { %p5441_p0 = scmp.ne.s32.totalorder %s396_s6, %s5440_s29  ;;  %p5449_p8 = scmp.lt.s32.totalorder %s5440_s29, %s5440_s29 }
  0x9f   : > { %p5443_p2 = pnand %p5441_p0, %p5721_p7  ;;  %p5450_p9 = por %p5449_p8, %p5448_p6 }
  0xa1   : > { %p5444_p4 = pneg %p5443_p2 }
  0xa3   : > { %p5451_p10 = pnand %p5450_p9, %p5444_p4 }
  0xa5   : > { %5454 = shalt.err (!%p5451_p10)
}
  0xa6   : > { %5043 = dma.hbm_to_vmem [thread:$0]  (!%p5705_p5), %s6868_s9, 2048, %s396_s6, [#allocation17], %s5584_s30, %s5584_s30, %s5585_s3  }
  0xa7   : > { %s37_s11 = sadd.s32 1, %s5573_s21  ;;  %s49_s28 = sadd.s32 1, %s5565_s19 }
  0xa8   : > { %p38_p7 = scmp.ge.s32.totalorder %s37_s11, 2  ;;  %p56_p1 = scmp.ne.s32.totalorder %s5565_s19, %s5561_s18 }
  0xa9   : > { %p57_p3 = scmp.eq.s32.totalorder %s5577_s22, 0  ;;  %p62_p11 = scmp.ne.s32.totalorder %s5561_s18, %s5557_s17 }
  0xaa   : > { %s7376_s11 = smov (%p38_p7, %s37_s11), 0  ;;  %p7065_p13 = scmp.ne.s32.totalorder %s7057_s24, 0 }
  0xab   : > { %p58_p12 = por %p57_p3, %p56_p1  ;;  %s44_s1 = ssub.s32 %s5573_s21, %s7376_s11 }
  0xac   : > { %p5867_p0 = por %p7065_p13, %p62_p11  ;;  %p5054_p2 = scmp.lt.s32.totalorder %s5577_s22, 2 }
  0xad   : > { %p47_p4 = scmp.eq.s32.totalorder %s44_s1, 0  ;;  %s412_s4 = sand.u32 1, %s5565_s19  }
  0xae   : > { %s4993_s6 = smul.u32 40, %s412_s4  ;;  %p5879_p5 = pnand %p5054_p2, %p58_p12 }
  0xaf   : > { %s5876_s8 = scalar_select %p47_p4, %s5565_s19, %s49_s28  }
  0xb0   : > { %s3812_s10 = smul.u32 640, %s5573_s21  ;;  %s416_s26 = scalar_lea.vmem [#allocation7], %s4993_s6 }
  0xb1   : > { %s424_s12 = sshll.u32 %s416_s26, 4  ;;  %s5890_s29 = scalar_lea.sflag [#allocation8], %s412_s4  ;;  %s5888_s12 = int_to_ptr.vmem [resolvable:$true] %s424_s12 }
  0xb2   : > { %s5886_s13 = scalar_lea.hbm %s6859_s0, %s3812_s10  ;;  %p5457_p8 = pneg %p5879_p5 }
  0xb3   : > { %s5455_s14 = scalar_lea.hbm %s5886_s13, 640  ;;  %s5460_s1 = scalar_lea.hbm %s6859_s0, 1280 }
  0xb4   : > { %p5456_p6 = scmp.ne.s32.totalorder %s5886_s13, %s5455_s14  ;;  %p5461_p7 = scmp.lt.u32.totalorder %s5886_s13, %s6859_s0 }
  0xb5   : > { %p5462_p1 = scmp.lt.u32.totalorder %s5460_s1, %s5455_s14  ;;  %p5464_p11 = scmp.lt.u32.totalorder %s5455_s14, %s5886_s13 }
  0xb6   : > { %p5458_p9 = pnand %p5457_p8, %p5456_p6 }
  0xb7   : > { %p5463_p3 = por %p5462_p1, %p5461_p7 }
  0xb8   : > { %p5459_p10 = pneg %p5458_p9 }
  0xb9   : > { %p5465_p12 = por %p5464_p11, %p5463_p3 }
  0xbb   : > { %p5466_p13 = pnand %p5465_p12, %p5459_p10 }
  0xbd   : > { %5469 = shalt.err (!%p5466_p13)
}
  0xbe   : > { %s5470_s4 = scalar_lea.vmem %s5888_s12, 640  ;;  %s5589_s26 = smov [#allocation7]  }
  0xbf   : > { %p5471_p2 = scmp.ne.s32.totalorder %s5888_s12, %s5470_s4  ;;  %s5475_s23 = sshll.u32 %s5589_s26, 4  ;;  %s5476_s23 = int_to_ptr.vmem [resolvable:$false] %s5475_s23 }
  0xc0   : > { %s5477_s27 = scalar_lea.vmem %s5476_s23, 1280  ;;  %p5478_p9 = scmp.lt.s32.totalorder %s5888_s12, %s5476_s23 }
  0xc1   : > { %p5473_p4 = pnand %p5471_p2, %p5457_p8  ;;  %p5479_p7 = scmp.lt.s32.totalorder %s5477_s27, %s5470_s4 }
  0xc3   : > { %p5474_p6 = pneg %p5473_p4  ;;  %p5480_p1 = por %p5479_p7, %p5478_p9 }
  0xc5   : > { %p5481_p3 = pnand %p5480_p1, %p5474_p6 }
  0xc7   : > { %5484 = shalt.err (!%p5481_p3)
}
  0xc8   : > { %5047 = dma.hbm_to_vmem [thread:$0]  (!%p5879_p5), %s5886_s13, 640, %s5888_s12, %s5890_s29, %s5584_s30, %s5584_s30, %s5585_s3  }
  0xc9   : > { %p7068_p8 = scmp.ne.s32.totalorder %s7058_s25, 0 }
  0xcb   : > { %436 = sbr.rel (%p7068_p8) target bundleno = 2418 (0x972), region = 64 }
  0xd2   : > { %s438_s14 = sand.u32 1, %s5561_s18  }
  0xd3   : > { %s4994_s15 = smul.u32 40, %s438_s14  ;;  %s439_s28 = scalar_lea.sflag [#allocation8], %s438_s14 }
  0xd5   : > { %s5924_s1 = scalar_lea.vmem [#allocation7], %s4994_s15 }
  0xd6   : > { %5536 = dma.done.wait (%p5867_p0), %s439_s28, 640  }
  0xd7   : > { %5538 = vsyncadd (%p5867_p0), %s439_s28, 4294966656  ;;  %p7069_p10 = scmp.ne.s32.totalorder %s7057_s24, 0 }
  0xd9   : > { %5540 = dma.done.wait (%p7069_p10), [#allocation11], 9216  }
  0xda   : > { %5542 = vsyncadd (%p7069_p10), [#allocation11], 4294958080 }
  0xdb   : > { %5544 = dma.done.wait (%p7069_p10), [#allocation14], 16384  }
  0xdc   : > { %5546 = vsyncadd (%p7069_p10), [#allocation14], 4294950912 }
  0xdd   : > { %5548 = dma.done.wait (%p7069_p10), [#allocation17], 4096  }
  0xde   : > { %5550 = vsyncadd (%p7069_p10), [#allocation17], 4294963200  ;;  %p3764_p0 = scmp.ne.s32.totalorder %s5569_s20, 0 }
  0xdf   : > { %v5590_v0 = vmov (!%p3764_p0), 0.0  }
  0xe0   : > { %504 = sbr.rel (%p3764_p0) target bundleno = 231 (0xe7), region = 96  ;;  %505 = vst [vmem:[#allocation3] sm:$0xff] (!%p3764_p0), %v5590_v0  ;;  %506 = vst [vmem:[#allocation4] sm:$0xff] (!%p3764_p0), %v5590_v0 }
  0xe1   : > { %507 = vst [vmem:[#allocation5] sm:$0xff] (!%p3764_p0), %v5590_v0  ;;  %508 = vst [vmem:[#allocation6] sm:$0xff] (!%p3764_p0), %v5590_v0 }
  0xe7 PF: > { %v515_v1 = vld [vmem:[#allocation10 + $0x8] sm:$0xff]  ;;  %v517_v3 = vld [vmem:[#allocation10 + $0x18] sm:$0xff]  ;;  %v514_v6 = vld [vmem:[#allocation10] sm:$0xff]  ;;  %v6880_v8 = vmov 0.0   ;;  %vm544_vm0 = vcmask 130048   ;;  %s7153_s30 = sld [smem:[#allocation114_spill]] }
  0xe8   : > { %v519_v2 = vld [vmem:[#allocation10 + $0x28] sm:$0xff]  ;;  %v521_v5 = vld [vmem:[#allocation10 + $0x38] sm:$0xff]  ;;  %v518_v7 = vld [vmem:[#allocation10 + $0x20] sm:$0xff]  ;;  %624 = vmatprep.mubr.f32.mxu0 %v6880_v8  ;;  %719 = vmatprep.mubr.f32.mxu1 %v6880_v8  ;;  %s7178_s12 = sld [smem:[#allocation116_spill]]  ;;  %p3805_p5 = scmp.ne.s32.totalorder %s5569_s20, 1 }
  0xe9   : > { %v3917_v4 = vpack.c.bf16 %v519_v2, %v515_v1  ;;  %v3921_v9 = vpack.c.bf16 %v521_v5, %v517_v3  ;;  %v3919_v10 = vpack.c.bf16 %v518_v7, %v514_v6  ;;  %v516_v11 = vld [vmem:[#allocation10 + $0x10] sm:$0xff]  ;;  %v771_v13 = vld [vmem:[#allocation12 + $0x8] sm:$0xff]  ;;  %v773_v16 = vld [vmem:[#allocation12 + $0x18] sm:$0xff]  ;;  %vm5593_vm1 = vmmov (!%p3805_p5), 0   ;;  %s7365_s13 = sld [smem:[#allocation117_spill]] (!%p3805_p5)  ;;  %s7366_s10 = sld [smem:[#allocation118_spill]] (!%p3805_p5) }
  0xea   : > { %v520_v12 = vld [vmem:[#allocation10 + $0x30] sm:$0xff]  ;;  %v775_v15 = vld [vmem:[#allocation12 + $0x28] sm:$0xff]  ;;  %v777_v17 = vld [vmem:[#allocation12 + $0x38] sm:$0xff] }
  0xeb   : > { %3918 = vmatprep.subr.bf16.mxu0 %v3917_v4  ;;  %v3923_v14 = vpack.c.bf16 %v520_v12, %v516_v11  ;;  %3922 = vmatprep.subr.bf16.mxu1 %v3921_v9  ;;  %v5945_v18 = vpack.c.bf16 %v775_v15, %v771_v13  ;;  %v5947_v19 = vpack.c.bf16 %v777_v17, %v773_v16  ;;  %v509_v20 = vld [vmem:[%s5924_s1] sm:$0xff]  ;;  %v770_v21 = vld [vmem:[#allocation12] sm:$0xff]  ;;  %v779_v26 = vld [vmem:[#allocation12 + $0x48] sm:$0xff] }
  0xec   : > { %3920 = vmatpush1.bf16.msra.mxu0 %v3919_v10  ;;  %v774_v22 = vld [vmem:[#allocation12 + $0x20] sm:$0xff]  ;;  %v772_v24 = vld [vmem:[#allocation12 + $0x10] sm:$0xff]  ;;  %v783_v28 = vld [vmem:[#allocation12 + $0x68] sm:$0xff] }
  0xed   : > { %7070 = vst [vmem:[#allocation25_spill] sm:$0xff] %v5945_v18  ;;  %7071 = vst [vmem:[#allocation26_spill] sm:$0xff] %v5947_v19  ;;  %3924 = vmatpush1.bf16.msra.mxu1 %v3923_v14  ;;  %v5950_v23 = vpack.c.bf16 %v774_v22, %v770_v21  ;;  %v776_v25 = vld [vmem:[#allocation12 + $0x30] sm:$0xff]  ;;  %3926 = vmatprep.subr.bf16.mxu0 %v5945_v18  ;;  %v781_v29 = vld [vmem:[#allocation12 + $0x58] sm:$0xff]  ;;  %v5957_v31 = vpack.c.bf16 %v783_v28, %v779_v26 }
  0xee   : > { %3958 = vmatprep.subr.bf16.mxu1 %v5947_v19  ;;  %v5954_v27 = vpack.c.bf16 %v776_v25, %v772_v24  ;;  %v785_v30 = vld [vmem:[#allocation12 + $0x78] sm:$0xff]  ;;  %v778_v33 = vld [vmem:[#allocation12 + $0x40] sm:$0xff]  ;;  %v780_v35 = vld [vmem:[#allocation12 + $0x50] sm:$0xff] }
  0xef   : > { %3765 = vmatmul.mubr.msk.f32.vlgmr.msra.gmra.mrb[0].mxu0 %vm544_vm0, %v509_v20  ;;  %v5959_v32 = vpack.c.bf16 %v785_v30, %v781_v29  ;;  %v782_v34 = vld [vmem:[#allocation12 + $0x60] sm:$0xff]  ;;  %v784_v37 = vld [vmem:[#allocation12 + $0x70] sm:$0xff]  ;;  %v787_v38 = vld [vmem:[#allocation12 + $0x88] sm:$0xff] }
  0xf0   : > { %3770 = vmatmul.mubr.msk.f32.vlgmr.msra.gmra.mrb[0].mxu1 %vm544_vm0, %v509_v20  ;;  %3928 = vmatpush1.bf16.msra.mxu0 %v5950_v23  ;;  %v5963_v36 = vpack.c.bf16 %v782_v34, %v778_v33  ;;  %v791_v39 = vld [vmem:[#allocation12 + $0xa8] sm:$0xff]  ;;  %v5967_v40 = vpack.c.bf16 %v784_v37, %v780_v35  ;;  %v789_v42 = vld [vmem:[#allocation12 + $0x98] sm:$0xff]  ;;  %v786_v44 = vld [vmem:[#allocation12 + $0x80] sm:$0xff] }
  0xf1   : > { %3960 = vmatpush1.bf16.msra.mxu1 %v5954_v27  ;;  %3930 = vmatprep.subr.bf16.mxu0 %v5957_v31  ;;  %v5969_v41 = vpack.c.bf16 %v791_v39, %v787_v38  ;;  %v793_v43 = vld [vmem:[#allocation12 + $0xb8] sm:$0xff]  ;;  %v790_v46 = vld [vmem:[#allocation12 + $0xa0] sm:$0xff]  ;;  %v788_v47 = vld [vmem:[#allocation12 + $0x90] sm:$0xff] }
  0xf2   : > { %3962 = vmatprep.subr.bf16.mxu1 %v5959_v32  ;;  %v5972_v45 = vpack.c.bf16 %v793_v43, %v789_v42  ;;  %v792_v48 = vld [vmem:[#allocation12 + $0xb0] sm:$0xff]  ;;  %630 = vmatprep.mubr.f32.mxu0 %v6880_v8  ;;  %v795_v49 = vld [vmem:[#allocation12 + $0xc8] sm:$0xff]  ;;  %v797_v51 = vld [vmem:[#allocation12 + $0xd8] sm:$0xff]  ;;  %v5977_v52 = vpack.c.bf16 %v790_v46, %v786_v44 }
  0xf3   : > { %v799_v50 = vld [vmem:[#allocation12 + $0xe8] sm:$0xff]  ;;  %725 = vmatprep.mubr.f32.mxu1 %v6880_v8  ;;  %v801_v53 = vld [vmem:[#allocation12 + $0xf8] sm:$0xff]  ;;  %v794_v54 = vld [vmem:[#allocation12 + $0xc0] sm:$0xff]  ;;  %v5981_v55 = vpack.c.bf16 %v792_v48, %v788_v47 }
  0xf4   : > { %3932 = vmatpush1.bf16.msra.mxu0 %v5963_v36  ;;  %v5983_v56 = vpack.c.bf16 %v799_v50, %v795_v49  ;;  %v798_v57 = vld [vmem:[#allocation12 + $0xe0] sm:$0xff]  ;;  %v796_v58 = vld [vmem:[#allocation12 + $0xd0] sm:$0xff]  ;;  %v5987_v60 = vpack.c.bf16 %v801_v53, %v797_v51  ;;  %v803_v62 = vld [vmem:[#allocation12 + $0x108] sm:$0xff] }
  0xf5   : > { %3964 = vmatpush1.bf16.msra.mxu1 %v5967_v40  ;;  %3934 = vmatprep.subr.bf16.mxu0 %v5969_v41  ;;  %v510_v59 = vld [vmem:[%s5924_s1 + $0x8] sm:$0xff]  ;;  %v800_v61 = vld [vmem:[#allocation12 + $0xf0] sm:$0xff]  ;;  %v807_v63 = vld [vmem:[#allocation12 + $0x128] sm:$0xff]  ;;  %v5993_v2 = vpack.c.bf16 %v798_v57, %v794_v54 }
  0xf6   : > { %3966 = vmatprep.subr.bf16.mxu1 %v5972_v45  ;;  %3766 = vmatmul.mubr.msk.f32.gmra.mrb[2].mxu0 %vm544_vm0, %v510_v59  ;;  %v805_v0 = vld [vmem:[#allocation12 + $0x118] sm:$0xff]  ;;  %v511_v3 = vld [vmem:[%s5924_s1 + $0x10] sm:$0xff]  ;;  %v5999_v4 = vpack.c.bf16 %v800_v61, %v796_v58  ;;  %v6001_v5 = vpack.c.bf16 %v807_v63, %v803_v62  ;;  %v804_v9 = vld [vmem:[#allocation12 + $0x110] sm:$0xff] }
  0xf7   : > { %3771 = vmatmul.mubr.msk.f32.gmra.mrb[2].mxu1 %vm544_vm0, %v510_v59  ;;  %v809_v1 = vld [vmem:[#allocation12 + $0x138] sm:$0xff]  ;;  %636 = vmatprep.mubr.f32.mxu0 %v6880_v8  ;;  %v802_v6 = vld [vmem:[#allocation12 + $0x100] sm:$0xff]  ;;  %v808_v11 = vld [vmem:[#allocation12 + $0x130] sm:$0xff] }
  0xf8   : > { %3936 = vmatpush1.bf16.msra.mxu0 %v5977_v52  ;;  %731 = vmatprep.mubr.f32.mxu1 %v6880_v8  ;;  %7072 = vst [vmem:[#allocation27_spill] sm:$0xff] %v6001_v5  ;;  %v806_v7 = vld [vmem:[#allocation12 + $0x120] sm:$0xff]  ;;  %v6004_v10 = vpack.c.bf16 %v809_v1, %v805_v0  ;;  %v811_v12 = vld [vmem:[#allocation12 + $0x148] sm:$0xff]  ;;  %v813_v14 = vld [vmem:[#allocation12 + $0x158] sm:$0xff]  ;;  %v6016_v20 = vpack.c.bf16 %v808_v11, %v804_v9 }
  0xf9   : > { %3968 = vmatpush1.bf16.msra.mxu1 %v5981_v55  ;;  %3938 = vmatprep.subr.bf16.mxu0 %v5983_v56  ;;  %v815_v13 = vld [vmem:[#allocation12 + $0x168] sm:$0xff]  ;;  %v817_v15 = vld [vmem:[#allocation12 + $0x178] sm:$0xff]  ;;  %v6011_v17 = vpack.c.bf16 %v806_v7, %v802_v6  ;;  %v810_v22 = vld [vmem:[#allocation12 + $0x140] sm:$0xff] }
  0xfa   : > { %3970 = vmatprep.subr.bf16.mxu1 %v5987_v60  ;;  %7073 = vst [vmem:[#allocation28_spill] sm:$0xff] %v6004_v10  ;;  %3767 = vmatmul.mubr.msk.f32.gmra.mrb[4].mxu0 %vm544_vm0, %v511_v3  ;;  %v512_v16 = vld [vmem:[%s5924_s1 + $0x18] sm:$0xff]  ;;  %7075 = vst [vmem:[#allocation30_spill] sm:$0xff] %v6016_v20  ;;  %v6018_v21 = vpack.c.bf16 %v815_v13, %v811_v12  ;;  %v814_v24 = vld [vmem:[#allocation12 + $0x160] sm:$0xff]  ;;  %v6021_v26 = vpack.c.bf16 %v817_v15, %v813_v14 }
  0xfb   : > { %3772 = vmatmul.mubr.msk.f32.gmra.mrb[4].mxu1 %vm544_vm0, %v511_v3  ;;  %642 = vmatprep.mubr.f32.mxu0 %v6880_v8  ;;  %7074 = vst [vmem:[#allocation29_spill] sm:$0xff] %v6011_v17  ;;  %v812_v25 = vld [vmem:[#allocation12 + $0x150] sm:$0xff]  ;;  %v819_v29 = vld [vmem:[#allocation12 + $0x188] sm:$0xff]  ;;  %v821_v33 = vld [vmem:[#allocation12 + $0x198] sm:$0xff]  ;;  %v6028_v37 = vpack.c.bf16 %v814_v24, %v810_v22 }
  0xfc   : > { %3940 = vmatpush1.bf16.msra.mxu0 %v5993_v2  ;;  %737 = vmatprep.mubr.f32.mxu1 %v6880_v8  ;;  %7076 = vst [vmem:[#allocation31_spill] sm:$0xff] %v6018_v21  ;;  %7077 = vst [vmem:[#allocation32_spill] sm:$0xff] %v6021_v26  ;;  %v816_v28 = vld [vmem:[#allocation12 + $0x170] sm:$0xff]  ;;  %v823_v30 = vld [vmem:[#allocation12 + $0x1a8] sm:$0xff] }
  0xfd   : > { %3972 = vmatpush1.bf16.msra.mxu1 %v5999_v4  ;;  %3942 = vmatprep.subr.bf16.mxu0 %v6001_v5  ;;  %v825_v34 = vld [vmem:[#allocation12 + $0x1b8] sm:$0xff]  ;;  %7078 = vst [vmem:[#allocation33_spill] sm:$0xff] %v6028_v37  ;;  %v6033_v38 = vpack.c.bf16 %v816_v28, %v812_v25  ;;  %v6035_v39 = vpack.c.bf16 %v823_v30, %v819_v29  ;;  %v818_v42 = vld [vmem:[#allocation12 + $0x180] sm:$0xff]  ;;  %v820_v44 = vld [vmem:[#allocation12 + $0x190] sm:$0xff] }
  0xfe   : > { %3974 = vmatprep.subr.bf16.mxu1 %v6004_v10  ;;  %3768 = vmatmul.mubr.msk.f32.gmra.mrb[6].mxu0 %vm544_vm0, %v512_v16  ;;  %v513_v35 = vld [vmem:[%s5924_s1 + $0x20] sm:$0xff]  ;;  %v822_v43 = vld [vmem:[#allocation12 + $0x1a0] sm:$0xff]  ;;  %v6038_v46 = vpack.c.bf16 %v825_v34, %v821_v33  ;;  %v827_v48 = vld [vmem:[#allocation12 + $0x1c8] sm:$0xff] }
  0xff   : > { %3773 = vmatmul.mubr.msk.f32.gmra.mrb[6].mxu1 %vm544_vm0, %v512_v16  ;;  %648 = vmatprep.mubr.f32.mxu0 %v6880_v8  ;;  %7079 = vst [vmem:[#allocation34_spill] sm:$0xff] %v6033_v38  ;;  %7080 = vst [vmem:[#allocation35_spill] sm:$0xff] %v6035_v39  ;;  %v824_v47 = vld [vmem:[#allocation12 + $0x1b0] sm:$0xff]  ;;  %v831_v49 = vld [vmem:[#allocation12 + $0x1e8] sm:$0xff]  ;;  %v6044_v53 = vpack.c.bf16 %v822_v43, %v818_v42 }
 0x100   : > { %3944 = vmatpush1.bf16.msra.mxu0 %v6011_v17  ;;  %743 = vmatprep.mubr.f32.mxu1 %v6880_v8  ;;  %7081 = vst [vmem:[#allocation36_spill] sm:$0xff] %v6038_v46  ;;  %v829_v50 = vld [vmem:[#allocation12 + $0x1d8] sm:$0xff]  ;;  %v6049_v54 = vpack.c.bf16 %v824_v47, %v820_v44  ;;  %v6051_v57 = vpack.c.bf16 %v831_v49, %v827_v48  ;;  %v826_v58 = vld [vmem:[#allocation12 + $0x1c0] sm:$0xff]  ;;  %v828_v61 = vld [vmem:[#allocation12 + $0x1d0] sm:$0xff] }
 0x101   : > { %3976 = vmatpush1.bf16.msra.mxu1 %v6016_v20  ;;  %3946 = vmatprep.subr.bf16.mxu0 %v6018_v21  ;;  %v833_v51 = vld [vmem:[#allocation12 + $0x1f8] sm:$0xff]  ;;  %7082 = vst [vmem:[#allocation37_spill] sm:$0xff] %v6044_v53  ;;  %v830_v59 = vld [vmem:[#allocation12 + $0x1e0] sm:$0xff]  ;;  %v832_v63 = vld [vmem:[#allocation12 + $0x1f0] sm:$0xff] }
 0x102   : > { %3978 = vmatprep.subr.bf16.mxu1 %v6021_v26  ;;  %3769 = vmatmul.mubr.msk.f32.gmra.mrb[8].mxu0 %vm544_vm0, %v513_v35  ;;  %7083 = vst [vmem:[#allocation38_spill] sm:$0xff] %v6049_v54  ;;  %7084 = vst [vmem:[#allocation39_spill] sm:$0xff] %v6051_v57  ;;  %v6054_v62 = vpack.c.bf16 %v833_v51, %v829_v50  ;;  %v899_v0 = vld [vmem:[#allocation15 + $0x8] sm:$0xff]  ;;  %v901_v3 = vld [vmem:[#allocation15 + $0x18] sm:$0xff]  ;;  %v6057_v7 = vpack.c.bf16 %v830_v59, %v826_v58 }
 0x103   : > { %3774 = vmatmul.mubr.msk.f32.gmra.mrb[8].mxu1 %vm544_vm0, %v513_v35  ;;  %1056 = vmatprep.mubr.f32.mxu0 %v6880_v8  ;;  %v903_v1 = vld [vmem:[#allocation15 + $0x28] sm:$0xff]  ;;  %v905_v6 = vld [vmem:[#allocation15 + $0x38] sm:$0xff]  ;;  %v6061_v9 = vpack.c.bf16 %v832_v63, %v828_v61  ;;  %v898_v12 = vld [vmem:[#allocation15] sm:$0xff] }
 0x104   : > { %3948 = vmatpush1.bf16.msra.mxu0 %v6028_v37  ;;  %1127 = vmatprep.mubr.f32.mxu1 %v6880_v8  ;;  %7085 = vst [vmem:[#allocation40_spill] sm:$0xff] %v6054_v62  ;;  %7086 = vst [vmem:[#allocation41_spill] sm:$0xff] %v6057_v7  ;;  %v6063_v11 = vpack.c.bf16 %v903_v1, %v899_v0  ;;  %v902_v13 = vld [vmem:[#allocation15 + $0x20] sm:$0xff]  ;;  %v900_v14 = vld [vmem:[#allocation15 + $0x10] sm:$0xff]  ;;  %v6066_v15 = vpack.c.bf16 %v905_v6, %v901_v3 }
 0x105   : > { %3980 = vmatpush1.bf16.msra.mxu1 %v6033_v38  ;;  %3950 = vmatprep.subr.bf16.mxu0 %v6035_v39  ;;  %7087 = vst [vmem:[#allocation42_spill] sm:$0xff] %v6061_v9  ;;  %v904_v16 = vld [vmem:[#allocation15 + $0x30] sm:$0xff]  ;;  %v907_v22 = vld [vmem:[#allocation15 + $0x48] sm:$0xff]  ;;  %v909_v25 = vld [vmem:[#allocation15 + $0x58] sm:$0xff]  ;;  %v6069_v30 = vpack.c.bf16 %v902_v13, %v898_v12 }
 0x106   : > { %3982 = vmatprep.subr.bf16.mxu1 %v6038_v46  ;;  %7088 = vst [vmem:[#allocation43_spill] sm:$0xff] %v6063_v11  ;;  %7089 = vst [vmem:[#allocation44_spill] sm:$0xff] %v6066_v15  ;;  %v911_v24 = vld [vmem:[#allocation15 + $0x68] sm:$0xff]  ;;  %v913_v28 = vld [vmem:[#allocation15 + $0x78] sm:$0xff]  ;;  %v6073_v33 = vpack.c.bf16 %v904_v16, %v900_v14 }
 0x107   : > { %v984_v29 = vld [vmem:[#allocation3] sm:$0xff]  ;;  %7090 = vst [vmem:[#allocation45_spill] sm:$0xff] %v6069_v30  ;;  %v6075_v34 = vpack.c.bf16 %v911_v24, %v907_v22  ;;  %v906_v35 = vld [vmem:[#allocation15 + $0x40] sm:$0xff]  ;;  %v6078_v44 = vpack.c.bf16 %v913_v28, %v909_v25  ;;  %v915_v48 = vld [vmem:[#allocation15 + $0x88] sm:$0xff] }
 0x108   : > { %3952 = vmatpush1.bf16.msra.mxu0 %v6044_v53  ;;  %7091 = vst [vmem:[#allocation46_spill] sm:$0xff] %v6073_v33  ;;  %v910_v42 = vld [vmem:[#allocation15 + $0x60] sm:$0xff]  ;;  %v908_v43 = vld [vmem:[#allocation15 + $0x50] sm:$0xff]  ;;  %v919_v49 = vld [vmem:[#allocation15 + $0xa8] sm:$0xff] }
 0x109   : > { %3984 = vmatpush1.bf16.msra.mxu1 %v6049_v54  ;;  %3954 = vmatprep.subr.bf16.mxu0 %v6051_v57  ;;  %7092 = vst [vmem:[#allocation47_spill] sm:$0xff] %v6075_v34  ;;  %7093 = vst [vmem:[#allocation48_spill] sm:$0xff] %v6078_v44  ;;  %v912_v47 = vld [vmem:[#allocation15 + $0x70] sm:$0xff]  ;;  %v917_v50 = vld [vmem:[#allocation15 + $0x98] sm:$0xff]  ;;  %v6081_v58 = vpack.c.bf16 %v910_v42, %v906_v35  ;;  %v6087_v61 = vpack.c.bf16 %v919_v49, %v915_v48 }
 0x10a   : > { %3986 = vmatprep.subr.bf16.mxu1 %v6054_v62  ;;  %v921_v51 = vld [vmem:[#allocation15 + $0xb8] sm:$0xff]  ;;  %v6085_v59 = vpack.c.bf16 %v912_v47, %v908_v43  ;;  %v914_v63 = vld [vmem:[#allocation15 + $0x80] sm:$0xff]  ;;  %v916_v1 = vld [vmem:[#allocation15 + $0x90] sm:$0xff] }
 0x10b   : > { %7094 = vst [vmem:[#allocation49_spill] sm:$0xff] %v6081_v58  ;;  %7096 = vst [vmem:[#allocation51_spill] sm:$0xff] %v6087_v61  ;;  %v918_v0 = vld [vmem:[#allocation15 + $0xa0] sm:$0xff]  ;;  %v6090_v3 = vpack.c.bf16 %v921_v51, %v917_v50  ;;  %v920_v6 = vld [vmem:[#allocation15 + $0xb0] sm:$0xff] }
 0x10c   : > { %3956 = vmatpush1.bf16.msra.mxu0 %v6057_v7  ;;  %7095 = vst [vmem:[#allocation50_spill] sm:$0xff] %v6085_v59  ;;  %v923_v12 = vld [vmem:[#allocation15 + $0xc8] sm:$0xff]  ;;  %v925_v14 = vld [vmem:[#allocation15 + $0xd8] sm:$0xff]  ;;  %v6095_v22 = vpack.c.bf16 %v918_v0, %v914_v63  ;;  %v6099_v24 = vpack.c.bf16 %v920_v6, %v916_v1  ;;  %v922_v28 = vld [vmem:[#allocation15 + $0xc0] sm:$0xff] }
 0x10d   : > { %3988 = vmatpush1.bf16.msra.mxu1 %v6061_v9  ;;  %3990 = vmatprep.subr.bf16.mxu0 %v6063_v11  ;;  %7097 = vst [vmem:[#allocation52_spill] sm:$0xff] %v6090_v3  ;;  %v927_v13 = vld [vmem:[#allocation15 + $0xe8] sm:$0xff]  ;;  %v929_v16 = vld [vmem:[#allocation15 + $0xf8] sm:$0xff]  ;;  %v924_v35 = vld [vmem:[#allocation15 + $0xd0] sm:$0xff] }
 0x10e   : > { %4022 = vmatprep.subr.bf16.mxu1 %v6066_v15  ;;  %7098 = vst [vmem:[#allocation53_spill] sm:$0xff] %v6095_v22  ;;  %7099 = vst [vmem:[#allocation54_spill] sm:$0xff] %v6099_v24  ;;  %v6101_v25 = vpack.c.bf16 %v927_v13, %v923_v12  ;;  %v6104_v42 = vpack.c.bf16 %v929_v16, %v925_v14  ;;  %v928_v43 = vld [vmem:[#allocation15 + $0xf0] sm:$0xff]  ;;  %v931_v47 = vld [vmem:[#allocation15 + $0x108] sm:$0xff] }
 0x10f   : > { %1057 = vmatmul.mubr.f32.vlgmr.msra.gmra.mrb[0].mxu0 %v984_v29  ;;  %v935_v48 = vld [vmem:[#allocation15 + $0x128] sm:$0xff]  ;;  %v933_v49 = vld [vmem:[#allocation15 + $0x118] sm:$0xff]  ;;  %v6111_v63 = vpack.c.bf16 %v928_v43, %v924_v35  ;;  %v930_v1 = vld [vmem:[#allocation15 + $0x100] sm:$0xff] }
 0x110   : > { %1128 = vmatmul.mubr.f32.vlgmr.msra.gmra.mrb[0].mxu1 %v984_v29  ;;  %3992 = vmatpush1.bf16.msra.mxu0 %v6069_v30  ;;  %7100 = vst [vmem:[#allocation55_spill] sm:$0xff] %v6101_v25  ;;  %v926_v29 = vld [vmem:[#allocation15 + $0xe0] sm:$0xff]  ;;  %7101 = vst [vmem:[#allocation56_spill] sm:$0xff] %v6104_v42  ;;  %v937_v50 = vld [vmem:[#allocation15 + $0x138] sm:$0xff]  ;;  %v6113_v0 = vpack.c.bf16 %v935_v48, %v931_v47 }
 0x111   : > { %4024 = vmatpush1.bf16.msra.mxu1 %v6073_v33  ;;  %3994 = vmatprep.subr.bf16.mxu0 %v6075_v34  ;;  %v6107_v51 = vpack.c.bf16 %v926_v29, %v922_v28  ;;  %7103 = vst [vmem:[#allocation58_spill] sm:$0xff] %v6111_v63  ;;  %v934_v6 = vld [vmem:[#allocation15 + $0x120] sm:$0xff]  ;;  %v6116_v12 = vpack.c.bf16 %v937_v50, %v933_v49  ;;  %v932_v13 = vld [vmem:[#allocation15 + $0x110] sm:$0xff]  ;;  %v939_v29 = vld [vmem:[#allocation15 + $0x148] sm:$0xff] }
 0x112   : > { %4026 = vmatprep.subr.bf16.mxu1 %v6078_v44  ;;  %1226 = vmatprep.mubr.f32.mxu0 %v6880_v8  ;;  %7104 = vst [vmem:[#allocation59_spill] sm:$0xff] %v6113_v0  ;;  %v936_v14 = vld [vmem:[#allocation15 + $0x130] sm:$0xff]  ;;  %v6119_v16 = vpack.c.bf16 %v934_v6, %v930_v1  ;;  %v943_v35 = vld [vmem:[#allocation15 + $0x168] sm:$0xff]  ;;  %v941_v43 = vld [vmem:[#allocation15 + $0x158] sm:$0xff] }
 0x113   : > { %1297 = vmatprep.mubr.f32.mxu1 %v6880_v8  ;;  %7102 = vst [vmem:[#allocation57_spill] sm:$0xff] %v6107_v51  ;;  %7105 = vst [vmem:[#allocation60_spill] sm:$0xff] %v6116_v12  ;;  %v6123_v28 = vpack.c.bf16 %v936_v14, %v932_v13  ;;  %v6128_v47 = vpack.c.bf16 %v943_v35, %v939_v29  ;;  %v945_v48 = vld [vmem:[#allocation15 + $0x178] sm:$0xff]  ;;  %v938_v49 = vld [vmem:[#allocation15 + $0x140] sm:$0xff] }
 0x114   : > { %3996 = vmatpush1.bf16.msra.mxu0 %v6081_v58  ;;  %7106 = vst [vmem:[#allocation61_spill] sm:$0xff] %v6119_v16  ;;  %v942_v50 = vld [vmem:[#allocation15 + $0x160] sm:$0xff]  ;;  %v6130_v1 = vpack.c.bf16 %v945_v48, %v941_v43  ;;  %v940_v13 = vld [vmem:[#allocation15 + $0x150] sm:$0xff]  ;;  %v951_v29 = vld [vmem:[#allocation15 + $0x1a8] sm:$0xff] }
 0x115   : > { %4028 = vmatpush1.bf16.msra.mxu1 %v6085_v59  ;;  %3998 = vmatprep.subr.bf16.mxu0 %v6087_v61  ;;  %7107 = vst [vmem:[#allocation62_spill] sm:$0xff] %v6123_v28  ;;  %7108 = vst [vmem:[#allocation63_spill] sm:$0xff] %v6128_v47  ;;  %v6132_v6 = vpack.c.bf16 %v942_v50, %v938_v49  ;;  %v944_v14 = vld [vmem:[#allocation15 + $0x170] sm:$0xff]  ;;  %v949_v35 = vld [vmem:[#allocation15 + $0x198] sm:$0xff] }
 0x116   : > { %4030 = vmatprep.subr.bf16.mxu1 %v6090_v3  ;;  %7109 = vst [vmem:[#allocation64_spill] sm:$0xff] %v6130_v1  ;;  %v6135_v8 = vpack.c.bf16 %v944_v14, %v940_v13  ;;  %v953_v43 = vld [vmem:[#allocation15 + $0x1b8] sm:$0xff]  ;;  %v946_v48 = vld [vmem:[#allocation15 + $0x180] sm:$0xff]  ;;  %v948_v13 = vld [vmem:[#allocation15 + $0x190] sm:$0xff] }
 0x117   : > { %7110 = vst [vmem:[#allocation65_spill] sm:$0xff] %v6132_v6  ;;  %v950_v49 = vld [vmem:[#allocation15 + $0x1a0] sm:$0xff]  ;;  %v6142_v50 = vpack.c.bf16 %v953_v43, %v949_v35  ;;  %v952_v14 = vld [vmem:[#allocation15 + $0x1b0] sm:$0xff]  ;;  %v961_v35 = vld [vmem:[#allocation15 + $0x1f8] sm:$0xff] }
 0x118   : > { %4000 = vmatpush1.bf16.msra.mxu0 %v6095_v22  ;;  %7111 = vst [vmem:[#allocation66_spill] sm:$0xff] %v6135_v8  ;;  %v954_v43 = vld [vmem:[#allocation15 + $0x1c0] sm:$0xff] }
 0x119   : > { %4032 = vmatpush1.bf16.msra.mxu1 %v6099_v24  ;;  %4002 = vmatprep.subr.bf16.mxu0 %v6101_v25  ;;  %7113 = vst [vmem:[#allocation68_spill] sm:$0xff] %v6142_v50 }
 0x11a   : > { %4034 = vmatprep.subr.bf16.mxu1 %v6104_v42 }
 0x11c   : > { %4004 = vmatpush1.bf16.msra.mxu0 %v6107_v51 }
 0x11d   : > { %4036 = vmatpush1.bf16.msra.mxu1 %v6111_v63  ;;  %4006 = vmatprep.subr.bf16.mxu0 %v6113_v0 }
 0x11e   : > { %4038 = vmatprep.subr.bf16.mxu1 %v6116_v12  ;;  %v6144_v12 = vpack.c.bf16 %v950_v49, %v946_v48  ;;  %v958_v48 = vld [vmem:[#allocation15 + $0x1e0] sm:$0xff] }
 0x120   : > { %4008 = vmatpush1.bf16.msra.mxu0 %v6119_v16  ;;  %7114 = vst [vmem:[#allocation69_spill] sm:$0xff] %v6144_v12 }
 0x121   : > { %4040 = vmatpush1.bf16.msra.mxu1 %v6123_v28  ;;  %4010 = vmatprep.subr.bf16.mxu0 %v6128_v47  ;;  %v947_v28 = vld [vmem:[#allocation15 + $0x188] sm:$0xff]  ;;  %v6156_v47 = vpack.c.bf16 %v958_v48, %v954_v43  ;;  %v838_v43 = vld [vmem:[#allocation13 + $0x20] sm:$0xff] }
 0x122   : > { %4042 = vmatprep.subr.bf16.mxu1 %v6130_v1  ;;  %v6140_v16 = vpack.c.bf16 %v951_v29, %v947_v28  ;;  %v6147_v1 = vpack.c.bf16 %v952_v14, %v948_v13  ;;  %v959_v28 = vld [vmem:[#allocation15 + $0x1e8] sm:$0xff]  ;;  %v957_v29 = vld [vmem:[#allocation15 + $0x1d8] sm:$0xff]  ;;  %v956_v13 = vld [vmem:[#allocation15 + $0x1d0] sm:$0xff] }
 0x123   : > { %v6154_v49 = vpack.c.bf16 %v961_v35, %v957_v29  ;;  %7118 = vst [vmem:[#allocation73_spill] sm:$0xff] %v6156_v47  ;;  %v960_v14 = vld [vmem:[#allocation15 + $0x1f0] sm:$0xff]  ;;  %v841_v29 = vld [vmem:[#allocation13 + $0x38] sm:$0xff]  ;;  %v834_v35 = vld [vmem:[#allocation13] sm:$0xff] }
 0x124   : > { %4012 = vmatpush1.bf16.msra.mxu0 %v6132_v6  ;;  %7112 = vst [vmem:[#allocation67_spill] sm:$0xff] %v6140_v16  ;;  %7115 = vst [vmem:[#allocation70_spill] sm:$0xff] %v6147_v1 }
 0x125   : > { %4044 = vmatpush1.bf16.msra.mxu1 %v6135_v8  ;;  %4014 = vmatprep.subr.bf16.mxu0 %v6140_v16  ;;  %v955_v8 = vld [vmem:[#allocation15 + $0x1c8] sm:$0xff]  ;;  %7117 = vst [vmem:[#allocation72_spill] sm:$0xff] %v6154_v49  ;;  %v6168_v16 = vpack.c.bf16 %v838_v43, %v834_v35  ;;  %v842_v35 = vld [vmem:[#allocation13 + $0x40] sm:$0xff] }
 0x126   : > { %4046 = vmatprep.subr.bf16.mxu1 %v6142_v50  ;;  %v6152_v6 = vpack.c.bf16 %v959_v28, %v955_v8  ;;  %v6159_v50 = vpack.c.bf16 %v960_v14, %v956_v13  ;;  %v839_v8 = vld [vmem:[#allocation13 + $0x28] sm:$0xff]  ;;  %v837_v28 = vld [vmem:[#allocation13 + $0x18] sm:$0xff]  ;;  %v836_v13 = vld [vmem:[#allocation13 + $0x10] sm:$0xff] }
 0x127   : > { %v6166_v48 = vpack.c.bf16 %v841_v29, %v837_v28  ;;  %7122 = vst [vmem:[#allocation77_spill] sm:$0xff] %v6168_v16  ;;  %v840_v14 = vld [vmem:[#allocation13 + $0x30] sm:$0xff]  ;;  %v849_v29 = vld [vmem:[#allocation13 + $0x78] sm:$0xff]  ;;  %v846_v43 = vld [vmem:[#allocation13 + $0x60] sm:$0xff] }
 0x128   : > { %4016 = vmatpush1.bf16.msra.mxu0 %v6144_v12  ;;  %7116 = vst [vmem:[#allocation71_spill] sm:$0xff] %v6152_v6  ;;  %7119 = vst [vmem:[#allocation74_spill] sm:$0xff] %v6159_v50 }
 0x129   : > { %4048 = vmatpush1.bf16.msra.mxu1 %v6147_v1  ;;  %4018 = vmatprep.subr.bf16.mxu0 %v6152_v6  ;;  %v835_v1 = vld [vmem:[#allocation13 + $0x8] sm:$0xff]  ;;  %7121 = vst [vmem:[#allocation76_spill] sm:$0xff] %v6166_v48  ;;  %v7127_v6 = vmov 0.0  }
 0x12a   : > { %4050 = vmatprep.subr.bf16.mxu1 %v6154_v49  ;;  %v6164_v12 = vpack.c.bf16 %v839_v8, %v835_v1  ;;  %v986_v49 = vld [vmem:[#allocation5] sm:$0xff]  ;;  %v847_v1 = vld [vmem:[#allocation13 + $0x68] sm:$0xff]  ;;  %v845_v8 = vld [vmem:[#allocation13 + $0x58] sm:$0xff] }
 0x12c   : > { %4020 = vmatpush1.bf16.msra.mxu0 %v6156_v47  ;;  %7120 = vst [vmem:[#allocation75_spill] sm:$0xff] %v6164_v12  ;;  %v6171_v47 = vpack.c.bf16 %v840_v14, %v836_v13  ;;  %v6180_v13 = vpack.c.bf16 %v846_v43, %v842_v35  ;;  %v844_v14 = vld [vmem:[#allocation13 + $0x50] sm:$0xff]  ;;  %v850_v35 = vld [vmem:[#allocation13 + $0x80] sm:$0xff] }
 0x12d   : > { %4052 = vmatpush1.bf16.msra.mxu1 %v6159_v50  ;;  %4054 = vmatprep.subr.bf16.mxu0 %v6164_v12  ;;  %v843_v50 = vld [vmem:[#allocation13 + $0x48] sm:$0xff]  ;;  %v6178_v12 = vpack.c.bf16 %v849_v29, %v845_v8  ;;  %v857_v29 = vld [vmem:[#allocation13 + $0xb8] sm:$0xff]  ;;  %v854_v43 = vld [vmem:[#allocation13 + $0xa0] sm:$0xff] }
 0x12e   : > { %7123 = vst [vmem:[#allocation78_spill] sm:$0xff] %v6171_v47  ;;  %4086 = vmatprep.subr.bf16.mxu1 %v6166_v48  ;;  %v6175_v28 = vpack.c.bf16 %v847_v1, %v843_v50  ;;  %7126 = vst [vmem:[#allocation81_spill] sm:$0xff] %v6180_v13  ;;  %v848_v48 = vld [vmem:[#allocation13 + $0x70] sm:$0xff]  ;;  %v851_v50 = vld [vmem:[#allocation13 + $0x88] sm:$0xff] }
 0x12f   : > { %1227 = vmatmul.mubr.f32.vlgmr.msra.gmra.mrb[10].mxu0 %v986_v49  ;;  %7125 = vst [vmem:[#allocation80_spill] sm:$0xff] %v6178_v12  ;;  %v855_v1 = vld [vmem:[#allocation13 + $0xa8] sm:$0xff] }
 0x130   : > { %1298 = vmatmul.mubr.f32.vlgmr.msra.gmra.mrb[10].mxu1 %v986_v49  ;;  %4056 = vmatpush1.bf16.msra.mxu0 %v6168_v16  ;;  %7124 = vst [vmem:[#allocation79_spill] sm:$0xff] %v6175_v28  ;;  %v6184_v49 = vpack.c.bf16 %v848_v48, %v844_v14  ;;  %v853_v16 = vld [vmem:[#allocation13 + $0x98] sm:$0xff]  ;;  %v6189_v8 = vpack.c.bf16 %v855_v1, %v851_v50  ;;  %v852_v14 = vld [vmem:[#allocation13 + $0x90] sm:$0xff]  ;;  %v863_v50 = vld [vmem:[#allocation13 + $0xe8] sm:$0xff] }
 0x131   : > { %4088 = vmatpush1.bf16.msra.mxu1 %v6171_v47  ;;  %1368 = vmatprep.mubr.f32.mxu0 %v7127_v6  ;;  %v6192_v47 = vpack.c.bf16 %v857_v29, %v853_v16  ;;  %v6194_v48 = vpack.c.bf16 %v854_v43, %v850_v35  ;;  %v861_v1 = vld [vmem:[#allocation13 + $0xd8] sm:$0xff]  ;;  %v858_v16 = vld [vmem:[#allocation13 + $0xc0] sm:$0xff] }
 0x132   : > { %4058 = vmatprep.subr.bf16.mxu0 %v6175_v28  ;;  %7128 = vst [vmem:[#allocation82_spill] sm:$0xff] %v6184_v49  ;;  %1439 = vmatprep.mubr.f32.mxu1 %v7127_v6  ;;  %7129 = vst [vmem:[#allocation83_spill] sm:$0xff] %v6189_v8  ;;  %v856_v28 = vld [vmem:[#allocation13 + $0xb0] sm:$0xff]  ;;  %v862_v29 = vld [vmem:[#allocation13 + $0xe0] sm:$0xff] }
 0x133   : > { %4090 = vmatprep.subr.bf16.mxu1 %v6178_v12  ;;  %7130 = vst [vmem:[#allocation84_spill] sm:$0xff] %v6192_v47  ;;  %7131 = vst [vmem:[#allocation85_spill] sm:$0xff] %v6194_v48  ;;  %v6197_v12 = vpack.c.bf16 %v856_v28, %v852_v14  ;;  %v6206_v43 = vpack.c.bf16 %v862_v29, %v858_v16  ;;  %v860_v28 = vld [vmem:[#allocation13 + $0xd0] sm:$0xff]  ;;  %v870_v16 = vld [vmem:[#allocation13 + $0x120] sm:$0xff] }
 0x134   : > { %4060 = vmatpush1.bf16.msra.mxu0 %v6180_v13  ;;  %v859_v13 = vld [vmem:[#allocation13 + $0xc8] sm:$0xff]  ;;  %v864_v14 = vld [vmem:[#allocation13 + $0xf0] sm:$0xff] }
 0x135   : > { %4092 = vmatpush1.bf16.msra.mxu1 %v6184_v49  ;;  %4062 = vmatprep.subr.bf16.mxu0 %v6189_v8  ;;  %7132 = vst [vmem:[#allocation86_spill] sm:$0xff] %v6197_v12  ;;  %v6201_v0 = vpack.c.bf16 %v863_v50, %v859_v13  ;;  %v865_v49 = vld [vmem:[#allocation13 + $0xf8] sm:$0xff]  ;;  %7135 = vst [vmem:[#allocation89_spill] sm:$0xff] %v6206_v43  ;;  %v871_v13 = vld [vmem:[#allocation13 + $0x128] sm:$0xff] }
 0x136   : > { %4094 = vmatprep.subr.bf16.mxu1 %v6192_v47  ;;  %v6204_v35 = vpack.c.bf16 %v865_v49, %v861_v1  ;;  %v6209_v47 = vpack.c.bf16 %v864_v14, %v860_v28  ;;  %v869_v50 = vld [vmem:[#allocation13 + $0x118] sm:$0xff]  ;;  %v866_v49 = vld [vmem:[#allocation13 + $0x100] sm:$0xff]  ;;  %v868_v29 = vld [vmem:[#allocation13 + $0x110] sm:$0xff] }
 0x137   : > { %7133 = vst [vmem:[#allocation87_spill] sm:$0xff] %v6201_v0  ;;  %v6219_v28 = vpack.c.bf16 %v870_v16, %v866_v49  ;;  %v880_v16 = vld [vmem:[#allocation13 + $0x170] sm:$0xff] }
 0x138   : > { %4064 = vmatpush1.bf16.msra.mxu0 %v6194_v48  ;;  %7134 = vst [vmem:[#allocation88_spill] sm:$0xff] %v6204_v35  ;;  %7136 = vst [vmem:[#allocation90_spill] sm:$0xff] %v6209_v47  ;;  %v867_v48 = vld [vmem:[#allocation13 + $0x108] sm:$0xff] }
 0x139   : > { %4096 = vmatpush1.bf16.msra.mxu1 %v6197_v12  ;;  %4066 = vmatprep.subr.bf16.mxu0 %v6201_v0  ;;  %v6213_v8 = vpack.c.bf16 %v871_v13, %v867_v48  ;;  %v873_v12 = vld [vmem:[#allocation13 + $0x138] sm:$0xff]  ;;  %v872_v0 = vld [vmem:[#allocation13 + $0x130] sm:$0xff]  ;;  %7139 = vst [vmem:[#allocation93_spill] sm:$0xff] %v6219_v28  ;;  %v879_v48 = vld [vmem:[#allocation13 + $0x168] sm:$0xff] }
 0x13a   : > { %4098 = vmatprep.subr.bf16.mxu1 %v6204_v35  ;;  %v6216_v1 = vpack.c.bf16 %v873_v12, %v869_v50  ;;  %v6221_v14 = vpack.c.bf16 %v872_v0, %v868_v29  ;;  %v877_v13 = vld [vmem:[#allocation13 + $0x158] sm:$0xff]  ;;  %v874_v50 = vld [vmem:[#allocation13 + $0x140] sm:$0xff]  ;;  %v876_v0 = vld [vmem:[#allocation13 + $0x150] sm:$0xff] }
 0x13b   : > { %7137 = vst [vmem:[#allocation91_spill] sm:$0xff] %v6213_v8  ;;  %v881_v12 = vld [vmem:[#allocation13 + $0x178] sm:$0xff]  ;;  %v883_v29 = vld [vmem:[#allocation13 + $0x188] sm:$0xff] }
 0x13c   : > { %4068 = vmatpush1.bf16.msra.mxu0 %v6206_v43  ;;  %7138 = vst [vmem:[#allocation92_spill] sm:$0xff] %v6216_v1  ;;  %7140 = vst [vmem:[#allocation94_spill] sm:$0xff] %v6221_v14  ;;  %v875_v43 = vld [vmem:[#allocation13 + $0x148] sm:$0xff]  ;;  %v6228_v63 = vpack.c.bf16 %v881_v12, %v877_v13  ;;  %v882_v13 = vld [vmem:[#allocation13 + $0x180] sm:$0xff] }
 0x13d   : > { %4100 = vmatpush1.bf16.msra.mxu1 %v6209_v47  ;;  %4070 = vmatprep.subr.bf16.mxu0 %v6213_v8  ;;  %v6225_v35 = vpack.c.bf16 %v879_v48, %v875_v43  ;;  %v878_v47 = vld [vmem:[#allocation13 + $0x160] sm:$0xff]  ;;  %v887_v8 = vld [vmem:[#allocation13 + $0x1a8] sm:$0xff]  ;;  %v889_v43 = vld [vmem:[#allocation13 + $0x1b8] sm:$0xff] }
 0x13e   : > { %4102 = vmatprep.subr.bf16.mxu1 %v6216_v1  ;;  %7142 = vst [vmem:[#allocation96_spill] sm:$0xff] %v6228_v63  ;;  %v6230_v49 = vpack.c.bf16 %v878_v47, %v874_v50  ;;  %v6233_v1 = vpack.c.bf16 %v880_v16, %v876_v0  ;;  %v6236_v48 = vpack.c.bf16 %v887_v8, %v883_v29  ;;  %v886_v12 = vld [vmem:[#allocation13 + $0x1a0] sm:$0xff]  ;;  %v884_v47 = vld [vmem:[#allocation13 + $0x190] sm:$0xff]  ;;  %v895_v0 = vld [vmem:[#allocation13 + $0x1e8] sm:$0xff] }
 0x13f   : > { %7141 = vst [vmem:[#allocation95_spill] sm:$0xff] %v6225_v35  ;;  %v6241_v50 = vpack.c.bf16 %v886_v12, %v882_v13  ;;  %v897_v29 = vld [vmem:[#allocation13 + $0x1f8] sm:$0xff]  ;;  %v894_v13 = vld [vmem:[#allocation13 + $0x1e0] sm:$0xff]  ;;  %v892_v12 = vld [vmem:[#allocation13 + $0x1d0] sm:$0xff] }
 0x140   : > { %4072 = vmatpush1.bf16.msra.mxu0 %v6219_v28  ;;  %7143 = vst [vmem:[#allocation97_spill] sm:$0xff] %v6230_v49  ;;  %7144 = vst [vmem:[#allocation98_spill] sm:$0xff] %v6233_v1  ;;  %v885_v28 = vld [vmem:[#allocation13 + $0x198] sm:$0xff] }
 0x141   : > { %4104 = vmatpush1.bf16.msra.mxu1 %v6221_v14  ;;  %4074 = vmatprep.subr.bf16.mxu0 %v6225_v35  ;;  %7145 = vst [vmem:[#allocation99_spill] sm:$0xff] %v6236_v48  ;;  %v6238_v51 = vpack.c.bf16 %v889_v43, %v885_v28  ;;  %7147 = vst [vmem:[#allocation101_spill] sm:$0xff] %v6241_v50  ;;  %v888_v14 = vld [vmem:[#allocation13 + $0x1b0] sm:$0xff]  ;;  %v891_v35 = vld [vmem:[#allocation13 + $0x1c8] sm:$0xff] }
 0x142   : > { %4106 = vmatprep.subr.bf16.mxu1 %v6228_v63  ;;  %v6245_v16 = vpack.c.bf16 %v888_v14, %v884_v47  ;;  %v6247_v8 = vpack.c.bf16 %v895_v0, %v891_v35  ;;  %v893_v28 = vld [vmem:[#allocation13 + $0x1d8] sm:$0xff]  ;;  %v890_v43 = vld [vmem:[#allocation13 + $0x1c0] sm:$0xff]  ;;  %v524_v14 = vlaneseq }
 0x143   : > { %7146 = vst [vmem:[#allocation100_spill] sm:$0xff] %v6238_v51  ;;  %v6250_v63 = vpack.c.bf16 %v897_v29, %v893_v28  ;;  %v6253_v42 = vpack.c.bf16 %v894_v13, %v890_v43 }
 0x144   : > { %4076 = vmatpush1.bf16.msra.mxu0 %v6230_v49  ;;  %7148 = vst [vmem:[#allocation102_spill] sm:$0xff] %v6245_v16  ;;  %7149 = vst [vmem:[#allocation103_spill] sm:$0xff] %v6247_v8  ;;  %v896_v49 = vld [vmem:[#allocation13 + $0x1f0] sm:$0xff]  ;;  %v6264_v47 = vshrl.u32 %v524_v14, 7 }
 0x145   : > { %4108 = vmatpush1.bf16.msra.mxu1 %v6233_v1  ;;  %4078 = vmatprep.subr.bf16.mxu0 %v6236_v48  ;;  %7150 = vst [vmem:[#allocation104_spill] sm:$0xff] %v6250_v63  ;;  %7151 = vst [vmem:[#allocation105_spill] sm:$0xff] %v6253_v42  ;;  %v6257_v35 = vpack.c.bf16 %v896_v49, %v892_v12  ;;  %v522_v49 = vld [vmem:[%s7153_s30] sm:$0xf] }
 0x146   : > { %4110 = vmatprep.subr.bf16.mxu1 %v6238_v51  ;;  %v6978_v0 = vsub.s32 0, %v6264_v47  ;;  %v6979_v28 = vsub.s32 1, %v6264_v47  ;;  %v6986_v12 = vsub.s32 3, %v6264_v47 }
 0x147   : > { %7152 = vst [vmem:[#allocation106_spill] sm:$0xff] %v6257_v35 }
 0x148   : > { %4080 = vmatpush1.bf16.msra.mxu0 %v6241_v50  ;;  %v6273_v29 = vrot.slane %v522_v49, %v6978_v0  ;;  %v6277_v43 = vrot.slane %v522_v49, %v6979_v28  ;;  %v6284_v0 = vrot.slane %v522_v49, %v6986_v12  ;;  %v6995_v28 = vsub.s32 2, %v6264_v47 }
 0x149   : > { %4112 = vmatpush1.bf16.msra.mxu1 %v6245_v16  ;;  %4082 = vmatprep.subr.bf16.mxu0 %v6247_v8 }
 0x14a   : > { %4114 = vmatprep.subr.bf16.mxu1 %v6250_v63  ;;  %7154 = vst [vmem:[#allocation107_spill] sm:$0xff] %v6273_v29  ;;  %7155 = vst [vmem:[#allocation108_spill] sm:$0xff] %v6277_v43 }
 0x14b   : > { %7156 = vst [vmem:[#allocation109_spill] sm:$0xff] %v6284_v0 }
 0x14c   : > { %4084 = vmatpush1.bf16.msra.mxu0 %v6253_v42 }
 0x14d   : > { %4116 = vmatpush1.bf16.msra.mxu1 %v6257_v35  ;;  %4118 = vmatprep.subr.bf16.mxu0 %v5945_v18 }
 0x14e   : > { %4150 = vmatprep.subr.bf16.mxu1 %v5947_v19 }
 0x1e2   : > { %v1058_v13 = vpop.f32.mrb[0].mxu0 }
 0x1e3   : > { %v4933_v14 = vadd.f32 %v1058_v13, %v6273_v29  ;;  %v1129_v19 = vpop.f32.mrb[0].mxu1  ;;  %v1060_v18 = vpop.f32.mrb[1].mxu0  ;;  %v6290_v13 = vrot.slane %v522_v49, %v6995_v28 }
 0x1e4   : > { %v4934_v35 = vadd.f32 %v1060_v18, %v6277_v43  ;;  %v1131_v42 = vpop.f32.mrb[1].mxu1 }
 0x1e5   : > { %v3775_v63 = vmul.f32 -1.442695, %v4933_v14  ;;  %v4944_v16 = vadd.f32 %v1131_v42, %v6284_v0  ;;  %v4943_v18 = vadd.f32 %v1129_v19, %v6290_v13 }
 0x1e6   : > { %v3776_v8 = vmul.f32 -1.442695, %v4934_v35 }
 0x1e7   : > { %5127 = vpow2.f32 %v3775_v63  ;;  %v3777_v50 = vmul.f32 -1.442695, %v4944_v16  ;;  %v7159_v16 = vld [vmem:[#allocation58_spill] sm:$0xff] }
 0x1e8   : > { %5129 = vpow2.f32 %v3776_v8  ;;  %v985_v8 = vld [vmem:[#allocation4] sm:$0xff] }
 0x1e9   : > { %5131 = vpow2.f32 %v3777_v50 }
 0x1ea   : > { %5133 = vtanh.f32 %v4943_v18  ;;  %v7163_v18 = vld [vmem:[#allocation62_spill] sm:$0xff] }
 0x1f1   : > { %v5128_v51 = vpop.eup %5127 }
 0x1f2   : > { %v5130_v14 = vpop.eup %5129  ;;  %v1141_v35 = vadd.f32 1.0, %v5128_v51 }
 0x1f3   : > { %v1147_v12 = vadd.f32 1.0, %v5130_v14  ;;  %v5132_v63 = vpop.eup %5131  ;;  %v7164_v14 = vld [vmem:[#allocation63_spill] sm:$0xff] }
 0x1f4   : > { %5135 = vrcp.f32 %v1141_v35  ;;  %v5134_v48 = vpop.eup %5133  ;;  %v1154_v43 = vadd.f32 1.0, %v5132_v63  ;;  %v7165_v35 = vld [vmem:[#allocation64_spill] sm:$0xff]  ;;  %v7166_v63 = vld [vmem:[#allocation65_spill] sm:$0xff] }
 0x1f5   : > { %5137 = vrcp.f32 %v1147_v12  ;;  %v7162_v12 = vld [vmem:[#allocation61_spill] sm:$0xff] }
 0x1f6   : > { %5139 = vrcp.f32 %v1154_v43  ;;  %v7161_v43 = vld [vmem:[#allocation60_spill] sm:$0xff] }
 0x1fe   : > { %v5136_v1 = vpop.eup %5135 }
 0x1ff   : > { %v5138_v42 = vpop.eup %5137  ;;  %v1158_v0 = vmul.f32 %v5136_v1, %v5134_v48  ;;  %v7157_v1 = vld [vmem:[#allocation56_spill] sm:$0xff]  ;;  %v7158_v48 = vld [vmem:[#allocation57_spill] sm:$0xff] }
 0x200   : > { %v1157_v49 = vmul.f32 %v5138_v42, %v985_v8  ;;  %v5140_v19 = vpop.eup %5139  ;;  %v7167_v8 = vld [vmem:[#allocation66_spill] sm:$0xff]  ;;  %v7168_v42 = vld [vmem:[#allocation67_spill] sm:$0xff] }
 0x202   : > { %v6293_v28 = vadd.f32 %v1158_v0, %v1157_v49  ;;  %v7160_v0 = vld [vmem:[#allocation59_spill] sm:$0xff]  ;;  %v7169_v49 = vld [vmem:[#allocation68_spill] sm:$0xff] }
 0x204   : > { %5141 = vtanh.f32 %v6293_v28 }
 0x20e   : > { %v5142_v51 = vpop.eup %5141 }
 0x20f   : > { %v1161_v50 = vmul.f32 %v5142_v51, %v5140_v19  ;;  %v7170_v19 = vld [vmem:[#allocation69_spill] sm:$0xff]  ;;  %v7171_v51 = vld [vmem:[#allocation70_spill] sm:$0xff] }
 0x211   : > { %1369 = vmatmul.mubr.f32.vlgmr.msra.gmra.mrb[10].mxu0 %v1161_v50  ;;  %1440 = vmatmul.mubr.f32.vlgmr.msra.gmra.mrb[10].mxu1 %v1161_v50 }
 0x212   : > { %4120 = vmatpush1.bf16.msra.mxu0 %v5950_v23  ;;  %4152 = vmatpush1.bf16.msra.mxu1 %v5954_v27 }
 0x213   : > { %4122 = vmatprep.subr.bf16.mxu0 %v5957_v31  ;;  %4154 = vmatprep.subr.bf16.mxu1 %v5959_v32 }
 0x214   : > { %1543 = vmatprep.mubr.f32.mxu0 %v7127_v6  ;;  %1614 = vmatprep.mubr.f32.mxu1 %v7127_v6 }
 0x216   : > { %4124 = vmatpush1.bf16.msra.mxu0 %v5963_v36  ;;  %4156 = vmatpush1.bf16.msra.mxu1 %v5967_v40 }
 0x217   : > { %4126 = vmatprep.subr.bf16.mxu0 %v5969_v41  ;;  %4158 = vmatprep.subr.bf16.mxu1 %v5972_v45 }
 0x21a   : > { %4128 = vmatpush1.bf16.msra.mxu0 %v5977_v52  ;;  %4160 = vmatpush1.bf16.msra.mxu1 %v5981_v55 }
 0x21b   : > { %4130 = vmatprep.subr.bf16.mxu0 %v5983_v56  ;;  %4162 = vmatprep.subr.bf16.mxu1 %v5987_v60 }
 0x21e   : > { %4132 = vmatpush1.bf16.msra.mxu0 %v5993_v2  ;;  %4164 = vmatpush1.bf16.msra.mxu1 %v5999_v4 }
 0x21f   : > { %4134 = vmatprep.subr.bf16.mxu0 %v6001_v5  ;;  %4166 = vmatprep.subr.bf16.mxu1 %v6004_v10 }
 0x222   : > { %4136 = vmatpush1.bf16.msra.mxu0 %v6011_v17  ;;  %4168 = vmatpush1.bf16.msra.mxu1 %v6016_v20 }
 0x223   : > { %4138 = vmatprep.subr.bf16.mxu0 %v6018_v21  ;;  %4170 = vmatprep.subr.bf16.mxu1 %v6021_v26 }
 0x226   : > { %4140 = vmatpush1.bf16.msra.mxu0 %v6028_v37  ;;  %4172 = vmatpush1.bf16.msra.mxu1 %v6033_v38 }
 0x227   : > { %4142 = vmatprep.subr.bf16.mxu0 %v6035_v39  ;;  %4174 = vmatprep.subr.bf16.mxu1 %v6038_v46 }
 0x22a   : > { %4144 = vmatpush1.bf16.msra.mxu0 %v6044_v53  ;;  %4176 = vmatpush1.bf16.msra.mxu1 %v6049_v54 }
 0x22b   : > { %4146 = vmatprep.subr.bf16.mxu0 %v6051_v57  ;;  %4178 = vmatprep.subr.bf16.mxu1 %v6054_v62 }
 0x22e   : > { %4148 = vmatpush1.bf16.msra.mxu0 %v6057_v7  ;;  %4180 = vmatpush1.bf16.msra.mxu1 %v6061_v9 }
 0x22f   : > { %4182 = vmatprep.subr.bf16.mxu0 %v6063_v11  ;;  %4214 = vmatprep.subr.bf16.mxu1 %v6066_v15 }
 0x231   : > { %1544 = vmatmul.mubr.f32.vlgmr.msra.gmra.mrb[2].mxu0 %v1161_v50  ;;  %1615 = vmatmul.mubr.f32.vlgmr.msra.gmra.mrb[2].mxu1 %v1161_v50  ;;  %v7172_v50 = vld [vmem:[#allocation71_spill] sm:$0xff] }
 0x232   : > { %4184 = vmatpush1.bf16.msra.mxu0 %v6069_v30  ;;  %4216 = vmatpush1.bf16.msra.mxu1 %v6073_v33 }
 0x233   : > { %4186 = vmatprep.subr.bf16.mxu0 %v6075_v34  ;;  %4218 = vmatprep.subr.bf16.mxu1 %v6078_v44 }
 0x234   : > { %1713 = vmatprep.mubr.f32.mxu0 %v7127_v6  ;;  %1784 = vmatprep.mubr.f32.mxu1 %v7127_v6 }
 0x236   : > { %4188 = vmatpush1.bf16.msra.mxu0 %v6081_v58  ;;  %4220 = vmatpush1.bf16.msra.mxu1 %v6085_v59 }
 0x237   : > { %4190 = vmatprep.subr.bf16.mxu0 %v6087_v61  ;;  %4222 = vmatprep.subr.bf16.mxu1 %v6090_v3 }
 0x23a   : > { %4192 = vmatpush1.bf16.msra.mxu0 %v6095_v22  ;;  %4224 = vmatpush1.bf16.msra.mxu1 %v6099_v24 }
 0x23b   : > { %4194 = vmatprep.subr.bf16.mxu0 %v6101_v25  ;;  %4226 = vmatprep.subr.bf16.mxu1 %v7157_v1 }
 0x23e   : > { %4196 = vmatpush1.bf16.msra.mxu0 %v7158_v48  ;;  %4228 = vmatpush1.bf16.msra.mxu1 %v7159_v16  ;;  %v7182_v16 = vsub.s32 3, %v6264_v47 }
 0x23f   : > { %4198 = vmatprep.subr.bf16.mxu0 %v7160_v0  ;;  %4230 = vmatprep.subr.bf16.mxu1 %v7161_v43 }
 0x242   : > { %4200 = vmatpush1.bf16.msra.mxu0 %v7162_v12  ;;  %4232 = vmatpush1.bf16.msra.mxu1 %v7163_v18  ;;  %v7173_v12 = vld [vmem:[#allocation72_spill] sm:$0xff]  ;;  %v7174_v18 = vld [vmem:[#allocation73_spill] sm:$0xff] }
 0x243   : > { %4202 = vmatprep.subr.bf16.mxu0 %v7164_v14  ;;  %4234 = vmatprep.subr.bf16.mxu1 %v7165_v35  ;;  %v7175_v14 = vld [vmem:[#allocation74_spill] sm:$0xff]  ;;  %v7176_v35 = vld [vmem:[#allocation75_spill] sm:$0xff] }
 0x246   : > { %4204 = vmatpush1.bf16.msra.mxu0 %v7166_v63  ;;  %4236 = vmatpush1.bf16.msra.mxu1 %v7167_v8  ;;  %v7177_v63 = vld [vmem:[#allocation76_spill] sm:$0xff] }
 0x247   : > { %4206 = vmatprep.subr.bf16.mxu0 %v7168_v42  ;;  %4238 = vmatprep.subr.bf16.mxu1 %v7169_v49  ;;  %v962_v49 = vld [vmem:[%s7178_s12] sm:$0xf] }
 0x248   : > { %v6379_v48 = vrot.slane %v962_v49, %v7182_v16 }
 0x24a   : > { %4208 = vmatpush1.bf16.msra.mxu0 %v7170_v19  ;;  %4240 = vmatpush1.bf16.msra.mxu1 %v7171_v51  ;;  %v7179_v19 = vsub.s32 0, %v6264_v47  ;;  %7183 = vst [vmem:[#allocation111_spill] sm:$0xff] %v6379_v48 }
 0x24b   : > { %4210 = vmatprep.subr.bf16.mxu0 %v7172_v50  ;;  %4242 = vmatprep.subr.bf16.mxu1 %v7173_v12  ;;  %v7181_v50 = vsub.s32 1, %v6264_v47 }
 0x24c   : > { %v6369_v42 = vrot.slane %v962_v49, %v7179_v19 }
 0x24d   : > { %v6373_v51 = vrot.slane %v962_v49, %v7181_v50  ;;  %v7184_v50 = vsub.s32 2, %v6264_v47 }
 0x24e   : > { %4212 = vmatpush1.bf16.msra.mxu0 %v7174_v18  ;;  %4244 = vmatpush1.bf16.msra.mxu1 %v7175_v14  ;;  %7180 = vst [vmem:[#allocation110_spill] sm:$0xff] %v6369_v42 }
 0x24f   : > { %4246 = vmatprep.subr.bf16.mxu0 %v7176_v35  ;;  %4278 = vmatprep.subr.bf16.mxu1 %v7177_v63  ;;  %v6384_v1 = vrot.slane %v962_v49, %v7184_v50 }
 0x251   : > { %7185 = vst [vmem:[#allocation112_spill] sm:$0xff] %v6384_v1 }
 0x2e4   : > { %v1370_v12 = vpop.f32.mrb[10].mxu0  ;;  %v1441_v18 = vpop.f32.mrb[10].mxu1 }
 0x2e5   : > { %v1446_v14 = vadd.f32 %v1370_v12, %v6369_v42  ;;  %v1372_v8 = vpop.f32.mrb[11].mxu0  ;;  %v1443_v35 = vpop.f32.mrb[11].mxu1  ;;  %v1448_v12 = vadd.f32 %v1441_v18, %v6384_v1 }
 0x2e6   : > { %v1447_v63 = vadd.f32 %v1372_v8, %v6373_v51  ;;  %v1449_v19 = vadd.f32 %v1443_v35, %v6379_v48 }
 0x2e7   : > { %v3778_v43 = vmul.f32 -1.442695, %v1446_v14 }
 0x2e8   : > { %v3779_v0 = vmul.f32 -1.442695, %v1447_v63  ;;  %v3780_v25 = vmul.f32 -1.442695, %v1449_v19 }
 0x2e9   : > { %5143 = vpow2.f32 %v3778_v43 }
 0x2ea   : > { %5145 = vpow2.f32 %v3779_v0  ;;  %v987_v0 = vld [vmem:[#allocation6] sm:$0xff] }
 0x2eb   : > { %5147 = vpow2.f32 %v3780_v25 }
 0x2ec   : > { %5149 = vtanh.f32 %v1448_v12 }
 0x2f3   : > { %v5144_v42 = vpop.eup %5143 }
 0x2f4   : > { %v5146_v24 = vpop.eup %5145  ;;  %v1453_v8 = vadd.f32 1.0, %v5144_v42 }
 0x2f5   : > { %v1459_v14 = vadd.f32 1.0, %v5146_v24  ;;  %v5148_v16 = vpop.eup %5147  ;;  %v7186_v24 = vld [vmem:[#allocation108_spill] sm:$0xff] }
 0x2f6   : > { %5151 = vrcp.f32 %v1453_v8  ;;  %v5150_v43 = vpop.eup %5149  ;;  %v1466_v47 = vadd.f32 1.0, %v5148_v16 }
 0x2f7   : > { %5153 = vrcp.f32 %v1459_v14 }
 0x2f8   : > { %5155 = vrcp.f32 %v1466_v47 }
 0x300   : > { %v5152_v63 = vpop.eup %5151 }
 0x301   : > { %v5154_v35 = vpop.eup %5153  ;;  %v1470_v48 = vmul.f32 %v5152_v63, %v5150_v43  ;;  %v7187_v43 = vld [vmem:[#allocation109_spill] sm:$0xff] }
 0x302   : > { %v1469_v49 = vmul.f32 %v5154_v35, %v987_v0  ;;  %v5156_v0 = vpop.eup %5155 }
 0x304   : > { %v6387_v50 = vadd.f32 %v1470_v48, %v1469_v49  ;;  %v1545_v19 = vpop.f32.mrb[2].mxu0  ;;  %v1616_v18 = vpop.f32.mrb[2].mxu1 }
 0x305   : > { %v4935_v42 = vadd.f32 %v1545_v19, %v6273_v29  ;;  %v1547_v25 = vpop.f32.mrb[3].mxu0  ;;  %v1618_v12 = vpop.f32.mrb[3].mxu1  ;;  %v4945_v35 = vadd.f32 %v1616_v18, %v6290_v13  ;;  %v7192_v18 = vld [vmem:[#allocation81_spill] sm:$0xff] }
 0x306   : > { %v4936_v8 = vadd.f32 %v1547_v25, %v7186_v24  ;;  %5157 = vtanh.f32 %v6387_v50  ;;  %v4946_v16 = vadd.f32 %v1618_v12, %v7187_v43  ;;  %v7188_v25 = vld [vmem:[#allocation77_spill] sm:$0xff]  ;;  %v7191_v12 = vld [vmem:[#allocation80_spill] sm:$0xff] }
 0x307   : > { %v3781_v14 = vmul.f32 -1.442695, %v4935_v42  ;;  %v7189_v42 = vld [vmem:[#allocation78_spill] sm:$0xff] }
 0x308   : > { %v3782_v1 = vmul.f32 -1.442695, %v4936_v8  ;;  %v3783_v63 = vmul.f32 -1.442695, %v4946_v16  ;;  %v7190_v8 = vld [vmem:[#allocation79_spill] sm:$0xff] }
 0x309   : > { %5159 = vpow2.f32 %v3781_v14  ;;  %v7193_v14 = vld [vmem:[#allocation82_spill] sm:$0xff]  ;;  %v7194_v16 = vld [vmem:[#allocation83_spill] sm:$0xff] }
 0x30a   : > { %5161 = vpow2.f32 %v3782_v1 }
 0x30b   : > { %5163 = vpow2.f32 %v3783_v63  ;;  %v7197_v63 = vld [vmem:[#allocation86_spill] sm:$0xff] }
 0x30c   : > { %5165 = vtanh.f32 %v4945_v35  ;;  %v7198_v35 = vld [vmem:[#allocation87_spill] sm:$0xff] }
 0x310   : > { %v5158_v48 = vpop.eup %5157 }
 0x311   : > { %v1473_v47 = vmul.f32 %v5158_v48, %v5156_v0  ;;  %v7195_v0 = vld [vmem:[#allocation84_spill] sm:$0xff]  ;;  %v7196_v48 = vld [vmem:[#allocation85_spill] sm:$0xff] }
 0x313   : > { %v5160_v49 = vpop.eup %5159  ;;  %1714 = vmatmul.mubr.f32.vlgmr.msra.gmra.mrb[12].mxu0 %v1473_v47  ;;  %1785 = vmatmul.mubr.f32.vlgmr.msra.gmra.mrb[12].mxu1 %v1473_v47 }
 0x314   : > { %v5162_v19 = vpop.eup %5161  ;;  %v1628_v29 = vadd.f32 1.0, %v5160_v49  ;;  %4248 = vmatpush1.bf16.msra.mxu0 %v7188_v25  ;;  %4280 = vmatpush1.bf16.msra.mxu1 %v7189_v42  ;;  %v7206_v42 = vld [vmem:[#allocation95_spill] sm:$0xff] }
 0x315   : > { %v1634_v1 = vadd.f32 1.0, %v5162_v19  ;;  %4250 = vmatprep.subr.bf16.mxu0 %v7190_v8  ;;  %4282 = vmatprep.subr.bf16.mxu1 %v7191_v12  ;;  %v5164_v47 = vpop.eup %5163  ;;  %v7202_v8 = vld [vmem:[#allocation91_spill] sm:$0xff] }
 0x316   : > { %5167 = vrcp.f32 %v1628_v29  ;;  %1855 = vmatprep.mubr.f32.mxu0 %v7127_v6  ;;  %1926 = vmatprep.mubr.f32.mxu1 %v7127_v6  ;;  %v7199_v29 = vld [vmem:[#allocation88_spill] sm:$0xff]  ;;  %v5166_v49 = vpop.eup %5165 }
 0x317   : > { %5169 = vrcp.f32 %v1634_v1  ;;  %v7200_v1 = vld [vmem:[#allocation89_spill] sm:$0xff] }
 0x318   : > { %4252 = vmatpush1.bf16.msra.mxu0 %v7192_v18  ;;  %4284 = vmatpush1.bf16.msra.mxu1 %v7193_v14  ;;  %v7201_v18 = vld [vmem:[#allocation90_spill] sm:$0xff] }
 0x319   : > { %4254 = vmatprep.subr.bf16.mxu0 %v7194_v16  ;;  %4286 = vmatprep.subr.bf16.mxu1 %v7195_v0  ;;  %v1641_v16 = vadd.f32 1.0, %v5164_v47  ;;  %v7203_v0 = vld [vmem:[#allocation92_spill] sm:$0xff]  ;;  %v7208_v47 = vld [vmem:[#allocation97_spill] sm:$0xff] }
 0x31b   : > { %5171 = vrcp.f32 %v1641_v16  ;;  %v7215_v16 = vld [vmem:[#allocation104_spill] sm:$0xff] }
 0x31c   : > { %4256 = vmatpush1.bf16.msra.mxu0 %v7196_v48  ;;  %4288 = vmatpush1.bf16.msra.mxu1 %v7197_v63 }
 0x31d   : > { %4258 = vmatprep.subr.bf16.mxu0 %v7198_v35  ;;  %4290 = vmatprep.subr.bf16.mxu1 %v7199_v29  ;;  %v7204_v35 = vld [vmem:[#allocation93_spill] sm:$0xff]  ;;  %v7205_v29 = vld [vmem:[#allocation94_spill] sm:$0xff] }
 0x320   : > { %v5168_v19 = vpop.eup %5167  ;;  %4260 = vmatpush1.bf16.msra.mxu0 %v7200_v1  ;;  %4292 = vmatpush1.bf16.msra.mxu1 %v7201_v18  ;;  %v7207_v1 = vld [vmem:[#allocation96_spill] sm:$0xff] }
 0x321   : > { %v5170_v14 = vpop.eup %5169  ;;  %v1645_v12 = vmul.f32 %v5168_v19, %v5166_v49  ;;  %4262 = vmatprep.subr.bf16.mxu0 %v7202_v8  ;;  %4294 = vmatprep.subr.bf16.mxu1 %v7203_v0  ;;  %v7209_v49 = vld [vmem:[#allocation98_spill] sm:$0xff]  ;;  %v7210_v19 = vld [vmem:[#allocation99_spill] sm:$0xff] }
 0x322   : > { %v1644_v63 = vmul.f32 %v5170_v14, %v6293_v28  ;;  %v7211_v28 = vld [vmem:[#allocation100_spill] sm:$0xff]  ;;  %v7213_v14 = vld [vmem:[#allocation102_spill] sm:$0xff] }
 0x324   : > { %v6413_v48 = vadd.f32 %v1645_v12, %v1644_v63  ;;  %4264 = vmatpush1.bf16.msra.mxu0 %v7204_v35  ;;  %4296 = vmatpush1.bf16.msra.mxu1 %v7205_v29  ;;  %v7212_v12 = vld [vmem:[#allocation101_spill] sm:$0xff]  ;;  %v7214_v63 = vld [vmem:[#allocation103_spill] sm:$0xff]  ;;  %v7217_v35 = vld [vmem:[#allocation106_spill] sm:$0xff] }
 0x325   : > { %4266 = vmatprep.subr.bf16.mxu0 %v7206_v42  ;;  %4298 = vmatprep.subr.bf16.mxu1 %v7207_v1  ;;  %v5172_v42 = vpop.eup %5171  ;;  %v7216_v29 = vld [vmem:[#allocation105_spill] sm:$0xff] }
 0x326   : > { %5173 = vtanh.f32 %v6413_v48 }
 0x328   : > { %4268 = vmatpush1.bf16.msra.mxu0 %v7208_v47  ;;  %4300 = vmatpush1.bf16.msra.mxu1 %v7209_v49  ;;  %v7218_v49 = vld [vmem:[#allocation25_spill] sm:$0xff] }
 0x329   : > { %4270 = vmatprep.subr.bf16.mxu0 %v7210_v19  ;;  %4302 = vmatprep.subr.bf16.mxu1 %v7211_v28  ;;  %v7219_v19 = vld [vmem:[#allocation26_spill] sm:$0xff] }
 0x32c   : > { %4272 = vmatpush1.bf16.msra.mxu0 %v7212_v12  ;;  %4304 = vmatpush1.bf16.msra.mxu1 %v7213_v14 }
 0x32d   : > { %4274 = vmatprep.subr.bf16.mxu0 %v7214_v63  ;;  %4306 = vmatprep.subr.bf16.mxu1 %v7215_v16 }
 0x330   : > { %v5174_v1 = vpop.eup %5173  ;;  %4276 = vmatpush1.bf16.msra.mxu0 %v7216_v29  ;;  %4308 = vmatpush1.bf16.msra.mxu1 %v7217_v35 }
 0x331   : > { %v1648_v47 = vmul.f32 %v5174_v1, %v5172_v42  ;;  %4310 = vmatprep.subr.bf16.mxu0 %v7218_v49  ;;  %4342 = vmatprep.subr.bf16.mxu1 %v7219_v19  ;;  %v7220_v42 = vld [vmem:[#allocation54_spill] sm:$0xff]  ;;  %v7221_v1 = vld [vmem:[#allocation55_spill] sm:$0xff] }
 0x333   : > { %1856 = vmatmul.mubr.f32.vlgmr.msra.gmra.mrb[12].mxu0 %v1648_v47  ;;  %1927 = vmatmul.mubr.f32.vlgmr.msra.gmra.mrb[12].mxu1 %v1648_v47 }
 0x334   : > { %4312 = vmatpush1.bf16.msra.mxu0 %v5950_v23  ;;  %4344 = vmatpush1.bf16.msra.mxu1 %v5954_v27 }
 0x335   : > { %4314 = vmatprep.subr.bf16.mxu0 %v5957_v31  ;;  %4346 = vmatprep.subr.bf16.mxu1 %v5959_v32 }
 0x336   : > { %2030 = vmatprep.mubr.f32.mxu0 %v7127_v6  ;;  %2101 = vmatprep.mubr.f32.mxu1 %v7127_v6 }
 0x338   : > { %4316 = vmatpush1.bf16.msra.mxu0 %v5963_v36  ;;  %4348 = vmatpush1.bf16.msra.mxu1 %v5967_v40 }
 0x339   : > { %4318 = vmatprep.subr.bf16.mxu0 %v5969_v41  ;;  %4350 = vmatprep.subr.bf16.mxu1 %v5972_v45 }
 0x33c   : > { %4320 = vmatpush1.bf16.msra.mxu0 %v5977_v52  ;;  %4352 = vmatpush1.bf16.msra.mxu1 %v5981_v55 }
 0x33d   : > { %4322 = vmatprep.subr.bf16.mxu0 %v5983_v56  ;;  %4354 = vmatprep.subr.bf16.mxu1 %v5987_v60 }
 0x340   : > { %4324 = vmatpush1.bf16.msra.mxu0 %v5993_v2  ;;  %4356 = vmatpush1.bf16.msra.mxu1 %v5999_v4 }
 0x341   : > { %4326 = vmatprep.subr.bf16.mxu0 %v6001_v5  ;;  %4358 = vmatprep.subr.bf16.mxu1 %v6004_v10 }
 0x344   : > { %4328 = vmatpush1.bf16.msra.mxu0 %v6011_v17  ;;  %4360 = vmatpush1.bf16.msra.mxu1 %v6016_v20 }
 0x345   : > { %4330 = vmatprep.subr.bf16.mxu0 %v6018_v21  ;;  %4362 = vmatprep.subr.bf16.mxu1 %v6021_v26 }
 0x348   : > { %4332 = vmatpush1.bf16.msra.mxu0 %v6028_v37  ;;  %4364 = vmatpush1.bf16.msra.mxu1 %v6033_v38 }
 0x349   : > { %4334 = vmatprep.subr.bf16.mxu0 %v6035_v39  ;;  %4366 = vmatprep.subr.bf16.mxu1 %v6038_v46 }
 0x34c   : > { %4336 = vmatpush1.bf16.msra.mxu0 %v6044_v53  ;;  %4368 = vmatpush1.bf16.msra.mxu1 %v6049_v54 }
 0x34d   : > { %4338 = vmatprep.subr.bf16.mxu0 %v6051_v57  ;;  %4370 = vmatprep.subr.bf16.mxu1 %v6054_v62 }
 0x350   : > { %4340 = vmatpush1.bf16.msra.mxu0 %v6057_v7  ;;  %4372 = vmatpush1.bf16.msra.mxu1 %v6061_v9 }
 0x351   : > { %4374 = vmatprep.subr.bf16.mxu0 %v6063_v11  ;;  %4406 = vmatprep.subr.bf16.mxu1 %v6066_v15 }
 0x353   : > { %2031 = vmatmul.mubr.f32.vlgmr.msra.gmra.mrb[4].mxu0 %v1648_v47  ;;  %2102 = vmatmul.mubr.f32.vlgmr.msra.gmra.mrb[4].mxu1 %v1648_v47  ;;  %v7222_v47 = vld [vmem:[#allocation56_spill] sm:$0xff] }
 0x354   : > { %4376 = vmatpush1.bf16.msra.mxu0 %v6069_v30  ;;  %4408 = vmatpush1.bf16.msra.mxu1 %v6073_v33  ;;  %v7225_v33 = vld [vmem:[#allocation59_spill] sm:$0xff]  ;;  %v7243_v30 = vld [vmem:[#allocation110_spill] sm:$0xff] }
 0x355   : > { %4378 = vmatprep.subr.bf16.mxu0 %v6075_v34  ;;  %4410 = vmatprep.subr.bf16.mxu1 %v6078_v44  ;;  %v7223_v44 = vld [vmem:[#allocation57_spill] sm:$0xff]  ;;  %v7224_v34 = vld [vmem:[#allocation58_spill] sm:$0xff] }
 0x356   : > { %2200 = vmatprep.mubr.f32.mxu0 %v7127_v6  ;;  %2271 = vmatprep.mubr.f32.mxu1 %v7127_v6 }
 0x358   : > { %4380 = vmatpush1.bf16.msra.mxu0 %v6081_v58  ;;  %4412 = vmatpush1.bf16.msra.mxu1 %v6085_v59  ;;  %v7226_v58 = vld [vmem:[#allocation60_spill] sm:$0xff]  ;;  %v7227_v59 = vld [vmem:[#allocation61_spill] sm:$0xff] }
 0x359   : > { %4382 = vmatprep.subr.bf16.mxu0 %v6087_v61  ;;  %4414 = vmatprep.subr.bf16.mxu1 %v6090_v3  ;;  %v7228_v61 = vld [vmem:[#allocation62_spill] sm:$0xff]  ;;  %v7229_v3 = vld [vmem:[#allocation63_spill] sm:$0xff] }
 0x35c   : > { %4384 = vmatpush1.bf16.msra.mxu0 %v6095_v22  ;;  %4416 = vmatpush1.bf16.msra.mxu1 %v7220_v42  ;;  %v7230_v22 = vld [vmem:[#allocation64_spill] sm:$0xff]  ;;  %v7231_v42 = vld [vmem:[#allocation65_spill] sm:$0xff] }
 0x35d   : > { %4386 = vmatprep.subr.bf16.mxu0 %v7221_v1  ;;  %4418 = vmatprep.subr.bf16.mxu1 %v7222_v47  ;;  %v7232_v1 = vld [vmem:[#allocation66_spill] sm:$0xff]  ;;  %v7233_v47 = vld [vmem:[#allocation67_spill] sm:$0xff] }
 0x360   : > { %4388 = vmatpush1.bf16.msra.mxu0 %v7223_v44  ;;  %4420 = vmatpush1.bf16.msra.mxu1 %v7224_v34  ;;  %v7234_v44 = vld [vmem:[#allocation68_spill] sm:$0xff]  ;;  %v7235_v34 = vld [vmem:[#allocation69_spill] sm:$0xff] }
 0x361   : > { %4390 = vmatprep.subr.bf16.mxu0 %v7225_v33  ;;  %4422 = vmatprep.subr.bf16.mxu1 %v7226_v58  ;;  %v7236_v33 = vld [vmem:[#allocation70_spill] sm:$0xff]  ;;  %v7237_v58 = vld [vmem:[#allocation71_spill] sm:$0xff] }
 0x364   : > { %4392 = vmatpush1.bf16.msra.mxu0 %v7227_v59  ;;  %4424 = vmatpush1.bf16.msra.mxu1 %v7228_v61  ;;  %v7238_v59 = vld [vmem:[#allocation72_spill] sm:$0xff]  ;;  %v7239_v61 = vld [vmem:[#allocation73_spill] sm:$0xff] }
 0x365   : > { %4394 = vmatprep.subr.bf16.mxu0 %v7229_v3  ;;  %4426 = vmatprep.subr.bf16.mxu1 %v7230_v22  ;;  %v7240_v3 = vld [vmem:[#allocation74_spill] sm:$0xff]  ;;  %v7241_v22 = vld [vmem:[#allocation75_spill] sm:$0xff] }
 0x368   : > { %4396 = vmatpush1.bf16.msra.mxu0 %v7231_v42  ;;  %4428 = vmatpush1.bf16.msra.mxu1 %v7232_v1  ;;  %v7242_v42 = vld [vmem:[#allocation76_spill] sm:$0xff] }
 0x369   : > { %4398 = vmatprep.subr.bf16.mxu0 %v7233_v47  ;;  %4430 = vmatprep.subr.bf16.mxu1 %v7234_v44 }
 0x36c   : > { %4400 = vmatpush1.bf16.msra.mxu0 %v7235_v34  ;;  %4432 = vmatpush1.bf16.msra.mxu1 %v7236_v33 }
 0x36d   : > { %4402 = vmatprep.subr.bf16.mxu0 %v7237_v58  ;;  %4434 = vmatprep.subr.bf16.mxu1 %v7238_v59  ;;  %v7244_v59 = vld [vmem:[#allocation111_spill] sm:$0xff] }
 0x370   : > { %4404 = vmatpush1.bf16.msra.mxu0 %v7239_v61  ;;  %4436 = vmatpush1.bf16.msra.mxu1 %v7240_v3  ;;  %v7245_v3 = vld [vmem:[#allocation112_spill] sm:$0xff] }
 0x371   : > { %4438 = vmatprep.subr.bf16.mxu0 %v7241_v22  ;;  %4470 = vmatprep.subr.bf16.mxu1 %v7242_v42 }
 0x406   : > { %v1857_v1 = vpop.f32.mrb[12].mxu0  ;;  %v1928_v47 = vpop.f32.mrb[12].mxu1 }
 0x407   : > { %v1933_v44 = vadd.f32 %v1857_v1, %v7243_v30  ;;  %v1859_v15 = vpop.f32.mrb[13].mxu0  ;;  %v1930_v34 = vpop.f32.mrb[13].mxu1  ;;  %v1935_v7 = vadd.f32 %v1928_v47, %v7245_v3  ;;  %v7246_v3 = vld [vmem:[#allocation107_spill] sm:$0xff] }
 0x408   : > { %v1934_v33 = vadd.f32 %v1859_v15, %v6373_v51  ;;  %v1936_v61 = vadd.f32 %v1930_v34, %v7244_v59 }
 0x409   : > { %v3784_v11 = vmul.f32 -1.442695, %v1933_v44 }
 0x40a   : > { %v3785_v58 = vmul.f32 -1.442695, %v1934_v33  ;;  %v3786_v9 = vmul.f32 -1.442695, %v1936_v61 }
 0x40b   : > { %5175 = vpow2.f32 %v3784_v11 }
 0x40c   : > { %5177 = vpow2.f32 %v3785_v58 }
 0x40d   : > { %5179 = vpow2.f32 %v3786_v9 }
 0x40e   : > { %5181 = vtanh.f32 %v1935_v7 }
 0x415   : > { %v5176_v22 = vpop.eup %5175 }
 0x416   : > { %v5178_v62 = vpop.eup %5177  ;;  %v1940_v42 = vadd.f32 1.0, %v5176_v22 }
 0x417   : > { %v1946_v57 = vadd.f32 1.0, %v5178_v62  ;;  %v5180_v1 = vpop.eup %5179 }
 0x418   : > { %5183 = vrcp.f32 %v1940_v42  ;;  %v5182_v30 = vpop.eup %5181  ;;  %v1953_v11 = vadd.f32 1.0, %v5180_v1 }
 0x419   : > { %5185 = vrcp.f32 %v1946_v57 }
 0x41a   : > { %5187 = vrcp.f32 %v1953_v11 }
 0x422   : > { %v5184_v15 = vpop.eup %5183 }
 0x423   : > { %v5186_v44 = vpop.eup %5185  ;;  %v1957_v33 = vmul.f32 %v5184_v15, %v5182_v30 }
 0x424   : > { %v1956_v58 = vmul.f32 %v5186_v44, %v6387_v50  ;;  %v5188_v50 = vpop.eup %5187 }
 0x426   : > { %v6505_v34 = vadd.f32 %v1957_v33, %v1956_v58  ;;  %v2032_v61 = vpop.f32.mrb[4].mxu0  ;;  %v2103_v47 = vpop.f32.mrb[4].mxu1 }
 0x427   : > { %v4937_v22 = vadd.f32 %v2032_v61, %v7246_v3  ;;  %v2034_v9 = vpop.f32.mrb[5].mxu0  ;;  %v2105_v7 = vpop.f32.mrb[5].mxu1  ;;  %v4947_v44 = vadd.f32 %v2103_v47, %v6290_v13  ;;  %v7250_v47 = vld [vmem:[#allocation81_spill] sm:$0xff] }
 0x428   : > { %v4938_v62 = vadd.f32 %v2034_v9, %v7186_v24  ;;  %5189 = vtanh.f32 %v6505_v34  ;;  %v4948_v30 = vadd.f32 %v2105_v7, %v7187_v43  ;;  %v7249_v7 = vld [vmem:[#allocation80_spill] sm:$0xff] }
 0x429   : > { %v3787_v57 = vmul.f32 -1.442695, %v4937_v22  ;;  %v7247_v22 = vld [vmem:[#allocation78_spill] sm:$0xff] }
 0x42a   : > { %v3788_v42 = vmul.f32 -1.442695, %v4938_v62  ;;  %v3789_v15 = vmul.f32 -1.442695, %v4948_v30  ;;  %v7248_v62 = vld [vmem:[#allocation79_spill] sm:$0xff]  ;;  %v7253_v30 = vld [vmem:[#allocation84_spill] sm:$0xff] }
 0x42b   : > { %5191 = vpow2.f32 %v3787_v57  ;;  %v7251_v57 = vld [vmem:[#allocation82_spill] sm:$0xff] }
 0x42c   : > { %5193 = vpow2.f32 %v3788_v42  ;;  %v7252_v42 = vld [vmem:[#allocation83_spill] sm:$0xff] }
 0x42d   : > { %5195 = vpow2.f32 %v3789_v15  ;;  %v7256_v15 = vld [vmem:[#allocation87_spill] sm:$0xff] }
 0x42e   : > { %5197 = vtanh.f32 %v4947_v44  ;;  %v7257_v44 = vld [vmem:[#allocation88_spill] sm:$0xff] }
 0x432   : > { %v5190_v1 = vpop.eup %5189 }
 0x433   : > { %v1960_v33 = vmul.f32 %v5190_v1, %v5188_v50  ;;  %v7254_v50 = vld [vmem:[#allocation85_spill] sm:$0xff]  ;;  %v7255_v1 = vld [vmem:[#allocation86_spill] sm:$0xff] }
 0x435   : > { %v5192_v11 = vpop.eup %5191  ;;  %2201 = vmatmul.mubr.f32.vlgmr.msra.gmra.mrb[14].mxu0 %v1960_v33  ;;  %2272 = vmatmul.mubr.f32.vlgmr.msra.gmra.mrb[14].mxu1 %v1960_v33 }
 0x436   : > { %v5194_v58 = vpop.eup %5193  ;;  %v2115_v61 = vadd.f32 1.0, %v5192_v11  ;;  %4440 = vmatpush1.bf16.msra.mxu0 %v7188_v25  ;;  %4472 = vmatpush1.bf16.msra.mxu1 %v7247_v22 }
 0x437   : > { %v2121_v9 = vadd.f32 1.0, %v5194_v58  ;;  %4442 = vmatprep.subr.bf16.mxu0 %v7248_v62  ;;  %4474 = vmatprep.subr.bf16.mxu1 %v7249_v7  ;;  %v5196_v33 = vpop.eup %5195 }
 0x438   : > { %5199 = vrcp.f32 %v2115_v61  ;;  %2342 = vmatprep.mubr.f32.mxu0 %v7127_v6  ;;  %2413 = vmatprep.mubr.f32.mxu1 %v7127_v6  ;;  %v5198_v11 = vpop.eup %5197  ;;  %v7258_v61 = vld [vmem:[#allocation89_spill] sm:$0xff] }
 0x439   : > { %5201 = vrcp.f32 %v2121_v9 }
 0x43a   : > { %4444 = vmatpush1.bf16.msra.mxu0 %v7250_v47  ;;  %4476 = vmatpush1.bf16.msra.mxu1 %v7251_v57 }
 0x43b   : > { %4446 = vmatprep.subr.bf16.mxu0 %v7252_v42  ;;  %4478 = vmatprep.subr.bf16.mxu1 %v7253_v30  ;;  %v2128_v42 = vadd.f32 1.0, %v5196_v33  ;;  %v7261_v30 = vld [vmem:[#allocation95_spill] sm:$0xff]  ;;  %v7263_v33 = vld [vmem:[#allocation97_spill] sm:$0xff] }
 0x43d   : > { %5203 = vrcp.f32 %v2128_v42 }
 0x43e   : > { %4448 = vmatpush1.bf16.msra.mxu0 %v7254_v50  ;;  %4480 = vmatpush1.bf16.msra.mxu1 %v7255_v1 }
 0x43f   : > { %4450 = vmatprep.subr.bf16.mxu0 %v7256_v15  ;;  %4482 = vmatprep.subr.bf16.mxu1 %v7257_v44  ;;  %v7259_v15 = vld [vmem:[#allocation93_spill] sm:$0xff]  ;;  %v7260_v44 = vld [vmem:[#allocation94_spill] sm:$0xff] }
 0x442   : > { %v5200_v58 = vpop.eup %5199  ;;  %4452 = vmatpush1.bf16.msra.mxu0 %v7258_v61  ;;  %4484 = vmatpush1.bf16.msra.mxu1 %v7201_v18  ;;  %v7262_v61 = vld [vmem:[#allocation96_spill] sm:$0xff] }
 0x443   : > { %v5202_v9 = vpop.eup %5201  ;;  %v2132_v57 = vmul.f32 %v5200_v58, %v5198_v11  ;;  %4454 = vmatprep.subr.bf16.mxu0 %v7202_v8  ;;  %4486 = vmatprep.subr.bf16.mxu1 %v7203_v0  ;;  %v7264_v11 = vld [vmem:[#allocation98_spill] sm:$0xff]  ;;  %v7265_v58 = vld [vmem:[#allocation99_spill] sm:$0xff] }
 0x444   : > { %v2131_v1 = vmul.f32 %v5202_v9, %v6413_v48  ;;  %v7267_v9 = vld [vmem:[#allocation40_spill] sm:$0xff] }
 0x446   : > { %v6531_v50 = vadd.f32 %v2132_v57, %v2131_v1  ;;  %4456 = vmatpush1.bf16.msra.mxu0 %v7259_v15  ;;  %4488 = vmatpush1.bf16.msra.mxu1 %v7260_v44  ;;  %v7266_v1 = vld [vmem:[#allocation39_spill] sm:$0xff] }
 0x447   : > { %4458 = vmatprep.subr.bf16.mxu0 %v7261_v30  ;;  %4490 = vmatprep.subr.bf16.mxu1 %v7262_v61  ;;  %v5204_v48 = vpop.eup %5203 }
 0x448   : > { %5205 = vtanh.f32 %v6531_v50 }
 0x44a   : > { %4460 = vmatpush1.bf16.msra.mxu0 %v7263_v33  ;;  %4492 = vmatpush1.bf16.msra.mxu1 %v7264_v11 }
 0x44b   : > { %4462 = vmatprep.subr.bf16.mxu0 %v7265_v58  ;;  %4494 = vmatprep.subr.bf16.mxu1 %v7211_v28 }
 0x44e   : > { %4464 = vmatpush1.bf16.msra.mxu0 %v7212_v12  ;;  %4496 = vmatpush1.bf16.msra.mxu1 %v7213_v14 }
 0x44f   : > { %4466 = vmatprep.subr.bf16.mxu0 %v7214_v63  ;;  %4498 = vmatprep.subr.bf16.mxu1 %v7215_v16 }
 0x452   : > { %v5206_v57 = vpop.eup %5205  ;;  %4468 = vmatpush1.bf16.msra.mxu0 %v7216_v29  ;;  %4500 = vmatpush1.bf16.msra.mxu1 %v7217_v35 }
 0x453   : > { %4502 = vmatprep.subr.bf16.mxu0 %v7218_v49  ;;  %4534 = vmatprep.subr.bf16.mxu1 %v7219_v19  ;;  %v2135_v42 = vmul.f32 %v5206_v57, %v5204_v48  ;;  %v7268_v48 = vld [vmem:[#allocation41_spill] sm:$0xff]  ;;  %v7269_v57 = vld [vmem:[#allocation42_spill] sm:$0xff] }
 0x455   : > { %2343 = vmatmul.mubr.f32.vlgmr.msra.gmra.mrb[14].mxu0 %v2135_v42  ;;  %2414 = vmatmul.mubr.f32.vlgmr.msra.gmra.mrb[14].mxu1 %v2135_v42 }
 0x456   : > { %4504 = vmatpush1.bf16.msra.mxu0 %v5950_v23  ;;  %4536 = vmatpush1.bf16.msra.mxu1 %v5954_v27 }
 0x457   : > { %4506 = vmatprep.subr.bf16.mxu0 %v5957_v31  ;;  %4538 = vmatprep.subr.bf16.mxu1 %v5959_v32 }
 0x458   : > { %2517 = vmatprep.mubr.f32.mxu0 %v7127_v6  ;;  %2588 = vmatprep.mubr.f32.mxu1 %v7127_v6 }
 0x45a   : > { %4508 = vmatpush1.bf16.msra.mxu0 %v5963_v36  ;;  %4540 = vmatpush1.bf16.msra.mxu1 %v5967_v40 }
 0x45b   : > { %4510 = vmatprep.subr.bf16.mxu0 %v5969_v41  ;;  %4542 = vmatprep.subr.bf16.mxu1 %v5972_v45 }
 0x45e   : > { %4512 = vmatpush1.bf16.msra.mxu0 %v5977_v52  ;;  %4544 = vmatpush1.bf16.msra.mxu1 %v5981_v55 }
 0x45f   : > { %4514 = vmatprep.subr.bf16.mxu0 %v5983_v56  ;;  %4546 = vmatprep.subr.bf16.mxu1 %v5987_v60 }
 0x462   : > { %4516 = vmatpush1.bf16.msra.mxu0 %v5993_v2  ;;  %4548 = vmatpush1.bf16.msra.mxu1 %v5999_v4 }
 0x463   : > { %4518 = vmatprep.subr.bf16.mxu0 %v6001_v5  ;;  %4550 = vmatprep.subr.bf16.mxu1 %v6004_v10 }
 0x466   : > { %4520 = vmatpush1.bf16.msra.mxu0 %v6011_v17  ;;  %4552 = vmatpush1.bf16.msra.mxu1 %v6016_v20 }
 0x467   : > { %4522 = vmatprep.subr.bf16.mxu0 %v6018_v21  ;;  %4554 = vmatprep.subr.bf16.mxu1 %v6021_v26  ;;  %v7270_v26 = vld [vmem:[#allocation43_spill] sm:$0xff] }
 0x46a   : > { %4524 = vmatpush1.bf16.msra.mxu0 %v6028_v37  ;;  %4556 = vmatpush1.bf16.msra.mxu1 %v6033_v38  ;;  %v7271_v37 = vld [vmem:[#allocation44_spill] sm:$0xff]  ;;  %v7304_v38 = vld [vmem:[#allocation110_spill] sm:$0xff] }
 0x46b   : > { %4526 = vmatprep.subr.bf16.mxu0 %v6035_v39  ;;  %4558 = vmatprep.subr.bf16.mxu1 %v6038_v46  ;;  %v7272_v39 = vld [vmem:[#allocation45_spill] sm:$0xff]  ;;  %v7273_v46 = vld [vmem:[#allocation46_spill] sm:$0xff] }
 0x46e   : > { %4528 = vmatpush1.bf16.msra.mxu0 %v6044_v53  ;;  %4560 = vmatpush1.bf16.msra.mxu1 %v6049_v54  ;;  %v7274_v53 = vld [vmem:[#allocation47_spill] sm:$0xff]  ;;  %v7275_v54 = vld [vmem:[#allocation48_spill] sm:$0xff] }
 0x46f   : > { %4530 = vmatprep.subr.bf16.mxu0 %v7266_v1  ;;  %4562 = vmatprep.subr.bf16.mxu1 %v7267_v9  ;;  %v7285_v9 = vld [vmem:[#allocation58_spill] sm:$0xff]  ;;  %v7286_v1 = vld [vmem:[#allocation59_spill] sm:$0xff] }
 0x472   : > { %4532 = vmatpush1.bf16.msra.mxu0 %v7268_v48  ;;  %4564 = vmatpush1.bf16.msra.mxu1 %v7269_v57  ;;  %v7276_v48 = vld [vmem:[#allocation49_spill] sm:$0xff]  ;;  %v7277_v57 = vld [vmem:[#allocation50_spill] sm:$0xff] }
 0x473   : > { %4566 = vmatprep.subr.bf16.mxu0 %v7270_v26  ;;  %4598 = vmatprep.subr.bf16.mxu1 %v7271_v37  ;;  %v7278_v26 = vld [vmem:[#allocation51_spill] sm:$0xff]  ;;  %v7279_v37 = vld [vmem:[#allocation52_spill] sm:$0xff] }
 0x475   : > { %2518 = vmatmul.mubr.f32.vlgmr.msra.gmra.mrb[6].mxu0 %v2135_v42  ;;  %2589 = vmatmul.mubr.f32.vlgmr.msra.gmra.mrb[6].mxu1 %v2135_v42  ;;  %v7280_v42 = vld [vmem:[#allocation53_spill] sm:$0xff] }
 0x476   : > { %4568 = vmatpush1.bf16.msra.mxu0 %v7272_v39  ;;  %4600 = vmatpush1.bf16.msra.mxu1 %v7273_v46  ;;  %v7281_v39 = vld [vmem:[#allocation54_spill] sm:$0xff]  ;;  %v7282_v46 = vld [vmem:[#allocation55_spill] sm:$0xff] }
 0x477   : > { %4570 = vmatprep.subr.bf16.mxu0 %v7274_v53  ;;  %4602 = vmatprep.subr.bf16.mxu1 %v7275_v54  ;;  %v7283_v53 = vld [vmem:[#allocation56_spill] sm:$0xff]  ;;  %v7284_v54 = vld [vmem:[#allocation57_spill] sm:$0xff] }
 0x478   : > { %2687 = vmatprep.mubr.f32.mxu0 %v7127_v6  ;;  %2758 = vmatprep.mubr.f32.mxu1 %v7127_v6 }
 0x47a   : > { %4572 = vmatpush1.bf16.msra.mxu0 %v7276_v48  ;;  %4604 = vmatpush1.bf16.msra.mxu1 %v7277_v57  ;;  %v7287_v48 = vld [vmem:[#allocation60_spill] sm:$0xff]  ;;  %v7288_v57 = vld [vmem:[#allocation61_spill] sm:$0xff] }
 0x47b   : > { %4574 = vmatprep.subr.bf16.mxu0 %v7278_v26  ;;  %4606 = vmatprep.subr.bf16.mxu1 %v7279_v37  ;;  %v7289_v26 = vld [vmem:[#allocation62_spill] sm:$0xff]  ;;  %v7290_v37 = vld [vmem:[#allocation63_spill] sm:$0xff] }
 0x47e   : > { %4576 = vmatpush1.bf16.msra.mxu0 %v7280_v42  ;;  %4608 = vmatpush1.bf16.msra.mxu1 %v7281_v39  ;;  %v7291_v42 = vld [vmem:[#allocation64_spill] sm:$0xff]  ;;  %v7292_v39 = vld [vmem:[#allocation65_spill] sm:$0xff] }
 0x47f   : > { %4578 = vmatprep.subr.bf16.mxu0 %v7282_v46  ;;  %4610 = vmatprep.subr.bf16.mxu1 %v7283_v53  ;;  %v7293_v46 = vld [vmem:[#allocation66_spill] sm:$0xff]  ;;  %v7294_v53 = vld [vmem:[#allocation67_spill] sm:$0xff] }
 0x482   : > { %4580 = vmatpush1.bf16.msra.mxu0 %v7284_v54  ;;  %4612 = vmatpush1.bf16.msra.mxu1 %v7285_v9  ;;  %v7295_v54 = vld [vmem:[#allocation68_spill] sm:$0xff]  ;;  %v7296_v9 = vld [vmem:[#allocation69_spill] sm:$0xff] }
 0x483   : > { %4582 = vmatprep.subr.bf16.mxu0 %v7286_v1  ;;  %4614 = vmatprep.subr.bf16.mxu1 %v7287_v48  ;;  %v7297_v1 = vld [vmem:[#allocation70_spill] sm:$0xff]  ;;  %v7298_v48 = vld [vmem:[#allocation71_spill] sm:$0xff] }
 0x486   : > { %4584 = vmatpush1.bf16.msra.mxu0 %v7288_v57  ;;  %4616 = vmatpush1.bf16.msra.mxu1 %v7289_v26  ;;  %v7299_v57 = vld [vmem:[#allocation72_spill] sm:$0xff]  ;;  %v7300_v26 = vld [vmem:[#allocation73_spill] sm:$0xff] }
 0x487   : > { %4586 = vmatprep.subr.bf16.mxu0 %v7290_v37  ;;  %4618 = vmatprep.subr.bf16.mxu1 %v7291_v42  ;;  %v7301_v37 = vld [vmem:[#allocation74_spill] sm:$0xff]  ;;  %v7302_v42 = vld [vmem:[#allocation75_spill] sm:$0xff] }
 0x48a   : > { %4588 = vmatpush1.bf16.msra.mxu0 %v7292_v39  ;;  %4620 = vmatpush1.bf16.msra.mxu1 %v7293_v46  ;;  %v7303_v39 = vld [vmem:[#allocation76_spill] sm:$0xff] }
 0x48b   : > { %4590 = vmatprep.subr.bf16.mxu0 %v7294_v53  ;;  %4622 = vmatprep.subr.bf16.mxu1 %v7295_v54 }
 0x48e   : > { %4592 = vmatpush1.bf16.msra.mxu0 %v7296_v9  ;;  %4624 = vmatpush1.bf16.msra.mxu1 %v7297_v1 }
 0x48f   : > { %4594 = vmatprep.subr.bf16.mxu0 %v7298_v48  ;;  %4626 = vmatprep.subr.bf16.mxu1 %v7299_v57 }
 0x492   : > { %4596 = vmatpush1.bf16.msra.mxu0 %v7300_v26  ;;  %4628 = vmatpush1.bf16.msra.mxu1 %v7301_v37  ;;  %v7305_v37 = vld [vmem:[#allocation112_spill] sm:$0xff] }
 0x493   : > { %4630 = vmatprep.subr.bf16.mxu0 %v7302_v42  ;;  %4662 = vmatprep.subr.bf16.mxu1 %v7303_v39 }
 0x528   : > { %v2344_v46 = vpop.f32.mrb[14].mxu0  ;;  %v2415_v53 = vpop.f32.mrb[14].mxu1 }
 0x529   : > { %v2420_v54 = vadd.f32 %v2344_v46, %v7304_v38  ;;  %v2346_v21 = vpop.f32.mrb[15].mxu0  ;;  %v2417_v9 = vpop.f32.mrb[15].mxu1  ;;  %v2422_v17 = vadd.f32 %v2415_v53, %v7305_v37 }
 0x52a   : > { %v2421_v1 = vadd.f32 %v2346_v21, %v6373_v51  ;;  %v2423_v26 = vadd.f32 %v2417_v9, %v7244_v59 }
 0x52b   : > { %v3790_v20 = vmul.f32 -1.442695, %v2420_v54 }
 0x52c   : > { %v3791_v48 = vmul.f32 -1.442695, %v2421_v1  ;;  %v3792_v57 = vmul.f32 -1.442695, %v2423_v26 }
 0x52d   : > { %5207 = vpow2.f32 %v3790_v20 }
 0x52e   : > { %5209 = vpow2.f32 %v3791_v48 }
 0x52f   : > { %5211 = vpow2.f32 %v3792_v57 }
 0x530   : > { %5213 = vtanh.f32 %v2422_v17 }
 0x537   : > { %v5208_v42 = vpop.eup %5207 }
 0x538   : > { %v5210_v10 = vpop.eup %5209  ;;  %v2427_v39 = vadd.f32 1.0, %v5208_v42 }
 0x539   : > { %v2433_v5 = vadd.f32 1.0, %v5210_v10  ;;  %v5212_v46 = vpop.eup %5211 }
 0x53a   : > { %5215 = vrcp.f32 %v2427_v39  ;;  %v5214_v38 = vpop.eup %5213  ;;  %v2440_v20 = vadd.f32 1.0, %v5212_v46 }
 0x53b   : > { %5217 = vrcp.f32 %v2433_v5 }
 0x53c   : > { %5219 = vrcp.f32 %v2440_v20 }
 0x544   : > { %v5216_v21 = vpop.eup %5215 }
 0x545   : > { %v5218_v54 = vpop.eup %5217  ;;  %v2444_v1 = vmul.f32 %v5216_v21, %v5214_v38 }
 0x546   : > { %v2443_v48 = vmul.f32 %v5218_v54, %v6505_v34  ;;  %v5220_v34 = vpop.eup %5219 }
 0x548   : > { %v6623_v9 = vadd.f32 %v2444_v1, %v2443_v48  ;;  %v2519_v26 = vpop.f32.mrb[6].mxu0  ;;  %v2590_v53 = vpop.f32.mrb[6].mxu1 }
 0x549   : > { %v4939_v42 = vadd.f32 %v2519_v26, %v7246_v3  ;;  %v2521_v57 = vpop.f32.mrb[7].mxu0  ;;  %v2592_v17 = vpop.f32.mrb[7].mxu1  ;;  %v4949_v54 = vadd.f32 %v2590_v53, %v6290_v13  ;;  %v7306_v53 = vld [vmem:[#allocation82_spill] sm:$0xff] }
 0x54a   : > { %v4940_v10 = vadd.f32 %v2521_v57, %v7186_v24  ;;  %5221 = vtanh.f32 %v6623_v9  ;;  %v4950_v38 = vadd.f32 %v2592_v17, %v7187_v43  ;;  %v7307_v57 = vld [vmem:[#allocation83_spill] sm:$0xff]  ;;  %v7308_v17 = vld [vmem:[#allocation84_spill] sm:$0xff] }
 0x54b   : > { %v3793_v5 = vmul.f32 -1.442695, %v4939_v42 }
 0x54c   : > { %v3794_v39 = vmul.f32 -1.442695, %v4940_v10  ;;  %v3795_v21 = vmul.f32 -1.442695, %v4950_v38  ;;  %v7309_v10 = vld [vmem:[#allocation85_spill] sm:$0xff]  ;;  %v7312_v38 = vld [vmem:[#allocation88_spill] sm:$0xff] }
 0x54d   : > { %5223 = vpow2.f32 %v3793_v5  ;;  %v7310_v5 = vld [vmem:[#allocation86_spill] sm:$0xff] }
 0x54e   : > { %5225 = vpow2.f32 %v3794_v39  ;;  %v7311_v39 = vld [vmem:[#allocation87_spill] sm:$0xff] }
 0x54f   : > { %5227 = vpow2.f32 %v3795_v21 }
 0x550   : > { %5229 = vtanh.f32 %v4949_v54  ;;  %v7313_v54 = vld [vmem:[#allocation89_spill] sm:$0xff] }
 0x554   : > { %v5222_v46 = vpop.eup %5221 }
 0x555   : > { %v2447_v1 = vmul.f32 %v5222_v46, %v5220_v34 }
 0x557   : > { %v5224_v20 = vpop.eup %5223  ;;  %2688 = vmatmul.mubr.f32.vlgmr.msra.gmra.mrb[16].mxu0 %v2447_v1  ;;  %2759 = vmatmul.mubr.f32.vlgmr.msra.gmra.mrb[16].mxu1 %v2447_v1 }
 0x558   : > { %v5226_v48 = vpop.eup %5225  ;;  %v2602_v26 = vadd.f32 1.0, %v5224_v20  ;;  %4632 = vmatpush1.bf16.msra.mxu0 %v7188_v25  ;;  %4664 = vmatpush1.bf16.msra.mxu1 %v7247_v22 }
 0x559   : > { %v2608_v42 = vadd.f32 1.0, %v5226_v48  ;;  %4634 = vmatprep.subr.bf16.mxu0 %v7248_v62  ;;  %4666 = vmatprep.subr.bf16.mxu1 %v7249_v7  ;;  %v5228_v34 = vpop.eup %5227 }
 0x55a   : > { %5231 = vrcp.f32 %v2602_v26  ;;  %2829 = vmatprep.mubr.f32.mxu0 %v7127_v6  ;;  %2900 = vmatprep.mubr.f32.mxu1 %v7127_v6  ;;  %v5230_v46 = vpop.eup %5229  ;;  %v2615_v48 = vadd.f32 1.0, %v5228_v34 }
 0x55b   : > { %5233 = vrcp.f32 %v2608_v42 }
 0x55c   : > { %4636 = vmatpush1.bf16.msra.mxu0 %v7250_v47  ;;  %4668 = vmatpush1.bf16.msra.mxu1 %v7306_v53  ;;  %5235 = vrcp.f32 %v2615_v48  ;;  %v7333_v48 = vld [vmem:[#allocation46_spill] sm:$0xff] }
 0x55d   : > { %4638 = vmatprep.subr.bf16.mxu0 %v7307_v57  ;;  %4670 = vmatprep.subr.bf16.mxu1 %v7308_v17 }
 0x560   : > { %4640 = vmatpush1.bf16.msra.mxu0 %v7309_v10  ;;  %4672 = vmatpush1.bf16.msra.mxu1 %v7310_v5 }
 0x561   : > { %4642 = vmatprep.subr.bf16.mxu0 %v7311_v39  ;;  %4674 = vmatprep.subr.bf16.mxu1 %v7312_v38 }
 0x564   : > { %v5232_v21 = vpop.eup %5231  ;;  %4644 = vmatpush1.bf16.msra.mxu0 %v7313_v54  ;;  %4676 = vmatpush1.bf16.msra.mxu1 %v7201_v18 }
 0x565   : > { %v5234_v1 = vpop.eup %5233  ;;  %v2619_v20 = vmul.f32 %v5232_v21, %v5230_v46  ;;  %4646 = vmatprep.subr.bf16.mxu0 %v7202_v8  ;;  %4678 = vmatprep.subr.bf16.mxu1 %v7203_v0  ;;  %v7330_v21 = vld [vmem:[#allocation43_spill] sm:$0xff] }
 0x566   : > { %v2618_v26 = vmul.f32 %v5234_v1, %v6531_v50  ;;  %v5236_v50 = vpop.eup %5235  ;;  %v7331_v1 = vld [vmem:[#allocation44_spill] sm:$0xff] }
 0x568   : > { %v6649_v42 = vadd.f32 %v2619_v20, %v2618_v26  ;;  %4648 = vmatpush1.bf16.msra.mxu0 %v7259_v15  ;;  %4680 = vmatpush1.bf16.msra.mxu1 %v7260_v44  ;;  %v7332_v20 = vld [vmem:[#allocation45_spill] sm:$0xff]  ;;  %v7334_v26 = vld [vmem:[#allocation47_spill] sm:$0xff] }
 0x569   : > { %4650 = vmatprep.subr.bf16.mxu0 %v7261_v30  ;;  %4682 = vmatprep.subr.bf16.mxu1 %v7262_v61 }
 0x56a   : > { %5237 = vtanh.f32 %v6649_v42 }
 0x56c   : > { %4652 = vmatpush1.bf16.msra.mxu0 %v7263_v33  ;;  %4684 = vmatpush1.bf16.msra.mxu1 %v7264_v11 }
 0x56d   : > { %4654 = vmatprep.subr.bf16.mxu0 %v7265_v58  ;;  %4686 = vmatprep.subr.bf16.mxu1 %v7211_v28 }
 0x570   : > { %4656 = vmatpush1.bf16.msra.mxu0 %v7212_v12  ;;  %4688 = vmatpush1.bf16.msra.mxu1 %v7213_v14 }
 0x571   : > { %4658 = vmatprep.subr.bf16.mxu0 %v7214_v63  ;;  %4690 = vmatprep.subr.bf16.mxu1 %v7215_v16 }
 0x574   : > { %v5238_v34 = vpop.eup %5237  ;;  %4660 = vmatpush1.bf16.msra.mxu0 %v7216_v29  ;;  %4692 = vmatpush1.bf16.msra.mxu1 %v7217_v35 }
 0x575   : > { %v2622_v46 = vmul.f32 %v5238_v34, %v5236_v50  ;;  %4694 = vmatprep.subr.bf16.mxu0 %v7218_v49  ;;  %4726 = vmatprep.subr.bf16.mxu1 %v7219_v19  ;;  %v7328_v49 = vld [vmem:[#allocation41_spill] sm:$0xff]  ;;  %v7329_v19 = vld [vmem:[#allocation42_spill] sm:$0xff]  ;;  %v7335_v50 = vld [vmem:[#allocation48_spill] sm:$0xff] }
 0x576   : > { %v7336_v34 = vld [vmem:[#allocation49_spill] sm:$0xff] }
 0x577   : > { %2830 = vmatmul.mubr.f32.vlgmr.msra.gmra.mrb[16].mxu0 %v2622_v46  ;;  %2901 = vmatmul.mubr.f32.vlgmr.msra.gmra.mrb[16].mxu1 %v2622_v46 }
 0x578   : > { %4696 = vmatpush1.bf16.msra.mxu0 %v5950_v23  ;;  %4728 = vmatpush1.bf16.msra.mxu1 %v5954_v27  ;;  %v7314_v23 = vld [vmem:[#allocation27_spill] sm:$0xff]  ;;  %v7315_v27 = vld [vmem:[#allocation28_spill] sm:$0xff] }
 0x579   : > { %4698 = vmatprep.subr.bf16.mxu0 %v5957_v31  ;;  %4730 = vmatprep.subr.bf16.mxu1 %v5959_v32  ;;  %v7316_v31 = vld [vmem:[#allocation29_spill] sm:$0xff]  ;;  %v7317_v32 = vld [vmem:[#allocation30_spill] sm:$0xff] }
 0x57a   : > { %3004 = vmatprep.mubr.f32.mxu0 %v7127_v6  ;;  %3075 = vmatprep.mubr.f32.mxu1 %v7127_v6 }
 0x57c   : > { %4700 = vmatpush1.bf16.msra.mxu0 %v5963_v36  ;;  %4732 = vmatpush1.bf16.msra.mxu1 %v5967_v40  ;;  %v7318_v36 = vld [vmem:[#allocation31_spill] sm:$0xff]  ;;  %v7319_v40 = vld [vmem:[#allocation32_spill] sm:$0xff] }
 0x57d   : > { %4702 = vmatprep.subr.bf16.mxu0 %v5969_v41  ;;  %4734 = vmatprep.subr.bf16.mxu1 %v5972_v45  ;;  %v7320_v41 = vld [vmem:[#allocation33_spill] sm:$0xff]  ;;  %v7321_v45 = vld [vmem:[#allocation34_spill] sm:$0xff] }
 0x580   : > { %4704 = vmatpush1.bf16.msra.mxu0 %v5977_v52  ;;  %4736 = vmatpush1.bf16.msra.mxu1 %v5981_v55  ;;  %v7322_v52 = vld [vmem:[#allocation35_spill] sm:$0xff]  ;;  %v7323_v55 = vld [vmem:[#allocation36_spill] sm:$0xff] }
 0x581   : > { %4706 = vmatprep.subr.bf16.mxu0 %v5983_v56  ;;  %4738 = vmatprep.subr.bf16.mxu1 %v5987_v60  ;;  %v7324_v56 = vld [vmem:[#allocation37_spill] sm:$0xff]  ;;  %v7325_v60 = vld [vmem:[#allocation38_spill] sm:$0xff] }
 0x584   : > { %4708 = vmatpush1.bf16.msra.mxu0 %v5993_v2  ;;  %4740 = vmatpush1.bf16.msra.mxu1 %v5999_v4  ;;  %v7326_v2 = vld [vmem:[#allocation39_spill] sm:$0xff]  ;;  %v7327_v4 = vld [vmem:[#allocation40_spill] sm:$0xff] }
 0x585   : > { %4710 = vmatprep.subr.bf16.mxu0 %v7314_v23  ;;  %4742 = vmatprep.subr.bf16.mxu1 %v7315_v27  ;;  %v7337_v23 = vld [vmem:[#allocation50_spill] sm:$0xff]  ;;  %v7338_v27 = vld [vmem:[#allocation51_spill] sm:$0xff] }
 0x588   : > { %4712 = vmatpush1.bf16.msra.mxu0 %v7316_v31  ;;  %4744 = vmatpush1.bf16.msra.mxu1 %v7317_v32  ;;  %v7339_v31 = vld [vmem:[#allocation52_spill] sm:$0xff]  ;;  %v7341_v32 = vld [vmem:[#allocation54_spill] sm:$0xff] }
 0x589   : > { %4714 = vmatprep.subr.bf16.mxu0 %v7318_v36  ;;  %4746 = vmatprep.subr.bf16.mxu1 %v7319_v40  ;;  %v7342_v36 = vld [vmem:[#allocation55_spill] sm:$0xff]  ;;  %v7343_v40 = vld [vmem:[#allocation56_spill] sm:$0xff] }
 0x58c   : > { %4716 = vmatpush1.bf16.msra.mxu0 %v7320_v41  ;;  %4748 = vmatpush1.bf16.msra.mxu1 %v7321_v45  ;;  %v7344_v41 = vld [vmem:[#allocation57_spill] sm:$0xff]  ;;  %v7345_v45 = vld [vmem:[#allocation58_spill] sm:$0xff] }
 0x58d   : > { %4718 = vmatprep.subr.bf16.mxu0 %v7322_v52  ;;  %4750 = vmatprep.subr.bf16.mxu1 %v7323_v55  ;;  %v7346_v52 = vld [vmem:[#allocation59_spill] sm:$0xff]  ;;  %v7347_v55 = vld [vmem:[#allocation60_spill] sm:$0xff] }
 0x590   : > { %4720 = vmatpush1.bf16.msra.mxu0 %v7324_v56  ;;  %4752 = vmatpush1.bf16.msra.mxu1 %v7325_v60  ;;  %v7348_v56 = vld [vmem:[#allocation61_spill] sm:$0xff]  ;;  %v7349_v60 = vld [vmem:[#allocation62_spill] sm:$0xff] }
 0x591   : > { %4722 = vmatprep.subr.bf16.mxu0 %v7326_v2  ;;  %4754 = vmatprep.subr.bf16.mxu1 %v7327_v4  ;;  %v7350_v2 = vld [vmem:[#allocation63_spill] sm:$0xff]  ;;  %v7351_v4 = vld [vmem:[#allocation64_spill] sm:$0xff] }
 0x594   : > { %4724 = vmatpush1.bf16.msra.mxu0 %v7328_v49  ;;  %4756 = vmatpush1.bf16.msra.mxu1 %v7329_v19  ;;  %v7352_v49 = vld [vmem:[#allocation65_spill] sm:$0xff]  ;;  %v7353_v19 = vld [vmem:[#allocation66_spill] sm:$0xff] }
 0x595   : > { %4758 = vmatprep.subr.bf16.mxu0 %v7330_v21  ;;  %4790 = vmatprep.subr.bf16.mxu1 %v7331_v1  ;;  %v7354_v21 = vld [vmem:[#allocation67_spill] sm:$0xff]  ;;  %v7355_v1 = vld [vmem:[#allocation68_spill] sm:$0xff] }
 0x597   : > { %3005 = vmatmul.mubr.f32.vlgmr.msra.gmra.mrb[8].mxu0 %v2622_v46  ;;  %3076 = vmatmul.mubr.f32.vlgmr.msra.gmra.mrb[8].mxu1 %v2622_v46  ;;  %v7340_v46 = vld [vmem:[#allocation53_spill] sm:$0xff] }
 0x598   : > { %4760 = vmatpush1.bf16.msra.mxu0 %v7332_v20  ;;  %4792 = vmatpush1.bf16.msra.mxu1 %v7333_v48  ;;  %v7356_v20 = vld [vmem:[#allocation69_spill] sm:$0xff]  ;;  %v7357_v48 = vld [vmem:[#allocation70_spill] sm:$0xff] }
 0x599   : > { %4762 = vmatprep.subr.bf16.mxu0 %v7334_v26  ;;  %4794 = vmatprep.subr.bf16.mxu1 %v7335_v50  ;;  %v7358_v26 = vld [vmem:[#allocation71_spill] sm:$0xff]  ;;  %v7359_v50 = vld [vmem:[#allocation72_spill] sm:$0xff] }
 0x59a   : > { %3174 = vmatprep.mubr.f32.mxu0 %v7127_v6  ;;  %3245 = vmatprep.mubr.f32.mxu1 %v7127_v6 }
 0x59c   : > { %4764 = vmatpush1.bf16.msra.mxu0 %v7336_v34  ;;  %4796 = vmatpush1.bf16.msra.mxu1 %v7337_v23  ;;  %v7360_v34 = vld [vmem:[#allocation73_spill] sm:$0xff]  ;;  %v7361_v23 = vld [vmem:[#allocation74_spill] sm:$0xff] }
 0x59d   : > { %4766 = vmatprep.subr.bf16.mxu0 %v7338_v27  ;;  %4798 = vmatprep.subr.bf16.mxu1 %v7339_v31  ;;  %v7362_v27 = vld [vmem:[#allocation75_spill] sm:$0xff]  ;;  %v7363_v31 = vld [vmem:[#allocation76_spill] sm:$0xff] }
 0x5a0   : > { %4768 = vmatpush1.bf16.msra.mxu0 %v7340_v46  ;;  %4800 = vmatpush1.bf16.msra.mxu1 %v7341_v32 }
 0x5a1   : > { %4770 = vmatprep.subr.bf16.mxu0 %v7342_v36  ;;  %4802 = vmatprep.subr.bf16.mxu1 %v7343_v40  ;;  %v7364_v36 = vld [vmem:[#allocation110_spill] sm:$0xff] }
 0x5a4   : > { %4772 = vmatpush1.bf16.msra.mxu0 %v7344_v41  ;;  %4804 = vmatpush1.bf16.msra.mxu1 %v7345_v45 }
 0x5a5   : > { %4774 = vmatprep.subr.bf16.mxu0 %v7346_v52  ;;  %4806 = vmatprep.subr.bf16.mxu1 %v7347_v55 }
 0x5a8   : > { %4776 = vmatpush1.bf16.msra.mxu0 %v7348_v56  ;;  %4808 = vmatpush1.bf16.msra.mxu1 %v7349_v60 }
 0x5a9   : > { %4778 = vmatprep.subr.bf16.mxu0 %v7350_v2  ;;  %4810 = vmatprep.subr.bf16.mxu1 %v7351_v4 }
 0x5ac   : > { %4780 = vmatpush1.bf16.msra.mxu0 %v7352_v49  ;;  %4812 = vmatpush1.bf16.msra.mxu1 %v7353_v19 }
 0x5ad   : > { %4782 = vmatprep.subr.bf16.mxu0 %v7354_v21  ;;  %4814 = vmatprep.subr.bf16.mxu1 %v7355_v1 }
 0x5b0   : > { %4784 = vmatpush1.bf16.msra.mxu0 %v7356_v20  ;;  %4816 = vmatpush1.bf16.msra.mxu1 %v7357_v48 }
 0x5b1   : > { %4786 = vmatprep.subr.bf16.mxu0 %v7358_v26  ;;  %4818 = vmatprep.subr.bf16.mxu1 %v7359_v50 }
 0x5b4   : > { %4788 = vmatpush1.bf16.msra.mxu0 %v7360_v34  ;;  %4820 = vmatpush1.bf16.msra.mxu1 %v7361_v23 }
 0x5b5   : > { %4822 = vmatprep.subr.bf16.mxu0 %v7362_v27  ;;  %4854 = vmatprep.subr.bf16.mxu1 %v7363_v31 }
 0x64a   : > { %v2831_v46 = vpop.f32.mrb[16].mxu0  ;;  %v2902_v32 = vpop.f32.mrb[16].mxu1 }
 0x64b   : > { %v2907_v40 = vadd.f32 %v2831_v46, %v7364_v36  ;;  %v2833_v41 = vpop.f32.mrb[17].mxu0  ;;  %v2904_v45 = vpop.f32.mrb[17].mxu1  ;;  %v2909_v4 = vadd.f32 %v2902_v32, %v7305_v37 }
 0x64c   : > { %v2908_v52 = vadd.f32 %v2833_v41, %v6373_v51  ;;  %v2910_v60 = vadd.f32 %v2904_v45, %v7244_v59 }
 0x64d   : > { %v3796_v55 = vmul.f32 -1.442695, %v2907_v40 }
 0x64e   : > { %v3797_v56 = vmul.f32 -1.442695, %v2908_v52  ;;  %v3798_v2 = vmul.f32 -1.442695, %v2910_v60 }
 0x64f   : > { %5239 = vpow2.f32 %v3796_v55 }
 0x650   : > { %5241 = vpow2.f32 %v3797_v56 }
 0x651   : > { %5243 = vpow2.f32 %v3798_v2 }
 0x652   : > { %5245 = vtanh.f32 %v2909_v4 }
 0x659   : > { %v5240_v49 = vpop.eup %5239 }
 0x65a   : > { %v5242_v19 = vpop.eup %5241  ;;  %v2914_v21 = vadd.f32 1.0, %v5240_v49 }
 0x65b   : > { %v2920_v1 = vadd.f32 1.0, %v5242_v19  ;;  %v5244_v20 = vpop.eup %5243 }
 0x65c   : > { %5247 = vrcp.f32 %v2914_v21  ;;  %v5246_v48 = vpop.eup %5245  ;;  %v2927_v23 = vadd.f32 1.0, %v5244_v20  ;;  %v3431_v20 = vld [vmem:[#allocation16 + $0x8] sm:$0xff] (!%p3805_p5) }
 0x65d   : > { %5249 = vrcp.f32 %v2920_v1 }
 0x65e   : > { %5251 = vrcp.f32 %v2927_v23  ;;  %v5594_v23 = vmov (!%p3805_p5), 0.0  }
 0x666   : > { %v5248_v26 = vpop.eup %5247 }
 0x667   : > { %v5250_v50 = vpop.eup %5249  ;;  %v2931_v34 = vmul.f32 %v5248_v26, %v5246_v48  ;;  %v3432_v48 = vld [vmem:[#allocation16 + $0x10] sm:$0xff] (!%p3805_p5)  ;;  %v5592_v26 = vmov (!%p3805_p5), 0.0|0.0  }
 0x668   : > { %v2930_v27 = vmul.f32 %v5250_v50, %v6623_v9  ;;  %v5252_v9 = vpop.eup %5251 }
 0x66a   : > { %v6741_v31 = vadd.f32 %v2931_v34, %v2930_v27  ;;  %v3006_v46 = vpop.f32.mrb[8].mxu0  ;;  %v3077_v32 = vpop.f32.mrb[8].mxu1  ;;  %v3433_v34 = vld [vmem:[#allocation16 + $0x18] sm:$0xff] (!%p3805_p5) }
 0x66b   : > { %v4941_v40 = vadd.f32 %v3006_v46, %v7246_v3  ;;  %v3008_v41 = vpop.f32.mrb[9].mxu0  ;;  %v3079_v45 = vpop.f32.mrb[9].mxu1  ;;  %v4951_v49 = vadd.f32 %v3077_v32, %v6290_v13  ;;  %v4889_v27 = vpack.c.bf16 (!%p3805_p5), %v3433_v34, %v3432_v48  ;;  %v3435_v46 = vld [vmem:[#allocation16 + $0x28] sm:$0xff] (!%p3805_p5)  ;;  %v3524_v32 = vld [vmem:[#allocation18] sm:$0xff] (!%p3805_p5) }
 0x66c   : > { %v4942_v52 = vadd.f32 %v3008_v41, %v7186_v24  ;;  %5253 = vtanh.f32 %v6741_v31  ;;  %v4952_v60 = vadd.f32 %v3079_v45, %v7187_v43  ;;  %v3526_v45 = vld [vmem:[#allocation18 + $0x10] sm:$0xff] (!%p3805_p5) }
 0x66d   : > { %v3799_v55 = vmul.f32 -1.442695, %v4941_v40  ;;  %v3525_v40 = vld [vmem:[#allocation18 + $0x8] sm:$0xff] (!%p3805_p5) }
 0x66e   : > { %v3800_v56 = vmul.f32 -1.442695, %v4942_v52  ;;  %v3801_v4 = vmul.f32 -1.442695, %v4952_v60  ;;  %v4910_v41 = vpack.c.bf16 (!%p3805_p5), %v3525_v40, %v3524_v32  ;;  %v3527_v52 = vld [vmem:[#allocation18 + $0x18] sm:$0xff] (!%p3805_p5) }
 0x66f   : > { %5255 = vpow2.f32 %v3799_v55  ;;  %v3437_v60 = vld [vmem:[#allocation16 + $0x38] sm:$0xff] (!%p3805_p5) }
 0x670   : > { %5257 = vpow2.f32 %v3800_v56  ;;  %v3436_v56 = vld [vmem:[#allocation16 + $0x30] sm:$0xff] (!%p3805_p5) }
 0x671   : > { %5259 = vpow2.f32 %v3801_v4  ;;  %v3529_v4 = vld [vmem:[#allocation18 + $0x28] sm:$0xff] (!%p3805_p5) }
 0x672   : > { %5261 = vtanh.f32 %v4951_v49  ;;  %v4895_v49 = vpack.c.bf16 (!%p3805_p5), %v3437_v60, %v3436_v56 }
 0x676   : > { %v5254_v2 = vpop.eup %5253 }
 0x677   : > { %v2934_v19 = vmul.f32 %v5254_v2, %v5252_v9  ;;  %v4913_v9 = vpack.c.bf16 (!%p3805_p5), %v3527_v52, %v3526_v45  ;;  %v3528_v2 = vld [vmem:[#allocation18 + $0x20] sm:$0xff] (!%p3805_p5) }
 0x679   : > { %v5256_v21 = vpop.eup %5255  ;;  %3175 = vmatmul.mubr.f32.vlgmr.msra.gmra.mrb[18].mxu0 %v2934_v19  ;;  %3246 = vmatmul.mubr.f32.vlgmr.msra.gmra.mrb[18].mxu1 %v2934_v19  ;;  %v3438_v19 = vld [vmem:[#allocation16 + $0x40] sm:$0xff] (!%p3805_p5) }
 0x67a   : > { %v5258_v3 = vpop.eup %5257  ;;  %v3089_v1 = vadd.f32 1.0, %v5256_v21  ;;  %4824 = vmatpush1.bf16.msra.mxu0 %v7188_v25  ;;  %4856 = vmatpush1.bf16.msra.mxu1 %v7247_v22  ;;  %v3439_v21 = vld [vmem:[#allocation16 + $0x48] sm:$0xff] (!%p3805_p5) }
 0x67b   : > { %v3095_v24 = vadd.f32 1.0, %v5258_v3  ;;  %4826 = vmatprep.subr.bf16.mxu0 %v7248_v62  ;;  %4858 = vmatprep.subr.bf16.mxu1 %v7249_v7  ;;  %v5260_v13 = vpop.eup %5259  ;;  %v4916_v3 = vpack.c.bf16 (!%p3805_p5), %v3529_v4, %v3528_v2 }
 0x67c   : > { %5263 = vrcp.f32 %v3089_v1  ;;  %3316 = vmatprep.mubr.f32.mxu0 %v7127_v6  ;;  %3387 = vmatprep.mubr.f32.mxu1 %v7127_v6  ;;  %v5262_v43 = vpop.eup %5261  ;;  %v3102_v62 = vadd.f32 1.0, %v5260_v13  ;;  %v3530_v1 = vld [vmem:[#allocation18 + $0x30] sm:$0xff] (!%p3805_p5)  ;;  %v4898_v13 = vpack.c.bf16 (!%p3805_p5), %v3439_v21, %v3438_v19 }
 0x67d   : > { %5265 = vrcp.f32 %v3095_v24  ;;  %v3531_v24 = vld [vmem:[#allocation18 + $0x38] sm:$0xff] (!%p3805_p5) }
 0x67e   : > { %4828 = vmatpush1.bf16.msra.mxu0 %v7250_v47  ;;  %4860 = vmatpush1.bf16.msra.mxu1 %v7306_v53  ;;  %5267 = vrcp.f32 %v3102_v62  ;;  %v3533_v62 = vld [vmem:[#allocation18 + $0x48] sm:$0xff] (!%p3805_p5) }
 0x67f   : > { %4830 = vmatprep.subr.bf16.mxu0 %v7307_v57  ;;  %4862 = vmatprep.subr.bf16.mxu1 %v7308_v17 }
 0x682   : > { %4832 = vmatpush1.bf16.msra.mxu0 %v7309_v10  ;;  %4864 = vmatpush1.bf16.msra.mxu1 %v7310_v5 }
 0x683   : > { %4834 = vmatprep.subr.bf16.mxu0 %v7311_v39  ;;  %4866 = vmatprep.subr.bf16.mxu1 %v7312_v38 }
 0x686   : > { %v5264_v6 = vpop.eup %5263  ;;  %4836 = vmatpush1.bf16.msra.mxu0 %v7313_v54  ;;  %4868 = vmatpush1.bf16.msra.mxu1 %v7201_v18 }
 0x687   : > { %v5266_v25 = vpop.eup %5265  ;;  %v3106_v22 = vmul.f32 %v5264_v6, %v5262_v43  ;;  %4838 = vmatprep.subr.bf16.mxu0 %v7202_v8  ;;  %4870 = vmatprep.subr.bf16.mxu1 %v7203_v0  ;;  %v3440_v43 = vld [vmem:[#allocation16 + $0x50] sm:$0xff] (!%p3805_p5)  ;;  %v3441_v6 = vld [vmem:[#allocation16 + $0x58] sm:$0xff] (!%p3805_p5) }
 0x688   : > { %v3105_v7 = vmul.f32 %v5266_v25, %v6649_v42  ;;  %v5268_v8 = vpop.eup %5267  ;;  %v4919_v25 = vpack.c.bf16 (!%p3805_p5), %v3531_v24, %v3530_v1 }
 0x68a   : > { %v3107_v47 = vadd.f32 %v3106_v22, %v3105_v7  ;;  %4840 = vmatpush1.bf16.msra.mxu0 %v7259_v15  ;;  %4872 = vmatpush1.bf16.msra.mxu1 %v7260_v44  ;;  %v3532_v22 = vld [vmem:[#allocation18 + $0x40] sm:$0xff] (!%p3805_p5)  ;;  %v4901_v7 = vpack.c.bf16 (!%p3805_p5), %v3441_v6, %v3440_v43 }
 0x68b   : > { %4842 = vmatprep.subr.bf16.mxu0 %v7261_v30  ;;  %4874 = vmatprep.subr.bf16.mxu1 %v7262_v61 }
 0x68c   : > { %3423 = vst [vmem:[#allocation4] sm:$0xff] %v3107_v47  ;;  %5269 = vtanh.f32 %v3107_v47  ;;  %v3442_v47 = vld [vmem:[#allocation16 + $0x60] sm:$0xff] (!%p3805_p5) }
 0x68e   : > { %4844 = vmatpush1.bf16.msra.mxu0 %v7263_v33  ;;  %4876 = vmatpush1.bf16.msra.mxu1 %v7264_v11 }
 0x68f   : > { %4846 = vmatprep.subr.bf16.mxu0 %v7265_v58  ;;  %4878 = vmatprep.subr.bf16.mxu1 %v7211_v28 }
 0x692   : > { %4848 = vmatpush1.bf16.msra.mxu0 %v7212_v12  ;;  %4880 = vmatpush1.bf16.msra.mxu1 %v7213_v14 }
 0x693   : > { %4850 = vmatprep.subr.bf16.mxu0 %v7214_v63  ;;  %4882 = vmatprep.subr.bf16.mxu1 %v7215_v16 }
 0x696   : > { %v5270_v18 = vpop.eup %5269  ;;  %4852 = vmatpush1.bf16.msra.mxu0 %v7216_v29  ;;  %4884 = vmatpush1.bf16.msra.mxu1 %v7217_v35 }
 0x697   : > { %v3109_v0 = vmul.f32 %v5270_v18, %v5268_v8  ;;  %4885 = vmatprep.subr.bf16.mxu0 (!%p3805_p5), %v5592_v26  ;;  %4909 = vmatprep.subr.bf16.mxu1 (!%p3805_p5), %v5592_v26  ;;  %v3443_v8 = vld [vmem:[#allocation16 + $0x68] sm:$0xff] (!%p3805_p5)  ;;  %v4922_v18 = vpack.c.bf16 (!%p3805_p5), %v3533_v62, %v3532_v22 }
 0x699   : > { %3317 = vmatmul.mubr.f32.vlgmr.msra.gmra.mrb[18].mxu0 %v3109_v0  ;;  %3422 = vst [vmem:[#allocation3] sm:$0xff] %v3109_v0  ;;  %3388 = vmatmul.mubr.f32.vlgmr.msra.gmra.mrb[18].mxu1 %v3109_v0  ;;  %v3534_v0 = vld [vmem:[#allocation18 + $0x50] sm:$0xff] (!%p3805_p5) }
 0x69a   : > { %3879 = vmatprep.mubr.msk.f32.mxu0 (!%p3805_p5), %vm5593_vm1, %v5594_v23  ;;  %3914 = vmatprep.mubr.msk.f32.mxu1 (!%p3805_p5), %vm5593_vm1, %v5594_v23 }
 0x69b   : > { %4911 = vmatpush3.bf16.msra.mxu1 (!%p3805_p5), %v4910_v41 }
 0x69c   : > { %4912 = vmatprep.subr.bf16.mxu1 (!%p3805_p5), %v5592_v26 }
 0x69f   : > { %4914 = vmatpush3.bf16.msra.mxu1 (!%p3805_p5), %v4913_v9 }
 0x6a0   : > { %4915 = vmatprep.subr.bf16.mxu1 (!%p3805_p5), %v5592_v26 }
 0x6a3   : > { %4917 = vmatpush3.bf16.msra.mxu1 (!%p3805_p5), %v4916_v3 }
 0x6a4   : > { %4918 = vmatprep.subr.bf16.mxu1 (!%p3805_p5), %v5592_v26 }
 0x6a7   : > { %4920 = vmatpush3.bf16.msra.mxu1 (!%p3805_p5), %v4919_v25 }
 0x6a8   : > { %4921 = vmatprep.subr.bf16.mxu1 (!%p3805_p5), %v5592_v26 }
 0x6ab   : > { %4923 = vmatpush3.bf16.msra.mxu1 (!%p3805_p5), %v4922_v18 }
 0x6ac   : > { %4924 = vmatprep.subr.bf16.mxu1 (!%p3805_p5), %v5592_v26 }
 0x76c   : > { %v3318_v30 = vpop.f32.mrb[18].mxu0  ;;  %v3389_v28 = vpop.f32.mrb[18].mxu1 }
 0x76d   : > { %v3394_v12 = vadd.f32 %v3318_v30, %v7364_v36  ;;  %v3320_v15 = vpop.f32.mrb[19].mxu0  ;;  %v3391_v14 = vpop.f32.mrb[19].mxu1  ;;  %v3396_v35 = vadd.f32 %v3389_v28, %v7305_v37  ;;  %v3430_v36 = vld [vmem:[#allocation16] sm:$0xff] (!%p3805_p5)  ;;  %v3535_v30 = vld [vmem:[#allocation18 + $0x58] sm:$0xff] (!%p3805_p5)  ;;  %v4904_v28 = vpack.c.bf16 (!%p3805_p5), %v3443_v8, %v3442_v47 }
 0x76e   : > { %v3395_v63 = vadd.f32 %v3320_v15, %v6373_v51  ;;  %v3397_v29 = vadd.f32 %v3391_v14, %v7244_v59  ;;  %v4886_v50 = vpack.c.bf16 (!%p3805_p5), %v3431_v20, %v3430_v36  ;;  %v3445_v15 = vld [vmem:[#allocation16 + $0x78] sm:$0xff] (!%p3805_p5)  ;;  %v4925_v14 = vpack.c.bf16 (!%p3805_p5), %v3535_v30, %v3534_v0 }
 0x76f   : > { %v3802_v44 = vmul.f32 -1.442695, %v3394_v12  ;;  %v3444_v12 = vld [vmem:[#allocation16 + $0x70] sm:$0xff] (!%p3805_p5) }
 0x770   : > { %v3803_v16 = vmul.f32 -1.442695, %v3395_v63  ;;  %v3804_v61 = vmul.f32 -1.442695, %v3397_v29  ;;  %4887 = vmatpush3.bf16.msra.mxu0 (!%p3805_p5), %v4886_v50  ;;  %v3536_v63 = vld [vmem:[#allocation18 + $0x60] sm:$0xff] (!%p3805_p5)  ;;  %4926 = vmatpush3.bf16.msra.mxu1 (!%p3805_p5), %v4925_v14 }
 0x771   : > { %5271 = vpow2.f32 %v3802_v44  ;;  %4888 = vmatprep.subr.bf16.mxu0 (!%p3805_p5), %v5592_v26  ;;  %v3537_v44 = vld [vmem:[#allocation18 + $0x68] sm:$0xff] (!%p3805_p5)  ;;  %4927 = vmatprep.subr.bf16.mxu1 (!%p3805_p5), %v5592_v26 }
 0x772   : > { %5273 = vpow2.f32 %v3803_v16  ;;  %v4907_v16 = vpack.c.bf16 (!%p3805_p5), %v3445_v15, %v3444_v12  ;;  %v4928_v29 = vpack.c.bf16 (!%p3805_p5), %v3537_v44, %v3536_v63 }
 0x773   : > { %5275 = vpow2.f32 %v3804_v61  ;;  %v3538_v61 = vld [vmem:[#allocation18 + $0x70] sm:$0xff] (!%p3805_p5) }
 0x774   : > { %5277 = vtanh.f32 %v3396_v35  ;;  %4890 = vmatpush3.bf16.msra.mxu0 (!%p3805_p5), %v4889_v27  ;;  %4929 = vmatpush3.bf16.msra.mxu1 (!%p3805_p5), %v4928_v29  ;;  %v3539_v35 = vld [vmem:[#allocation18 + $0x78] sm:$0xff] (!%p3805_p5) }
 0x775   : > { %4891 = vmatprep.subr.bf16.mxu0 (!%p3805_p5), %v5592_v26  ;;  %4930 = vmatprep.subr.bf16.mxu1 (!%p3805_p5), %v5592_v26 }
 0x77b   : > { %v5272_v33 = vpop.eup %5271 }
 0x77c   : > { %v5274_v11 = vpop.eup %5273  ;;  %v3401_v58 = vadd.f32 1.0, %v5272_v33  ;;  %v4931_v33 = vpack.c.bf16 (!%p3805_p5), %v3539_v35, %v3538_v61 }
 0x77d   : > { %v3407_v53 = vadd.f32 1.0, %v5274_v11  ;;  %v5276_v57 = vpop.eup %5275  ;;  %v3806_v11 = vld [vmem:[%s7365_s13] ss:$0 sm:$0xff] (!%p3805_p5) }
 0x77e   : > { %5279 = vrcp.f32 %v3401_v58  ;;  %v5278_v17 = vpop.eup %5277  ;;  %v3414_v39 = vadd.f32 1.0, %v5276_v57  ;;  %4932 = vmatpush3.bf16.msra.mxu1 (!%p3805_p5), %v4931_v33 }
 0x77f   : > { %5281 = vrcp.f32 %v3407_v53 }
 0x780   : > { %5283 = vrcp.f32 %v3414_v39 }
 0x788   : > { %v5280_v51 = vpop.eup %5279 }
 0x789   : > { %v5282_v10 = vpop.eup %5281  ;;  %v3418_v5 = vmul.f32 %v5280_v51, %v5278_v17  ;;  %v3807_v51 = vld [vmem:[%s7366_s10] ss:$0 sm:$0xff] (!%p3805_p5) }
 0x78a   : > { %v3417_v38 = vmul.f32 %v5282_v10, %v6741_v31  ;;  %v5284_v37 = vpop.eup %5283  ;;  %v3434_v31 = vld [vmem:[#allocation16 + $0x20] sm:$0xff] (!%p3805_p5) }
 0x78b   : > { %v4892_v55 = vpack.c.bf16 (!%p3805_p5), %v3435_v46, %v3434_v31 }
 0x78c   : > { %v3419_v59 = vadd.f32 %v3418_v5, %v3417_v38 }
 0x78d   : > { %4893 = vmatpush3.bf16.msra.mxu0 (!%p3805_p5), %v4892_v55 }
 0x78e   : > { %5285 = vtanh.f32 %v3419_v59  ;;  %3425 = vst [vmem:[#allocation6] sm:$0xff] %v3419_v59  ;;  %4894 = vmatprep.subr.bf16.mxu0 (!%p3805_p5), %v5592_v26 }
 0x791   : > { %4896 = vmatpush3.bf16.msra.mxu0 (!%p3805_p5), %v4895_v49 }
 0x792   : > { %4897 = vmatprep.subr.bf16.mxu0 (!%p3805_p5), %v5592_v26 }
 0x795   : > { %3429 = sbr.rel (%p3805_p5) target bundleno = 2387 (0x953), region = 100  ;;  %4899 = vmatpush3.bf16.msra.mxu0 (!%p3805_p5), %v4898_v13 }
 0x796   : > { %4900 = vmatprep.subr.bf16.mxu0 (!%p3805_p5), %v5592_v26 }
 0x798   : > { %v5286_v54 = vpop.eup %5285 }
 0x799   : > { %v6786_v42 = vmul.f32 %v5286_v54, %v5284_v37  ;;  %4902 = vmatpush3.bf16.msra.mxu0 (!%p3805_p5), %v4901_v7 }
 0x79a   : > { %4903 = vmatprep.subr.bf16.mxu0 (!%p3805_p5), %v5592_v26 }
 0x79b   : > { %3424 = vst [vmem:[#allocation5] sm:$0xff] %v6786_v42 }
 0x79d   : > { %4905 = vmatpush3.bf16.msra.mxu0 %v4904_v28 }
 0x79e   : > { %4906 = vmatprep.subr.bf16.mxu0 %v5592_v26 }
 0x7a1   : > { %4908 = vmatpush3.bf16.msra.mxu0 %v4907_v16 }
 0x7a4   : > { %3880 = vmatmul.mubr.f32.vlgmr.msra.gmra.mrb[0].mxu0 %v6786_v42 }
 0x877   : > { %v3519_v58 = vpop.f32.mrb[0].mxu0 }
 0x878   : > { %v3520_v53 = vadd.f32 %v3806_v11, %v3519_v58  ;;  %v3881_v57 = vpop.f32.mrb[1].mxu0 }
 0x87a   : > { %v3523_v17 = vmax.f32 %v3520_v53, 0.0 }
 0x87c   : > { %3915 = vmatmul.mubr.f32.vlgmr.msra.gmra.mrb[0].mxu1 %v3523_v17 }
 0x94f   : > { %v3613_v10 = vpop.f32.mrb[0].mxu1 }
 0x950   : > { %v3614_v5 = vadd.f32 %v3807_v51, %v3613_v10  ;;  %v3916_v39 = vpop.f32.mrb[1].mxu1 }
 0x952   : > { %3617 = vst [vmem:[#allocation19] sm:$0xff] %v3614_v5 }
 0x953 PF: > { %s7367_s4 = sadd.s32 4294967295, %s5577_s22   ;;  %s5595_s23 = smov [#allocation19]  }
 0x954   : > { %p6815_p11 = scmp.eq.s32.totalorder %s7367_s4, 1  ;;  %s3627_s27 = sshll.u32 %s5595_s23, 4  ;;  %s3628_s27 = int_to_ptr.vmem [resolvable:$true] %s3627_s27 }
 0x955   : > { %s5485_s14 = scalar_lea.vmem %s3628_s27, 128  ;;  %p5492_p4 = scmp.lt.s32.totalorder %s3628_s27, %s3628_s27 }
 0x956   : > { %p5486_p12 = scmp.ne.s32.totalorder %s3628_s27, %s5485_s14  ;;  %p5493_p6 = scmp.lt.s32.totalorder %s5485_s14, %s5485_s14 }
 0x958   : > { %p5487_p13 = pnand %p5486_p12, %p6815_p11  ;;  %p5494_p9 = por %p5493_p6, %p5492_p4 }
 0x95a   : > { %p5488_p2 = pneg %p5487_p13 }
 0x95c   : > { %p5495_p7 = pnand %p5494_p9, %p5488_p2 }
 0x95e   : > { %5498 = shalt.err (!%p5495_p7)
}
 0x95f   : > { %s7369_s1 = sld [smem:[#allocation119_spill]] }
 0x965   : > { %s5499_s24 = scalar_lea.hbm %s7369_s1, 128 }
 0x966   : > { %p5500_p1 = scmp.ne.s32.totalorder %s7369_s1, %s5499_s24  ;;  %p5505_p10 = scmp.lt.u32.totalorder %s5499_s24, %s7369_s1 }
 0x968   : > { %p5501_p3 = pnand %p5500_p1, %p6815_p11 }
 0x96a   : > { %p5502_p8 = pneg %p5501_p3 }
 0x96c   : > { %p5507_p0 = pnand %p5505_p10, %p5502_p8 }
 0x96e   : > { %5510 = shalt.err (!%p5507_p0)
}
 0x96f   : > { %5022 = dma.vmem_to_hbm [thread:$0]  (%p6815_p11), %s3628_s27, 128, %s7369_s1, [#allocation9]  }
 0x970   : > { %5552 = dma.done.wait (%p6815_p11), [#allocation9], 128  }
 0x971   : > { %5554 = vsyncadd (%p6815_p11), [#allocation9], 4294967168 }
 0x972 PF: > { %s28_s22 = sadd.s32 1, %s5577_s22   ;;  %s7370_s17 = smov %s5561_s18 }
 0x973   : > { %p25_p5 = scmp.ge.s32.totalorder %s28_s22, 4   ;;  %s7371_s18 = smov %s5565_s19 }
 0x974   : > { %s7372_s19 = smov %s5876_s8  ;;  %s7373_s20 = smov %s5573_s21 }
 0x975   : > { %s7374_s21 = smov %s7376_s11  ;;  %27 = sbr.rel (!%p25_p5) target bundleno = 16 (0x10), region = 138 }
 0x97c   :  { %3640 = vsyncpa [#allocation8], 1 }
 0x97d   :  { %3642 = vsyncpa [#allocation8 + $0x1], 1 }
 0x97e   :  { %3643 = vsyncpa [#allocation11], 1 }
 0x97f   :  { %3644 = vsyncpa [#allocation14], 1 }
 0x980   :  { %3645 = vsyncpa [#allocation17], 1 }
 0x981   :  { %3646 = vsyncpa [#allocation9], 1 }
 0x982   :  { %3648 = vsyncpa [#allocation9 + $0x1], 1 }

</bundles_post_ra>
